<compile_context>
chip_gen: v6e
topology: v6e:2x2x1
jax: 0.10.0
libtpu: 0.0.40
codegen_flags: <defaults>
</compile_context>

<pallas_src>
import functools

import numpy as np
import jax
import jax.numpy as jnp
from jax import lax
from jax.experimental import pallas as pl
from jax.experimental.pallas import tpu as pltpu


def _ceil8(n):
    return (n + 7) // 8 * 8


# ----------------------------------------------------------------------------
# The single fused kernel: 4x (conv s2 + ReLU)  ->  4x (convT s2 + ReLU/Sigmoid)
# One grid step == one batch element; everything lives in VMEM.
# ----------------------------------------------------------------------------
def _fused_ae_kernel(*refs, n_enc, n_dec):
    x_ref = refs[0]
    o_ref = refs[-1]
    prm = refs[1:-1]

    x = x_ref[0]                                  # (rows_in, C_in) f32
    i = 0

    # ---- encoder: Conv2d(k=3, s=2, p=1) + ReLU via gather-matmul im2col ----
    for _ in range(n_enc):
        g_ref, w_ref, b_ref = prm[i], prm[i + 1], prm[i + 2]
        i += 3
        taps = w_ref.shape[0]                     # 9
        rout = g_ref.shape[0] // taps             # padded output rows
        # One big 0/1 gather GEMM producing all 9 tap slabs (stacked on rows).
        xt_all = jnp.dot(g_ref[...], x, preferred_element_type=jnp.float32)
        acc = None
        for t in range(taps):
            xt = xt_all[t * rout:(t + 1) * rout, :]
            term = jnp.dot(xt, w_ref[t], preferred_element_type=jnp.float32)
            acc = term if acc is None else acc + term
        x = jnp.maximum(acc + b_ref[...], 0.0)    # fused bias + ReLU

    # ---- decoder: ConvTranspose2d(k=4, s=2, p=1) as sub-pixel conv ----------
    for l in range(n_dec):
        gw_ref, wd_ref, b_ref, d_ref = prm[i], prm[i + 1], prm[i + 2], prm[i + 3]
        i += 4
        taps = wd_ref.shape[0]                    # 4 (2x2 window)
        rwin = gw_ref.shape[0] // taps            # padded window rows
        xt_all = jnp.dot(gw_ref[...], x, preferred_element_type=jnp.float32)
        z = None
        for t in range(taps):
            xt = xt_all[t * rwin:(t + 1) * rwin, :]
            term = jnp.dot(xt, wd_ref[t], preferred_element_type=jnp.float32)
            z = term if z is None else z + term
        z = z + b_ref[...]                        # fused bias (per phase block)
        last = (l == n_dec - 1)
        if last:
            # sigmoid; EUP exp + approx reciprocal.
            z = pl.reciprocal(1.0 + jnp.exp(-z), approx=True)
        else:
            z = jnp.maximum(z, 0.0)
        # In-kernel depth-to-space: phase-selection matmuls (no XLA epilogue).
        oc = z.shape[-1] // 4
        y = None
        for p in range(4):
            zp = z[:, p * oc:(p + 1) * oc]
            term = jnp.dot(d_ref[p], zp, preferred_element_type=jnp.float32)
            y = term if y is None else y + term
        if last:
            y = jnp.clip(y, 0.0, 1.0)             # guard approx-recip overshoot
        x = y

    o_ref[0] = x


# ----------------------------------------------------------------------------
# One-time packing: build the 0/1 gather matrices and GEMM weights.
# All row counts are padded to multiples of 8 (sublane granularity).
# ----------------------------------------------------------------------------
def _pack_params(raw, H, W, c_pad):
    inputs = []
    h, w, rin, cin = H, W, H * W, c_pad

    # Encoder: Conv2d(OC, IC, 3, 3), stride 2, pad 1.
    for (wt, bt) in raw["enc"]:
        wnp = np.asarray(wt, np.float32)
        bnp = np.asarray(bt, np.float32)
        OC, IC, KH, KW = wnp.shape
        oh_, ow_ = h // 2, w // 2
        rout = _ceil8(oh_ * ow_)
        G = np.zeros((KH * KW * rout, rin), np.float32)
        Wstk = np.zeros((KH * KW, cin, OC), np.float32)
        for ki in range(KH):
            for kj in range(KW):
                t = ki * KW + kj
                Wstk[t, :IC, :] = wnp[:, :, ki, kj].T
                for oh in range(oh_):
                    ih = 2 * oh - 1 + ki
                    if not 0 <= ih < h:
                        continue
                    for ow in range(ow_):
                        iw = 2 * ow - 1 + kj
                        if 0 <= iw < w:
                            G[t * rout + oh * ow_ + ow, ih * w + iw] = 1.0
        inputs += [jnp.asarray(G), jnp.asarray(Wstk), jnp.asarray(bnp[None, :])]
        h, w, rin, cin = oh_, ow_, rout, OC

    # Decoder: ConvTranspose2d(IC, OC, 4, 4), stride 2, pad 1 (sub-pixel form).
    for (wt, bt) in raw["dec"]:
        wnp = np.asarray(wt, np.float32)
        bnp = np.asarray(bt, np.float32)
        IC, OC, _, _ = wnp.shape
        wh, ww = h + 1, w + 1                     # 2x2 windows over pad-1 input
        rwin = _ceil8(wh * ww)
        rfin = _ceil8(4 * h * w)
        Gw = np.zeros((4 * rwin, rin), np.float32)
        Wd = np.zeros((4, cin, 4 * OC), np.float32)
        D = np.zeros((4, rfin, rwin), np.float32)
        for a in range(2):
            for b in range(2):
                t = 2 * a + b
                for hp in range(wh):
                    ih = hp + a - 1
                    if not 0 <= ih < h:
                        continue
                    for wp in range(ww):
                        iw = wp + b - 1
                        if 0 <= iw < w:
                            Gw[t * rwin + hp * ww + wp, ih * w + iw] = 1.0
                for r in range(2):
                    for c in range(2):
                        Wd[t, :IC, (2 * r + c) * OC:(2 * r + c + 1) * OC] = \
                            wnp[:, :, 3 - r - 2 * a, 3 - c - 2 * b]
        for r in range(2):
            for c in range(2):
                p = 2 * r + c
                for hh in range(h):
                    for ww_ in range(w):
                        oy, ox = 2 * hh + r, 2 * ww_ + c
                        D[p, oy * (2 * w) + ox, (hh + r) * ww + (ww_ + c)] = 1.0
        inputs += [jnp.asarray(Gw), jnp.asarray(Wd),
                   jnp.asarray(np.tile(bnp, 4)[None, :]), jnp.asarray(D)]
        h, w, rin, cin = 2 * h, 2 * w, rfin, OC

    return inputs, (h, w, rin, cin)


def _const_spec(arr):
    zeros = (0,) * arr.ndim
    return pl.BlockSpec(arr.shape, lambda n: zeros)


def make_autoencoder(raw, batch, in_c, H, W):
    c_pad = max(_ceil8(in_c), 8)
    params, (Hf, Wf, rows_f, c_out) = _pack_params(raw, H, W, c_pad)
    n_enc, n_dec = len(raw["enc"]), len(raw["dec"])

    kernel = functools.partial(_fused_ae_kernel, n_enc=n_enc, n_dec=n_dec)
    in_specs = ([pl.BlockSpec((1, H * W, c_pad), lambda n: (n, 0, 0))] +
                [_const_spec(a) for a in params])
    out_specs = pl.BlockSpec((1, rows_f, c_out), lambda n: (n, 0, 0))
    out_shape = jax.ShapeDtypeStruct((batch, rows_f, c_out), jnp.float32)

    call = pl.pallas_call(
        kernel,
        out_shape=out_shape,
        grid=(batch,),
        in_specs=in_specs,
        out_specs=out_specs,
        compiler_params=pltpu.CompilerParams(
            dimension_semantics=("parallel",)),   # batch -> 2 TCs on v7x
    )

    def forward(ps, x_nchw):
        # NCHW -> NHWC + channel pad, exactly once at the boundary.
        x = jnp.transpose(x_nchw, (0, 2, 3, 1))
        x = jnp.pad(x, ((0, 0), (0, 0), (0, 0), (0, c_pad - in_c)))
        x = x.reshape(batch, H * W, c_pad).astype(jnp.float32)
        y = call(x, *ps)
        if rows_f != Hf * Wf:
            y = y[:, :Hf * Wf, :]
        y = y.reshape(batch, Hf, Wf, c_out)
        return jnp.transpose(y, (0, 3, 1, 2))     # NHWC -> NCHW, once
    return forward, params


# ----------------------------------------------------------------------------
# Deterministic synthetic parameters (PyTorch layouts) + pure-JAX reference.
# ----------------------------------------------------------------------------
def init_raw_params(key):
    enc = [(16, 3), (32, 16), (64, 32), (128, 64)]
    dec = [(128, 64), (64, 32), (32, 16), (16, 3)]
    raw = {"enc": [], "dec": []}
    for oc, ic in enc:
        key, k1, k2 = jax.random.split(key, 3)
        w = jax.random.normal(k1, (oc, ic, 3, 3), jnp.float32) / np.sqrt(ic * 9.0)
        b = 0.01 * jax.random.normal(k2, (oc,), jnp.float32)
        raw["enc"].append((w, b))
    for ic, oc in dec:
        key, k1, k2 = jax.random.split(key, 3)
        w = jax.random.normal(k1, (ic, oc, 4, 4), jnp.float32) / np.sqrt(ic * 16.0)
        b = 0.01 * jax.random.normal(k2, (oc,), jnp.float32)
        raw["dec"].append((w, b))
    return raw


def reference_forward(raw, x):
    y = x
    for (w, b) in raw["enc"]:
        y = lax.conv_general_dilated(
            y, w, window_strides=(2, 2), padding=((1, 1), (1, 1)),
            dimension_numbers=("NCHW", "OIHW", "NCHW"),
            precision=lax.Precision.HIGHEST)
        y = jnp.maximum(y + b[None, :, None, None], 0.0)
    nd = len(raw["dec"])
    for i, (w, b) in enumerate(raw["dec"]):
        w_r = jnp.transpose(w[:, :, ::-1, ::-1], (1, 0, 2, 3))
        y = lax.conv_general_dilated(
            y, w_r, window_strides=(1, 1), padding=((2, 2), (2, 2)),
            lhs_dilation=(2, 2),
            dimension_numbers=("NCHW", "OIHW", "NCHW"),
            precision=lax.Precision.HIGHEST)
        y = y + b[None, :, None, None]
        y = jax.nn.sigmoid(y) if i == nd - 1 else jnp.maximum(y, 0.0)
    return y


if __name__ == "__main__":
    key = jax.random.PRNGKey(0)
    kp, kx = jax.random.split(key)
    raw = init_raw_params(kp)
    x = jax.random.normal(kx, (2, 3, 16, 16), jnp.float32)

    forward, params = make_autoencoder(raw, batch=2, in_c=3, H=16, W=16)
    fwd = jax.jit(forward)
    y = jax.block_until_ready(fwd(params, x))

    assert y.shape == (2, 3, 16, 16), y.shape
    assert bool(jnp.all(jnp.isfinite(y)))
    assert bool(jnp.all((y >= 0.0) & (y <= 1.0)))     # sigmoid output range

    # Numerical check against a pure-JAX conv / conv-transpose reference.
    y_ref = reference_forward(raw, x)
    err = float(jnp.max(jnp.abs(y - y_ref)))
    assert err < 5e-2, err

    print("KERNEL_OK")
</pallas_src>

<mosaic_0001>
module attributes {stable_mosaic.version = 11 : i64} {
  func.func @_fused_ae_kernel(%arg0: i32, %arg1: memref<1x256x8xf32, #tpu.memory_space<vmem>>, %arg2: memref<576x256xf32, #tpu.memory_space<vmem>>, %arg3: memref<9x8x16xf32, #tpu.memory_space<vmem>>, %arg4: memref<1x16xf32, #tpu.memory_space<vmem>>, %arg5: memref<144x64xf32, #tpu.memory_space<vmem>>, %arg6: memref<9x16x32xf32, #tpu.memory_space<vmem>>, %arg7: memref<1x32xf32, #tpu.memory_space<vmem>>, %arg8: memref<72x16xf32, #tpu.memory_space<vmem>>, %arg9: memref<9x32x64xf32, #tpu.memory_space<vmem>>, %arg10: memref<1x64xf32, #tpu.memory_space<vmem>>, %arg11: memref<72x8xf32, #tpu.memory_space<vmem>>, %arg12: memref<9x64x128xf32, #tpu.memory_space<vmem>>, %arg13: memref<1x128xf32, #tpu.memory_space<vmem>>, %arg14: memref<32x8xf32, #tpu.memory_space<vmem>>, %arg15: memref<4x128x256xf32, #tpu.memory_space<vmem>>, %arg16: memref<1x256xf32, #tpu.memory_space<vmem>>, %arg17: memref<4x8x8xf32, #tpu.memory_space<vmem>>, %arg18: memref<64x8xf32, #tpu.memory_space<vmem>>, %arg19: memref<4x64x128xf32, #tpu.memory_space<vmem>>, %arg20: memref<1x128xf32, #tpu.memory_space<vmem>>, %arg21: memref<4x16x16xf32, #tpu.memory_space<vmem>>, %arg22: memref<128x16xf32, #tpu.memory_space<vmem>>, %arg23: memref<4x32x64xf32, #tpu.memory_space<vmem>>, %arg24: memref<1x64xf32, #tpu.memory_space<vmem>>, %arg25: memref<4x64x32xf32, #tpu.memory_space<vmem>>, %arg26: memref<352x64xf32, #tpu.memory_space<vmem>>, %arg27: memref<4x16x12xf32, #tpu.memory_space<vmem>>, %arg28: memref<1x12xf32, #tpu.memory_space<vmem>>, %arg29: memref<4x256x88xf32, #tpu.memory_space<vmem>>, %arg30: memref<1x256x3xf32, #tpu.memory_space<vmem>>) attributes {dimension_semantics = [#tpu.dimension_semantics<parallel>], iteration_bounds = array<i64: 2>, scalar_prefetch = 0 : i64, scratch_operands = 0 : i64, tpu.core_type = #tpu.core_type<tc>, window_params = [{transform_indices = @transform_0, window_bounds = array<i64: 1, 256, 8>}, {pipeline_mode = #tpu.pipeline_mode<synchronous>, transform_indices = @transform_1, window_bounds = array<i64: 576, 256>}, {pipeline_mode = #tpu.pipeline_mode<synchronous>, transform_indices = @transform_2, window_bounds = array<i64: 9, 8, 16>}, {pipeline_mode = #tpu.pipeline_mode<synchronous>, transform_indices = @transform_3, window_bounds = array<i64: 1, 16>}, {pipeline_mode = #tpu.pipeline_mode<synchronous>, transform_indices = @transform_4, window_bounds = array<i64: 144, 64>}, {pipeline_mode = #tpu.pipeline_mode<synchronous>, transform_indices = @transform_5, window_bounds = array<i64: 9, 16, 32>}, {pipeline_mode = #tpu.pipeline_mode<synchronous>, transform_indices = @transform_6, window_bounds = array<i64: 1, 32>}, {pipeline_mode = #tpu.pipeline_mode<synchronous>, transform_indices = @transform_7, window_bounds = array<i64: 72, 16>}, {pipeline_mode = #tpu.pipeline_mode<synchronous>, transform_indices = @transform_8, window_bounds = array<i64: 9, 32, 64>}, {pipeline_mode = #tpu.pipeline_mode<synchronous>, transform_indices = @transform_9, window_bounds = array<i64: 1, 64>}, {pipeline_mode = #tpu.pipeline_mode<synchronous>, transform_indices = @transform_10, window_bounds = array<i64: 72, 8>}, {pipeline_mode = #tpu.pipeline_mode<synchronous>, transform_indices = @transform_11, window_bounds = array<i64: 9, 64, 128>}, {pipeline_mode = #tpu.pipeline_mode<synchronous>, transform_indices = @transform_12, window_bounds = array<i64: 1, 128>}, {pipeline_mode = #tpu.pipeline_mode<synchronous>, transform_indices = @transform_13, window_bounds = array<i64: 32, 8>}, {pipeline_mode = #tpu.pipeline_mode<synchronous>, transform_indices = @transform_14, window_bounds = array<i64: 4, 128, 256>}, {pipeline_mode = #tpu.pipeline_mode<synchronous>, transform_indices = @transform_15, window_bounds = array<i64: 1, 256>}, {pipeline_mode = #tpu.pipeline_mode<synchronous>, transform_indices = @transform_16, window_bounds = array<i64: 4, 8, 8>}, {pipeline_mode = #tpu.pipeline_mode<synchronous>, transform_indices = @transform_17, window_bounds = array<i64: 64, 8>}, {pipeline_mode = #tpu.pipeline_mode<synchronous>, transform_indices = @transform_18, window_bounds = array<i64: 4, 64, 128>}, {pipeline_mode = #tpu.pipeline_mode<synchronous>, transform_indices = @transform_19, window_bounds = array<i64: 1, 128>}, {pipeline_mode = #tpu.pipeline_mode<synchronous>, transform_indices = @transform_20, window_bounds = array<i64: 4, 16, 16>}, {pipeline_mode = #tpu.pipeline_mode<synchronous>, transform_indices = @transform_21, window_bounds = array<i64: 128, 16>}, {pipeline_mode = #tpu.pipeline_mode<synchronous>, transform_indices = @transform_22, window_bounds = array<i64: 4, 32, 64>}, {pipeline_mode = #tpu.pipeline_mode<synchronous>, transform_indices = @transform_23, window_bounds = array<i64: 1, 64>}, {pipeline_mode = #tpu.pipeline_mode<synchronous>, transform_indices = @transform_24, window_bounds = array<i64: 4, 64, 32>}, {pipeline_mode = #tpu.pipeline_mode<synchronous>, transform_indices = @transform_25, window_bounds = array<i64: 352, 64>}, {pipeline_mode = #tpu.pipeline_mode<synchronous>, transform_indices = @transform_26, window_bounds = array<i64: 4, 16, 12>}, {pipeline_mode = #tpu.pipeline_mode<synchronous>, transform_indices = @transform_27, window_bounds = array<i64: 1, 12>}, {pipeline_mode = #tpu.pipeline_mode<synchronous>, transform_indices = @transform_28, window_bounds = array<i64: 4, 256, 88>}, {transform_indices = @transform_29, window_bounds = array<i64: 1, 256, 3>}]} {
    %c0 = arith.constant 0 : index
    %c0_0 = arith.constant 0 : index
    %c0_1 = arith.constant 0 : index
    %0 = vector.load %arg1[%c0, %c0_0, %c0_1] : memref<1x256x8xf32, #tpu.memory_space<vmem>>, vector<1x256x8xf32>
    %1 = vector.shape_cast %0 : vector<1x256x8xf32> to vector<256x8xf32>
    %c0_2 = arith.constant 0 : index
    %c0_3 = arith.constant 0 : index
    %2 = vector.load %arg2[%c0_2, %c0_3] : memref<576x256xf32, #tpu.memory_space<vmem>>, vector<576x256xf32>
    %cst = arith.constant dense<0.000000e+00> : vector<576x8xf32>
    %3 = tpu.matmul %2, %1, %cst {dimension_numbers = #tpu.dot_dimension_numbers<[1], [0], [0], [1], [0, 0, 1, 1], [], []>} : vector<576x256xf32>, vector<256x8xf32>, vector<576x8xf32> -> vector<576x8xf32>
    %4 = vector.extract_strided_slice %3 {offsets = [0, 0], sizes = [64, 8], strides = [1, 1]} : vector<576x8xf32> to vector<64x8xf32>
    %c0_4 = arith.constant 0 : index
    %c0_5 = arith.constant 0 : index
    %c0_6 = arith.constant 0 : index
    %5 = vector.load %arg3[%c0_4, %c0_5, %c0_6] : memref<9x8x16xf32, #tpu.memory_space<vmem>>, vector<1x8x16xf32>
    %6 = vector.shape_cast %5 : vector<1x8x16xf32> to vector<8x16xf32>
    %cst_7 = arith.constant dense<0.000000e+00> : vector<64x16xf32>
    %7 = tpu.matmul %4, %6, %cst_7 {dimension_numbers = #tpu.dot_dimension_numbers<[1], [0], [0], [1], [0, 0, 1, 1], [], []>} : vector<64x8xf32>, vector<8x16xf32>, vector<64x16xf32> -> vector<64x16xf32>
    %8 = vector.extract_strided_slice %3 {offsets = [64, 0], sizes = [64, 8], strides = [1, 1]} : vector<576x8xf32> to vector<64x8xf32>
    %c1 = arith.constant 1 : index
    %c0_8 = arith.constant 0 : index
    %c0_9 = arith.constant 0 : index
    %9 = vector.load %arg3[%c1, %c0_8, %c0_9] : memref<9x8x16xf32, #tpu.memory_space<vmem>>, vector<1x8x16xf32>
    %10 = vector.shape_cast %9 : vector<1x8x16xf32> to vector<8x16xf32>
    %cst_10 = arith.constant dense<0.000000e+00> : vector<64x16xf32>
    %11 = tpu.matmul %8, %10, %cst_10 {dimension_numbers = #tpu.dot_dimension_numbers<[1], [0], [0], [1], [0, 0, 1, 1], [], []>} : vector<64x8xf32>, vector<8x16xf32>, vector<64x16xf32> -> vector<64x16xf32>
    %12 = arith.addf %7, %11 : vector<64x16xf32>
    %13 = vector.extract_strided_slice %3 {offsets = [128, 0], sizes = [64, 8], strides = [1, 1]} : vector<576x8xf32> to vector<64x8xf32>
    %c2 = arith.constant 2 : index
    %c0_11 = arith.constant 0 : index
    %c0_12 = arith.constant 0 : index
    %14 = vector.load %arg3[%c2, %c0_11, %c0_12] : memref<9x8x16xf32, #tpu.memory_space<vmem>>, vector<1x8x16xf32>
    %15 = vector.shape_cast %14 : vector<1x8x16xf32> to vector<8x16xf32>
    %cst_13 = arith.constant dense<0.000000e+00> : vector<64x16xf32>
    %16 = tpu.matmul %13, %15, %cst_13 {dimension_numbers = #tpu.dot_dimension_numbers<[1], [0], [0], [1], [0, 0, 1, 1], [], []>} : vector<64x8xf32>, vector<8x16xf32>, vector<64x16xf32> -> vector<64x16xf32>
    %17 = arith.addf %12, %16 : vector<64x16xf32>
    %18 = vector.extract_strided_slice %3 {offsets = [192, 0], sizes = [64, 8], strides = [1, 1]} : vector<576x8xf32> to vector<64x8xf32>
    %c3 = arith.constant 3 : index
    %c0_14 = arith.constant 0 : index
    %c0_15 = arith.constant 0 : index
    %19 = vector.load %arg3[%c3, %c0_14, %c0_15] : memref<9x8x16xf32, #tpu.memory_space<vmem>>, vector<1x8x16xf32>
    %20 = vector.shape_cast %19 : vector<1x8x16xf32> to vector<8x16xf32>
    %cst_16 = arith.constant dense<0.000000e+00> : vector<64x16xf32>
    %21 = tpu.matmul %18, %20, %cst_16 {dimension_numbers = #tpu.dot_dimension_numbers<[1], [0], [0], [1], [0, 0, 1, 1], [], []>} : vector<64x8xf32>, vector<8x16xf32>, vector<64x16xf32> -> vector<64x16xf32>
    %22 = arith.addf %17, %21 : vector<64x16xf32>
    %23 = vector.extract_strided_slice %3 {offsets = [256, 0], sizes = [64, 8], strides = [1, 1]} : vector<576x8xf32> to vector<64x8xf32>
    %c4 = arith.constant 4 : index
    %c0_17 = arith.constant 0 : index
    %c0_18 = arith.constant 0 : index
    %24 = vector.load %arg3[%c4, %c0_17, %c0_18] : memref<9x8x16xf32, #tpu.memory_space<vmem>>, vector<1x8x16xf32>
    %25 = vector.shape_cast %24 : vector<1x8x16xf32> to vector<8x16xf32>
    %cst_19 = arith.constant dense<0.000000e+00> : vector<64x16xf32>
    %26 = tpu.matmul %23, %25, %cst_19 {dimension_numbers = #tpu.dot_dimension_numbers<[1], [0], [0], [1], [0, 0, 1, 1], [], []>} : vector<64x8xf32>, vector<8x16xf32>, vector<64x16xf32> -> vector<64x16xf32>
    %27 = arith.addf %22, %26 : vector<64x16xf32>
    %28 = vector.extract_strided_slice %3 {offsets = [320, 0], sizes = [64, 8], strides = [1, 1]} : vector<576x8xf32> to vector<64x8xf32>
    %c5 = arith.constant 5 : index
    %c0_20 = arith.constant 0 : index
    %c0_21 = arith.constant 0 : index
    %29 = vector.load %arg3[%c5, %c0_20, %c0_21] : memref<9x8x16xf32, #tpu.memory_space<vmem>>, vector<1x8x16xf32>
    %30 = vector.shape_cast %29 : vector<1x8x16xf32> to vector<8x16xf32>
    %cst_22 = arith.constant dense<0.000000e+00> : vector<64x16xf32>
    %31 = tpu.matmul %28, %30, %cst_22 {dimension_numbers = #tpu.dot_dimension_numbers<[1], [0], [0], [1], [0, 0, 1, 1], [], []>} : vector<64x8xf32>, vector<8x16xf32>, vector<64x16xf32> -> vector<64x16xf32>
    %32 = arith.addf %27, %31 : vector<64x16xf32>
    %33 = vector.extract_strided_slice %3 {offsets = [384, 0], sizes = [64, 8], strides = [1, 1]} : vector<576x8xf32> to vector<64x8xf32>
    %c6 = arith.constant 6 : index
    %c0_23 = arith.constant 0 : index
    %c0_24 = arith.constant 0 : index
    %34 = vector.load %arg3[%c6, %c0_23, %c0_24] : memref<9x8x16xf32, #tpu.memory_space<vmem>>, vector<1x8x16xf32>
    %35 = vector.shape_cast %34 : vector<1x8x16xf32> to vector<8x16xf32>
    %cst_25 = arith.constant dense<0.000000e+00> : vector<64x16xf32>
    %36 = tpu.matmul %33, %35, %cst_25 {dimension_numbers = #tpu.dot_dimension_numbers<[1], [0], [0], [1], [0, 0, 1, 1], [], []>} : vector<64x8xf32>, vector<8x16xf32>, vector<64x16xf32> -> vector<64x16xf32>
    %37 = arith.addf %32, %36 : vector<64x16xf32>
    %38 = vector.extract_strided_slice %3 {offsets = [448, 0], sizes = [64, 8], strides = [1, 1]} : vector<576x8xf32> to vector<64x8xf32>
    %c7 = arith.constant 7 : index
    %c0_26 = arith.constant 0 : index
    %c0_27 = arith.constant 0 : index
    %39 = vector.load %arg3[%c7, %c0_26, %c0_27] : memref<9x8x16xf32, #tpu.memory_space<vmem>>, vector<1x8x16xf32>
    %40 = vector.shape_cast %39 : vector<1x8x16xf32> to vector<8x16xf32>
    %cst_28 = arith.constant dense<0.000000e+00> : vector<64x16xf32>
    %41 = tpu.matmul %38, %40, %cst_28 {dimension_numbers = #tpu.dot_dimension_numbers<[1], [0], [0], [1], [0, 0, 1, 1], [], []>} : vector<64x8xf32>, vector<8x16xf32>, vector<64x16xf32> -> vector<64x16xf32>
    %42 = arith.addf %37, %41 : vector<64x16xf32>
    %43 = vector.extract_strided_slice %3 {offsets = [512, 0], sizes = [64, 8], strides = [1, 1]} : vector<576x8xf32> to vector<64x8xf32>
    %c8 = arith.constant 8 : index
    %c0_29 = arith.constant 0 : index
    %c0_30 = arith.constant 0 : index
    %44 = vector.load %arg3[%c8, %c0_29, %c0_30] : memref<9x8x16xf32, #tpu.memory_space<vmem>>, vector<1x8x16xf32>
    %45 = vector.shape_cast %44 : vector<1x8x16xf32> to vector<8x16xf32>
    %cst_31 = arith.constant dense<0.000000e+00> : vector<64x16xf32>
    %46 = tpu.matmul %43, %45, %cst_31 {dimension_numbers = #tpu.dot_dimension_numbers<[1], [0], [0], [1], [0, 0, 1, 1], [], []>} : vector<64x8xf32>, vector<8x16xf32>, vector<64x16xf32> -> vector<64x16xf32>
    %47 = arith.addf %42, %46 : vector<64x16xf32>
    %c0_32 = arith.constant 0 : index
    %c0_33 = arith.constant 0 : index
    %48 = vector.load %arg4[%c0_32, %c0_33] : memref<1x16xf32, #tpu.memory_space<vmem>>, vector<1x16xf32>
    %49 = vector.broadcast %48 : vector<1x16xf32> to vector<64x16xf32>
    %50 = arith.addf %47, %49 : vector<64x16xf32>
    %cst_34 = arith.constant 0.000000e+00 : f32
    %51 = vector.broadcast %cst_34 : f32 to vector<64x16xf32>
    %52 = arith.maximumf %50, %51 : vector<64x16xf32>
    %c0_35 = arith.constant 0 : index
    %c0_36 = arith.constant 0 : index
    %53 = vector.load %arg5[%c0_35, %c0_36] : memref<144x64xf32, #tpu.memory_space<vmem>>, vector<144x64xf32>
    %cst_37 = arith.constant dense<0.000000e+00> : vector<144x16xf32>
    %54 = tpu.matmul %53, %52, %cst_37 {dimension_numbers = #tpu.dot_dimension_numbers<[1], [0], [0], [1], [0, 0, 1, 1], [], []>} : vector<144x64xf32>, vector<64x16xf32>, vector<144x16xf32> -> vector<144x16xf32>
    %55 = vector.extract_strided_slice %54 {offsets = [0, 0], sizes = [16, 16], strides = [1, 1]} : vector<144x16xf32> to vector<16x16xf32>
    %c0_38 = arith.constant 0 : index
    %c0_39 = arith.constant 0 : index
    %c0_40 = arith.constant 0 : index
    %56 = vector.load %arg6[%c0_38, %c0_39, %c0_40] : memref<9x16x32xf32, #tpu.memory_space<vmem>>, vector<1x16x32xf32>
    %57 = vector.shape_cast %56 : vector<1x16x32xf32> to vector<16x32xf32>
    %cst_41 = arith.constant dense<0.000000e+00> : vector<16x32xf32>
    %58 = tpu.matmul %55, %57, %cst_41 {dimension_numbers = #tpu.dot_dimension_numbers<[1], [0], [0], [1], [0, 0, 1, 1], [], []>} : vector<16x16xf32>, vector<16x32xf32>, vector<16x32xf32> -> vector<16x32xf32>
    %59 = vector.extract_strided_slice %54 {offsets = [16, 0], sizes = [16, 16], strides = [1, 1]} : vector<144x16xf32> to vector<16x16xf32>
    %c1_42 = arith.constant 1 : index
    %c0_43 = arith.constant 0 : index
    %c0_44 = arith.constant 0 : index
    %60 = vector.load %arg6[%c1_42, %c0_43, %c0_44] : memref<9x16x32xf32, #tpu.memory_space<vmem>>, vector<1x16x32xf32>
    %61 = vector.shape_cast %60 : vector<1x16x32xf32> to vector<16x32xf32>
    %cst_45 = arith.constant dense<0.000000e+00> : vector<16x32xf32>
    %62 = tpu.matmul %59, %61, %cst_45 {dimension_numbers = #tpu.dot_dimension_numbers<[1], [0], [0], [1], [0, 0, 1, 1], [], []>} : vector<16x16xf32>, vector<16x32xf32>, vector<16x32xf32> -> vector<16x32xf32>
    %63 = arith.addf %58, %62 : vector<16x32xf32>
    %64 = vector.extract_strided_slice %54 {offsets = [32, 0], sizes = [16, 16], strides = [1, 1]} : vector<144x16xf32> to vector<16x16xf32>
    %c2_46 = arith.constant 2 : index
    %c0_47 = arith.constant 0 : index
    %c0_48 = arith.constant 0 : index
    %65 = vector.load %arg6[%c2_46, %c0_47, %c0_48] : memref<9x16x32xf32, #tpu.memory_space<vmem>>, vector<1x16x32xf32>
    %66 = vector.shape_cast %65 : vector<1x16x32xf32> to vector<16x32xf32>
    %cst_49 = arith.constant dense<0.000000e+00> : vector<16x32xf32>
    %67 = tpu.matmul %64, %66, %cst_49 {dimension_numbers = #tpu.dot_dimension_numbers<[1], [0], [0], [1], [0, 0, 1, 1], [], []>} : vector<16x16xf32>, vector<16x32xf32>, vector<16x32xf32> -> vector<16x32xf32>
    %68 = arith.addf %63, %67 : vector<16x32xf32>
    %69 = vector.extract_strided_slice %54 {offsets = [48, 0], sizes = [16, 16], strides = [1, 1]} : vector<144x16xf32> to vector<16x16xf32>
    %c3_50 = arith.constant 3 : index
    %c0_51 = arith.constant 0 : index
    %c0_52 = arith.constant 0 : index
    %70 = vector.load %arg6[%c3_50, %c0_51, %c0_52] : memref<9x16x32xf32, #tpu.memory_space<vmem>>, vector<1x16x32xf32>
    %71 = vector.shape_cast %70 : vector<1x16x32xf32> to vector<16x32xf32>
    %cst_53 = arith.constant dense<0.000000e+00> : vector<16x32xf32>
    %72 = tpu.matmul %69, %71, %cst_53 {dimension_numbers = #tpu.dot_dimension_numbers<[1], [0], [0], [1], [0, 0, 1, 1], [], []>} : vector<16x16xf32>, vector<16x32xf32>, vector<16x32xf32> -> vector<16x32xf32>
    %73 = arith.addf %68, %72 : vector<16x32xf32>
    %74 = vector.extract_strided_slice %54 {offsets = [64, 0], sizes = [16, 16], strides = [1, 1]} : vector<144x16xf32> to vector<16x16xf32>
    %c4_54 = arith.constant 4 : index
    %c0_55 = arith.constant 0 : index
    %c0_56 = arith.constant 0 : index
    %75 = vector.load %arg6[%c4_54, %c0_55, %c0_56] : memref<9x16x32xf32, #tpu.memory_space<vmem>>, vector<1x16x32xf32>
    %76 = vector.shape_cast %75 : vector<1x16x32xf32> to vector<16x32xf32>
    %cst_57 = arith.constant dense<0.000000e+00> : vector<16x32xf32>
    %77 = tpu.matmul %74, %76, %cst_57 {dimension_numbers = #tpu.dot_dimension_numbers<[1], [0], [0], [1], [0, 0, 1, 1], [], []>} : vector<16x16xf32>, vector<16x32xf32>, vector<16x32xf32> -> vector<16x32xf32>
    %78 = arith.addf %73, %77 : vector<16x32xf32>
    %79 = vector.extract_strided_slice %54 {offsets = [80, 0], sizes = [16, 16], strides = [1, 1]} : vector<144x16xf32> to vector<16x16xf32>
    %c5_58 = arith.constant 5 : index
    %c0_59 = arith.constant 0 : index
    %c0_60 = arith.constant 0 : index
    %80 = vector.load %arg6[%c5_58, %c0_59, %c0_60] : memref<9x16x32xf32, #tpu.memory_space<vmem>>, vector<1x16x32xf32>
    %81 = vector.shape_cast %80 : vector<1x16x32xf32> to vector<16x32xf32>
    %cst_61 = arith.constant dense<0.000000e+00> : vector<16x32xf32>
    %82 = tpu.matmul %79, %81, %cst_61 {dimension_numbers = #tpu.dot_dimension_numbers<[1], [0], [0], [1], [0, 0, 1, 1], [], []>} : vector<16x16xf32>, vector<16x32xf32>, vector<16x32xf32> -> vector<16x32xf32>
    %83 = arith.addf %78, %82 : vector<16x32xf32>
    %84 = vector.extract_strided_slice %54 {offsets = [96, 0], sizes = [16, 16], strides = [1, 1]} : vector<144x16xf32> to vector<16x16xf32>
    %c6_62 = arith.constant 6 : index
    %c0_63 = arith.constant 0 : index
    %c0_64 = arith.constant 0 : index
    %85 = vector.load %arg6[%c6_62, %c0_63, %c0_64] : memref<9x16x32xf32, #tpu.memory_space<vmem>>, vector<1x16x32xf32>
    %86 = vector.shape_cast %85 : vector<1x16x32xf32> to vector<16x32xf32>
    %cst_65 = arith.constant dense<0.000000e+00> : vector<16x32xf32>
    %87 = tpu.matmul %84, %86, %cst_65 {dimension_numbers = #tpu.dot_dimension_numbers<[1], [0], [0], [1], [0, 0, 1, 1], [], []>} : vector<16x16xf32>, vector<16x32xf32>, vector<16x32xf32> -> vector<16x32xf32>
    %88 = arith.addf %83, %87 : vector<16x32xf32>
    %89 = vector.extract_strided_slice %54 {offsets = [112, 0], sizes = [16, 16], strides = [1, 1]} : vector<144x16xf32> to vector<16x16xf32>
    %c7_66 = arith.constant 7 : index
    %c0_67 = arith.constant 0 : index
    %c0_68 = arith.constant 0 : index
    %90 = vector.load %arg6[%c7_66, %c0_67, %c0_68] : memref<9x16x32xf32, #tpu.memory_space<vmem>>, vector<1x16x32xf32>
    %91 = vector.shape_cast %90 : vector<1x16x32xf32> to vector<16x32xf32>
    %cst_69 = arith.constant dense<0.000000e+00> : vector<16x32xf32>
    %92 = tpu.matmul %89, %91, %cst_69 {dimension_numbers = #tpu.dot_dimension_numbers<[1], [0], [0], [1], [0, 0, 1, 1], [], []>} : vector<16x16xf32>, vector<16x32xf32>, vector<16x32xf32> -> vector<16x32xf32>
    %93 = arith.addf %88, %92 : vector<16x32xf32>
    %94 = vector.extract_strided_slice %54 {offsets = [128, 0], sizes = [16, 16], strides = [1, 1]} : vector<144x16xf32> to vector<16x16xf32>
    %c8_70 = arith.constant 8 : index
    %c0_71 = arith.constant 0 : index
    %c0_72 = arith.constant 0 : index
    %95 = vector.load %arg6[%c8_70, %c0_71, %c0_72] : memref<9x16x32xf32, #tpu.memory_space<vmem>>, vector<1x16x32xf32>
    %96 = vector.shape_cast %95 : vector<1x16x32xf32> to vector<16x32xf32>
    %cst_73 = arith.constant dense<0.000000e+00> : vector<16x32xf32>
    %97 = tpu.matmul %94, %96, %cst_73 {dimension_numbers = #tpu.dot_dimension_numbers<[1], [0], [0], [1], [0, 0, 1, 1], [], []>} : vector<16x16xf32>, vector<16x32xf32>, vector<16x32xf32> -> vector<16x32xf32>
    %98 = arith.addf %93, %97 : vector<16x32xf32>
    %c0_74 = arith.constant 0 : index
    %c0_75 = arith.constant 0 : index
    %99 = vector.load %arg7[%c0_74, %c0_75] : memref<1x32xf32, #tpu.memory_space<vmem>>, vector<1x32xf32>
    %100 = vector.broadcast %99 : vector<1x32xf32> to vector<16x32xf32>
    %101 = arith.addf %98, %100 : vector<16x32xf32>
    %cst_76 = arith.constant 0.000000e+00 : f32
    %102 = vector.broadcast %cst_76 : f32 to vector<16x32xf32>
    %103 = arith.maximumf %101, %102 : vector<16x32xf32>
    %c0_77 = arith.constant 0 : index
    %c0_78 = arith.constant 0 : index
    %104 = vector.load %arg8[%c0_77, %c0_78] : memref<72x16xf32, #tpu.memory_space<vmem>>, vector<72x16xf32>
    %cst_79 = arith.constant dense<0.000000e+00> : vector<72x32xf32>
    %105 = tpu.matmul %104, %103, %cst_79 {dimension_numbers = #tpu.dot_dimension_numbers<[1], [0], [0], [1], [0, 0, 1, 1], [], []>} : vector<72x16xf32>, vector<16x32xf32>, vector<72x32xf32> -> vector<72x32xf32>
    %106 = vector.extract_strided_slice %105 {offsets = [0, 0], sizes = [8, 32], strides = [1, 1]} : vector<72x32xf32> to vector<8x32xf32>
    %c0_80 = arith.constant 0 : index
    %c0_81 = arith.constant 0 : index
    %c0_82 = arith.constant 0 : index
    %107 = vector.load %arg9[%c0_80, %c0_81, %c0_82] : memref<9x32x64xf32, #tpu.memory_space<vmem>>, vector<1x32x64xf32>
    %108 = vector.shape_cast %107 : vector<1x32x64xf32> to vector<32x64xf32>
    %cst_83 = arith.constant dense<0.000000e+00> : vector<8x64xf32>
    %109 = tpu.matmul %106, %108, %cst_83 {dimension_numbers = #tpu.dot_dimension_numbers<[1], [0], [0], [1], [0, 0, 1, 1], [], []>} : vector<8x32xf32>, vector<32x64xf32>, vector<8x64xf32> -> vector<8x64xf32>
    %110 = vector.extract_strided_slice %105 {offsets = [8, 0], sizes = [8, 32], strides = [1, 1]} : vector<72x32xf32> to vector<8x32xf32>
    %c1_84 = arith.constant 1 : index
    %c0_85 = arith.constant 0 : index
    %c0_86 = arith.constant 0 : index
    %111 = vector.load %arg9[%c1_84, %c0_85, %c0_86] : memref<9x32x64xf32, #tpu.memory_space<vmem>>, vector<1x32x64xf32>
    %112 = vector.shape_cast %111 : vector<1x32x64xf32> to vector<32x64xf32>
    %cst_87 = arith.constant dense<0.000000e+00> : vector<8x64xf32>
    %113 = tpu.matmul %110, %112, %cst_87 {dimension_numbers = #tpu.dot_dimension_numbers<[1], [0], [0], [1], [0, 0, 1, 1], [], []>} : vector<8x32xf32>, vector<32x64xf32>, vector<8x64xf32> -> vector<8x64xf32>
    %114 = arith.addf %109, %113 : vector<8x64xf32>
    %115 = vector.extract_strided_slice %105 {offsets = [16, 0], sizes = [8, 32], strides = [1, 1]} : vector<72x32xf32> to vector<8x32xf32>
    %c2_88 = arith.constant 2 : index
    %c0_89 = arith.constant 0 : index
    %c0_90 = arith.constant 0 : index
    %116 = vector.load %arg9[%c2_88, %c0_89, %c0_90] : memref<9x32x64xf32, #tpu.memory_space<vmem>>, vector<1x32x64xf32>
    %117 = vector.shape_cast %116 : vector<1x32x64xf32> to vector<32x64xf32>
    %cst_91 = arith.constant dense<0.000000e+00> : vector<8x64xf32>
    %118 = tpu.matmul %115, %117, %cst_91 {dimension_numbers = #tpu.dot_dimension_numbers<[1], [0], [0], [1], [0, 0, 1, 1], [], []>} : vector<8x32xf32>, vector<32x64xf32>, vector<8x64xf32> -> vector<8x64xf32>
    %119 = arith.addf %114, %118 : vector<8x64xf32>
    %120 = vector.extract_strided_slice %105 {offsets = [24, 0], sizes = [8, 32], strides = [1, 1]} : vector<72x32xf32> to vector<8x32xf32>
    %c3_92 = arith.constant 3 : index
    %c0_93 = arith.constant 0 : index
    %c0_94 = arith.constant 0 : index
    %121 = vector.load %arg9[%c3_92, %c0_93, %c0_94] : memref<9x32x64xf32, #tpu.memory_space<vmem>>, vector<1x32x64xf32>
    %122 = vector.shape_cast %121 : vector<1x32x64xf32> to vector<32x64xf32>
    %cst_95 = arith.constant dense<0.000000e+00> : vector<8x64xf32>
    %123 = tpu.matmul %120, %122, %cst_95 {dimension_numbers = #tpu.dot_dimension_numbers<[1], [0], [0], [1], [0, 0, 1, 1], [], []>} : vector<8x32xf32>, vector<32x64xf32>, vector<8x64xf32> -> vector<8x64xf32>
    %124 = arith.addf %119, %123 : vector<8x64xf32>
    %125 = vector.extract_strided_slice %105 {offsets = [32, 0], sizes = [8, 32], strides = [1, 1]} : vector<72x32xf32> to vector<8x32xf32>
    %c4_96 = arith.constant 4 : index
    %c0_97 = arith.constant 0 : index
    %c0_98 = arith.constant 0 : index
    %126 = vector.load %arg9[%c4_96, %c0_97, %c0_98] : memref<9x32x64xf32, #tpu.memory_space<vmem>>, vector<1x32x64xf32>
    %127 = vector.shape_cast %126 : vector<1x32x64xf32> to vector<32x64xf32>
    %cst_99 = arith.constant dense<0.000000e+00> : vector<8x64xf32>
    %128 = tpu.matmul %125, %127, %cst_99 {dimension_numbers = #tpu.dot_dimension_numbers<[1], [0], [0], [1], [0, 0, 1, 1], [], []>} : vector<8x32xf32>, vector<32x64xf32>, vector<8x64xf32> -> vector<8x64xf32>
    %129 = arith.addf %124, %128 : vector<8x64xf32>
    %130 = vector.extract_strided_slice %105 {offsets = [40, 0], sizes = [8, 32], strides = [1, 1]} : vector<72x32xf32> to vector<8x32xf32>
    %c5_100 = arith.constant 5 : index
    %c0_101 = arith.constant 0 : index
    %c0_102 = arith.constant 0 : index
    %131 = vector.load %arg9[%c5_100, %c0_101, %c0_102] : memref<9x32x64xf32, #tpu.memory_space<vmem>>, vector<1x32x64xf32>
    %132 = vector.shape_cast %131 : vector<1x32x64xf32> to vector<32x64xf32>
    %cst_103 = arith.constant dense<0.000000e+00> : vector<8x64xf32>
    %133 = tpu.matmul %130, %132, %cst_103 {dimension_numbers = #tpu.dot_dimension_numbers<[1], [0], [0], [1], [0, 0, 1, 1], [], []>} : vector<8x32xf32>, vector<32x64xf32>, vector<8x64xf32> -> vector<8x64xf32>
    %134 = arith.addf %129, %133 : vector<8x64xf32>
    %135 = vector.extract_strided_slice %105 {offsets = [48, 0], sizes = [8, 32], strides = [1, 1]} : vector<72x32xf32> to vector<8x32xf32>
    %c6_104 = arith.constant 6 : index
    %c0_105 = arith.constant 0 : index
    %c0_106 = arith.constant 0 : index
    %136 = vector.load %arg9[%c6_104, %c0_105, %c0_106] : memref<9x32x64xf32, #tpu.memory_space<vmem>>, vector<1x32x64xf32>
    %137 = vector.shape_cast %136 : vector<1x32x64xf32> to vector<32x64xf32>
    %cst_107 = arith.constant dense<0.000000e+00> : vector<8x64xf32>
    %138 = tpu.matmul %135, %137, %cst_107 {dimension_numbers = #tpu.dot_dimension_numbers<[1], [0], [0], [1], [0, 0, 1, 1], [], []>} : vector<8x32xf32>, vector<32x64xf32>, vector<8x64xf32> -> vector<8x64xf32>
    %139 = arith.addf %134, %138 : vector<8x64xf32>
    %140 = vector.extract_strided_slice %105 {offsets = [56, 0], sizes = [8, 32], strides = [1, 1]} : vector<72x32xf32> to vector<8x32xf32>
    %c7_108 = arith.constant 7 : index
    %c0_109 = arith.constant 0 : index
    %c0_110 = arith.constant 0 : index
    %141 = vector.load %arg9[%c7_108, %c0_109, %c0_110] : memref<9x32x64xf32, #tpu.memory_space<vmem>>, vector<1x32x64xf32>
    %142 = vector.shape_cast %141 : vector<1x32x64xf32> to vector<32x64xf32>
    %cst_111 = arith.constant dense<0.000000e+00> : vector<8x64xf32>
    %143 = tpu.matmul %140, %142, %cst_111 {dimension_numbers = #tpu.dot_dimension_numbers<[1], [0], [0], [1], [0, 0, 1, 1], [], []>} : vector<8x32xf32>, vector<32x64xf32>, vector<8x64xf32> -> vector<8x64xf32>
    %144 = arith.addf %139, %143 : vector<8x64xf32>
    %145 = vector.extract_strided_slice %105 {offsets = [64, 0], sizes = [8, 32], strides = [1, 1]} : vector<72x32xf32> to vector<8x32xf32>
    %c8_112 = arith.constant 8 : index
    %c0_113 = arith.constant 0 : index
    %c0_114 = arith.constant 0 : index
    %146 = vector.load %arg9[%c8_112, %c0_113, %c0_114] : memref<9x32x64xf32, #tpu.memory_space<vmem>>, vector<1x32x64xf32>
    %147 = vector.shape_cast %146 : vector<1x32x64xf32> to vector<32x64xf32>
    %cst_115 = arith.constant dense<0.000000e+00> : vector<8x64xf32>
    %148 = tpu.matmul %145, %147, %cst_115 {dimension_numbers = #tpu.dot_dimension_numbers<[1], [0], [0], [1], [0, 0, 1, 1], [], []>} : vector<8x32xf32>, vector<32x64xf32>, vector<8x64xf32> -> vector<8x64xf32>
    %149 = arith.addf %144, %148 : vector<8x64xf32>
    %c0_116 = arith.constant 0 : index
    %c0_117 = arith.constant 0 : index
    %150 = vector.load %arg10[%c0_116, %c0_117] : memref<1x64xf32, #tpu.memory_space<vmem>>, vector<1x64xf32>
    %151 = vector.broadcast %150 : vector<1x64xf32> to vector<8x64xf32>
    %152 = arith.addf %149, %151 : vector<8x64xf32>
    %cst_118 = arith.constant 0.000000e+00 : f32
    %153 = vector.broadcast %cst_118 : f32 to vector<8x64xf32>
    %154 = arith.maximumf %152, %153 : vector<8x64xf32>
    %c0_119 = arith.constant 0 : index
    %c0_120 = arith.constant 0 : index
    %155 = vector.load %arg11[%c0_119, %c0_120] : memref<72x8xf32, #tpu.memory_space<vmem>>, vector<72x8xf32>
    %cst_121 = arith.constant dense<0.000000e+00> : vector<72x64xf32>
    %156 = tpu.matmul %155, %154, %cst_121 {dimension_numbers = #tpu.dot_dimension_numbers<[1], [0], [0], [1], [0, 0, 1, 1], [], []>} : vector<72x8xf32>, vector<8x64xf32>, vector<72x64xf32> -> vector<72x64xf32>
    %157 = vector.extract_strided_slice %156 {offsets = [0, 0], sizes = [8, 64], strides = [1, 1]} : vector<72x64xf32> to vector<8x64xf32>
    %c0_122 = arith.constant 0 : index
    %c0_123 = arith.constant 0 : index
    %c0_124 = arith.constant 0 : index
    %158 = vector.load %arg12[%c0_122, %c0_123, %c0_124] : memref<9x64x128xf32, #tpu.memory_space<vmem>>, vector<1x64x128xf32>
    %159 = vector.shape_cast %158 : vector<1x64x128xf32> to vector<64x128xf32>
    %cst_125 = arith.constant dense<0.000000e+00> : vector<8x128xf32>
    %160 = tpu.matmul %157, %159, %cst_125 {dimension_numbers = #tpu.dot_dimension_numbers<[1], [0], [0], [1], [0, 0, 1, 1], [], []>} : vector<8x64xf32>, vector<64x128xf32>, vector<8x128xf32> -> vector<8x128xf32>
    %161 = vector.extract_strided_slice %156 {offsets = [8, 0], sizes = [8, 64], strides = [1, 1]} : vector<72x64xf32> to vector<8x64xf32>
    %c1_126 = arith.constant 1 : index
    %c0_127 = arith.constant 0 : index
    %c0_128 = arith.constant 0 : index
    %162 = vector.load %arg12[%c1_126, %c0_127, %c0_128] : memref<9x64x128xf32, #tpu.memory_space<vmem>>, vector<1x64x128xf32>
    %163 = vector.shape_cast %162 : vector<1x64x128xf32> to vector<64x128xf32>
    %cst_129 = arith.constant dense<0.000000e+00> : vector<8x128xf32>
    %164 = tpu.matmul %161, %163, %cst_129 {dimension_numbers = #tpu.dot_dimension_numbers<[1], [0], [0], [1], [0, 0, 1, 1], [], []>} : vector<8x64xf32>, vector<64x128xf32>, vector<8x128xf32> -> vector<8x128xf32>
    %165 = arith.addf %160, %164 : vector<8x128xf32>
    %166 = vector.extract_strided_slice %156 {offsets = [16, 0], sizes = [8, 64], strides = [1, 1]} : vector<72x64xf32> to vector<8x64xf32>
    %c2_130 = arith.constant 2 : index
    %c0_131 = arith.constant 0 : index
    %c0_132 = arith.constant 0 : index
    %167 = vector.load %arg12[%c2_130, %c0_131, %c0_132] : memref<9x64x128xf32, #tpu.memory_space<vmem>>, vector<1x64x128xf32>
    %168 = vector.shape_cast %167 : vector<1x64x128xf32> to vector<64x128xf32>
    %cst_133 = arith.constant dense<0.000000e+00> : vector<8x128xf32>
    %169 = tpu.matmul %166, %168, %cst_133 {dimension_numbers = #tpu.dot_dimension_numbers<[1], [0], [0], [1], [0, 0, 1, 1], [], []>} : vector<8x64xf32>, vector<64x128xf32>, vector<8x128xf32> -> vector<8x128xf32>
    %170 = arith.addf %165, %169 : vector<8x128xf32>
    %171 = vector.extract_strided_slice %156 {offsets = [24, 0], sizes = [8, 64], strides = [1, 1]} : vector<72x64xf32> to vector<8x64xf32>
    %c3_134 = arith.constant 3 : index
    %c0_135 = arith.constant 0 : index
    %c0_136 = arith.constant 0 : index
    %172 = vector.load %arg12[%c3_134, %c0_135, %c0_136] : memref<9x64x128xf32, #tpu.memory_space<vmem>>, vector<1x64x128xf32>
    %173 = vector.shape_cast %172 : vector<1x64x128xf32> to vector<64x128xf32>
    %cst_137 = arith.constant dense<0.000000e+00> : vector<8x128xf32>
    %174 = tpu.matmul %171, %173, %cst_137 {dimension_numbers = #tpu.dot_dimension_numbers<[1], [0], [0], [1], [0, 0, 1, 1], [], []>} : vector<8x64xf32>, vector<64x128xf32>, vector<8x128xf32> -> vector<8x128xf32>
    %175 = arith.addf %170, %174 : vector<8x128xf32>
    %176 = vector.extract_strided_slice %156 {offsets = [32, 0], sizes = [8, 64], strides = [1, 1]} : vector<72x64xf32> to vector<8x64xf32>
    %c4_138 = arith.constant 4 : index
    %c0_139 = arith.constant 0 : index
    %c0_140 = arith.constant 0 : index
    %177 = vector.load %arg12[%c4_138, %c0_139, %c0_140] : memref<9x64x128xf32, #tpu.memory_space<vmem>>, vector<1x64x128xf32>
    %178 = vector.shape_cast %177 : vector<1x64x128xf32> to vector<64x128xf32>
    %cst_141 = arith.constant dense<0.000000e+00> : vector<8x128xf32>
    %179 = tpu.matmul %176, %178, %cst_141 {dimension_numbers = #tpu.dot_dimension_numbers<[1], [0], [0], [1], [0, 0, 1, 1], [], []>} : vector<8x64xf32>, vector<64x128xf32>, vector<8x128xf32> -> vector<8x128xf32>
    %180 = arith.addf %175, %179 : vector<8x128xf32>
    %181 = vector.extract_strided_slice %156 {offsets = [40, 0], sizes = [8, 64], strides = [1, 1]} : vector<72x64xf32> to vector<8x64xf32>
    %c5_142 = arith.constant 5 : index
    %c0_143 = arith.constant 0 : index
    %c0_144 = arith.constant 0 : index
    %182 = vector.load %arg12[%c5_142, %c0_143, %c0_144] : memref<9x64x128xf32, #tpu.memory_space<vmem>>, vector<1x64x128xf32>
    %183 = vector.shape_cast %182 : vector<1x64x128xf32> to vector<64x128xf32>
    %cst_145 = arith.constant dense<0.000000e+00> : vector<8x128xf32>
    %184 = tpu.matmul %181, %183, %cst_145 {dimension_numbers = #tpu.dot_dimension_numbers<[1], [0], [0], [1], [0, 0, 1, 1], [], []>} : vector<8x64xf32>, vector<64x128xf32>, vector<8x128xf32> -> vector<8x128xf32>
    %185 = arith.addf %180, %184 : vector<8x128xf32>
    %186 = vector.extract_strided_slice %156 {offsets = [48, 0], sizes = [8, 64], strides = [1, 1]} : vector<72x64xf32> to vector<8x64xf32>
    %c6_146 = arith.constant 6 : index
    %c0_147 = arith.constant 0 : index
    %c0_148 = arith.constant 0 : index
    %187 = vector.load %arg12[%c6_146, %c0_147, %c0_148] : memref<9x64x128xf32, #tpu.memory_space<vmem>>, vector<1x64x128xf32>
    %188 = vector.shape_cast %187 : vector<1x64x128xf32> to vector<64x128xf32>
    %cst_149 = arith.constant dense<0.000000e+00> : vector<8x128xf32>
    %189 = tpu.matmul %186, %188, %cst_149 {dimension_numbers = #tpu.dot_dimension_numbers<[1], [0], [0], [1], [0, 0, 1, 1], [], []>} : vector<8x64xf32>, vector<64x128xf32>, vector<8x128xf32> -> vector<8x128xf32>
    %190 = arith.addf %185, %189 : vector<8x128xf32>
    %191 = vector.extract_strided_slice %156 {offsets = [56, 0], sizes = [8, 64], strides = [1, 1]} : vector<72x64xf32> to vector<8x64xf32>
    %c7_150 = arith.constant 7 : index
    %c0_151 = arith.constant 0 : index
    %c0_152 = arith.constant 0 : index
    %192 = vector.load %arg12[%c7_150, %c0_151, %c0_152] : memref<9x64x128xf32, #tpu.memory_space<vmem>>, vector<1x64x128xf32>
    %193 = vector.shape_cast %192 : vector<1x64x128xf32> to vector<64x128xf32>
    %cst_153 = arith.constant dense<0.000000e+00> : vector<8x128xf32>
    %194 = tpu.matmul %191, %193, %cst_153 {dimension_numbers = #tpu.dot_dimension_numbers<[1], [0], [0], [1], [0, 0, 1, 1], [], []>} : vector<8x64xf32>, vector<64x128xf32>, vector<8x128xf32> -> vector<8x128xf32>
    %195 = arith.addf %190, %194 : vector<8x128xf32>
    %196 = vector.extract_strided_slice %156 {offsets = [64, 0], sizes = [8, 64], strides = [1, 1]} : vector<72x64xf32> to vector<8x64xf32>
    %c8_154 = arith.constant 8 : index
    %c0_155 = arith.constant 0 : index
    %c0_156 = arith.constant 0 : index
    %197 = vector.load %arg12[%c8_154, %c0_155, %c0_156] : memref<9x64x128xf32, #tpu.memory_space<vmem>>, vector<1x64x128xf32>
    %198 = vector.shape_cast %197 : vector<1x64x128xf32> to vector<64x128xf32>
    %cst_157 = arith.constant dense<0.000000e+00> : vector<8x128xf32>
    %199 = tpu.matmul %196, %198, %cst_157 {dimension_numbers = #tpu.dot_dimension_numbers<[1], [0], [0], [1], [0, 0, 1, 1], [], []>} : vector<8x64xf32>, vector<64x128xf32>, vector<8x128xf32> -> vector<8x128xf32>
    %200 = arith.addf %195, %199 : vector<8x128xf32>
    %c0_158 = arith.constant 0 : index
    %c0_159 = arith.constant 0 : index
    %201 = vector.load %arg13[%c0_158, %c0_159] : memref<1x128xf32, #tpu.memory_space<vmem>>, vector<1x128xf32>
    %202 = vector.broadcast %201 : vector<1x128xf32> to vector<8x128xf32>
    %203 = arith.addf %200, %202 : vector<8x128xf32>
    %cst_160 = arith.constant 0.000000e+00 : f32
    %204 = vector.broadcast %cst_160 : f32 to vector<8x128xf32>
    %205 = arith.maximumf %203, %204 : vector<8x128xf32>
    %c0_161 = arith.constant 0 : index
    %c0_162 = arith.constant 0 : index
    %206 = vector.load %arg14[%c0_161, %c0_162] : memref<32x8xf32, #tpu.memory_space<vmem>>, vector<32x8xf32>
    %cst_163 = arith.constant dense<0.000000e+00> : vector<32x128xf32>
    %207 = tpu.matmul %206, %205, %cst_163 {dimension_numbers = #tpu.dot_dimension_numbers<[1], [0], [0], [1], [0, 0, 1, 1], [], []>} : vector<32x8xf32>, vector<8x128xf32>, vector<32x128xf32> -> vector<32x128xf32>
    %208 = vector.extract_strided_slice %207 {offsets = [0, 0], sizes = [8, 128], strides = [1, 1]} : vector<32x128xf32> to vector<8x128xf32>
    %c0_164 = arith.constant 0 : index
    %c0_165 = arith.constant 0 : index
    %c0_166 = arith.constant 0 : index
    %209 = vector.load %arg15[%c0_164, %c0_165, %c0_166] : memref<4x128x256xf32, #tpu.memory_space<vmem>>, vector<1x128x256xf32>
    %210 = vector.shape_cast %209 : vector<1x128x256xf32> to vector<128x256xf32>
    %cst_167 = arith.constant dense<0.000000e+00> : vector<8x256xf32>
    %211 = tpu.matmul %208, %210, %cst_167 {dimension_numbers = #tpu.dot_dimension_numbers<[1], [0], [0], [1], [0, 0, 1, 1], [], []>} : vector<8x128xf32>, vector<128x256xf32>, vector<8x256xf32> -> vector<8x256xf32>
    %212 = vector.extract_strided_slice %207 {offsets = [8, 0], sizes = [8, 128], strides = [1, 1]} : vector<32x128xf32> to vector<8x128xf32>
    %c1_168 = arith.constant 1 : index
    %c0_169 = arith.constant 0 : index
    %c0_170 = arith.constant 0 : index
    %213 = vector.load %arg15[%c1_168, %c0_169, %c0_170] : memref<4x128x256xf32, #tpu.memory_space<vmem>>, vector<1x128x256xf32>
    %214 = vector.shape_cast %213 : vector<1x128x256xf32> to vector<128x256xf32>
    %cst_171 = arith.constant dense<0.000000e+00> : vector<8x256xf32>
    %215 = tpu.matmul %212, %214, %cst_171 {dimension_numbers = #tpu.dot_dimension_numbers<[1], [0], [0], [1], [0, 0, 1, 1], [], []>} : vector<8x128xf32>, vector<128x256xf32>, vector<8x256xf32> -> vector<8x256xf32>
    %216 = arith.addf %211, %215 : vector<8x256xf32>
    %217 = vector.extract_strided_slice %207 {offsets = [16, 0], sizes = [8, 128], strides = [1, 1]} : vector<32x128xf32> to vector<8x128xf32>
    %c2_172 = arith.constant 2 : index
    %c0_173 = arith.constant 0 : index
    %c0_174 = arith.constant 0 : index
    %218 = vector.load %arg15[%c2_172, %c0_173, %c0_174] : memref<4x128x256xf32, #tpu.memory_space<vmem>>, vector<1x128x256xf32>
    %219 = vector.shape_cast %218 : vector<1x128x256xf32> to vector<128x256xf32>
    %cst_175 = arith.constant dense<0.000000e+00> : vector<8x256xf32>
    %220 = tpu.matmul %217, %219, %cst_175 {dimension_numbers = #tpu.dot_dimension_numbers<[1], [0], [0], [1], [0, 0, 1, 1], [], []>} : vector<8x128xf32>, vector<128x256xf32>, vector<8x256xf32> -> vector<8x256xf32>
    %221 = arith.addf %216, %220 : vector<8x256xf32>
    %222 = vector.extract_strided_slice %207 {offsets = [24, 0], sizes = [8, 128], strides = [1, 1]} : vector<32x128xf32> to vector<8x128xf32>
    %c3_176 = arith.constant 3 : index
    %c0_177 = arith.constant 0 : index
    %c0_178 = arith.constant 0 : index
    %223 = vector.load %arg15[%c3_176, %c0_177, %c0_178] : memref<4x128x256xf32, #tpu.memory_space<vmem>>, vector<1x128x256xf32>
    %224 = vector.shape_cast %223 : vector<1x128x256xf32> to vector<128x256xf32>
    %cst_179 = arith.constant dense<0.000000e+00> : vector<8x256xf32>
    %225 = tpu.matmul %222, %224, %cst_179 {dimension_numbers = #tpu.dot_dimension_numbers<[1], [0], [0], [1], [0, 0, 1, 1], [], []>} : vector<8x128xf32>, vector<128x256xf32>, vector<8x256xf32> -> vector<8x256xf32>
    %226 = arith.addf %221, %225 : vector<8x256xf32>
    %c0_180 = arith.constant 0 : index
    %c0_181 = arith.constant 0 : index
    %227 = vector.load %arg16[%c0_180, %c0_181] : memref<1x256xf32, #tpu.memory_space<vmem>>, vector<1x256xf32>
    %228 = vector.broadcast %227 : vector<1x256xf32> to vector<8x256xf32>
    %229 = arith.addf %226, %228 : vector<8x256xf32>
    %cst_182 = arith.constant 0.000000e+00 : f32
    %230 = vector.broadcast %cst_182 : f32 to vector<8x256xf32>
    %231 = arith.maximumf %229, %230 : vector<8x256xf32>
    %232 = vector.extract_strided_slice %231 {offsets = [0, 0], sizes = [8, 64], strides = [1, 1]} : vector<8x256xf32> to vector<8x64xf32>
    %c0_183 = arith.constant 0 : index
    %c0_184 = arith.constant 0 : index
    %c0_185 = arith.constant 0 : index
    %233 = vector.load %arg17[%c0_183, %c0_184, %c0_185] : memref<4x8x8xf32, #tpu.memory_space<vmem>>, vector<1x8x8xf32>
    %234 = vector.shape_cast %233 : vector<1x8x8xf32> to vector<8x8xf32>
    %cst_186 = arith.constant dense<0.000000e+00> : vector<8x64xf32>
    %235 = tpu.matmul %234, %232, %cst_186 {dimension_numbers = #tpu.dot_dimension_numbers<[1], [0], [0], [1], [0, 0, 1, 1], [], []>} : vector<8x8xf32>, vector<8x64xf32>, vector<8x64xf32> -> vector<8x64xf32>
    %236 = vector.extract_strided_slice %231 {offsets = [0, 64], sizes = [8, 64], strides = [1, 1]} : vector<8x256xf32> to vector<8x64xf32>
    %c1_187 = arith.constant 1 : index
    %c0_188 = arith.constant 0 : index
    %c0_189 = arith.constant 0 : index
    %237 = vector.load %arg17[%c1_187, %c0_188, %c0_189] : memref<4x8x8xf32, #tpu.memory_space<vmem>>, vector<1x8x8xf32>
    %238 = vector.shape_cast %237 : vector<1x8x8xf32> to vector<8x8xf32>
    %cst_190 = arith.constant dense<0.000000e+00> : vector<8x64xf32>
    %239 = tpu.matmul %238, %236, %cst_190 {dimension_numbers = #tpu.dot_dimension_numbers<[1], [0], [0], [1], [0, 0, 1, 1], [], []>} : vector<8x8xf32>, vector<8x64xf32>, vector<8x64xf32> -> vector<8x64xf32>
    %240 = arith.addf %235, %239 : vector<8x64xf32>
    %241 = vector.extract_strided_slice %231 {offsets = [0, 128], sizes = [8, 64], strides = [1, 1]} : vector<8x256xf32> to vector<8x64xf32>
    %c2_191 = arith.constant 2 : index
    %c0_192 = arith.constant 0 : index
    %c0_193 = arith.constant 0 : index
    %242 = vector.load %arg17[%c2_191, %c0_192, %c0_193] : memref<4x8x8xf32, #tpu.memory_space<vmem>>, vector<1x8x8xf32>
    %243 = vector.shape_cast %242 : vector<1x8x8xf32> to vector<8x8xf32>
    %cst_194 = arith.constant dense<0.000000e+00> : vector<8x64xf32>
    %244 = tpu.matmul %243, %241, %cst_194 {dimension_numbers = #tpu.dot_dimension_numbers<[1], [0], [0], [1], [0, 0, 1, 1], [], []>} : vector<8x8xf32>, vector<8x64xf32>, vector<8x64xf32> -> vector<8x64xf32>
    %245 = arith.addf %240, %244 : vector<8x64xf32>
    %246 = vector.extract_strided_slice %231 {offsets = [0, 192], sizes = [8, 64], strides = [1, 1]} : vector<8x256xf32> to vector<8x64xf32>
    %c3_195 = arith.constant 3 : index
    %c0_196 = arith.constant 0 : index
    %c0_197 = arith.constant 0 : index
    %247 = vector.load %arg17[%c3_195, %c0_196, %c0_197] : memref<4x8x8xf32, #tpu.memory_space<vmem>>, vector<1x8x8xf32>
    %248 = vector.shape_cast %247 : vector<1x8x8xf32> to vector<8x8xf32>
    %cst_198 = arith.constant dense<0.000000e+00> : vector<8x64xf32>
    %249 = tpu.matmul %248, %246, %cst_198 {dimension_numbers = #tpu.dot_dimension_numbers<[1], [0], [0], [1], [0, 0, 1, 1], [], []>} : vector<8x8xf32>, vector<8x64xf32>, vector<8x64xf32> -> vector<8x64xf32>
    %250 = arith.addf %245, %249 : vector<8x64xf32>
    %c0_199 = arith.constant 0 : index
    %c0_200 = arith.constant 0 : index
    %251 = vector.load %arg18[%c0_199, %c0_200] : memref<64x8xf32, #tpu.memory_space<vmem>>, vector<64x8xf32>
    %cst_201 = arith.constant dense<0.000000e+00> : vector<64x64xf32>
    %252 = tpu.matmul %251, %250, %cst_201 {dimension_numbers = #tpu.dot_dimension_numbers<[1], [0], [0], [1], [0, 0, 1, 1], [], []>} : vector<64x8xf32>, vector<8x64xf32>, vector<64x64xf32> -> vector<64x64xf32>
    %253 = vector.extract_strided_slice %252 {offsets = [0, 0], sizes = [16, 64], strides = [1, 1]} : vector<64x64xf32> to vector<16x64xf32>
    %c0_202 = arith.constant 0 : index
    %c0_203 = arith.constant 0 : index
    %c0_204 = arith.constant 0 : index
    %254 = vector.load %arg19[%c0_202, %c0_203, %c0_204] : memref<4x64x128xf32, #tpu.memory_space<vmem>>, vector<1x64x128xf32>
    %255 = vector.shape_cast %254 : vector<1x64x128xf32> to vector<64x128xf32>
    %cst_205 = arith.constant dense<0.000000e+00> : vector<16x128xf32>
    %256 = tpu.matmul %253, %255, %cst_205 {dimension_numbers = #tpu.dot_dimension_numbers<[1], [0], [0], [1], [0, 0, 1, 1], [], []>} : vector<16x64xf32>, vector<64x128xf32>, vector<16x128xf32> -> vector<16x128xf32>
    %257 = vector.extract_strided_slice %252 {offsets = [16, 0], sizes = [16, 64], strides = [1, 1]} : vector<64x64xf32> to vector<16x64xf32>
    %c1_206 = arith.constant 1 : index
    %c0_207 = arith.constant 0 : index
    %c0_208 = arith.constant 0 : index
    %258 = vector.load %arg19[%c1_206, %c0_207, %c0_208] : memref<4x64x128xf32, #tpu.memory_space<vmem>>, vector<1x64x128xf32>
    %259 = vector.shape_cast %258 : vector<1x64x128xf32> to vector<64x128xf32>
    %cst_209 = arith.constant dense<0.000000e+00> : vector<16x128xf32>
    %260 = tpu.matmul %257, %259, %cst_209 {dimension_numbers = #tpu.dot_dimension_numbers<[1], [0], [0], [1], [0, 0, 1, 1], [], []>} : vector<16x64xf32>, vector<64x128xf32>, vector<16x128xf32> -> vector<16x128xf32>
    %261 = arith.addf %256, %260 : vector<16x128xf32>
    %262 = vector.extract_strided_slice %252 {offsets = [32, 0], sizes = [16, 64], strides = [1, 1]} : vector<64x64xf32> to vector<16x64xf32>
    %c2_210 = arith.constant 2 : index
    %c0_211 = arith.constant 0 : index
    %c0_212 = arith.constant 0 : index
    %263 = vector.load %arg19[%c2_210, %c0_211, %c0_212] : memref<4x64x128xf32, #tpu.memory_space<vmem>>, vector<1x64x128xf32>
    %264 = vector.shape_cast %263 : vector<1x64x128xf32> to vector<64x128xf32>
    %cst_213 = arith.constant dense<0.000000e+00> : vector<16x128xf32>
    %265 = tpu.matmul %262, %264, %cst_213 {dimension_numbers = #tpu.dot_dimension_numbers<[1], [0], [0], [1], [0, 0, 1, 1], [], []>} : vector<16x64xf32>, vector<64x128xf32>, vector<16x128xf32> -> vector<16x128xf32>
    %266 = arith.addf %261, %265 : vector<16x128xf32>
    %267 = vector.extract_strided_slice %252 {offsets = [48, 0], sizes = [16, 64], strides = [1, 1]} : vector<64x64xf32> to vector<16x64xf32>
    %c3_214 = arith.constant 3 : index
    %c0_215 = arith.constant 0 : index
    %c0_216 = arith.constant 0 : index
    %268 = vector.load %arg19[%c3_214, %c0_215, %c0_216] : memref<4x64x128xf32, #tpu.memory_space<vmem>>, vector<1x64x128xf32>
    %269 = vector.shape_cast %268 : vector<1x64x128xf32> to vector<64x128xf32>
    %cst_217 = arith.constant dense<0.000000e+00> : vector<16x128xf32>
    %270 = tpu.matmul %267, %269, %cst_217 {dimension_numbers = #tpu.dot_dimension_numbers<[1], [0], [0], [1], [0, 0, 1, 1], [], []>} : vector<16x64xf32>, vector<64x128xf32>, vector<16x128xf32> -> vector<16x128xf32>
    %271 = arith.addf %266, %270 : vector<16x128xf32>
    %c0_218 = arith.constant 0 : index
    %c0_219 = arith.constant 0 : index
    %272 = vector.load %arg20[%c0_218, %c0_219] : memref<1x128xf32, #tpu.memory_space<vmem>>, vector<1x128xf32>
    %273 = vector.broadcast %272 : vector<1x128xf32> to vector<16x128xf32>
    %274 = arith.addf %271, %273 : vector<16x128xf32>
    %cst_220 = arith.constant 0.000000e+00 : f32
    %275 = vector.broadcast %cst_220 : f32 to vector<16x128xf32>
    %276 = arith.maximumf %274, %275 : vector<16x128xf32>
    %277 = vector.extract_strided_slice %276 {offsets = [0, 0], sizes = [16, 32], strides = [1, 1]} : vector<16x128xf32> to vector<16x32xf32>
    %c0_221 = arith.constant 0 : index
    %c0_222 = arith.constant 0 : index
    %c0_223 = arith.constant 0 : index
    %278 = vector.load %arg21[%c0_221, %c0_222, %c0_223] : memref<4x16x16xf32, #tpu.memory_space<vmem>>, vector<1x16x16xf32>
    %279 = vector.shape_cast %278 : vector<1x16x16xf32> to vector<16x16xf32>
    %cst_224 = arith.constant dense<0.000000e+00> : vector<16x32xf32>
    %280 = tpu.matmul %279, %277, %cst_224 {dimension_numbers = #tpu.dot_dimension_numbers<[1], [0], [0], [1], [0, 0, 1, 1], [], []>} : vector<16x16xf32>, vector<16x32xf32>, vector<16x32xf32> -> vector<16x32xf32>
    %281 = vector.extract_strided_slice %276 {offsets = [0, 32], sizes = [16, 32], strides = [1, 1]} : vector<16x128xf32> to vector<16x32xf32>
    %c1_225 = arith.constant 1 : index
    %c0_226 = arith.constant 0 : index
    %c0_227 = arith.constant 0 : index
    %282 = vector.load %arg21[%c1_225, %c0_226, %c0_227] : memref<4x16x16xf32, #tpu.memory_space<vmem>>, vector<1x16x16xf32>
    %283 = vector.shape_cast %282 : vector<1x16x16xf32> to vector<16x16xf32>
    %cst_228 = arith.constant dense<0.000000e+00> : vector<16x32xf32>
    %284 = tpu.matmul %283, %281, %cst_228 {dimension_numbers = #tpu.dot_dimension_numbers<[1], [0], [0], [1], [0, 0, 1, 1], [], []>} : vector<16x16xf32>, vector<16x32xf32>, vector<16x32xf32> -> vector<16x32xf32>
    %285 = arith.addf %280, %284 : vector<16x32xf32>
    %286 = vector.extract_strided_slice %276 {offsets = [0, 64], sizes = [16, 32], strides = [1, 1]} : vector<16x128xf32> to vector<16x32xf32>
    %c2_229 = arith.constant 2 : index
    %c0_230 = arith.constant 0 : index
    %c0_231 = arith.constant 0 : index
    %287 = vector.load %arg21[%c2_229, %c0_230, %c0_231] : memref<4x16x16xf32, #tpu.memory_space<vmem>>, vector<1x16x16xf32>
    %288 = vector.shape_cast %287 : vector<1x16x16xf32> to vector<16x16xf32>
    %cst_232 = arith.constant dense<0.000000e+00> : vector<16x32xf32>
    %289 = tpu.matmul %288, %286, %cst_232 {dimension_numbers = #tpu.dot_dimension_numbers<[1], [0], [0], [1], [0, 0, 1, 1], [], []>} : vector<16x16xf32>, vector<16x32xf32>, vector<16x32xf32> -> vector<16x32xf32>
    %290 = arith.addf %285, %289 : vector<16x32xf32>
    %291 = vector.extract_strided_slice %276 {offsets = [0, 96], sizes = [16, 32], strides = [1, 1]} : vector<16x128xf32> to vector<16x32xf32>
    %c3_233 = arith.constant 3 : index
    %c0_234 = arith.constant 0 : index
    %c0_235 = arith.constant 0 : index
    %292 = vector.load %arg21[%c3_233, %c0_234, %c0_235] : memref<4x16x16xf32, #tpu.memory_space<vmem>>, vector<1x16x16xf32>
    %293 = vector.shape_cast %292 : vector<1x16x16xf32> to vector<16x16xf32>
    %cst_236 = arith.constant dense<0.000000e+00> : vector<16x32xf32>
    %294 = tpu.matmul %293, %291, %cst_236 {dimension_numbers = #tpu.dot_dimension_numbers<[1], [0], [0], [1], [0, 0, 1, 1], [], []>} : vector<16x16xf32>, vector<16x32xf32>, vector<16x32xf32> -> vector<16x32xf32>
    %295 = arith.addf %290, %294 : vector<16x32xf32>
    %c0_237 = arith.constant 0 : index
    %c0_238 = arith.constant 0 : index
    %296 = vector.load %arg22[%c0_237, %c0_238] : memref<128x16xf32, #tpu.memory_space<vmem>>, vector<128x16xf32>
    %cst_239 = arith.constant dense<0.000000e+00> : vector<128x32xf32>
    %297 = tpu.matmul %296, %295, %cst_239 {dimension_numbers = #tpu.dot_dimension_numbers<[1], [0], [0], [1], [0, 0, 1, 1], [], []>} : vector<128x16xf32>, vector<16x32xf32>, vector<128x32xf32> -> vector<128x32xf32>
    %298 = vector.extract_strided_slice %297 {offsets = [0, 0], sizes = [32, 32], strides = [1, 1]} : vector<128x32xf32> to vector<32x32xf32>
    %c0_240 = arith.constant 0 : index
    %c0_241 = arith.constant 0 : index
    %c0_242 = arith.constant 0 : index
    %299 = vector.load %arg23[%c0_240, %c0_241, %c0_242] : memref<4x32x64xf32, #tpu.memory_space<vmem>>, vector<1x32x64xf32>
    %300 = vector.shape_cast %299 : vector<1x32x64xf32> to vector<32x64xf32>
    %cst_243 = arith.constant dense<0.000000e+00> : vector<32x64xf32>
    %301 = tpu.matmul %298, %300, %cst_243 {dimension_numbers = #tpu.dot_dimension_numbers<[1], [0], [0], [1], [0, 0, 1, 1], [], []>} : vector<32x32xf32>, vector<32x64xf32>, vector<32x64xf32> -> vector<32x64xf32>
    %302 = vector.extract_strided_slice %297 {offsets = [32, 0], sizes = [32, 32], strides = [1, 1]} : vector<128x32xf32> to vector<32x32xf32>
    %c1_244 = arith.constant 1 : index
    %c0_245 = arith.constant 0 : index
    %c0_246 = arith.constant 0 : index
    %303 = vector.load %arg23[%c1_244, %c0_245, %c0_246] : memref<4x32x64xf32, #tpu.memory_space<vmem>>, vector<1x32x64xf32>
    %304 = vector.shape_cast %303 : vector<1x32x64xf32> to vector<32x64xf32>
    %cst_247 = arith.constant dense<0.000000e+00> : vector<32x64xf32>
    %305 = tpu.matmul %302, %304, %cst_247 {dimension_numbers = #tpu.dot_dimension_numbers<[1], [0], [0], [1], [0, 0, 1, 1], [], []>} : vector<32x32xf32>, vector<32x64xf32>, vector<32x64xf32> -> vector<32x64xf32>
    %306 = arith.addf %301, %305 : vector<32x64xf32>
    %307 = vector.extract_strided_slice %297 {offsets = [64, 0], sizes = [32, 32], strides = [1, 1]} : vector<128x32xf32> to vector<32x32xf32>
    %c2_248 = arith.constant 2 : index
    %c0_249 = arith.constant 0 : index
    %c0_250 = arith.constant 0 : index
    %308 = vector.load %arg23[%c2_248, %c0_249, %c0_250] : memref<4x32x64xf32, #tpu.memory_space<vmem>>, vector<1x32x64xf32>
    %309 = vector.shape_cast %308 : vector<1x32x64xf32> to vector<32x64xf32>
    %cst_251 = arith.constant dense<0.000000e+00> : vector<32x64xf32>
    %310 = tpu.matmul %307, %309, %cst_251 {dimension_numbers = #tpu.dot_dimension_numbers<[1], [0], [0], [1], [0, 0, 1, 1], [], []>} : vector<32x32xf32>, vector<32x64xf32>, vector<32x64xf32> -> vector<32x64xf32>
    %311 = arith.addf %306, %310 : vector<32x64xf32>
    %312 = vector.extract_strided_slice %297 {offsets = [96, 0], sizes = [32, 32], strides = [1, 1]} : vector<128x32xf32> to vector<32x32xf32>
    %c3_252 = arith.constant 3 : index
    %c0_253 = arith.constant 0 : index
    %c0_254 = arith.constant 0 : index
    %313 = vector.load %arg23[%c3_252, %c0_253, %c0_254] : memref<4x32x64xf32, #tpu.memory_space<vmem>>, vector<1x32x64xf32>
    %314 = vector.shape_cast %313 : vector<1x32x64xf32> to vector<32x64xf32>
    %cst_255 = arith.constant dense<0.000000e+00> : vector<32x64xf32>
    %315 = tpu.matmul %312, %314, %cst_255 {dimension_numbers = #tpu.dot_dimension_numbers<[1], [0], [0], [1], [0, 0, 1, 1], [], []>} : vector<32x32xf32>, vector<32x64xf32>, vector<32x64xf32> -> vector<32x64xf32>
    %316 = arith.addf %311, %315 : vector<32x64xf32>
    %c0_256 = arith.constant 0 : index
    %c0_257 = arith.constant 0 : index
    %317 = vector.load %arg24[%c0_256, %c0_257] : memref<1x64xf32, #tpu.memory_space<vmem>>, vector<1x64xf32>
    %318 = vector.broadcast %317 : vector<1x64xf32> to vector<32x64xf32>
    %319 = arith.addf %316, %318 : vector<32x64xf32>
    %cst_258 = arith.constant 0.000000e+00 : f32
    %320 = vector.broadcast %cst_258 : f32 to vector<32x64xf32>
    %321 = arith.maximumf %319, %320 : vector<32x64xf32>
    %322 = vector.extract_strided_slice %321 {offsets = [0, 0], sizes = [32, 16], strides = [1, 1]} : vector<32x64xf32> to vector<32x16xf32>
    %c0_259 = arith.constant 0 : index
    %c0_260 = arith.constant 0 : index
    %c0_261 = arith.constant 0 : index
    %323 = vector.load %arg25[%c0_259, %c0_260, %c0_261] : memref<4x64x32xf32, #tpu.memory_space<vmem>>, vector<1x64x32xf32>
    %324 = vector.shape_cast %323 : vector<1x64x32xf32> to vector<64x32xf32>
    %cst_262 = arith.constant dense<0.000000e+00> : vector<64x16xf32>
    %325 = tpu.matmul %324, %322, %cst_262 {dimension_numbers = #tpu.dot_dimension_numbers<[1], [0], [0], [1], [0, 0, 1, 1], [], []>} : vector<64x32xf32>, vector<32x16xf32>, vector<64x16xf32> -> vector<64x16xf32>
    %326 = vector.extract_strided_slice %321 {offsets = [0, 16], sizes = [32, 16], strides = [1, 1]} : vector<32x64xf32> to vector<32x16xf32>
    %c1_263 = arith.constant 1 : index
    %c0_264 = arith.constant 0 : index
    %c0_265 = arith.constant 0 : index
    %327 = vector.load %arg25[%c1_263, %c0_264, %c0_265] : memref<4x64x32xf32, #tpu.memory_space<vmem>>, vector<1x64x32xf32>
    %328 = vector.shape_cast %327 : vector<1x64x32xf32> to vector<64x32xf32>
    %cst_266 = arith.constant dense<0.000000e+00> : vector<64x16xf32>
    %329 = tpu.matmul %328, %326, %cst_266 {dimension_numbers = #tpu.dot_dimension_numbers<[1], [0], [0], [1], [0, 0, 1, 1], [], []>} : vector<64x32xf32>, vector<32x16xf32>, vector<64x16xf32> -> vector<64x16xf32>
    %330 = arith.addf %325, %329 : vector<64x16xf32>
    %331 = vector.extract_strided_slice %321 {offsets = [0, 32], sizes = [32, 16], strides = [1, 1]} : vector<32x64xf32> to vector<32x16xf32>
    %c2_267 = arith.constant 2 : index
    %c0_268 = arith.constant 0 : index
    %c0_269 = arith.constant 0 : index
    %332 = vector.load %arg25[%c2_267, %c0_268, %c0_269] : memref<4x64x32xf32, #tpu.memory_space<vmem>>, vector<1x64x32xf32>
    %333 = vector.shape_cast %332 : vector<1x64x32xf32> to vector<64x32xf32>
    %cst_270 = arith.constant dense<0.000000e+00> : vector<64x16xf32>
    %334 = tpu.matmul %333, %331, %cst_270 {dimension_numbers = #tpu.dot_dimension_numbers<[1], [0], [0], [1], [0, 0, 1, 1], [], []>} : vector<64x32xf32>, vector<32x16xf32>, vector<64x16xf32> -> vector<64x16xf32>
    %335 = arith.addf %330, %334 : vector<64x16xf32>
    %336 = vector.extract_strided_slice %321 {offsets = [0, 48], sizes = [32, 16], strides = [1, 1]} : vector<32x64xf32> to vector<32x16xf32>
    %c3_271 = arith.constant 3 : index
    %c0_272 = arith.constant 0 : index
    %c0_273 = arith.constant 0 : index
    %337 = vector.load %arg25[%c3_271, %c0_272, %c0_273] : memref<4x64x32xf32, #tpu.memory_space<vmem>>, vector<1x64x32xf32>
    %338 = vector.shape_cast %337 : vector<1x64x32xf32> to vector<64x32xf32>
    %cst_274 = arith.constant dense<0.000000e+00> : vector<64x16xf32>
    %339 = tpu.matmul %338, %336, %cst_274 {dimension_numbers = #tpu.dot_dimension_numbers<[1], [0], [0], [1], [0, 0, 1, 1], [], []>} : vector<64x32xf32>, vector<32x16xf32>, vector<64x16xf32> -> vector<64x16xf32>
    %340 = arith.addf %335, %339 : vector<64x16xf32>
    %c0_275 = arith.constant 0 : index
    %c0_276 = arith.constant 0 : index
    %341 = vector.load %arg26[%c0_275, %c0_276] : memref<352x64xf32, #tpu.memory_space<vmem>>, vector<352x64xf32>
    %cst_277 = arith.constant dense<0.000000e+00> : vector<352x16xf32>
    %342 = tpu.matmul %341, %340, %cst_277 {dimension_numbers = #tpu.dot_dimension_numbers<[1], [0], [0], [1], [0, 0, 1, 1], [], []>} : vector<352x64xf32>, vector<64x16xf32>, vector<352x16xf32> -> vector<352x16xf32>
    %343 = vector.extract_strided_slice %342 {offsets = [0, 0], sizes = [88, 16], strides = [1, 1]} : vector<352x16xf32> to vector<88x16xf32>
    %c0_278 = arith.constant 0 : index
    %c0_279 = arith.constant 0 : index
    %c0_280 = arith.constant 0 : index
    %344 = vector.load %arg27[%c0_278, %c0_279, %c0_280] : memref<4x16x12xf32, #tpu.memory_space<vmem>>, vector<1x16x12xf32>
    %345 = vector.shape_cast %344 : vector<1x16x12xf32> to vector<16x12xf32>
    %cst_281 = arith.constant dense<0.000000e+00> : vector<88x12xf32>
    %346 = tpu.matmul %343, %345, %cst_281 {dimension_numbers = #tpu.dot_dimension_numbers<[1], [0], [0], [1], [0, 0, 1, 1], [], []>} : vector<88x16xf32>, vector<16x12xf32>, vector<88x12xf32> -> vector<88x12xf32>
    %347 = vector.extract_strided_slice %342 {offsets = [88, 0], sizes = [88, 16], strides = [1, 1]} : vector<352x16xf32> to vector<88x16xf32>
    %c1_282 = arith.constant 1 : index
    %c0_283 = arith.constant 0 : index
    %c0_284 = arith.constant 0 : index
    %348 = vector.load %arg27[%c1_282, %c0_283, %c0_284] : memref<4x16x12xf32, #tpu.memory_space<vmem>>, vector<1x16x12xf32>
    %349 = vector.shape_cast %348 : vector<1x16x12xf32> to vector<16x12xf32>
    %cst_285 = arith.constant dense<0.000000e+00> : vector<88x12xf32>
    %350 = tpu.matmul %347, %349, %cst_285 {dimension_numbers = #tpu.dot_dimension_numbers<[1], [0], [0], [1], [0, 0, 1, 1], [], []>} : vector<88x16xf32>, vector<16x12xf32>, vector<88x12xf32> -> vector<88x12xf32>
    %351 = arith.addf %346, %350 : vector<88x12xf32>
    %352 = vector.extract_strided_slice %342 {offsets = [176, 0], sizes = [88, 16], strides = [1, 1]} : vector<352x16xf32> to vector<88x16xf32>
    %c2_286 = arith.constant 2 : index
    %c0_287 = arith.constant 0 : index
    %c0_288 = arith.constant 0 : index
    %353 = vector.load %arg27[%c2_286, %c0_287, %c0_288] : memref<4x16x12xf32, #tpu.memory_space<vmem>>, vector<1x16x12xf32>
    %354 = vector.shape_cast %353 : vector<1x16x12xf32> to vector<16x12xf32>
    %cst_289 = arith.constant dense<0.000000e+00> : vector<88x12xf32>
    %355 = tpu.matmul %352, %354, %cst_289 {dimension_numbers = #tpu.dot_dimension_numbers<[1], [0], [0], [1], [0, 0, 1, 1], [], []>} : vector<88x16xf32>, vector<16x12xf32>, vector<88x12xf32> -> vector<88x12xf32>
    %356 = arith.addf %351, %355 : vector<88x12xf32>
    %357 = vector.extract_strided_slice %342 {offsets = [264, 0], sizes = [88, 16], strides = [1, 1]} : vector<352x16xf32> to vector<88x16xf32>
    %c3_290 = arith.constant 3 : index
    %c0_291 = arith.constant 0 : index
    %c0_292 = arith.constant 0 : index
    %358 = vector.load %arg27[%c3_290, %c0_291, %c0_292] : memref<4x16x12xf32, #tpu.memory_space<vmem>>, vector<1x16x12xf32>
    %359 = vector.shape_cast %358 : vector<1x16x12xf32> to vector<16x12xf32>
    %cst_293 = arith.constant dense<0.000000e+00> : vector<88x12xf32>
    %360 = tpu.matmul %357, %359, %cst_293 {dimension_numbers = #tpu.dot_dimension_numbers<[1], [0], [0], [1], [0, 0, 1, 1], [], []>} : vector<88x16xf32>, vector<16x12xf32>, vector<88x12xf32> -> vector<88x12xf32>
    %361 = arith.addf %356, %360 : vector<88x12xf32>
    %c0_294 = arith.constant 0 : index
    %c0_295 = arith.constant 0 : index
    %362 = vector.load %arg28[%c0_294, %c0_295] : memref<1x12xf32, #tpu.memory_space<vmem>>, vector<1x12xf32>
    %363 = vector.broadcast %362 : vector<1x12xf32> to vector<88x12xf32>
    %364 = arith.addf %361, %363 : vector<88x12xf32>
    %cst_296 = arith.constant 0.000000e+00 : f32
    %365 = vector.broadcast %cst_296 : f32 to vector<88x12xf32>
    %366 = arith.subf %365, %364 : vector<88x12xf32>
    %367 = math.exp %366 : vector<88x12xf32>
    %cst_297 = arith.constant 1.000000e+00 : f32
    %368 = vector.broadcast %cst_297 : f32 to vector<88x12xf32>
    %369 = arith.addf %368, %367 : vector<88x12xf32>
    %370 = tpu.reciprocal %369 {approx = true} : vector<88x12xf32> -> vector<88x12xf32>
    %371 = vector.extract_strided_slice %370 {offsets = [0, 0], sizes = [88, 3], strides = [1, 1]} : vector<88x12xf32> to vector<88x3xf32>
    %c0_298 = arith.constant 0 : index
    %c0_299 = arith.constant 0 : index
    %c0_300 = arith.constant 0 : index
    %372 = vector.load %arg29[%c0_298, %c0_299, %c0_300] : memref<4x256x88xf32, #tpu.memory_space<vmem>>, vector<1x256x88xf32>
    %373 = vector.shape_cast %372 : vector<1x256x88xf32> to vector<256x88xf32>
    %cst_301 = arith.constant dense<0.000000e+00> : vector<256x3xf32>
    %374 = tpu.matmul %373, %371, %cst_301 {dimension_numbers = #tpu.dot_dimension_numbers<[1], [0], [0], [1], [0, 0, 1, 1], [], []>} : vector<256x88xf32>, vector<88x3xf32>, vector<256x3xf32> -> vector<256x3xf32>
    %375 = vector.extract_strided_slice %370 {offsets = [0, 3], sizes = [88, 3], strides = [1, 1]} : vector<88x12xf32> to vector<88x3xf32>
    %c1_302 = arith.constant 1 : index
    %c0_303 = arith.constant 0 : index
    %c0_304 = arith.constant 0 : index
    %376 = vector.load %arg29[%c1_302, %c0_303, %c0_304] : memref<4x256x88xf32, #tpu.memory_space<vmem>>, vector<1x256x88xf32>
    %377 = vector.shape_cast %376 : vector<1x256x88xf32> to vector<256x88xf32>
    %cst_305 = arith.constant dense<0.000000e+00> : vector<256x3xf32>
    %378 = tpu.matmul %377, %375, %cst_305 {dimension_numbers = #tpu.dot_dimension_numbers<[1], [0], [0], [1], [0, 0, 1, 1], [], []>} : vector<256x88xf32>, vector<88x3xf32>, vector<256x3xf32> -> vector<256x3xf32>
    %379 = arith.addf %374, %378 : vector<256x3xf32>
    %380 = vector.extract_strided_slice %370 {offsets = [0, 6], sizes = [88, 3], strides = [1, 1]} : vector<88x12xf32> to vector<88x3xf32>
    %c2_306 = arith.constant 2 : index
    %c0_307 = arith.constant 0 : index
    %c0_308 = arith.constant 0 : index
    %381 = vector.load %arg29[%c2_306, %c0_307, %c0_308] : memref<4x256x88xf32, #tpu.memory_space<vmem>>, vector<1x256x88xf32>
    %382 = vector.shape_cast %381 : vector<1x256x88xf32> to vector<256x88xf32>
    %cst_309 = arith.constant dense<0.000000e+00> : vector<256x3xf32>
    %383 = tpu.matmul %382, %380, %cst_309 {dimension_numbers = #tpu.dot_dimension_numbers<[1], [0], [0], [1], [0, 0, 1, 1], [], []>} : vector<256x88xf32>, vector<88x3xf32>, vector<256x3xf32> -> vector<256x3xf32>
    %384 = arith.addf %379, %383 : vector<256x3xf32>
    %385 = vector.extract_strided_slice %370 {offsets = [0, 9], sizes = [88, 3], strides = [1, 1]} : vector<88x12xf32> to vector<88x3xf32>
    %c3_310 = arith.constant 3 : index
    %c0_311 = arith.constant 0 : index
    %c0_312 = arith.constant 0 : index
    %386 = vector.load %arg29[%c3_310, %c0_311, %c0_312] : memref<4x256x88xf32, #tpu.memory_space<vmem>>, vector<1x256x88xf32>
    %387 = vector.shape_cast %386 : vector<1x256x88xf32> to vector<256x88xf32>
    %cst_313 = arith.constant dense<0.000000e+00> : vector<256x3xf32>
    %388 = tpu.matmul %387, %385, %cst_313 {dimension_numbers = #tpu.dot_dimension_numbers<[1], [0], [0], [1], [0, 0, 1, 1], [], []>} : vector<256x88xf32>, vector<88x3xf32>, vector<256x3xf32> -> vector<256x3xf32>
    %389 = arith.addf %384, %388 : vector<256x3xf32>
    %cst_314 = arith.constant 0.000000e+00 : f32
    %cst_315 = arith.constant 1.000000e+00 : f32
    %390 = vector.broadcast %cst_314 : f32 to vector<256x3xf32>
    %391 = arith.maximumf %390, %389 : vector<256x3xf32>
    %392 = vector.broadcast %cst_315 : f32 to vector<256x3xf32>
    %393 = arith.minimumf %392, %391 : vector<256x3xf32>
    %c0_316 = arith.constant 0 : index
    %c0_317 = arith.constant 0 : index
    %c0_318 = arith.constant 0 : index
    %394 = vector.load %arg30[%c0_316, %c0_317, %c0_318] : memref<1x256x3xf32, #tpu.memory_space<vmem>>, vector<1x256x3xf32>
    %395 = vector.shape_cast %394 : vector<1x256x3xf32> to vector<256x3xf32>
    %396 = vector.shape_cast %393 : vector<256x3xf32> to vector<1x256x3xf32>
    tpu.vector_store %arg30[%c0_316, %c0_317, %c0_318], %396 {strides = array<i32>} : memref<1x256x3xf32, #tpu.memory_space<vmem>>, vector<1x256x3xf32>,
    return
  }
  func.func @transform_0(%arg0: i32) -> (i32, i32, i32) {
    %c0_i32 = arith.constant 0 : i32
    %c0_i32_0 = arith.constant 0 : i32
    %c0_i32_1 = arith.constant 0 : i32
    return %arg0, %c0_i32, %c0_i32_0 : i32, i32, i32
  }
  func.func @transform_1(%arg0: i32) -> (i32, i32) {
    %c0_i32 = arith.constant 0 : i32
    %c0_i32_0 = arith.constant 0 : i32
    %c0_i32_1 = arith.constant 0 : i32
    return %c0_i32, %c0_i32_0 : i32, i32
  }
  func.func @transform_2(%arg0: i32) -> (i32, i32, i32) {
    %c0_i32 = arith.constant 0 : i32
    %c0_i32_0 = arith.constant 0 : i32
    %c0_i32_1 = arith.constant 0 : i32
    %c0_i32_2 = arith.constant 0 : i32
    return %c0_i32, %c0_i32_0, %c0_i32_1 : i32, i32, i32
  }
  func.func @transform_3(%arg0: i32) -> (i32, i32) {
    %c0_i32 = arith.constant 0 : i32
    %c0_i32_0 = arith.constant 0 : i32
    %c0_i32_1 = arith.constant 0 : i32
    return %c0_i32, %c0_i32_0 : i32, i32
  }
  func.func @transform_4(%arg0: i32) -> (i32, i32) {
    %c0_i32 = arith.constant 0 : i32
    %c0_i32_0 = arith.constant 0 : i32
    %c0_i32_1 = arith.constant 0 : i32
    return %c0_i32, %c0_i32_0 : i32, i32
  }
  func.func @transform_5(%arg0: i32) -> (i32, i32, i32) {
    %c0_i32 = arith.constant 0 : i32
    %c0_i32_0 = arith.constant 0 : i32
    %c0_i32_1 = arith.constant 0 : i32
    %c0_i32_2 = arith.constant 0 : i32
    return %c0_i32, %c0_i32_0, %c0_i32_1 : i32, i32, i32
  }
  func.func @transform_6(%arg0: i32) -> (i32, i32) {
    %c0_i32 = arith.constant 0 : i32
    %c0_i32_0 = arith.constant 0 : i32
    %c0_i32_1 = arith.constant 0 : i32
    return %c0_i32, %c0_i32_0 : i32, i32
  }
  func.func @transform_7(%arg0: i32) -> (i32, i32) {
    %c0_i32 = arith.constant 0 : i32
    %c0_i32_0 = arith.constant 0 : i32
    %c0_i32_1 = arith.constant 0 : i32
    return %c0_i32, %c0_i32_0 : i32, i32
  }
  func.func @transform_8(%arg0: i32) -> (i32, i32, i32) {
    %c0_i32 = arith.constant 0 : i32
    %c0_i32_0 = arith.constant 0 : i32
    %c0_i32_1 = arith.constant 0 : i32
    %c0_i32_2 = arith.constant 0 : i32
    return %c0_i32, %c0_i32_0, %c0_i32_1 : i32, i32, i32
  }
  func.func @transform_9(%arg0: i32) -> (i32, i32) {
    %c0_i32 = arith.constant 0 : i32
    %c0_i32_0 = arith.constant 0 : i32
    %c0_i32_1 = arith.constant 0 : i32
    return %c0_i32, %c0_i32_0 : i32, i32
  }
  func.func @transform_10(%arg0: i32) -> (i32, i32) {
    %c0_i32 = arith.constant 0 : i32
    %c0_i32_0 = arith.constant 0 : i32
    %c0_i32_1 = arith.constant 0 : i32
    return %c0_i32, %c0_i32_0 : i32, i32
  }
  func.func @transform_11(%arg0: i32) -> (i32, i32, i32) {
    %c0_i32 = arith.constant 0 : i32
    %c0_i32_0 = arith.constant 0 : i32
    %c0_i32_1 = arith.constant 0 : i32
    %c0_i32_2 = arith.constant 0 : i32
    return %c0_i32, %c0_i32_0, %c0_i32_1 : i32, i32, i32
  }
  func.func @transform_12(%arg0: i32) -> (i32, i32) {
    %c0_i32 = arith.constant 0 : i32
    %c0_i32_0 = arith.constant 0 : i32
    %c0_i32_1 = arith.constant 0 : i32
    return %c0_i32, %c0_i32_0 : i32, i32
  }
  func.func @transform_13(%arg0: i32) -> (i32, i32) {
    %c0_i32 = arith.constant 0 : i32
    %c0_i32_0 = arith.constant 0 : i32
    %c0_i32_1 = arith.constant 0 : i32
    return %c0_i32, %c0_i32_0 : i32, i32
  }
  func.func @transform_14(%arg0: i32) -> (i32, i32, i32) {
    %c0_i32 = arith.constant 0 : i32
    %c0_i32_0 = arith.constant 0 : i32
    %c0_i32_1 = arith.constant 0 : i32
    %c0_i32_2 = arith.constant 0 : i32
    return %c0_i32, %c0_i32_0, %c0_i32_1 : i32, i32, i32
  }
  func.func @transform_15(%arg0: i32) -> (i32, i32) {
    %c0_i32 = arith.constant 0 : i32
    %c0_i32_0 = arith.constant 0 : i32
    %c0_i32_1 = arith.constant 0 : i32
    return %c0_i32, %c0_i32_0 : i32, i32
  }
  func.func @transform_16(%arg0: i32) -> (i32, i32, i32) {
    %c0_i32 = arith.constant 0 : i32
    %c0_i32_0 = arith.constant 0 : i32
    %c0_i32_1 = arith.constant 0 : i32
    %c0_i32_2 = arith.constant 0 : i32
    return %c0_i32, %c0_i32_0, %c0_i32_1 : i32, i32, i32
  }
  func.func @transform_17(%arg0: i32) -> (i32, i32) {
    %c0_i32 = arith.constant 0 : i32
    %c0_i32_0 = arith.constant 0 : i32
    %c0_i32_1 = arith.constant 0 : i32
    return %c0_i32, %c0_i32_0 : i32, i32
  }
  func.func @transform_18(%arg0: i32) -> (i32, i32, i32) {
    %c0_i32 = arith.constant 0 : i32
    %c0_i32_0 = arith.constant 0 : i32
    %c0_i32_1 = arith.constant 0 : i32
    %c0_i32_2 = arith.constant 0 : i32
    return %c0_i32, %c0_i32_0, %c0_i32_1 : i32, i32, i32
  }
  func.func @transform_19(%arg0: i32) -> (i32, i32) {
    %c0_i32 = arith.constant 0 : i32
    %c0_i32_0 = arith.constant 0 : i32
    %c0_i32_1 = arith.constant 0 : i32
    return %c0_i32, %c0_i32_0 : i32, i32
  }
  func.func @transform_20(%arg0: i32) -> (i32, i32, i32) {
    %c0_i32 = arith.constant 0 : i32
    %c0_i32_0 = arith.constant 0 : i32
    %c0_i32_1 = arith.constant 0 : i32
    %c0_i32_2 = arith.constant 0 : i32
    return %c0_i32, %c0_i32_0, %c0_i32_1 : i32, i32, i32
  }
  func.func @transform_21(%arg0: i32) -> (i32, i32) {
    %c0_i32 = arith.constant 0 : i32
    %c0_i32_0 = arith.constant 0 : i32
    %c0_i32_1 = arith.constant 0 : i32
    return %c0_i32, %c0_i32_0 : i32, i32
  }
  func.func @transform_22(%arg0: i32) -> (i32, i32, i32) {
    %c0_i32 = arith.constant 0 : i32
    %c0_i32_0 = arith.constant 0 : i32
    %c0_i32_1 = arith.constant 0 : i32
    %c0_i32_2 = arith.constant 0 : i32
    return %c0_i32, %c0_i32_0, %c0_i32_1 : i32, i32, i32
  }
  func.func @transform_23(%arg0: i32) -> (i32, i32) {
    %c0_i32 = arith.constant 0 : i32
    %c0_i32_0 = arith.constant 0 : i32
    %c0_i32_1 = arith.constant 0 : i32
    return %c0_i32, %c0_i32_0 : i32, i32
  }
  func.func @transform_24(%arg0: i32) -> (i32, i32, i32) {
    %c0_i32 = arith.constant 0 : i32
    %c0_i32_0 = arith.constant 0 : i32
    %c0_i32_1 = arith.constant 0 : i32
    %c0_i32_2 = arith.constant 0 : i32
    return %c0_i32, %c0_i32_0, %c0_i32_1 : i32, i32, i32
  }
  func.func @transform_25(%arg0: i32) -> (i32, i32) {
    %c0_i32 = arith.constant 0 : i32
    %c0_i32_0 = arith.constant 0 : i32
    %c0_i32_1 = arith.constant 0 : i32
    return %c0_i32, %c0_i32_0 : i32, i32
  }
  func.func @transform_26(%arg0: i32) -> (i32, i32, i32) {
    %c0_i32 = arith.constant 0 : i32
    %c0_i32_0 = arith.constant 0 : i32
    %c0_i32_1 = arith.constant 0 : i32
    %c0_i32_2 = arith.constant 0 : i32
    return %c0_i32, %c0_i32_0, %c0_i32_1 : i32, i32, i32
  }
  func.func @transform_27(%arg0: i32) -> (i32, i32) {
    %c0_i32 = arith.constant 0 : i32
    %c0_i32_0 = arith.constant 0 : i32
    %c0_i32_1 = arith.constant 0 : i32
    return %c0_i32, %c0_i32_0 : i32, i32
  }
  func.func @transform_28(%arg0: i32) -> (i32, i32, i32) {
    %c0_i32 = arith.constant 0 : i32
    %c0_i32_0 = arith.constant 0 : i32
    %c0_i32_1 = arith.constant 0 : i32
    %c0_i32_2 = arith.constant 0 : i32
    return %c0_i32, %c0_i32_0, %c0_i32_1 : i32, i32, i32
  }
  func.func @transform_29(%arg0: i32) -> (i32, i32, i32) {
    %c0_i32 = arith.constant 0 : i32
    %c0_i32_0 = arith.constant 0 : i32
    %c0_i32_1 = arith.constant 0 : i32
    return %arg0, %c0_i32, %c0_i32_0 : i32, i32, i32
  }
}

</mosaic_0001>

<bundles_post_ra>
// kernel: forward.1
= control target key start
LH: loop header
LB: loop body
LE: loop exit
PB: predicated region body
PF: predicated region fallthrough
CT: control target
= control target key end

     0   :  { %s14531_s6 = smov 1   ;;  %s14532_s10 = smov 2   ;;  %s16865_s0 = inlined_call_operand.smem [shape: u32[30], index: -1, kind: input, shape index: {}] }
   0x1   :  { %s14578_s5 = sld [smem:[%s16865_s0]]   ;;  %s14533_s14 = smov 3  }
   0x2   :  { %s14583_s9 = sld [smem:[%s16865_s0 + %s14531_s6]]   ;;  %s14534_s18 = smov 4  }
   0x3   :  { %s14588_s13 = sld [smem:[%s16865_s0 + %s14532_s10]]   ;;  %s14535_s22 = smov 5  }
   0x4   :  { %s14593_s17 = sld [smem:[%s16865_s0 + %s14533_s14]]   ;;  %s14536_s26 = smov 6  }
   0x5   :  { %s14598_s21 = sld [smem:[%s16865_s0 + %s14534_s18]]   ;;  %s14537_s30 = smov 7  }
   0x6   :  { %s14603_s25 = sld [smem:[%s16865_s0 + %s14535_s22]]   ;;  %s14538_s4 = smov 8  }
   0x7   :  { %s14608_s29 = sld [smem:[%s16865_s0 + %s14536_s26]]   ;;  %s14539_s10 = smov 9  }
   0x8   :  { %s14613_s3 = sld [smem:[%s16865_s0 + %s14537_s30]]   ;;  %s14540_s15 = smov 10  }
   0x9   :  { %s14618_s8 = sld [smem:[%s16865_s0 + %s14538_s4]]   ;;  %s14541_s20 = smov 11  }
   0xa   :  { %s14623_s14 = sld [smem:[%s16865_s0 + %s14539_s10]]   ;;  %s14542_s26 = smov 12  }
   0xb   :  { %s14628_s19 = sld [smem:[%s16865_s0 + %s14540_s15]]   ;;  %s14543_s1 = smov 13  }
   0xc   :  { %s14633_s24 = sld [smem:[%s16865_s0 + %s14541_s20]]   ;;  %s14544_s7 = smov 14  }
   0xd   :  { %s14638_s30 = sld [smem:[%s16865_s0 + %s14542_s26]]   ;;  %s14545_s15 = smov 15  }
   0xe   :  { %s14643_s6 = sld [smem:[%s16865_s0 + %s14543_s1]]   ;;  %s14546_s22 = smov 16  }
   0xf   :  { %s14648_s12 = sld [smem:[%s16865_s0 + %s14544_s7]]   ;;  %s14547_s28 = smov 17  }
  0x10   :  { %s14653_s20 = sld [smem:[%s16865_s0 + %s14545_s15]]   ;;  %s14548_s7 = smov 18  }
  0x11   :  { %s14658_s27 = sld [smem:[%s16865_s0 + %s14546_s22]]   ;;  %s14549_s15 = smov 19  }
  0x12   :  { %s14663_s4 = sld [smem:[%s16865_s0 + %s14547_s28]]   ;;  %s14550_s22 = smov 20  }
  0x13   :  { %16877 = sst [smem:[#allocation2_spill]] %s14638_s30  ;;  %s14551_s28 = smov 21  }
  0x14   :  { %s14668_s30 = sld [smem:[%s16865_s0 + %s14548_s7]]   ;;  %s14552_s7 = smov 22  }
  0x16   :  { %16878 = sst [smem:[#allocation3_spill]] %s14653_s20 }
  0x17   :  { %16879 = sst [smem:[#allocation4_spill]] %s14658_s27 }
  0x18   :  { %16880 = sst [smem:[#allocation5_spill]] %s14663_s4 }
  0x19   :  { %s14673_s20 = sld [smem:[%s16865_s0 + %s14549_s15]]   ;;  %s14553_s15 = smov 23  }
  0x1a   :  { %16881 = sst [smem:[#allocation6_spill]] %s14668_s30 }
  0x1b   :  { %s14678_s27 = sld [smem:[%s16865_s0 + %s14550_s22]]   ;;  %s14554_s22 = smov 24  }
  0x1c   :  { %s14683_s4 = sld [smem:[%s16865_s0 + %s14551_s28]]   ;;  %s14555_s28 = smov 25  }
  0x1d   :  { %s14688_s30 = sld [smem:[%s16865_s0 + %s14552_s7]]   ;;  %s14556_s7 = smov 26  }
  0x1f   :  { %16882 = sst [smem:[#allocation7_spill]] %s14673_s20 }
  0x20   :  { %s14693_s20 = sld [smem:[%s16865_s0 + %s14553_s15]]   ;;  %s14557_s15 = smov 27  }
  0x21   :  { %16883 = sst [smem:[#allocation8_spill]] %s14678_s27 }
  0x22   :  { %16884 = sst [smem:[#allocation9_spill]] %s14683_s4 }
  0x23   :  { %16885 = sst [smem:[#allocation10_spill]] %s14688_s30 }
  0x24   :  { %s14698_s27 = sld [smem:[%s16865_s0 + %s14554_s22]]   ;;  %s14558_s22 = smov 28  }
  0x25   :  { %s14703_s4 = sld [smem:[%s16865_s0 + %s14555_s28]]   ;;  %s14559_s28 = smov 29  }
  0x26   :  { %16886 = sst [smem:[#allocation11_spill]] %s14693_s20 }
  0x27   :  { %s14708_s30 = sld [smem:[%s16865_s0 + %s14556_s7]]   ;;  %s14725_s7 = smov 0  }
  0x28   :  { %s14713_s20 = sld [smem:[%s16865_s0 + %s14557_s15]]  }
  0x2a   :  { %16887 = sst [smem:[#allocation12_spill]] %s14698_s27 }
  0x2b   :  { %16888 = sst [smem:[#allocation13_spill]] %s14703_s4 }
  0x2c   :  { %s14718_s27 = sld [smem:[%s16865_s0 + %s14558_s22]]  }
  0x2d   :  { %s14723_s4 = sld [smem:[%s16865_s0 + %s14559_s28]]  }
  0x2e LB: > { %s11445_s10 = sadd.s32 4294967295, %s14529_s7   ;;  %p11449_p0 = scmp.ge.s32.totalorder %s14529_s7, 1  ;;  %s14529_s7 = sphi %s14725_s7, %s69_s7  }
  0x2f   : > { %p817_p1 = scmp.lt.s32.totalorder %s14529_s7, 3 }
  0x31   : > { %p818_p2 = pnand %p11449_p0, %p817_p1 }
  0x33   : > { %821 = sbr.rel (%p818_p2) target bundleno = 5510 (0x1586), region = 136 }
  0x38   : > { %p893_p3 = scmp.lt.s32.totalorder %s11445_s10, 1  ;;  %v936_v0 = vld [vmem:[%s14583_s9 + $0x8] sm:$0xff]  ;;  %v16874_v1 = vmov 0.0   ;;  %v935_v34 = vld [vmem:[%s14583_s9] sm:$0xff]  ;;  %v938_v35 = vld [vmem:[%s14583_s9 + $0x18] sm:$0xff]  ;;  %vm1507_vm0 = vcmask 64512  }
  0x39   : > { %1079 = vmatprep.subr.mxu0 %v16874_v1  ;;  %1143 = vmatprep.mubr.f32.mxu0 %v936_v0  ;;  %v937_v36 = vld [vmem:[%s14583_s9 + $0x10] sm:$0xff]  ;;  %v940_v37 = vld [vmem:[%s14583_s9 + $0x28] sm:$0xff]  ;;  %v939_v38 = vld [vmem:[%s14583_s9 + $0x20] sm:$0xff]  ;;  %vm2780_vm1 = vcmask 523264   ;;  %vm2995_vm2 = vcmask 130048   ;;  %vm14561_vm3 = vmmov 0  }
  0x3a   : > { %s16956_s10 = smov (!%p893_p3, %s11445_s10), 1  ;;  %v942_v39 = vld [vmem:[%s14583_s9 + $0x38] sm:$0xff]  ;;  %v941_v40 = vld [vmem:[%s14583_s9 + $0x30] sm:$0xff]  ;;  %v944_v41 = vld [vmem:[%s14583_s9 + $0x48] sm:$0xff]  ;;  %vm3926_vm4 = vcmask 261120   ;;  %s16892_s15 = sld [smem:[#allocation2_spill]] }
  0x3b   : > { %s16876_s0 = sshll.u32 %s16956_s10, 8  ;;  %v943_v42 = vld [vmem:[%s14583_s9 + $0x40] sm:$0xff]  ;;  %v946_v43 = vld [vmem:[%s14583_s9 + $0x58] sm:$0xff]  ;;  %v945_v44 = vld [vmem:[%s14583_s9 + $0x50] sm:$0xff]  ;;  %s16893_s16 = sld [smem:[#allocation3_spill]]  ;;  %vm9783_vm5 = vcmask 719872  }
  0x3c   : > { %s14741_s11 = scalar_lea.vmem %s14578_s5, %s16876_s0  ;;  %v948_v45 = vld [vmem:[%s14583_s9 + $0x68] sm:$0xff]  ;;  %v947_v46 = vld [vmem:[%s14583_s9 + $0x60] sm:$0xff]  ;;  %v950_v47 = vld [vmem:[%s14583_s9 + $0x78] sm:$0xff]  ;;  %s16894_s18 = sld [smem:[#allocation4_spill]]  ;;  %vm11328_vm6 = vcmask 23552  }
  0x3d   : > { %v918_v2 = vld [vmem:[%s14741_s11 + $0x78] sm:$0xff]  ;;  %v917_v3 = vld [vmem:[%s14741_s11 + $0x70] sm:$0xff]  ;;  %v916_v4 = vld [vmem:[%s14741_s11 + $0x68] sm:$0xff]  ;;  %s14562_s22 = smov 64   ;;  %s16895_s23 = sld [smem:[#allocation5_spill]] }
  0x3e   : > { %1080 = vmatpush1.msra.mxu0 %v918_v2  ;;  %v915_v5 = vld [vmem:[%s14741_s11 + $0x60] sm:$0xff]  ;;  %v914_v6 = vld [vmem:[%s14741_s11 + $0x58] sm:$0xff]  ;;  %v913_v7 = vld [vmem:[%s14741_s11 + $0x50] sm:$0xff]  ;;  %s16896_s26 = sld [smem:[#allocation6_spill]]  ;;  %s14563_s2 = smov 96  }
  0x3f   : > { %1081 = vmatprep.subr.mxu0 %v16874_v1  ;;  %v912_v8 = vld [vmem:[%s14741_s11 + $0x48] sm:$0xff]  ;;  %v911_v9 = vld [vmem:[%s14741_s11 + $0x40] sm:$0xff]  ;;  %v910_v10 = vld [vmem:[%s14741_s11 + $0x38] sm:$0xff]  ;;  %s16897_s28 = sld [smem:[#allocation8_spill]]  ;;  %s14569_s0 = smov 122  }
  0x40   : > { %1082 = vmatpush1.msra.mxu0 %v917_v3  ;;  %v909_v11 = vld [vmem:[%s14741_s11 + $0x30] sm:$0xff]  ;;  %v908_v12 = vld [vmem:[%s14741_s11 + $0x28] sm:$0xff]  ;;  %v907_v13 = vld [vmem:[%s14741_s11 + $0x20] sm:$0xff]  ;;  %s16898_s1 = sld [smem:[#allocation7_spill]] }
  0x41   : > { %1083 = vmatprep.subr.mxu0 %v16874_v1  ;;  %v906_v14 = vld [vmem:[%s14741_s11 + $0x18] sm:$0xff]  ;;  %v905_v15 = vld [vmem:[%s14741_s11 + $0x10] sm:$0xff]  ;;  %v904_v16 = vld [vmem:[%s14741_s11 + $0x8] sm:$0xff] }
  0x42   : > { %1084 = vmatpush1.msra.mxu0 %v916_v4  ;;  %v903_v17 = vld [vmem:[%s14741_s11] sm:$0xff]  ;;  %v934_v18 = vld [vmem:[%s14741_s11 + $0xf8] sm:$0xff]  ;;  %v933_v19 = vld [vmem:[%s14741_s11 + $0xf0] sm:$0xff] }
  0x43   : > { %1085 = vmatprep.subr.mxu0 %v16874_v1  ;;  %v932_v20 = vld [vmem:[%s14741_s11 + $0xe8] sm:$0xff]  ;;  %v931_v21 = vld [vmem:[%s14741_s11 + $0xe0] sm:$0xff]  ;;  %v930_v22 = vld [vmem:[%s14741_s11 + $0xd8] sm:$0xff] }
  0x44   : > { %1086 = vmatpush1.msra.mxu0 %v915_v5  ;;  %v929_v23 = vld [vmem:[%s14741_s11 + $0xd0] sm:$0xff]  ;;  %v928_v24 = vld [vmem:[%s14741_s11 + $0xc8] sm:$0xff]  ;;  %v927_v25 = vld [vmem:[%s14741_s11 + $0xc0] sm:$0xff] }
  0x45   : > { %1087 = vmatprep.subr.mxu0 %v16874_v1  ;;  %v926_v26 = vld [vmem:[%s14741_s11 + $0xb8] sm:$0xff]  ;;  %v925_v27 = vld [vmem:[%s14741_s11 + $0xb0] sm:$0xff]  ;;  %v924_v28 = vld [vmem:[%s14741_s11 + $0xa8] sm:$0xff] }
  0x46   : > { %1088 = vmatpush1.msra.mxu0 %v914_v6  ;;  %v923_v29 = vld [vmem:[%s14741_s11 + $0xa0] sm:$0xff]  ;;  %v922_v30 = vld [vmem:[%s14741_s11 + $0x98] sm:$0xff]  ;;  %v921_v31 = vld [vmem:[%s14741_s11 + $0x90] sm:$0xff] }
  0x47   : > { %1089 = vmatprep.subr.mxu0 %v16874_v1  ;;  %v920_v32 = vld [vmem:[%s14741_s11 + $0x88] sm:$0xff]  ;;  %v919_v33 = vld [vmem:[%s14741_s11 + $0x80] sm:$0xff]  ;;  %v949_v48 = vld [vmem:[%s14583_s9 + $0x70] sm:$0xff]  ;;  %s14564_s11 = smov 32  }
  0x48   : > { %1090 = vmatpush1.msra.mxu0 %v913_v7  ;;  %v952_v49 = vld [vmem:[%s14583_s9 + $0x88] sm:$0xff]  ;;  %v951_v50 = vld [vmem:[%s14583_s9 + $0x80] sm:$0xff]  ;;  %v954_v51 = vld [vmem:[%s14583_s9 + $0x98] sm:$0xff] }
  0x49   : > { %1091 = vmatprep.subr.mxu0 %v16874_v1  ;;  %v953_v52 = vld [vmem:[%s14583_s9 + $0x90] sm:$0xff]  ;;  %v956_v53 = vld [vmem:[%s14583_s9 + $0xa8] sm:$0xff]  ;;  %v955_v54 = vld [vmem:[%s14583_s9 + $0xa0] sm:$0xff] }
  0x4a   : > { %1092 = vmatpush1.msra.mxu0 %v912_v8  ;;  %v958_v55 = vld [vmem:[%s14583_s9 + $0xb8] sm:$0xff]  ;;  %v957_v56 = vld [vmem:[%s14583_s9 + $0xb0] sm:$0xff]  ;;  %v960_v57 = vld [vmem:[%s14583_s9 + $0xc8] sm:$0xff] }
  0x4b   : > { %1093 = vmatprep.subr.mxu0 %v16874_v1  ;;  %v959_v58 = vld [vmem:[%s14583_s9 + $0xc0] sm:$0xff]  ;;  %v962_v59 = vld [vmem:[%s14583_s9 + $0xd8] sm:$0xff]  ;;  %v961_v60 = vld [vmem:[%s14583_s9 + $0xd0] sm:$0xff] }
  0x4c   : > { %1094 = vmatpush1.msra.mxu0 %v911_v9  ;;  %v964_v61 = vld [vmem:[%s14583_s9 + $0xe8] sm:$0xff]  ;;  %v963_v62 = vld [vmem:[%s14583_s9 + $0xe0] sm:$0xff]  ;;  %v966_v63 = vld [vmem:[%s14583_s9 + $0xf8] sm:$0xff] }
  0x4d   : > { %1095 = vmatprep.subr.mxu0 %v16874_v1  ;;  %v965_v0 = vld [vmem:[%s14583_s9 + $0xf0] sm:$0xff]  ;;  %v968_v2 = vld [vmem:[%s14583_s9 + $0x108] sm:$0xff]  ;;  %v967_v3 = vld [vmem:[%s14583_s9 + $0x100] sm:$0xff] }
  0x4e   : > { %1096 = vmatpush1.msra.mxu0 %v910_v10  ;;  %v970_v4 = vld [vmem:[%s14583_s9 + $0x118] sm:$0xff]  ;;  %v969_v5 = vld [vmem:[%s14583_s9 + $0x110] sm:$0xff]  ;;  %v972_v6 = vld [vmem:[%s14583_s9 + $0x128] sm:$0xff] }
  0x4f   : > { %1097 = vmatprep.subr.mxu0 %v16874_v1  ;;  %v971_v7 = vld [vmem:[%s14583_s9 + $0x120] sm:$0xff]  ;;  %v974_v8 = vld [vmem:[%s14583_s9 + $0x138] sm:$0xff]  ;;  %v973_v9 = vld [vmem:[%s14583_s9 + $0x130] sm:$0xff] }
  0x50   : > { %1098 = vmatpush1.msra.mxu0 %v909_v11  ;;  %v976_v10 = vld [vmem:[%s14583_s9 + $0x148] sm:$0xff]  ;;  %v975_v11 = vld [vmem:[%s14583_s9 + $0x140] sm:$0xff] }
  0x51   : > { %1099 = vmatprep.subr.mxu0 %v16874_v1 }
  0x52   : > { %1100 = vmatpush1.msra.mxu0 %v908_v12  ;;  %v978_v12 = vld [vmem:[%s14583_s9 + $0x158] sm:$0xff] }
  0x53   : > { %1101 = vmatprep.subr.mxu0 %v16874_v1 }
  0x54   : > { %1102 = vmatpush1.msra.mxu0 %v907_v13  ;;  %v977_v13 = vld [vmem:[%s14583_s9 + $0x150] sm:$0xff] }
  0x55   : > { %1103 = vmatprep.subr.mxu0 %v16874_v1 }
  0x56   : > { %1104 = vmatpush1.msra.mxu0 %v906_v14  ;;  %v980_v14 = vld [vmem:[%s14583_s9 + $0x168] sm:$0xff] }
  0x57   : > { %1105 = vmatprep.subr.mxu0 %v16874_v1 }
  0x58   : > { %1106 = vmatpush1.msra.mxu0 %v905_v15  ;;  %v979_v15 = vld [vmem:[%s14583_s9 + $0x160] sm:$0xff] }
  0x59   : > { %1107 = vmatprep.subr.mxu0 %v16874_v1 }
  0x5a   : > { %1108 = vmatpush1.msra.mxu0 %v904_v16  ;;  %v982_v16 = vld [vmem:[%s14583_s9 + $0x178] sm:$0xff] }
  0x5b   : > { %1109 = vmatprep.subr.mxu0 %v16874_v1 }
  0x5c   : > { %1110 = vmatpush1.msra.mxu0 %v903_v17  ;;  %v981_v17 = vld [vmem:[%s14583_s9 + $0x170] sm:$0xff] }
  0x5d   : > { %1111 = vmatprep.subr.mxu0 %v16874_v1 }
  0x5e   : > { %1112 = vmatpush2.msra.mxu0 %v934_v18  ;;  %v984_v18 = vld [vmem:[%s14583_s9 + $0x188] sm:$0xff] }
  0x5f   : > { %1113 = vmatprep.subr.mxu0 %v16874_v1 }
  0x60   : > { %1114 = vmatpush2.msra.mxu0 %v933_v19  ;;  %v983_v19 = vld [vmem:[%s14583_s9 + $0x180] sm:$0xff] }
  0x61   : > { %1115 = vmatprep.subr.mxu0 %v16874_v1 }
  0x62   : > { %1116 = vmatpush2.msra.mxu0 %v932_v20  ;;  %v986_v20 = vld [vmem:[%s14583_s9 + $0x198] sm:$0xff] }
  0x63   : > { %1117 = vmatprep.subr.mxu0 %v16874_v1 }
  0x64   : > { %1118 = vmatpush2.msra.mxu0 %v931_v21  ;;  %v985_v21 = vld [vmem:[%s14583_s9 + $0x190] sm:$0xff] }
  0x65   : > { %1119 = vmatprep.subr.mxu0 %v16874_v1 }
  0x66   : > { %1120 = vmatpush2.msra.mxu0 %v930_v22  ;;  %v988_v22 = vld [vmem:[%s14583_s9 + $0x1a8] sm:$0xff] }
  0x67   : > { %1121 = vmatprep.subr.mxu0 %v16874_v1 }
  0x68   : > { %1122 = vmatpush2.msra.mxu0 %v929_v23  ;;  %v11454_v23 = vld [vmem:[%s14588_s13 + $0x8] sm:$0xff] }
  0x69   : > { %1123 = vmatprep.subr.mxu0 %v16874_v1  ;;  %13050 = vmatprep.subr.mxu1 %v11454_v23 }
  0x6a   : > { %1124 = vmatpush2.msra.mxu0 %v928_v24  ;;  %13051 = vmatpush3.msra.mxu1 %v11454_v23  ;;  %v987_v24 = vld [vmem:[%s14583_s9 + $0x1a0] sm:$0xff]  ;;  %v1042_v23 = vld [vmem:[%s14583_s9 + $0x358] sm:$0xff] }
  0x6b   : > { %1125 = vmatprep.subr.mxu0 %v16874_v1 }
  0x6c   : > { %1126 = vmatpush2.msra.mxu0 %v927_v25  ;;  %v990_v25 = vld [vmem:[%s14583_s9 + $0x1b8] sm:$0xff] }
  0x6d   : > { %1127 = vmatprep.subr.mxu0 %v16874_v1 }
  0x6e   : > { %1128 = vmatpush2.msra.mxu0 %v926_v26  ;;  %v989_v26 = vld [vmem:[%s14583_s9 + $0x1b0] sm:$0xff] }
  0x6f   : > { %1129 = vmatprep.subr.mxu0 %v16874_v1 }
  0x70   : > { %1130 = vmatpush2.msra.mxu0 %v925_v27  ;;  %v992_v27 = vld [vmem:[%s14583_s9 + $0x1c8] sm:$0xff] }
  0x71   : > { %1131 = vmatprep.subr.mxu0 %v16874_v1 }
  0x72   : > { %1132 = vmatpush2.msra.mxu0 %v924_v28  ;;  %v991_v28 = vld [vmem:[%s14583_s9 + $0x1c0] sm:$0xff] }
  0x73   : > { %1133 = vmatprep.subr.mxu0 %v16874_v1 }
  0x74   : > { %1134 = vmatpush2.msra.mxu0 %v923_v29  ;;  %v994_v29 = vld [vmem:[%s14583_s9 + $0x1d8] sm:$0xff] }
  0x75   : > { %1135 = vmatprep.subr.mxu0 %v16874_v1 }
  0x76   : > { %1136 = vmatpush2.msra.mxu0 %v922_v30  ;;  %v993_v30 = vld [vmem:[%s14583_s9 + $0x1d0] sm:$0xff] }
  0x77   : > { %1137 = vmatprep.subr.mxu0 %v16874_v1 }
  0x78   : > { %1138 = vmatpush2.msra.mxu0 %v921_v31  ;;  %v996_v31 = vld [vmem:[%s14583_s9 + $0x1e8] sm:$0xff] }
  0x79   : > { %1139 = vmatprep.subr.mxu0 %v16874_v1 }
  0x7a   : > { %1140 = vmatpush2.msra.mxu0 %v920_v32  ;;  %v995_v32 = vld [vmem:[%s14583_s9 + $0x1e0] sm:$0xff] }
  0x7b   : > { %1141 = vmatprep.subr.mxu0 %v16874_v1 }
  0x7c   : > { %1142 = vmatpush2.msra.mxu0 %v919_v33  ;;  %v998_v33 = vld [vmem:[%s14583_s9 + $0x1f8] sm:$0xff] }
  0x7d   : > { %1144 = vmatmul.mubr.f32.vlgmr.msra.gmra.mxu0 %v935_v34  ;;  %13441 = vmatprep.subr.mxu0 %v16874_v1  ;;  %v997_v34 = vld [vmem:[%s14583_s9 + $0x1f0] sm:$0xff] }
  0x7e   : > { %1148 = vmatprep.mubr.f32.mxu0 %v938_v35  ;;  %v1000_v35 = vld [vmem:[%s14583_s9 + $0x208] sm:$0xff] }
  0x81   : > { %1149 = vmatmul.mubr.f32.gmra.mxu0 %v937_v36  ;;  %v999_v36 = vld [vmem:[%s14583_s9 + $0x200] sm:$0xff] }
  0x82   : > { %1153 = vmatprep.mubr.f32.mxu0 %v940_v37  ;;  %v1002_v37 = vld [vmem:[%s14583_s9 + $0x218] sm:$0xff] }
  0x85   : > { %1154 = vmatmul.mubr.f32.gmra.mxu0 %v939_v38  ;;  %v14875_v38 = vld [vmem:[%s14588_s13] sm:$0xff] }
  0x86   : > { %1158 = vmatprep.mubr.f32.mxu0 %v942_v39  ;;  %13064 = vmatprep.subr.mxu1 %v14875_v38  ;;  %v1001_v39 = vld [vmem:[%s14583_s9 + $0x210] sm:$0xff] }
  0x89   : > { %1159 = vmatmul.mubr.f32.gmra.mxu0 %v941_v40  ;;  %v1004_v40 = vld [vmem:[%s14583_s9 + $0x228] sm:$0xff] }
  0x8a   : > { %1163 = vmatprep.mubr.f32.mxu0 %v944_v41  ;;  %v1003_v41 = vld [vmem:[%s14583_s9 + $0x220] sm:$0xff] }
  0x8d   : > { %1164 = vmatmul.mubr.f32.gmra.mxu0 %v943_v42  ;;  %v1006_v42 = vld [vmem:[%s14583_s9 + $0x238] sm:$0xff] }
  0x8e   : > { %1168 = vmatprep.mubr.f32.mxu0 %v946_v43  ;;  %v1005_v43 = vld [vmem:[%s14583_s9 + $0x230] sm:$0xff] }
  0x91   : > { %1169 = vmatmul.mubr.f32.gmra.mxu0 %v945_v44  ;;  %v1008_v44 = vld [vmem:[%s14583_s9 + $0x248] sm:$0xff] }
  0x92   : > { %1173 = vmatprep.mubr.f32.mxu0 %v948_v45  ;;  %v1007_v45 = vld [vmem:[%s14583_s9 + $0x240] sm:$0xff] }
  0x95   : > { %1174 = vmatmul.mubr.f32.gmra.mxu0 %v947_v46  ;;  %v1010_v46 = vld [vmem:[%s14583_s9 + $0x258] sm:$0xff] }
  0x96   : > { %1178 = vmatprep.mubr.f32.mxu0 %v950_v47  ;;  %v1009_v47 = vld [vmem:[%s14583_s9 + $0x250] sm:$0xff] }
  0x99   : > { %1179 = vmatmul.mubr.f32.gmra.mxu0 %v949_v48  ;;  %v1012_v48 = vld [vmem:[%s14583_s9 + $0x268] sm:$0xff] }
  0x9a   : > { %1183 = vmatprep.mubr.f32.mxu0 %v952_v49  ;;  %v1011_v49 = vld [vmem:[%s14583_s9 + $0x260] sm:$0xff] }
  0x9d   : > { %1184 = vmatmul.mubr.f32.gmra.mxu0 %v951_v50  ;;  %v1014_v50 = vld [vmem:[%s14583_s9 + $0x278] sm:$0xff] }
  0x9e   : > { %1188 = vmatprep.mubr.f32.mxu0 %v954_v51  ;;  %v1013_v51 = vld [vmem:[%s14583_s9 + $0x270] sm:$0xff] }
  0xa1   : > { %1189 = vmatmul.mubr.f32.gmra.mxu0 %v953_v52  ;;  %v1016_v52 = vld [vmem:[%s14583_s9 + $0x288] sm:$0xff] }
  0xa2   : > { %1193 = vmatprep.mubr.f32.mxu0 %v956_v53  ;;  %v1015_v53 = vld [vmem:[%s14583_s9 + $0x280] sm:$0xff] }
  0xa5   : > { %1194 = vmatmul.mubr.f32.gmra.mxu0 %v955_v54  ;;  %v1018_v54 = vld [vmem:[%s14583_s9 + $0x298] sm:$0xff] }
  0xa6   : > { %1198 = vmatprep.mubr.f32.mxu0 %v958_v55  ;;  %v1017_v55 = vld [vmem:[%s14583_s9 + $0x290] sm:$0xff] }
  0xa9   : > { %1199 = vmatmul.mubr.f32.gmra.mxu0 %v957_v56  ;;  %v1020_v56 = vld [vmem:[%s14583_s9 + $0x2a8] sm:$0xff] }
  0xaa   : > { %1203 = vmatprep.mubr.f32.mxu0 %v960_v57  ;;  %v1019_v57 = vld [vmem:[%s14583_s9 + $0x2a0] sm:$0xff] }
  0xad   : > { %1204 = vmatmul.mubr.f32.gmra.mxu0 %v959_v58  ;;  %v1022_v58 = vld [vmem:[%s14583_s9 + $0x2b8] sm:$0xff] }
  0xae   : > { %1208 = vmatprep.mubr.f32.mxu0 %v962_v59  ;;  %v1021_v59 = vld [vmem:[%s14583_s9 + $0x2b0] sm:$0xff] }
  0xb1   : > { %1209 = vmatmul.mubr.f32.gmra.mxu0 %v961_v60  ;;  %v1024_v60 = vld [vmem:[%s14583_s9 + $0x2c8] sm:$0xff] }
  0xb2   : > { %1213 = vmatprep.mubr.f32.mxu0 %v964_v61  ;;  %v1023_v61 = vld [vmem:[%s14583_s9 + $0x2c0] sm:$0xff] }
  0xb5   : > { %1214 = vmatmul.mubr.f32.gmra.mxu0 %v963_v62  ;;  %v1026_v62 = vld [vmem:[%s14583_s9 + $0x2d8] sm:$0xff] }
  0xb6   : > { %1218 = vmatprep.mubr.f32.mxu0 %v966_v63  ;;  %v1025_v63 = vld [vmem:[%s14583_s9 + $0x2d0] sm:$0xff] }
  0xb9   : > { %1219 = vmatmul.mubr.f32.gmra.mxu0 %v965_v0  ;;  %v1028_v0 = vld [vmem:[%s14583_s9 + $0x2e8] sm:$0xff] }
  0xba   : > { %1223 = vmatprep.mubr.f32.mxu0 %v968_v2  ;;  %v1027_v2 = vld [vmem:[%s14583_s9 + $0x2e0] sm:$0xff] }
  0xbd   : > { %1224 = vmatmul.mubr.f32.gmra.mxu0 %v967_v3  ;;  %v1030_v3 = vld [vmem:[%s14583_s9 + $0x2f8] sm:$0xff] }
  0xbe   : > { %1228 = vmatprep.mubr.f32.mxu0 %v970_v4  ;;  %v1029_v4 = vld [vmem:[%s14583_s9 + $0x2f0] sm:$0xff] }
  0xc1   : > { %1229 = vmatmul.mubr.f32.gmra.mxu0 %v969_v5  ;;  %v1032_v5 = vld [vmem:[%s14583_s9 + $0x308] sm:$0xff] }
  0xc2   : > { %1233 = vmatprep.mubr.f32.mxu0 %v972_v6  ;;  %v1031_v6 = vld [vmem:[%s14583_s9 + $0x300] sm:$0xff] }
  0xc5   : > { %1234 = vmatmul.mubr.f32.gmra.mxu0 %v971_v7  ;;  %v1034_v7 = vld [vmem:[%s14583_s9 + $0x318] sm:$0xff] }
  0xc6   : > { %1238 = vmatprep.mubr.f32.mxu0 %v974_v8 }
  0xc9   : > { %1239 = vmatmul.mubr.f32.gmra.mxu0 %v973_v9  ;;  %v1033_v9 = vld [vmem:[%s14583_s9 + $0x310] sm:$0xff] }
  0xca   : > { %1243 = vmatprep.mubr.f32.mxu0 %v976_v10 }
  0xcd   : > { %1244 = vmatmul.mubr.f32.gmra.mxu0 %v975_v11  ;;  %v1036_v11 = vld [vmem:[%s14583_s9 + $0x328] sm:$0xff] }
  0xce   : > { %1248 = vmatprep.mubr.f32.mxu0 %v978_v12 }
  0xd1   : > { %1249 = vmatmul.mubr.f32.gmra.mxu0 %v977_v13  ;;  %v1035_v13 = vld [vmem:[%s14583_s9 + $0x320] sm:$0xff] }
  0xd2   : > { %1253 = vmatprep.mubr.f32.mxu0 %v980_v14 }
  0xd5   : > { %1254 = vmatmul.mubr.f32.gmra.mxu0 %v979_v15  ;;  %v1038_v15 = vld [vmem:[%s14583_s9 + $0x338] sm:$0xff] }
  0xd6   : > { %1258 = vmatprep.mubr.f32.mxu0 %v982_v16 }
  0xd9   : > { %1259 = vmatmul.mubr.f32.gmra.mxu0 %v981_v17  ;;  %v1037_v17 = vld [vmem:[%s14583_s9 + $0x330] sm:$0xff] }
  0xda   : > { %1263 = vmatprep.mubr.f32.mxu0 %v984_v18 }
  0xdd   : > { %1264 = vmatmul.mubr.f32.gmra.mxu0 %v983_v19  ;;  %v1040_v19 = vld [vmem:[%s14583_s9 + $0x348] sm:$0xff] }
  0xde   : > { %1268 = vmatprep.mubr.f32.mxu0 %v986_v20 }
  0xe1   : > { %1269 = vmatmul.mubr.f32.gmra.mxu0 %v985_v21  ;;  %v1039_v21 = vld [vmem:[%s14583_s9 + $0x340] sm:$0xff] }
  0xe2   : > { %1273 = vmatprep.mubr.f32.mxu0 %v988_v22 }
  0xe5   : > { %1274 = vmatmul.mubr.f32.gmra.mxu0 %v987_v24 }
  0xe6   : > { %1278 = vmatprep.mubr.f32.mxu0 %v990_v25  ;;  %v1041_v25 = vld [vmem:[%s14583_s9 + $0x350] sm:$0xff] }
  0xe9   : > { %1279 = vmatmul.mubr.f32.gmra.mxu0 %v989_v26 }
  0xea   : > { %1283 = vmatprep.mubr.f32.mxu0 %v992_v27  ;;  %v1044_v27 = vld [vmem:[%s14583_s9 + $0x368] sm:$0xff] }
  0xed   : > { %1284 = vmatmul.mubr.f32.gmra.mxu0 %v991_v28 }
  0xee   : > { %1288 = vmatprep.mubr.f32.mxu0 %v994_v29  ;;  %v1043_v29 = vld [vmem:[%s14583_s9 + $0x360] sm:$0xff] }
  0xf1   : > { %1289 = vmatmul.mubr.f32.gmra.mxu0 %v993_v30 }
  0xf2   : > { %1293 = vmatprep.mubr.f32.mxu0 %v996_v31  ;;  %v1046_v31 = vld [vmem:[%s14583_s9 + $0x378] sm:$0xff] }
  0xf5   : > { %1294 = vmatmul.mubr.f32.gmra.mxu0 %v995_v32 }
  0xf6   : > { %1298 = vmatprep.mubr.f32.mxu0 %v998_v33  ;;  %v1045_v33 = vld [vmem:[%s14583_s9 + $0x370] sm:$0xff] }
  0xf9   : > { %1299 = vmatmul.mubr.f32.gmra.mxu0 %v997_v34 }
  0xfa   : > { %1303 = vmatprep.mubr.f32.mxu0 %v1000_v35  ;;  %v1048_v35 = vld [vmem:[%s14583_s9 + $0x388] sm:$0xff] }
  0xfd   : > { %1304 = vmatmul.mubr.f32.gmra.mxu0 %v999_v36 }
  0xfe   : > { %1308 = vmatprep.mubr.f32.mxu0 %v1002_v37  ;;  %v1047_v37 = vld [vmem:[%s14583_s9 + $0x380] sm:$0xff] }
 0x101   : > { %1309 = vmatmul.mubr.f32.gmra.mxu0 %v1001_v39 }
 0x102   : > { %1313 = vmatprep.mubr.f32.mxu0 %v1004_v40  ;;  %v1050_v40 = vld [vmem:[%s14583_s9 + $0x398] sm:$0xff] }
 0x105   : > { %1314 = vmatmul.mubr.f32.gmra.mxu0 %v1003_v41 }
 0x106   : > { %1318 = vmatprep.mubr.f32.mxu0 %v1006_v42  ;;  %v1049_v42 = vld [vmem:[%s14583_s9 + $0x390] sm:$0xff] }
 0x109   : > { %1319 = vmatmul.mubr.f32.gmra.mxu0 %v1005_v43 }
 0x10a   : > { %1323 = vmatprep.mubr.f32.mxu0 %v1008_v44  ;;  %v1052_v44 = vld [vmem:[%s14583_s9 + $0x3a8] sm:$0xff] }
 0x10d   : > { %1324 = vmatmul.mubr.f32.gmra.mxu0 %v1007_v45 }
 0x10e   : > { %1328 = vmatprep.mubr.f32.mxu0 %v1010_v46  ;;  %v11471_v46 = vld [vmem:[%s14588_s13 + $0x10] sm:$0xff] }
 0x111   : > { %1329 = vmatmul.mubr.f32.gmra.mxu0 %v1009_v47  ;;  %v1051_v47 = vld [vmem:[%s14583_s9 + $0x3a0] sm:$0xff] }
 0x112   : > { %1333 = vmatprep.mubr.f32.mxu0 %v1012_v48 }
 0x115   : > { %1334 = vmatmul.mubr.f32.gmra.mxu0 %v1011_v49  ;;  %v1054_v49 = vld [vmem:[%s14583_s9 + $0x3b8] sm:$0xff] }
 0x116   : > { %1338 = vmatprep.mubr.f32.mxu0 %v1014_v50 }
 0x119   : > { %1339 = vmatmul.mubr.f32.gmra.mxu0 %v1013_v51  ;;  %v1053_v51 = vld [vmem:[%s14583_s9 + $0x3b0] sm:$0xff] }
 0x11a   : > { %1343 = vmatprep.mubr.f32.mxu0 %v1016_v52 }
 0x11d   : > { %1344 = vmatmul.mubr.f32.gmra.mxu0 %v1015_v53  ;;  %v1056_v53 = vld [vmem:[%s14583_s9 + $0x3c8] sm:$0xff] }
 0x11e   : > { %1348 = vmatprep.mubr.f32.mxu0 %v1018_v54 }
 0x121   : > { %1349 = vmatmul.mubr.f32.gmra.mxu0 %v1017_v55  ;;  %v1055_v55 = vld [vmem:[%s14583_s9 + $0x3c0] sm:$0xff] }
 0x122   : > { %1353 = vmatprep.mubr.f32.mxu0 %v1020_v56  ;;  %v1058_v56 = vld [vmem:[%s14583_s9 + $0x3d8] sm:$0xff] }
 0x125   : > { %1354 = vmatmul.mubr.f32.gmra.mxu0 %v1019_v57 }
 0x126   : > { %1358 = vmatprep.mubr.f32.mxu0 %v1022_v58  ;;  %v1057_v58 = vld [vmem:[%s14583_s9 + $0x3d0] sm:$0xff] }
 0x129   : > { %1359 = vmatmul.mubr.f32.gmra.mxu0 %v1021_v59 }
 0x12a   : > { %1363 = vmatprep.mubr.f32.mxu0 %v1024_v60  ;;  %v1060_v60 = vld [vmem:[%s14583_s9 + $0x3e8] sm:$0xff] }
 0x12d   : > { %1364 = vmatmul.mubr.f32.gmra.mxu0 %v1023_v61 }
 0x12e   : > { %1368 = vmatprep.mubr.f32.mxu0 %v1026_v62  ;;  %v1059_v62 = vld [vmem:[%s14583_s9 + $0x3e0] sm:$0xff] }
 0x131   : > { %1369 = vmatmul.mubr.f32.gmra.mxu0 %v1025_v63 }
 0x132   : > { %1373 = vmatprep.mubr.f32.mxu0 %v1028_v0  ;;  %v1062_v0 = vld [vmem:[%s14583_s9 + $0x3f8] sm:$0xff] }
 0x135   : > { %1374 = vmatmul.mubr.f32.gmra.mxu0 %v1027_v2 }
 0x136   : > { %1378 = vmatprep.mubr.f32.mxu0 %v1030_v3  ;;  %v1061_v3 = vld [vmem:[%s14583_s9 + $0x3f0] sm:$0xff] }
 0x139   : > { %1379 = vmatmul.mubr.f32.gmra.mxu0 %v1029_v4 }
 0x13a   : > { %1383 = vmatprep.mubr.f32.mxu0 %v1032_v5  ;;  %v1064_v5 = vld [vmem:[%s14583_s9 + $0x408] sm:$0xff] }
 0x13d   : > { %v14910_v8 = vpop.f32.mrf.mxu0  ;;  %1384 = vmatmul.mubr.f32.gmra.mxu0 %v1031_v6 }
 0x13e   : > { %1388 = vmatprep.mubr.f32.mxu0 %v1034_v7  ;;  %v1063_v7 = vld [vmem:[%s14583_s9 + $0x400] sm:$0xff] }
 0x13f   : > { %v1147_v10 = vpop.f32.mrf.mxu0 }
 0x140   : > { %v1066_v10 = vld [vmem:[%s14583_s9 + $0x418] sm:$0xff] }
 0x141   : > { %v14914_v12 = vpop.f32.mrf.mxu0  ;;  %1389 = vmatmul.mubr.f32.gmra.mxu0 %v1033_v9 }
 0x142   : > { %1393 = vmatprep.mubr.f32.mxu0 %v1036_v11 }
 0x143   : > { %v1152_v14 = vpop.f32.mrf.mxu0 }
 0x144   : > { %v1065_v14 = vld [vmem:[%s14583_s9 + $0x410] sm:$0xff] }
 0x145   : > { %v14918_v16 = vpop.f32.mrf.mxu0  ;;  %1394 = vmatmul.mubr.f32.gmra.mxu0 %v1035_v13  ;;  %v11480_v13 = vld [vmem:[%s14588_s13 + $0x18] sm:$0xff] }
 0x146   : > { %1398 = vmatprep.mubr.f32.mxu0 %v1038_v15 }
 0x147   : > { %v1157_v18 = vpop.f32.mrf.mxu0 }
 0x148   : > { %v1067_v18 = vld [vmem:[%s14583_s9 + $0x420] sm:$0xff] }
 0x149   : > { %v14922_v20 = vpop.f32.mrf.mxu0  ;;  %1399 = vmatmul.mubr.f32.gmra.mxu0 %v1037_v17  ;;  %v1068_v17 = vld [vmem:[%s14583_s9 + $0x428] sm:$0xff] }
 0x14a   : > { %1403 = vmatprep.mubr.f32.mxu0 %v1040_v19  ;;  %v1070_v19 = vld [vmem:[%s14583_s9 + $0x438] sm:$0xff] }
 0x14b   : > { %v1162_v22 = vpop.f32.mrf.mxu0 }
 0x14d   : > { %v14926_v24 = vpop.f32.mrf.mxu0  ;;  %1404 = vmatmul.mubr.f32.gmra.mxu0 %v1039_v21  ;;  %v1069_v21 = vld [vmem:[%s14583_s9 + $0x430] sm:$0xff] }
 0x14e   : > { %1408 = vmatprep.mubr.f32.mxu0 %v1042_v23 }
 0x14f   : > { %v1167_v26 = vpop.f32.mrf.mxu0 }
 0x150   : > { %v1074_v26 = vld [vmem:[%s14583_s9 + $0x458] sm:$0xff] }
 0x151   : > { %v14930_v28 = vpop.f32.mrf.mxu0  ;;  %1409 = vmatmul.mubr.f32.gmra.mxu0 %v1041_v25 }
 0x152   : > { %1413 = vmatprep.mubr.f32.mxu0 %v1044_v27 }
 0x153   : > { %v1172_v30 = vpop.f32.mrf.mxu0 }
 0x155   : > { %v14934_v32 = vpop.f32.mrf.mxu0  ;;  %1414 = vmatmul.mubr.f32.gmra.mxu0 %v1043_v29  ;;  %v1073_v29 = vld [vmem:[%s14583_s9 + $0x450] sm:$0xff] }
 0x156   : > { %1418 = vmatprep.mubr.f32.mxu0 %v1046_v31  ;;  %v1076_v31 = vld [vmem:[%s14583_s9 + $0x468] sm:$0xff] }
 0x157   : > { %v1177_v34 = vpop.f32.mrf.mxu0 }
 0x159   : > { %v14938_v36 = vpop.f32.mrf.mxu0  ;;  %1419 = vmatmul.mubr.f32.gmra.mxu0 %v1045_v33  ;;  %v1075_v33 = vld [vmem:[%s14583_s9 + $0x460] sm:$0xff] }
 0x15a   : > { %1423 = vmatprep.mubr.f32.mxu0 %v1048_v35  ;;  %v1078_v35 = vld [vmem:[%s14583_s9 + $0x478] sm:$0xff] }
 0x15b   : > { %v1182_v39 = vpop.f32.mrf.mxu0 }
 0x15d   : > { %v1185_v41 = vpop.f32.mrf.mxu0  ;;  %1424 = vmatmul.mubr.f32.gmra.mxu0 %v1047_v37  ;;  %v1077_v37 = vld [vmem:[%s14583_s9 + $0x470] sm:$0xff] }
 0x15e   : > { %13052 = vmatprep.mubr.msk.f32.mxu1 %vm1507_vm0, %v1185_v41  ;;  %1428 = vmatprep.mubr.f32.mxu0 %v1050_v40 }
 0x15f   : > { %v1187_v43 = vpop.f32.mrf.mxu0 }
 0x161   : > { %v1190_v45 = vpop.f32.mrf.mxu0  ;;  %1429 = vmatmul.mubr.f32.gmra.mxu0 %v1049_v42 }
 0x162   : > { %13053 = vmatmul.mubr.msk.f32.vlgmr.msra.gmra.mxu1 %vm1507_vm0, %v1190_v45  ;;  %1433 = vmatprep.mubr.f32.mxu0 %v1052_v44  ;;  %v11498_v45 = vld [vmem:[%s14588_s13 + $0x28] sm:$0xff] }
 0x163   : > { %v1192_v48 = vpop.f32.mrf.mxu0  ;;  %13065 = vmatpush3.msra.mxu1 %v14875_v38 }
 0x164   : > { %13078 = vmatprep.subr.mxu1 %v11471_v46 }
 0x165   : > { %v1195_v50 = vpop.f32.mrf.mxu0  ;;  %1434 = vmatmul.mubr.f32.gmra.mxu0 %v1051_v47 }
 0x166   : > { %13055 = vmatprep.mubr.msk.f32.mxu1 %vm1507_vm0, %v1195_v50  ;;  %1438 = vmatprep.mubr.f32.mxu0 %v1054_v49 }
 0x167   : > { %v1197_v52 = vpop.f32.mrf.mxu0 }
 0x169   : > { %v1200_v54 = vpop.f32.mrf.mxu0  ;;  %1439 = vmatmul.mubr.f32.gmra.mxu0 %v1053_v51 }
 0x16a   : > { %13056 = vmatmul.mubr.msk.f32.gmra.mxu1 %vm1507_vm0, %v1200_v54  ;;  %1443 = vmatprep.mubr.f32.mxu0 %v1056_v53 }
 0x16b   : > { %v1202_v38 = vpop.f32.mrf.mxu0 }
 0x16d   : > { %v1205_v57 = vpop.f32.mrf.mxu0  ;;  %1444 = vmatmul.mubr.f32.gmra.mxu0 %v1055_v55 }
 0x16e   : > { %13058 = vmatprep.mubr.msk.f32.mxu1 %vm1507_vm0, %v1205_v57  ;;  %1448 = vmatprep.mubr.f32.mxu0 %v1058_v56 }
 0x16f   : > { %v1207_v59 = vpop.f32.mrf.mxu0 }
 0x171   : > { %v1210_v61 = vpop.f32.mrf.mxu0  ;;  %1449 = vmatmul.mubr.f32.gmra.mxu0 %v1057_v58 }
 0x172   : > { %13059 = vmatmul.mubr.msk.f32.gmra.mxu1 %vm1507_vm0, %v1210_v61  ;;  %1453 = vmatprep.mubr.f32.mxu0 %v1060_v60  ;;  %v11507_v61 = vld [vmem:[%s14588_s13 + $0x30] sm:$0xff] }
 0x173   : > { %v1212_v63 = vpop.f32.mrf.mxu0 }
 0x175   : > { %v1215_v2 = vpop.f32.mrf.mxu0  ;;  %1454 = vmatmul.mubr.f32.gmra.mxu0 %v1059_v62 }
 0x176   : > { %13061 = vmatprep.mubr.msk.f32.mxu1 %vm1507_vm0, %v1215_v2  ;;  %1458 = vmatprep.mubr.f32.mxu0 %v1062_v0 }
 0x177   : > { %v1217_v4 = vpop.f32.mrf.mxu0 }
 0x179   : > { %v1220_v6 = vpop.f32.mrf.mxu0  ;;  %1459 = vmatmul.mubr.f32.gmra.mxu0 %v1061_v3 }
 0x17a   : > { %13062 = vmatmul.mubr.msk.f32.gmra.mxu1 %vm1507_vm0, %v1220_v6  ;;  %1463 = vmatprep.mubr.f32.mxu0 %v1064_v5 }
 0x17b   : > { %v1222_v9 = vpop.f32.mrf.mxu0  ;;  %13066 = vmatprep.mubr.msk.f32.mxu1 %vm1507_vm0, %v14910_v8 }
 0x17d   : > { %v1225_v11 = vpop.f32.mrf.mxu0  ;;  %1464 = vmatmul.mubr.f32.gmra.mxu0 %v1063_v7 }
 0x17e   : > { %13067 = vmatmul.mubr.msk.f32.vlgmr.msra.gmra.mxu1 %vm1507_vm0, %v14914_v12  ;;  %1468 = vmatprep.mubr.f32.mxu0 %v1066_v10 }
 0x17f   : > { %v1227_v15 = vpop.f32.mrf.mxu0  ;;  %13069 = vmatprep.mubr.msk.f32.mxu1 %vm1507_vm0, %v14918_v16  ;;  %13079 = vmatpush3.msra.mxu1 %v11471_v46 }
 0x180   : > { %13092 = vmatprep.subr.mxu1 %v11480_v13 }
 0x181   : > { %v1230_v8 = vpop.f32.mrf.mxu0  ;;  %1469 = vmatmul.mubr.f32.gmra.mxu0 %v1065_v14 }
 0x182   : > { %13070 = vmatmul.mubr.msk.f32.gmra.mxu1 %vm1507_vm0, %v14922_v20  ;;  %1473 = vmatprep.mubr.f32.mxu0 %v1068_v17  ;;  %v1072_v20 = vld [vmem:[%s14583_s9 + $0x448] sm:$0xff] }
 0x183   : > { %v1232_v12 = vpop.f32.mrf.mxu0  ;;  %13072 = vmatprep.mubr.msk.f32.mxu1 %vm1507_vm0, %v14926_v24  ;;  %v1071_v24 = vld [vmem:[%s14583_s9 + $0x440] sm:$0xff] }
 0x185   : > { %v1235_v16 = vpop.f32.mrf.mxu0  ;;  %1474 = vmatmul.mubr.f32.gmra.mxu0 %v1067_v18 }
 0x186   : > { %13073 = vmatmul.mubr.msk.f32.gmra.mxu1 %vm1507_vm0, %v14930_v28  ;;  %1478 = vmatprep.mubr.f32.mxu0 %v1070_v19  ;;  %v11489_v28 = vld [vmem:[%s14588_s13 + $0x20] sm:$0xff] }
 0x187   : > { %v1237_v22 = vpop.f32.mrf.mxu0  ;;  %13075 = vmatprep.mubr.msk.f32.mxu1 %vm1507_vm0, %v14934_v32 }
 0x189   : > { %v1240_v23 = vpop.f32.mrf.mxu0  ;;  %1479 = vmatmul.mubr.f32.gmra.mxu0 %v1069_v21 }
 0x18a   : > { %13076 = vmatmul.mubr.msk.f32.gmra.mxu1 %vm1507_vm0, %v14938_v36  ;;  %1483 = vmatprep.mubr.f32.mxu0 %v1072_v20 }
 0x18b   : > { %v1242_v25 = vpop.f32.mrf.mxu0  ;;  %13080 = vmatprep.mubr.msk.f32.mxu1 %vm1507_vm0, %v1225_v11 }
 0x18d   : > { %v1245_v27 = vpop.f32.mrf.mxu0  ;;  %1484 = vmatmul.mubr.f32.gmra.mxu0 %v1071_v24 }
 0x18e   : > { %13081 = vmatmul.mubr.msk.f32.vlgmr.msra.gmra.mxu1 %vm1507_vm0, %v1230_v8  ;;  %1488 = vmatprep.mubr.f32.mxu0 %v1074_v26  ;;  %v11516_v8 = vld [vmem:[%s14588_s13 + $0x38] sm:$0xff] }
 0x18f   : > { %v1247_v30 = vpop.f32.mrf.mxu0  ;;  %13083 = vmatprep.mubr.msk.f32.mxu1 %vm1507_vm0, %v1235_v16  ;;  %13093 = vmatpush3.msra.mxu1 %v11480_v13 }
 0x190   : > { %13106 = vmatprep.subr.mxu1 %v11489_v28 }
 0x191   : > { %v1250_v32 = vpop.f32.mrf.mxu0  ;;  %1489 = vmatmul.mubr.f32.gmra.mxu0 %v1073_v29 }
 0x192   : > { %13084 = vmatmul.mubr.msk.f32.gmra.mxu1 %vm1507_vm0, %v1240_v23  ;;  %1493 = vmatprep.mubr.f32.mxu0 %v1076_v31 }
 0x193   : > { %v1252_v34 = vpop.f32.mrf.mxu0  ;;  %13086 = vmatprep.mubr.msk.f32.mxu1 %vm1507_vm0, %v1245_v27 }
 0x195   : > { %v1255_v36 = vpop.f32.mrf.mxu0  ;;  %1494 = vmatmul.mubr.f32.gmra.mxu0 %v1075_v33 }
 0x196   : > { %13087 = vmatmul.mubr.msk.f32.gmra.mxu1 %vm1507_vm0, %v1250_v32  ;;  %1498 = vmatprep.mubr.f32.mxu0 %v1078_v35  ;;  %v11525_v32 = vld [vmem:[%s14588_s13 + $0x40] sm:$0xff] }
 0x197   : > { %v1257_v39 = vpop.f32.mrf.mxu0  ;;  %13089 = vmatprep.mubr.msk.f32.mxu1 %vm1507_vm0, %v1255_v36 }
 0x199   : > { %v1260_v40 = vpop.f32.mrf.mxu0  ;;  %1499 = vmatmul.mubr.f32.gmra.mxu0 %v1077_v37 }
 0x19a   : > { %13090 = vmatmul.mubr.msk.f32.gmra.mxu1 %vm1507_vm0, %v1260_v40 }
 0x19b   : > { %v1262_v41 = vpop.f32.mrf.mxu0 }
 0x19d   : > { %v1265_v42 = vpop.f32.mrf.mxu0 }
 0x19e   : > { %13094 = vmatprep.mubr.msk.f32.mxu1 %vm1507_vm0, %v1265_v42 }
 0x19f   : > { %v1267_v43 = vpop.f32.mrf.mxu0 }
 0x1a1   : > { %v1270_v44 = vpop.f32.mrf.mxu0 }
 0x1a2   : > { %13095 = vmatmul.mubr.msk.f32.vlgmr.msra.gmra.mxu1 %vm1507_vm0, %v1270_v44 }
 0x1a3   : > { %v1272_v46 = vpop.f32.mrf.mxu0  ;;  %13107 = vmatpush3.msra.mxu1 %v11489_v28 }
 0x1a4   : > { %13120 = vmatprep.subr.mxu1 %v11498_v45 }
 0x1a5   : > { %v1275_v47 = vpop.f32.mrf.mxu0 }
 0x1a6   : > { %13097 = vmatprep.mubr.msk.f32.mxu1 %vm1507_vm0, %v1275_v47 }
 0x1a7   : > { %v1277_v48 = vpop.f32.mrf.mxu0 }
 0x1a9   : > { %v1280_v49 = vpop.f32.mrf.mxu0 }
 0x1aa   : > { %13098 = vmatmul.mubr.msk.f32.gmra.mxu1 %vm1507_vm0, %v1280_v49 }
 0x1ab   : > { %v1282_v50 = vpop.f32.mrf.mxu0 }
 0x1ad   : > { %v1285_v51 = vpop.f32.mrf.mxu0 }
 0x1ae   : > { %13100 = vmatprep.mubr.msk.f32.mxu1 %vm1507_vm0, %v1285_v51 }
 0x1af   : > { %v1287_v52 = vpop.f32.mrf.mxu0 }
 0x1b1   : > { %v1290_v53 = vpop.f32.mrf.mxu0 }
 0x1b2   : > { %13101 = vmatmul.mubr.msk.f32.gmra.mxu1 %vm1507_vm0, %v1290_v53 }
 0x1b3   : > { %v1292_v54 = vpop.f32.mrf.mxu0 }
 0x1b5   : > { %v1295_v55 = vpop.f32.mrf.mxu0 }
 0x1b6   : > { %13103 = vmatprep.mubr.msk.f32.mxu1 %vm1507_vm0, %v1295_v55 }
 0x1b7   : > { %v1297_v38 = vpop.f32.mrf.mxu0 }
 0x1b9   : > { %v1300_v56 = vpop.f32.mrf.mxu0 }
 0x1ba   : > { %13104 = vmatmul.mubr.msk.f32.gmra.mxu1 %vm1507_vm0, %v1300_v56 }
 0x1bb   : > { %v1302_v57 = vpop.f32.mrf.mxu0 }
 0x1bd   : > { %v1305_v58 = vpop.f32.mrf.mxu0 }
 0x1be   : > { %13108 = vmatprep.mubr.msk.f32.mxu1 %vm1507_vm0, %v1305_v58 }
 0x1bf   : > { %v1307_v59 = vpop.f32.mrf.mxu0 }
 0x1c1   : > { %v1310_v60 = vpop.f32.mrf.mxu0 }
 0x1c2   : > { %13109 = vmatmul.mubr.msk.f32.vlgmr.msra.gmra.mxu1 %vm1507_vm0, %v1310_v60 }
 0x1c3   : > { %v1312_v62 = vpop.f32.mrf.mxu0  ;;  %13121 = vmatpush3.msra.mxu1 %v11498_v45 }
 0x1c4   : > { %13134 = vmatprep.subr.mxu1 %v11507_v61 }
 0x1c5   : > { %v1315_v63 = vpop.f32.mrf.mxu0 }
 0x1c6   : > { %13111 = vmatprep.mubr.msk.f32.mxu1 %vm1507_vm0, %v1315_v63 }
 0x1c7   : > { %v1317_v0 = vpop.f32.mrf.mxu0 }
 0x1c9   : > { %v1320_v2 = vpop.f32.mrf.mxu0 }
 0x1ca   : > { %13112 = vmatmul.mubr.msk.f32.gmra.mxu1 %vm1507_vm0, %v1320_v2 }
 0x1cb   : > { %v1322_v3 = vpop.f32.mrf.mxu0 }
 0x1cd   : > { %v1325_v4 = vpop.f32.mrf.mxu0 }
 0x1ce   : > { %13114 = vmatprep.mubr.msk.f32.mxu1 %vm1507_vm0, %v1325_v4 }
 0x1cf   : > { %v1327_v5 = vpop.f32.mrf.mxu0 }
 0x1d1   : > { %v1330_v6 = vpop.f32.mrf.mxu0 }
 0x1d2   : > { %13115 = vmatmul.mubr.msk.f32.gmra.mxu1 %vm1507_vm0, %v1330_v6 }
 0x1d3   : > { %v1332_v7 = vpop.f32.mrf.mxu0 }
 0x1d5   : > { %v1335_v9 = vpop.f32.mrf.mxu0 }
 0x1d6   : > { %13117 = vmatprep.mubr.msk.f32.mxu1 %vm1507_vm0, %v1335_v9 }
 0x1d7   : > { %v1337_v10 = vpop.f32.mrf.mxu0 }
 0x1d9   : > { %v1340_v11 = vpop.f32.mrf.mxu0 }
 0x1da   : > { %13118 = vmatmul.mubr.msk.f32.gmra.mxu1 %vm1507_vm0, %v1340_v11 }
 0x1db   : > { %v1342_v13 = vpop.f32.mrf.mxu0 }
 0x1dd   : > { %v1345_v14 = vpop.f32.mrf.mxu0 }
 0x1de   : > { %13122 = vmatprep.mubr.msk.f32.mxu1 %vm1507_vm0, %v1345_v14 }
 0x1df   : > { %v1347_v15 = vpop.f32.mrf.mxu0 }
 0x1e1   : > { %v1350_v17 = vpop.f32.mrf.mxu0 }
 0x1e2   : > { %13123 = vmatmul.mubr.msk.f32.vlgmr.msra.gmra.mxu1 %vm1507_vm0, %v1350_v17 }
 0x1e3   : > { %v1352_v18 = vpop.f32.mrf.mxu0  ;;  %13135 = vmatpush3.msra.mxu1 %v11507_v61 }
 0x1e4   : > { %13148 = vmatprep.subr.mxu1 %v11516_v8 }
 0x1e5   : > { %v1355_v12 = vpop.f32.mrf.mxu0 }
 0x1e6   : > { %13125 = vmatprep.mubr.msk.f32.mxu1 %vm1507_vm0, %v1355_v12 }
 0x1e7   : > { %v1357_v19 = vpop.f32.mrf.mxu0 }
 0x1e9   : > { %v1360_v16 = vpop.f32.mrf.mxu0 }
 0x1ea   : > { %13126 = vmatmul.mubr.msk.f32.gmra.mxu1 %vm1507_vm0, %v1360_v16 }
 0x1eb   : > { %v1362_v21 = vpop.f32.mrf.mxu0 }
 0x1ed   : > { %v1365_v22 = vpop.f32.mrf.mxu0 }
 0x1ee   : > { %13128 = vmatprep.mubr.msk.f32.mxu1 %vm1507_vm0, %v1365_v22 }
 0x1ef   : > { %v1367_v20 = vpop.f32.mrf.mxu0 }
 0x1f1   : > { %v1370_v23 = vpop.f32.mrf.mxu0 }
 0x1f2   : > { %13129 = vmatmul.mubr.msk.f32.gmra.mxu1 %vm1507_vm0, %v1370_v23 }
 0x1f3   : > { %v1372_v24 = vpop.f32.mrf.mxu0 }
 0x1f5   : > { %v1375_v25 = vpop.f32.mrf.mxu0 }
 0x1f6   : > { %13131 = vmatprep.mubr.msk.f32.mxu1 %vm1507_vm0, %v1375_v25 }
 0x1f7   : > { %v1377_v26 = vpop.f32.mrf.mxu0 }
 0x1f9   : > { %v1380_v27 = vpop.f32.mrf.mxu0 }
 0x1fa   : > { %13132 = vmatmul.mubr.msk.f32.gmra.mxu1 %vm1507_vm0, %v1380_v27 }
 0x1fb   : > { %v1382_v28 = vpop.f32.mrf.mxu0 }
 0x1fd   : > { %v1385_v29 = vpop.f32.mrf.mxu0 }
 0x1fe   : > { %13136 = vmatprep.mubr.msk.f32.mxu1 %vm1507_vm0, %v1385_v29 }
 0x1ff   : > { %v1387_v30 = vpop.f32.mrf.mxu0 }
 0x201   : > { %v1390_v31 = vpop.f32.mrf.mxu0 }
 0x202   : > { %13137 = vmatmul.mubr.msk.f32.vlgmr.msra.gmra.mxu1 %vm1507_vm0, %v1390_v31 }
 0x203   : > { %v1392_v33 = vpop.f32.mrf.mxu0  ;;  %13149 = vmatpush3.msra.mxu1 %v11516_v8 }
 0x204   : > { %13162 = vmatprep.subr.mxu1 %v11525_v32 }
 0x205   : > { %v1395_v34 = vpop.f32.mrf.mxu0 }
 0x206   : > { %13139 = vmatprep.mubr.msk.f32.mxu1 %vm1507_vm0, %v1395_v34 }
 0x207   : > { %v1397_v35 = vpop.f32.mrf.mxu0 }
 0x209   : > { %v1400_v36 = vpop.f32.mrf.mxu0 }
 0x20a   : > { %13140 = vmatmul.mubr.msk.f32.gmra.mxu1 %vm1507_vm0, %v1400_v36 }
 0x20b   : > { %v1402_v37 = vpop.f32.mrf.mxu0 }
 0x20d   : > { %v1405_v39 = vpop.f32.mrf.mxu0 }
 0x20e   : > { %13142 = vmatprep.mubr.msk.f32.mxu1 %vm1507_vm0, %v1405_v39 }
 0x20f   : > { %v1407_v40 = vpop.f32.mrf.mxu0 }
 0x211   : > { %v1410_v41 = vpop.f32.mrf.mxu0 }
 0x212   : > { %13143 = vmatmul.mubr.msk.f32.gmra.mxu1 %vm1507_vm0, %v1410_v41 }
 0x213   : > { %v1412_v42 = vpop.f32.mrf.mxu0 }
 0x215   : > { %v1415_v43 = vpop.f32.mrf.mxu0 }
 0x216   : > { %13145 = vmatprep.mubr.msk.f32.mxu1 %vm1507_vm0, %v1415_v43 }
 0x217   : > { %v1417_v44 = vpop.f32.mrf.mxu0 }
 0x219   : > { %v1420_v45 = vpop.f32.mrf.mxu0 }
 0x21a   : > { %13146 = vmatmul.mubr.msk.f32.gmra.mxu1 %vm1507_vm0, %v1420_v45 }
 0x21b   : > { %v1422_v46 = vpop.f32.mrf.mxu0 }
 0x21d   : > { %v1425_v47 = vpop.f32.mrf.mxu0 }
 0x21e   : > { %13150 = vmatprep.mubr.msk.f32.mxu1 %vm1507_vm0, %v1425_v47 }
 0x21f   : > { %v1427_v48 = vpop.f32.mrf.mxu0 }
 0x221   : > { %v1430_v49 = vpop.f32.mrf.mxu0 }
 0x222   : > { %13151 = vmatmul.mubr.msk.f32.vlgmr.msra.gmra.mxu1 %vm1507_vm0, %v1430_v49  ;;  %v13054_v53 = vpop.f32.mrf.mxu1 }
 0x223   : > { %v1432_v50 = vpop.f32.mrf.mxu0  ;;  %13163 = vmatpush3.msra.mxu1 %v11525_v32 }
 0x224   : > { %v15047_v38 = vpop.f32.mrf.mxu1 }
 0x225   : > { %v1435_v51 = vpop.f32.mrf.mxu0 }
 0x226   : > { %13153 = vmatprep.mubr.msk.f32.mxu1 %vm1507_vm0, %v1435_v51 }
 0x227   : > { %v1437_v52 = vpop.f32.mrf.mxu0 }
 0x229   : > { %v1440_v54 = vpop.f32.mrf.mxu0 }
 0x22a   : > { %13154 = vmatmul.mubr.msk.f32.gmra.mxu1 %vm1507_vm0, %v1440_v54  ;;  %v13057_v57 = vpop.f32.mrf.mxu1 }
 0x22b   : > { %v1442_v55 = vpop.f32.mrf.mxu0 }
 0x22c   : > { %v15050_v60 = vpop.f32.mrf.mxu1 }
 0x22d   : > { %v1445_v56 = vpop.f32.mrf.mxu0 }
 0x22e   : > { %13156 = vmatprep.mubr.msk.f32.mxu1 %vm1507_vm0, %v1445_v56 }
 0x22f   : > { %v1447_v58 = vpop.f32.mrf.mxu0 }
 0x231   : > { %v1450_v59 = vpop.f32.mrf.mxu0 }
 0x232   : > { %13157 = vmatmul.mubr.msk.f32.gmra.mxu1 %vm1507_vm0, %v1450_v59  ;;  %v13060_v62 = vpop.f32.mrf.mxu1 }
 0x233   : > { %v1452_v61 = vpop.f32.mrf.mxu0 }
 0x234   : > { %v15054_v2 = vpop.f32.mrf.mxu1 }
 0x235   : > { %v1455_v63 = vpop.f32.mrf.mxu0 }
 0x236   : > { %13159 = vmatprep.mubr.msk.f32.mxu1 %vm1507_vm0, %v1455_v63 }
 0x237   : > { %v1457_v0 = vpop.f32.mrf.mxu0 }
 0x239   : > { %v1460_v3 = vpop.f32.mrf.mxu0 }
 0x23a   : > { %v13063_v4 = vpop.f32.mrf.mxu1  ;;  %13160 = vmatmul.mubr.msk.f32.gmra.mxu1 %vm1507_vm0, %v1460_v3 }
 0x23b   : > { %v1462_v5 = vpop.f32.mrf.mxu0 }
 0x23c   : > { %v15057_v6 = vpop.f32.mrf.mxu1 }
 0x23d   : > { %v1465_v7 = vpop.f32.mrf.mxu0 }
 0x23e   : > { %v13068_v9 = vpop.f32.mrf.mxu1  ;;  %13164 = vmatprep.mubr.msk.f32.mxu1 %vm1507_vm0, %v1465_v7 }
 0x23f   : > { %v1733_v10 = vadd.f32 %v13068_v9, %v13054_v53  ;;  %v1467_v11 = vpop.f32.mrf.mxu0 }
 0x240   : > { %v15060_v13 = vpop.f32.mrf.mxu1 }
 0x241   : > { %v1470_v14 = vpop.f32.mrf.mxu0 }
 0x242   : > { %v13071_v15 = vpop.f32.mrf.mxu1  ;;  %13165 = vmatmul.mubr.msk.f32.vlgmr.msra.gmra.mxu1 %vm1507_vm0, %v1470_v14 }
 0x243   : > { %v1743_v17 = vadd.f32 %v13071_v15, %v13057_v57  ;;  %v1472_v8 = vpop.f32.mrf.mxu0 }
 0x244   : > { %v15063_v18 = vpop.f32.mrf.mxu1 }
 0x245   : > { %v1475_v12 = vpop.f32.mrf.mxu0 }
 0x246   : > { %v13074_v19 = vpop.f32.mrf.mxu1  ;;  %13167 = vmatprep.mubr.msk.f32.mxu1 %vm1507_vm0, %v1475_v12 }
 0x247   : > { %v1753_v16 = vadd.f32 %v13074_v19, %v13060_v62  ;;  %v1477_v21 = vpop.f32.mrf.mxu0 }
 0x248   : > { %v15066_v22 = vpop.f32.mrf.mxu1 }
 0x249   : > { %v1480_v20 = vpop.f32.mrf.mxu0 }
 0x24a   : > { %v13077_v23 = vpop.f32.mrf.mxu1  ;;  %13168 = vmatmul.mubr.msk.f32.gmra.mxu1 %vm1507_vm0, %v1480_v20 }
 0x24b   : > { %v1763_v24 = vadd.f32 %v13077_v23, %v13063_v4  ;;  %v1482_v25 = vpop.f32.mrf.mxu0 }
 0x24c   : > { %v15069_v26 = vpop.f32.mrf.mxu1 }
 0x24d   : > { %v1485_v27 = vpop.f32.mrf.mxu0 }
 0x24e   : > { %v13082_v28 = vpop.f32.mrf.mxu1  ;;  %13170 = vmatprep.mubr.msk.f32.mxu1 %vm1507_vm0, %v1485_v27 }
 0x24f   : > { %v1898_v29 = vadd.f32 %v13082_v28, %v1733_v10  ;;  %v1487_v30 = vpop.f32.mrf.mxu0 }
 0x250   : > { %v15072_v31 = vpop.f32.mrf.mxu1 }
 0x251   : > { %v1490_v32 = vpop.f32.mrf.mxu0 }
 0x252   : > { %v13085_v33 = vpop.f32.mrf.mxu1  ;;  %13171 = vmatmul.mubr.msk.f32.gmra.mxu1 %vm1507_vm0, %v1490_v32 }
 0x253   : > { %v1900_v34 = vadd.f32 %v13085_v33, %v1743_v17  ;;  %v1492_v35 = vpop.f32.mrf.mxu0  ;;  %v2762_v17 = vld [vmem:[%s14598_s21] sm:$0xff] }
 0x254   : > { %v15075_v36 = vpop.f32.mrf.mxu1 }
 0x255   : > { %v1495_v37 = vpop.f32.mrf.mxu0 }
 0x256   : > { %v13088_v39 = vpop.f32.mrf.mxu1  ;;  %13173 = vmatprep.mubr.msk.f32.mxu1 %vm1507_vm0, %v1495_v37 }
 0x257   : > { %v1902_v40 = vadd.f32 %v13088_v39, %v1753_v16  ;;  %v1497_v41 = vpop.f32.mrf.mxu0 }
 0x258   : > { %v15078_v42 = vpop.f32.mrf.mxu1 }
 0x259   : > { %v1500_v43 = vpop.f32.mrf.mxu0 }
 0x25a   : > { %v13091_v44 = vpop.f32.mrf.mxu1  ;;  %13174 = vmatmul.mubr.msk.f32.gmra.mxu1 %vm1507_vm0, %v1500_v43 }
 0x25b   : > { %v1904_v45 = vadd.f32 %v13091_v44, %v1763_v24  ;;  %v1502_v46 = vpop.f32.mrf.mxu0  ;;  %13192 = vmatprep.mubr.msk.f32.mxu1 %vm2780_vm1, %v2762_v17 }
 0x25c   : > { %v1888_v47 = vpop.f32.mrf.mxu1 }
 0x262   : > { %v13096_v48 = vpop.f32.mrf.mxu1 }
 0x263   : > { %v2037_v49 = vadd.f32 %v13096_v48, %v1898_v29 }
 0x264   : > { %v15081_v50 = vpop.f32.mrf.mxu1 }
 0x26a   : > { %v13099_v51 = vpop.f32.mrf.mxu1 }
 0x26b   : > { %v2039_v52 = vadd.f32 %v13099_v51, %v1900_v34  ;;  %v1758_v51 = vadd.f32 %v15069_v26, %v15057_v6  ;;  %v1728_v6 = vadd.f32 %v15060_v13, %v15047_v38 }
 0x26c   : > { %v15083_v53 = vpop.f32.mrf.mxu1 }
 0x272   : > { %v13102_v54 = vpop.f32.mrf.mxu1 }
 0x273   : > { %v2041_v55 = vadd.f32 %v13102_v54, %v1902_v40  ;;  %v1903_v54 = vadd.f32 %v1888_v47, %v1758_v51 }
 0x274   : > { %v2017_v56 = vpop.f32.mrf.mxu1 }
 0x27a   : > { %v13105_v57 = vpop.f32.mrf.mxu1 }
 0x27b   : > { %v2043_v58 = vadd.f32 %v13105_v57, %v1904_v45 }
 0x27c   : > { %v2027_v59 = vpop.f32.mrf.mxu1 }
 0x282   : > { %v13110_v61 = vpop.f32.mrf.mxu1 }
 0x283   : > { %v2176_v62 = vadd.f32 %v13110_v61, %v2037_v49  ;;  %v1748_v49 = vadd.f32 %v15066_v22, %v15054_v2 }
 0x284   : > { %v15085_v63 = vpop.f32.mrf.mxu1 }
 0x28a   : > { %v13113_v0 = vpop.f32.mrf.mxu1 }
 0x28b   : > { %v2178_v3 = vadd.f32 %v13113_v0, %v2039_v52  ;;  %v1901_v52 = vadd.f32 %v15078_v42, %v1748_v49 }
 0x28c   : > { %v2146_v4 = vpop.f32.mrf.mxu1 }
 0x28d   : > { %v2040_v61 = vadd.f32 %v2017_v56, %v1901_v52 }
 0x292   : > { %v13116_v5 = vpop.f32.mrf.mxu1 }
 0x293   : > { %v2180_v7 = vadd.f32 %v13116_v5, %v2041_v55  ;;  %v1738_v55 = vadd.f32 %v15063_v18, %v15050_v60  ;;  %v1897_v18 = vadd.f32 %v15072_v31, %v1728_v6  ;;  %v2770_v6 = vld [vmem:[%s14598_s21 + $0x40] sm:$0xff] }
 0x294   : > { %v2156_v9 = vpop.f32.mrf.mxu1 }
 0x295   : > { %v1899_v5 = vadd.f32 %v15075_v36, %v1738_v55  ;;  %v2179_v17 = vadd.f32 %v2156_v9, %v2040_v61  ;;  %v11554_v61 = vld [vmem:[%s14603_s25 + $0x18] sm:$0xff] }
 0x297   : > { %v2038_v22 = vadd.f32 %v15083_v53, %v1899_v5  ;;  %v2766_v5 = vld [vmem:[%s14598_s21 + $0x20] sm:$0xff] }
 0x299   : > { %v2177_v56 = vadd.f32 %v2146_v4, %v2038_v22  ;;  %v11534_v4 = vld [vmem:[%s14593_s17] ss:$0 sm:$0xff]  ;;  %v2771_v22 = vld [vmem:[%s14598_s21 + $0x48] sm:$0xff] }
 0x29a   : > { %v13119_v10 = vpop.f32.mrf.mxu1 }
 0x29b   : > { %v2182_v0 = vadd.f32 %v13119_v10, %v2043_v58 }
 0x29c   : > { %v2166_v11 = vpop.f32.mrf.mxu1 }
 0x2a2   : > { %v13124_v14 = vpop.f32.mrf.mxu1 }
 0x2a3   : > { %v15087_v15 = vadd.f32 %v13124_v14, %v2176_v62  ;;  %v2042_v62 = vadd.f32 %v2027_v59, %v1903_v54 }
 0x2a4   : > { %v15091_v8 = vpop.f32.mrf.mxu1 }
 0x2a5   : > { %v2181_v1 = vadd.f32 %v2166_v11, %v2042_v62  ;;  %v2036_v11 = vadd.f32 %v15081_v50, %v1897_v18  ;;  %v2764_v62 = vld [vmem:[%s14598_s21 + $0x10] sm:$0xff] }
 0x2a6   : > { %v2776_v18 = vld [vmem:[%s14598_s21 + $0x70] sm:$0xff] }
 0x2aa   : > { %v13127_v12 = vpop.f32.mrf.mxu1 }
 0x2ab   : > { %v2317_v58 = vadd.f32 %v13127_v12, %v2178_v3 }
 0x2ac   : > { %v2285_v19 = vpop.f32.mrf.mxu1 }
 0x2b2   : > { %v13130_v16 = vpop.f32.mrf.mxu1 }
 0x2b4   : > { %v2295_v21 = vpop.f32.mrf.mxu1 }
 0x2b5   : > { %v2318_v26 = vadd.f32 %v2295_v21, %v2179_v17  ;;  %v2768_v17 = vld [vmem:[%s14598_s21 + $0x30] sm:$0xff] }
 0x2ba   : > { %v13133_v20 = vpop.f32.mrf.mxu1 }
 0x2bb   : > { %v2321_v2 = vadd.f32 %v13133_v20, %v2182_v0  ;;  %v2765_v0 = vld [vmem:[%s14598_s21 + $0x18] sm:$0xff] }
 0x2bc   : > { %v2305_v23 = vpop.f32.mrf.mxu1 }
 0x2bd   : > { %v2320_v42 = vadd.f32 %v2305_v23, %v2181_v1  ;;  %v2175_v23 = vadd.f32 %v15085_v63, %v2036_v11 }
 0x2c2   : > { %v15093_v24 = vpop.f32.mrf.mxu1 }
 0x2c3   : > { %v2454_v50 = vadd.f32 %v15093_v24, %v15087_v15 }
 0x2c4   : > { %v15095_v25 = vpop.f32.mrf.mxu1 }
 0x2ca   : > { %v13141_v27 = vpop.f32.mrf.mxu1 }
 0x2cb   : > { %v2456_v38 = vadd.f32 %v13141_v27, %v2317_v58  ;;  %v2778_v58 = vld [vmem:[%s14598_s21 + $0x80] sm:$0xff] }
 0x2cc   : > { %v2424_v28 = vpop.f32.mrf.mxu1 }
 0x2d2   : > { %v13144_v29 = vpop.f32.mrf.mxu1 }
 0x2d4   : > { %v2434_v30 = vpop.f32.mrf.mxu1 }
 0x2d5   : > { %v2457_v59 = vadd.f32 %v2434_v30, %v2318_v26  ;;  %v2772_v26 = vld [vmem:[%s14598_s21 + $0x50] sm:$0xff] }
 0x2da   : > { %v13147_v32 = vpop.f32.mrf.mxu1 }
 0x2db   : > { %v2460_v60 = vadd.f32 %v13147_v32, %v2321_v2  ;;  %v2769_v2 = vld [vmem:[%s14598_s21 + $0x38] sm:$0xff] }
 0x2dc   : > { %v2444_v33 = vpop.f32.mrf.mxu1 }
 0x2dd   : > { %v2459_v9 = vadd.f32 %v2444_v33, %v2320_v42  ;;  %v2314_v33 = vadd.f32 %v15091_v8, %v2175_v23  ;;  %v2773_v42 = vld [vmem:[%s14598_s21 + $0x58] sm:$0xff] }
 0x2de   : > { %v11564_v23 = vld [vmem:[%s14603_s25 + $0x38] sm:$0xff] }
 0x2e2   : > { %v15097_v34 = vpop.f32.mrf.mxu1 }
 0x2e3   : > { %v2593_v63 = vadd.f32 %v15097_v34, %v2454_v50 }
 0x2e4   : > { %v15099_v35 = vpop.f32.mrf.mxu1 }
 0x2ea   : > { %v13155_v37 = vpop.f32.mrf.mxu1 }
 0x2eb   : > { %v2595_v12 = vadd.f32 %v13155_v37, %v2456_v38  ;;  %v2990_v38 = vld [vmem:[%s14603_s25] sm:$0xff] }
 0x2ec   : > { %v2563_v39 = vpop.f32.mrf.mxu1 }
 0x2f2   : > { %v13158_v40 = vpop.f32.mrf.mxu1 }
 0x2f4   : > { %v2573_v41 = vpop.f32.mrf.mxu1 }
 0x2f5   : > { %v2596_v53 = vadd.f32 %v2573_v41, %v2457_v59  ;;  %v11553_v59 = vld [vmem:[%s14603_s25 + $0x10] sm:$0xff] }
 0x2fa   : > { %v13161_v43 = vpop.f32.mrf.mxu1 }
 0x2fc   : > { %v2583_v44 = vpop.f32.mrf.mxu1 }
 0x2fd   : > { %v2598_v21 = vadd.f32 %v2583_v44, %v2459_v9  ;;  %v2453_v44 = vadd.f32 %v15095_v25, %v2314_v33  ;;  %v2991_v9 = vld [vmem:[%s14603_s25 + $0x8] sm:$0xff]  ;;  %v11572_v33 = vld [vmem:[%s14603_s25 + $0x58] sm:$0xff] }
 0x2ff   : > { %v2592_v49 = vadd.f32 %v15099_v35, %v2453_v44 }
 0x302   : > { %v15101_v45 = vpop.f32.mrf.mxu1 }
 0x303   : > { %v2732_v8 = vadd.f32 %v15101_v45, %v2593_v63  ;;  %v11580_v63 = vld [vmem:[%s14603_s25 + $0x78] sm:$0xff] }
 0x304   : > { %v15103_v46 = vpop.f32.mrf.mxu1 }
 0x305   : > { %16889 = vst [vmem:[#allocation14_spill] sm:$0xff] %v15103_v46  ;;  %v2319_v46 = vadd.f32 %v13130_v16, %v2180_v7  ;;  %v2599_v7 = vadd.f32 %v13161_v43, %v2460_v60  ;;  %v2316_v16 = vadd.f32 %v2285_v19, %v2177_v56  ;;  %v2747_v34 = vadd.f32 %v11534_v4, %v2732_v8  ;;  %v2775_v60 = vld [vmem:[%s14598_s21 + $0x68] sm:$0xff]  ;;  %v2777_v56 = vld [vmem:[%s14598_s21 + $0x78] sm:$0xff] }
 0x307   : > { %v2458_v47 = vadd.f32 %v13144_v29, %v2319_v46  ;;  %v2455_v31 = vadd.f32 %v2424_v28, %v2316_v16  ;;  %v2755_v54 = vmax.f32 %v2747_v34, 0.0 }
 0x309   : > { %v2597_v10 = vadd.f32 %v13158_v40, %v2458_v47  ;;  %v2594_v19 = vadd.f32 %v2563_v39, %v2455_v31  ;;  %v2774_v47 = vld [vmem:[%s14598_s21 + $0x60] sm:$0xff] }
 0x30a   : > { %v13169_v48 = vpop.f32.mrf.mxu1 }
 0x30b   : > { %v2734_v27 = vadd.f32 %v13169_v48, %v2595_v12  ;;  %v11568_v12 = vld [vmem:[%s14603_s25 + $0x48] sm:$0xff] }
 0x30c   : > { %v2702_v57 = vpop.f32.mrf.mxu1  ;;  %v16890_v24 = vld [vmem:[#allocation14_spill] sm:$0xff] }
 0x30d   : > { %v2733_v28 = vadd.f32 %v2702_v57, %v2594_v19  ;;  %v2749_v51 = vadd.f32 %v11534_v4, %v2734_v27  ;;  %v2731_v39 = vadd.f32 %v16890_v24, %v2592_v49  ;;  %v2763_v57 = vld [vmem:[%s14598_s21 + $0x8] sm:$0xff]  ;;  %v11571_v19 = vld [vmem:[%s14603_s25 + $0x50] sm:$0xff] }
 0x30e   : > { %v11584_v49 = vld [vmem:[%s14603_s25 + $0x88] sm:$0xff] }
 0x30f   : > { %v2748_v48 = vadd.f32 %v11534_v4, %v2733_v28  ;;  %v2757_v52 = vmax.f32 %v2749_v51, 0.0  ;;  %v2746_v35 = vadd.f32 %v11534_v4, %v2731_v39  ;;  %v11583_v51 = vld [vmem:[%s14603_s25 + $0x80] sm:$0xff] }
 0x311   : > { %v2756_v45 = vmax.f32 %v2748_v48, 0.0  ;;  %v2754_v55 = vmax.f32 %v2746_v35, 0.0 }
 0x312   : > { %v13172_v14 = vpop.f32.mrf.mxu1 }
 0x313   : > { %v2736_v1 = vadd.f32 %v13172_v14, %v2597_v10  ;;  %v2767_v14 = vld [vmem:[%s14598_s21 + $0x28] sm:$0xff] }
 0x314   : > { %v2712_v36 = vpop.f32.mrf.mxu1 }
 0x315   : > { %v2735_v29 = vadd.f32 %v2712_v36, %v2596_v53  ;;  %v2751_v40 = vadd.f32 %v11534_v4, %v2736_v1  ;;  %v2779_v36 = vld [vmem:[%s14598_s21 + $0x88] sm:$0xff]  ;;  %v11559_v1 = vld [vmem:[%s14603_s25 + $0x20] sm:$0xff] }
 0x316   : > { %v11560_v53 = vld [vmem:[%s14603_s25 + $0x28] sm:$0xff] }
 0x317   : > { %v2750_v46 = vadd.f32 %v11534_v4, %v2735_v29  ;;  %v2759_v15 = vmax.f32 %v2751_v40, 0.0  ;;  %v11576_v40 = vld [vmem:[%s14603_s25 + $0x68] sm:$0xff] }
 0x319   : > { %v2758_v25 = vmax.f32 %v2750_v46, 0.0  ;;  %v11579_v46 = vld [vmem:[%s14603_s25 + $0x70] sm:$0xff] }
 0x31a   : > { %v13175_v13 = vpop.f32.mrf.mxu1 }
 0x31b   : > { %v2738_v20 = vadd.f32 %v13175_v13, %v2599_v7 }
 0x31c   : > { %v2722_v3 = vpop.f32.mrf.mxu1 }
 0x31d   : > { %v2753_v30 = vadd.f32 %v11534_v4, %v2738_v20  ;;  %v2737_v32 = vadd.f32 %v2722_v3, %v2598_v21 }
 0x31f   : > { %v2761_v41 = vmax.f32 %v2753_v30, 0.0  ;;  %v2752_v43 = vadd.f32 %v11534_v4, %v2737_v32  ;;  %v11563_v4 = vld [vmem:[%s14603_s25 + $0x30] sm:$0xff]  ;;  %v11567_v30 = vld [vmem:[%s14603_s25 + $0x40] sm:$0xff] }
 0x321   : > { %13176 = vmatprep.subr.mxu1 %v2761_v41  ;;  %v2760_v37 = vmax.f32 %v2752_v43, 0.0  ;;  %v11575_v43 = vld [vmem:[%s14603_s25 + $0x60] sm:$0xff] }
 0x322   : > { %13177 = vmatpush3.msra.mxu1 %v2761_v41 }
 0x323   : > { %13178 = vmatprep.subr.mxu1 %v2760_v37 }
 0x324   : > { %13179 = vmatpush3.msra.mxu1 %v2760_v37 }
 0x325   : > { %13180 = vmatprep.subr.mxu1 %v2759_v15 }
 0x326   : > { %13181 = vmatpush3.msra.mxu1 %v2759_v15  ;;  %v16891_v15 = vmov 0.0  }
 0x327   : > { %13182 = vmatprep.subr.mxu1 %v2758_v25  ;;  %13457 = vmatprep.mubr.msk.f32.mxu0 %vm14561_vm3, %v16891_v15 }
 0x328   : > { %13183 = vmatpush3.msra.mxu1 %v2758_v25 }
 0x329   : > { %13184 = vmatprep.subr.mxu1 %v2757_v52 }
 0x32a   : > { %13185 = vmatpush3.msra.mxu1 %v2757_v52 }
 0x32b   : > { %13186 = vmatprep.subr.mxu1 %v2756_v45 }
 0x32c   : > { %13187 = vmatpush3.msra.mxu1 %v2756_v45 }
 0x32d   : > { %13188 = vmatprep.subr.mxu1 %v2755_v54 }
 0x32e   : > { %13189 = vmatpush3.msra.mxu1 %v2755_v54 }
 0x32f   : > { %13190 = vmatprep.subr.mxu1 %v2754_v55 }
 0x330   : > { %13191 = vmatpush3.msra.mxu1 %v2754_v55 }
 0x331   : > { %13193 = vmatmul.mubr.msk.f32.vlgmr.msra.gmra.mxu1 %vm2780_vm1, %v2763_v57  ;;  %13219 = vmatprep.subr.mxu1 %v11554_v61 }
 0x332   : > { %13195 = vmatprep.mubr.msk.f32.mxu1 %vm2780_vm1, %v2764_v62  ;;  %13220 = vmatpush3.msra.mxu1 %v11554_v61 }
 0x333   : > { %13221 = vmatprep.subr.mxu1 %v11553_v59 }
 0x334   : > { %13222 = vmatpush3.msra.mxu1 %v11553_v59 }
 0x335   : > { %13196 = vmatmul.mubr.msk.f32.gmra.mxu1 %vm2780_vm1, %v2765_v0  ;;  %13226 = vmatprep.subr.mxu1 %v2991_v9 }
 0x336   : > { %13198 = vmatprep.mubr.msk.f32.mxu1 %vm2780_vm1, %v2766_v5 }
 0x339   : > { %13199 = vmatmul.mubr.msk.f32.gmra.mxu1 %vm2780_vm1, %v2767_v14 }
 0x33a   : > { %13201 = vmatprep.mubr.msk.f32.mxu1 %vm2780_vm1, %v2768_v17 }
 0x33d   : > { %13202 = vmatmul.mubr.msk.f32.gmra.mxu1 %vm2780_vm1, %v2769_v2 }
 0x33e   : > { %13204 = vmatprep.mubr.msk.f32.mxu1 %vm2780_vm1, %v2770_v6 }
 0x341   : > { %13205 = vmatmul.mubr.msk.f32.gmra.mxu1 %vm2780_vm1, %v2771_v22 }
 0x342   : > { %13207 = vmatprep.mubr.msk.f32.mxu1 %vm2780_vm1, %v2772_v26 }
 0x345   : > { %13208 = vmatmul.mubr.msk.f32.gmra.mxu1 %vm2780_vm1, %v2773_v42 }
 0x346   : > { %13210 = vmatprep.mubr.msk.f32.mxu1 %vm2780_vm1, %v2774_v47 }
 0x349   : > { %13211 = vmatmul.mubr.msk.f32.gmra.mxu1 %vm2780_vm1, %v2775_v60 }
 0x34a   : > { %13213 = vmatprep.mubr.msk.f32.mxu1 %vm2780_vm1, %v2776_v18 }
 0x34d   : > { %13214 = vmatmul.mubr.msk.f32.gmra.mxu1 %vm2780_vm1, %v2777_v56 }
 0x34e   : > { %13216 = vmatprep.mubr.msk.f32.mxu1 %vm2780_vm1, %v2778_v58 }
 0x351   : > { %13217 = vmatmul.mubr.msk.f32.gmra.mxu1 %vm2780_vm1, %v2779_v36 }
 0x3f1   : > { %v13194_v10 = vpop.f32.mrf.mxu1 }
 0x3f3   : > { %v2901_v7 = vpop.f32.mrf.mxu1 }
 0x3f5   : > { %v13197_v11 = vpop.f32.mrf.mxu1 }
 0x3f7   : > { %v2911_v16 = vpop.f32.mrf.mxu1 }
 0x3f8   : > { %13223 = vmatprep.mubr.msk.f32.mxu1 %vm2995_vm2, %v2911_v16 }
 0x3f9   : > { %13224 = vmatmul.mubr.msk.f32.vlgmr.msra.gmra.mxu1 %vm2995_vm2, %v13197_v11  ;;  %v13200_v13 = vpop.f32.mrf.mxu1 }
 0x3fa   : > { %13227 = vmatpush3.msra.mxu1 %v2991_v9  ;;  %13230 = vmatprep.mubr.msk.f32.mxu1 %vm2995_vm2, %v2901_v7 }
 0x3fb   : > { %13228 = vmatprep.subr.mxu1 %v2990_v38  ;;  %v2921_v21 = vpop.f32.mrf.mxu1 }
 0x3fc   : > { %13229 = vmatpush3.msra.mxu1 %v2990_v38 }
 0x3fd   : > { %13231 = vmatmul.mubr.msk.f32.vlgmr.msra.gmra.mxu1 %vm2995_vm2, %v13194_v10  ;;  %13233 = vmatprep.subr.mxu1 %v11560_v53  ;;  %v13203_v20 = vpop.f32.mrf.mxu1  ;;  %v11587_v10 = vld [vmem:[%s14608_s29] ss:$0 sm:$0xff] }
 0x3fe   : > { %13234 = vmatpush3.msra.mxu1 %v11560_v53  ;;  %13237 = vmatprep.mubr.msk.f32.mxu1 %vm2995_vm2, %v2921_v21 }
 0x3ff   : > { %13235 = vmatprep.subr.mxu1 %v11559_v1  ;;  %v2931_v31 = vpop.f32.mrf.mxu1 }
 0x400   : > { %13236 = vmatpush3.msra.mxu1 %v11559_v1 }
 0x401   : > { %13238 = vmatmul.mubr.msk.f32.vlgmr.msra.gmra.mxu1 %vm2995_vm2, %v13200_v13  ;;  %13240 = vmatprep.subr.mxu1 %v11564_v23  ;;  %v13206_v3 = vpop.f32.mrf.mxu1 }
 0x402   : > { %13241 = vmatpush3.msra.mxu1 %v11564_v23  ;;  %13244 = vmatprep.mubr.msk.f32.mxu1 %vm2995_vm2, %v2931_v31  ;;  %v11600_v23 = vld [vmem:[%s14618_s8 + $0x38] sm:$0xff]  ;;  %v11599_v31 = vld [vmem:[%s14618_s8 + $0x30] sm:$0xff] }
 0x403   : > { %13242 = vmatprep.subr.mxu1 %v11563_v4  ;;  %v2941_v29 = vpop.f32.mrf.mxu1 }
 0x404   : > { %13243 = vmatpush3.msra.mxu1 %v11563_v4  ;;  %v3772_v4 = vld [vmem:[%s14613_s3 + $0x8] sm:$0xff] }
 0x405   : > { %13245 = vmatmul.mubr.msk.f32.vlgmr.msra.gmra.mxu1 %vm2995_vm2, %v13203_v20  ;;  %13247 = vmatprep.subr.mxu1 %v11568_v12  ;;  %v13209_v32 = vpop.f32.mrf.mxu1  ;;  %v3771_v20 = vld [vmem:[%s14613_s3] sm:$0xff] }
 0x406   : > { %13248 = vmatpush3.msra.mxu1 %v11568_v12  ;;  %13251 = vmatprep.mubr.msk.f32.mxu1 %vm2995_vm2, %v2941_v29  ;;  %v3774_v12 = vld [vmem:[%s14613_s3 + $0x18] sm:$0xff]  ;;  %v3775_v29 = vld [vmem:[%s14613_s3 + $0x20] sm:$0xff] }
 0x407   : > { %13249 = vmatprep.subr.mxu1 %v11567_v30  ;;  %v2951_v50 = vpop.f32.mrf.mxu1 }
 0x408   : > { %13250 = vmatpush3.msra.mxu1 %v11567_v30  ;;  %v3776_v30 = vld [vmem:[%s14613_s3 + $0x28] sm:$0xff] }
 0x409   : > { %13252 = vmatmul.mubr.msk.f32.vlgmr.msra.gmra.mxu1 %vm2995_vm2, %v13206_v3  ;;  %13254 = vmatprep.subr.mxu1 %v11572_v33  ;;  %v13212_v27 = vpop.f32.mrf.mxu1  ;;  %v3773_v3 = vld [vmem:[%s14613_s3 + $0x10] sm:$0xff] }
 0x40a   : > { %13255 = vmatpush3.msra.mxu1 %v11572_v33  ;;  %13258 = vmatprep.mubr.msk.f32.mxu1 %vm2995_vm2, %v2951_v50  ;;  %v3778_v33 = vld [vmem:[%s14613_s3 + $0x38] sm:$0xff]  ;;  %v3779_v50 = vld [vmem:[%s14613_s3 + $0x40] sm:$0xff] }
 0x40b   : > { %13256 = vmatprep.subr.mxu1 %v11571_v19  ;;  %v2961_v41 = vpop.f32.mrf.mxu1 }
 0x40c   : > { %13257 = vmatpush3.msra.mxu1 %v11571_v19  ;;  %v11598_v19 = vld [vmem:[%s14618_s8 + $0x28] sm:$0xff] }
 0x40d   : > { %13259 = vmatmul.mubr.msk.f32.vlgmr.msra.gmra.mxu1 %vm2995_vm2, %v13209_v32  ;;  %13261 = vmatprep.subr.mxu1 %v11576_v40  ;;  %v13215_v44 = vpop.f32.mrf.mxu1  ;;  %v3777_v32 = vld [vmem:[%s14613_s3 + $0x30] sm:$0xff] }
 0x40e   : > { %13262 = vmatpush3.msra.mxu1 %v11576_v40  ;;  %13265 = vmatprep.mubr.msk.f32.mxu1 %vm2995_vm2, %v2961_v41 }
 0x40f   : > { %13263 = vmatprep.subr.mxu1 %v11575_v43  ;;  %v2971_v28 = vpop.f32.mrf.mxu1 }
 0x410   : > { %13264 = vmatpush3.msra.mxu1 %v11575_v43  ;;  %v3920_v43 = vld [vmem:[%s14618_s8 + $0x18] sm:$0xff] }
 0x411   : > { %13266 = vmatmul.mubr.msk.f32.vlgmr.msra.gmra.mxu1 %vm2995_vm2, %v13212_v27  ;;  %13268 = vmatprep.subr.mxu1 %v11580_v63  ;;  %v13218_v37 = vpop.f32.mrf.mxu1  ;;  %v11597_v27 = vld [vmem:[%s14618_s8 + $0x20] sm:$0xff] }
 0x412   : > { %13269 = vmatpush3.msra.mxu1 %v11580_v63  ;;  %13272 = vmatprep.mubr.msk.f32.mxu1 %vm2995_vm2, %v2971_v28  ;;  %v3919_v63 = vld [vmem:[%s14618_s8 + $0x10] sm:$0xff] }
 0x413   : > { %13270 = vmatprep.subr.mxu1 %v11579_v46  ;;  %v2981_v8 = vpop.f32.mrf.mxu1 }
 0x414   : > { %13271 = vmatpush3.msra.mxu1 %v11579_v46  ;;  %v3918_v46 = vld [vmem:[%s14618_s8 + $0x8] sm:$0xff] }
 0x415   : > { %13273 = vmatmul.mubr.msk.f32.vlgmr.msra.gmra.mxu1 %vm2995_vm2, %v13215_v44  ;;  %13275 = vmatprep.subr.mxu1 %v11584_v49 }
 0x416   : > { %13276 = vmatpush3.msra.mxu1 %v11584_v49  ;;  %13279 = vmatprep.mubr.msk.f32.mxu1 %vm2995_vm2, %v2981_v8  ;;  %v3917_v49 = vld [vmem:[%s14618_s8] sm:$0xff] }
 0x417   : > { %13277 = vmatprep.subr.mxu1 %v11583_v51 }
 0x418   : > { %13278 = vmatpush3.msra.mxu1 %v11583_v51  ;;  %v11606_v51 = vld [vmem:[%s14618_s8 + $0x58] sm:$0xff] }
 0x419   : > { %13280 = vmatmul.mubr.msk.f32.vlgmr.msra.gmra.mxu1 %vm2995_vm2, %v13218_v37  ;;  %13282 = vmatprep.subr.mxu1 %v16891_v15 }
 0x41a   : > { %13286 = vmatprep.mubr.msk.f32.mxu1 %vm14561_vm3, %v16891_v15 }
 0x4b9   : > { %v13225_v24 = vpop.f32.mrf.mxu1 }
 0x4bb   : > { %v3068_v39 = vpop.f32.mrf.mxu1 }
 0x4bd   : > { %v13232_v48 = vpop.f32.mrf.mxu1 }
 0x4be   : > { %v3155_v57 = vadd.f32 %v13232_v48, %v13225_v24 }
 0x4bf   : > { %v3149_v25 = vpop.f32.mrf.mxu1 }
 0x4c0   : > { %v3150_v62 = vadd.f32 %v3149_v25, %v3068_v39  ;;  %v11605_v39 = vld [vmem:[%s14618_s8 + $0x50] sm:$0xff]  ;;  %v11604_v25 = vld [vmem:[%s14618_s8 + $0x48] sm:$0xff] }
 0x4c1   : > { %v13239_v34 = vpop.f32.mrf.mxu1 }
 0x4c2   : > { %v3243_v0 = vadd.f32 %v13239_v34, %v3155_v57 }
 0x4c3   : > { %v3233_v52 = vpop.f32.mrf.mxu1 }
 0x4c4   : > { %v3242_v14 = vadd.f32 %v3233_v52, %v3150_v62  ;;  %v11603_v52 = vld [vmem:[%s14618_s8 + $0x40] sm:$0xff] }
 0x4c5   : > { %v13246_v35 = vpop.f32.mrf.mxu1 }
 0x4c6   : > { %v3329_v17 = vadd.f32 %v13246_v35, %v3243_v0  ;;  %v11608_v0 = vld [vmem:[%s14618_s8 + $0x60] sm:$0xff] }
 0x4c7   : > { %v3319_v45 = vpop.f32.mrf.mxu1 }
 0x4c8   : > { %v3328_v6 = vadd.f32 %v3319_v45, %v3242_v14  ;;  %v11611_v45 = vld [vmem:[%s14618_s8 + $0x78] sm:$0xff] }
 0x4c9   : > { %v13253_v54 = vpop.f32.mrf.mxu1  ;;  %v11616_v14 = vld [vmem:[%s14618_s8 + $0x98] sm:$0xff] }
 0x4ca   : > { %v3415_v22 = vadd.f32 %v13253_v54, %v3329_v17 }
 0x4cb   : > { %v3405_v55 = vpop.f32.mrf.mxu1 }
 0x4cc   : > { %v3414_v42 = vadd.f32 %v3405_v55, %v3328_v6  ;;  %v11610_v55 = vld [vmem:[%s14618_s8 + $0x70] sm:$0xff] }
 0x4cd   : > { %v13260_v61 = vpop.f32.mrf.mxu1 }
 0x4ce   : > { %v3501_v47 = vadd.f32 %v13260_v61, %v3415_v22  ;;  %v11609_v61 = vld [vmem:[%s14618_s8 + $0x68] sm:$0xff] }
 0x4cf   : > { %v3491_v5 = vpop.f32.mrf.mxu1  ;;  %v11614_v22 = vld [vmem:[%s14618_s8 + $0x88] sm:$0xff] }
 0x4d0   : > { %v3500_v18 = vadd.f32 %v3491_v5, %v3414_v42  ;;  %v11613_v42 = vld [vmem:[%s14618_s8 + $0x80] sm:$0xff] }
 0x4d1   : > { %v13267_v2 = vpop.f32.mrf.mxu1 }
 0x4d2   : > { %v3587_v56 = vadd.f32 %v13267_v2, %v3501_v47  ;;  %v11615_v2 = vld [vmem:[%s14618_s8 + $0x90] sm:$0xff] }
 0x4d3   : > { %v3577_v26 = vpop.f32.mrf.mxu1 }
 0x4d4   : > { %v3586_v36 = vadd.f32 %v3577_v26, %v3500_v18  ;;  %v11620_v18 = vld [vmem:[%s14618_s8 + $0xb0] sm:$0xff] }
 0x4d5   : > { %v13274_v60 = vpop.f32.mrf.mxu1 }
 0x4d6   : > { %v3673_v59 = vadd.f32 %v13274_v60, %v3587_v56  ;;  %v11621_v60 = vld [vmem:[%s14618_s8 + $0xb8] sm:$0xff]  ;;  %v11619_v56 = vld [vmem:[%s14618_s8 + $0xa8] sm:$0xff] }
 0x4d7   : > { %v3663_v58 = vpop.f32.mrf.mxu1 }
 0x4d8   : > { %v3672_v7 = vadd.f32 %v3663_v58, %v3586_v36  ;;  %v11618_v58 = vld [vmem:[%s14618_s8 + $0xa0] sm:$0xff]  ;;  %v11626_v36 = vld [vmem:[%s14618_s8 + $0xd8] sm:$0xff] }
 0x4d9   : > { %v13281_v9 = vpop.f32.mrf.mxu1 }
 0x4da   : > { %v3759_v11 = vadd.f32 %v13281_v9, %v3673_v59  ;;  %v11625_v59 = vld [vmem:[%s14618_s8 + $0xd0] sm:$0xff]  ;;  %v11624_v9 = vld [vmem:[%s14618_s8 + $0xc8] sm:$0xff] }
 0x4db   : > { %v3749_v16 = vpop.f32.mrf.mxu1 }
 0x4dc   : > { %v3768_v38 = vadd.f32 %v11587_v10, %v3759_v11  ;;  %v3758_v13 = vadd.f32 %v3749_v16, %v3672_v7  ;;  %v11631_v7 = vld [vmem:[%s14618_s8 + $0xf8] sm:$0xff]  ;;  %v11630_v11 = vld [vmem:[%s14618_s8 + $0xf0] sm:$0xff]  ;;  %v11629_v16 = vld [vmem:[%s14618_s8 + $0xe8] sm:$0xff] }
 0x4de   : > { %v3770_v53 = vmax.f32 %v3768_v38, 0.0  ;;  %v3767_v21 = vadd.f32 %v11587_v10, %v3758_v13  ;;  %v11623_v10 = vld [vmem:[%s14618_s8 + $0xc0] sm:$0xff]  ;;  %v11636_v13 = vld [vmem:[%s14618_s8 + $0x118] sm:$0xff] }
 0x4df   : > { %v11628_v38 = vld [vmem:[%s14618_s8 + $0xe0] sm:$0xff] }
 0x4e0   : > { %v3769_v1 = vmax.f32 %v3767_v21, 0.0  ;;  %13283 = vmatpush3.msra.mxu1 %v3770_v53  ;;  %v11635_v53 = vld [vmem:[%s14618_s8 + $0x110] sm:$0xff]  ;;  %v11634_v21 = vld [vmem:[%s14618_s8 + $0x108] sm:$0xff] }
 0x4e1   : > { %13284 = vmatprep.subr.mxu1 %v16891_v15 }
 0x4e2   : > { %13285 = vmatpush3.msra.mxu1 %v3769_v1  ;;  %v11633_v1 = vld [vmem:[%s14618_s8 + $0x100] sm:$0xff] }
 0x4e3   : > { %13287 = vmatmul.mubr.msk.f32.vlgmr.msra.gmra.mxu1 %vm2995_vm2, %v3771_v20  ;;  %13313 = vmatprep.subr.mxu1 %v16891_v15  ;;  %v11655_v20 = vld [vmem:[%s14633_s24 + $0x78] sm:$0xff] }
 0x4e4   : > { %13289 = vmatprep.mubr.msk.f32.mxu1 %vm14561_vm3, %v16891_v15  ;;  %13314 = vmatpush3.msra.mxu1 %v11600_v23  ;;  %v11654_v23 = vld [vmem:[%s14633_s24 + $0x70] sm:$0xff] }
 0x4e5   : > { %13315 = vmatprep.subr.mxu1 %v16891_v15  ;;  %13442 = vmatpush3.msra.mxu0 %v11655_v20 }
 0x4e6   : > { %13316 = vmatpush3.msra.mxu1 %v11599_v31  ;;  %13443 = vmatprep.subr.mxu0 %v16891_v15  ;;  %v11653_v31 = vld [vmem:[%s14633_s24 + $0x68] sm:$0xff] }
 0x4e7   : > { %13290 = vmatmul.mubr.msk.f32.gmra.mxu1 %vm2995_vm2, %v3772_v4  ;;  %13317 = vmatprep.subr.mxu1 %v16891_v15  ;;  %v11652_v4 = vld [vmem:[%s14633_s24 + $0x60] sm:$0xff] }
 0x4e8   : > { %13292 = vmatprep.mubr.msk.f32.mxu1 %vm14561_vm3, %v16891_v15  ;;  %13318 = vmatpush3.msra.mxu1 %v11598_v19 }
 0x4e9   : > { %13319 = vmatprep.subr.mxu1 %v16891_v15  ;;  %13444 = vmatpush3.msra.mxu0 %v11654_v23  ;;  %v11663_v23 = vld [vmem:[%s14633_s24 + $0xa8] sm:$0xff] }
 0x4ea   : > { %13320 = vmatpush3.msra.mxu1 %v11597_v27  ;;  %13445 = vmatprep.subr.mxu0 %v16891_v15 }
 0x4eb   : > { %13293 = vmatmul.mubr.msk.f32.gmra.mxu1 %vm2995_vm2, %v3773_v3  ;;  %13324 = vmatprep.subr.mxu1 %v16891_v15  ;;  %v11651_v3 = vld [vmem:[%s14633_s24 + $0x58] sm:$0xff] }
 0x4ec   : > { %13295 = vmatprep.mubr.msk.f32.mxu1 %vm14561_vm3, %v16891_v15  ;;  %13446 = vmatpush3.msra.mxu0 %v11653_v31  ;;  %v11670_v31 = vld [vmem:[%s14633_s24 + $0xd8] sm:$0xff] }
 0x4ed   : > { %13447 = vmatprep.subr.mxu0 %v16891_v15 }
 0x4ee   : > { %13448 = vmatpush3.msra.mxu0 %v11652_v4 }
 0x4ef   : > { %13296 = vmatmul.mubr.msk.f32.gmra.mxu1 %vm2995_vm2, %v3774_v12  ;;  %13449 = vmatprep.subr.mxu0 %v16891_v15  ;;  %v11650_v12 = vld [vmem:[%s14633_s24 + $0x50] sm:$0xff] }
 0x4f0   : > { %13298 = vmatprep.mubr.msk.f32.mxu1 %vm14561_vm3, %v16891_v15  ;;  %13450 = vmatpush3.msra.mxu0 %v11651_v3  ;;  %v11662_v3 = vld [vmem:[%s14633_s24 + $0xa0] sm:$0xff] }
 0x4f1   : > { %13451 = vmatprep.subr.mxu0 %v16891_v15 }
 0x4f2   : > { %13452 = vmatpush3.msra.mxu0 %v11650_v12  ;;  %v11669_v12 = vld [vmem:[%s14633_s24 + $0xd0] sm:$0xff] }
 0x4f3   : > { %13299 = vmatmul.mubr.msk.f32.gmra.mxu1 %vm2995_vm2, %v3775_v29  ;;  %v11649_v29 = vld [vmem:[%s14633_s24 + $0x48] sm:$0xff]  ;;  %13453 = vmatprep.subr.mxu0 %v16891_v15 }
 0x4f4   : > { %13301 = vmatprep.mubr.msk.f32.mxu1 %vm14561_vm3, %v16891_v15  ;;  %13454 = vmatpush3.msra.mxu0 %v11649_v29 }
 0x4f5   : > { %13455 = vmatprep.subr.mxu0 %v16891_v15 }
 0x4f7   : > { %13302 = vmatmul.mubr.msk.f32.gmra.mxu1 %vm2995_vm2, %v3776_v30  ;;  %v11648_v30 = vld [vmem:[%s14633_s24 + $0x40] sm:$0xff] }
 0x4f8   : > { %13304 = vmatprep.mubr.msk.f32.mxu1 %vm14561_vm3, %v16891_v15  ;;  %13456 = vmatpush3.msra.mxu0 %v11648_v30  ;;  %v11661_v30 = vld [vmem:[%s14633_s24 + $0x98] sm:$0xff] }
 0x4f9   : > { %13479 = vmatprep.subr.mxu0 %v16891_v15 }
 0x4fb   : > { %13305 = vmatmul.mubr.msk.f32.gmra.mxu1 %vm2995_vm2, %v3777_v32 }
 0x4fc   : > { %13307 = vmatprep.mubr.msk.f32.mxu1 %vm14561_vm3, %v16891_v15 }
 0x4ff   : > { %13308 = vmatmul.mubr.msk.f32.gmra.mxu1 %vm2995_vm2, %v3778_v33 }
 0x500   : > { %13310 = vmatprep.mubr.msk.f32.mxu1 %vm14561_vm3, %v16891_v15 }
 0x503   : > { %13311 = vmatmul.mubr.msk.f32.gmra.mxu1 %vm2995_vm2, %v3779_v50 }
 0x504   : > { %13321 = vmatprep.mubr.msk.f32.mxu1 %vm14561_vm3, %v16891_v15 }
 0x5a3   : > { %v3873_v40 = vpop.f32.mrf.mxu1 }
 0x5a5   : > { %v13288_v41 = vpop.f32.mrf.mxu1 }
 0x5a7   : > { %v3878_v44 = vpop.f32.mrf.mxu1 }
 0x5a8   : > { %13322 = vmatmul.mubr.msk.f32.vlgmr.msra.gmra.mxu1 %vm3926_vm4, %v3878_v44 }
 0x5a9   : > { %13325 = vmatpush3.msra.mxu1 %v3920_v43  ;;  %v13291_v28 = vpop.f32.mrf.mxu1  ;;  %13332 = vmatprep.mubr.msk.f32.mxu1 %vm14561_vm3, %v16891_v15 }
 0x5aa   : > { %13326 = vmatprep.subr.mxu1 %v16891_v15 }
 0x5ab   : > { %13327 = vmatpush3.msra.mxu1 %v3919_v63  ;;  %v3883_v37 = vpop.f32.mrf.mxu1 }
 0x5ac   : > { %13328 = vmatprep.subr.mxu1 %v16891_v15 }
 0x5ad   : > { %13329 = vmatpush3.msra.mxu1 %v3918_v46  ;;  %v13294_v8 = vpop.f32.mrf.mxu1 }
 0x5ae   : > { %13330 = vmatprep.subr.mxu1 %v16891_v15 }
 0x5af   : > { %13331 = vmatpush3.msra.mxu1 %v3917_v49  ;;  %v3888_v24 = vpop.f32.mrf.mxu1 }
 0x5b0   : > { %13333 = vmatmul.mubr.msk.f32.vlgmr.msra.gmra.mxu1 %vm3926_vm4, %v3873_v40  ;;  %13335 = vmatprep.subr.mxu1 %v16891_v15 }
 0x5b1   : > { %13336 = vmatpush3.msra.mxu1 %v11606_v51  ;;  %13343 = vmatprep.mubr.msk.f32.mxu1 %vm14561_vm3, %v16891_v15  ;;  %v13297_v48 = vpop.f32.mrf.mxu1 }
 0x5b2   : > { %13337 = vmatprep.subr.mxu1 %v16891_v15 }
 0x5b3   : > { %13338 = vmatpush3.msra.mxu1 %v11605_v39  ;;  %v3893_v34 = vpop.f32.mrf.mxu1 }
 0x5b4   : > { %13339 = vmatprep.subr.mxu1 %v16891_v15 }
 0x5b5   : > { %13340 = vmatpush3.msra.mxu1 %v11604_v25  ;;  %v13300_v35 = vpop.f32.mrf.mxu1 }
 0x5b6   : > { %13341 = vmatprep.subr.mxu1 %v16891_v15 }
 0x5b7   : > { %13342 = vmatpush3.msra.mxu1 %v11603_v52  ;;  %v3898_v54 = vpop.f32.mrf.mxu1 }
 0x5b8   : > { %13344 = vmatmul.mubr.msk.f32.vlgmr.msra.gmra.mxu1 %vm3926_vm4, %v3883_v37  ;;  %13346 = vmatprep.subr.mxu1 %v16891_v15 }
 0x5b9   : > { %13347 = vmatpush3.msra.mxu1 %v11611_v45  ;;  %13354 = vmatprep.mubr.msk.f32.mxu1 %vm14561_vm3, %v16891_v15  ;;  %v13303_v57 = vpop.f32.mrf.mxu1 }
 0x5ba   : > { %13348 = vmatprep.subr.mxu1 %v16891_v15 }
 0x5bb   : > { %13349 = vmatpush3.msra.mxu1 %v11610_v55  ;;  %v3903_v62 = vpop.f32.mrf.mxu1 }
 0x5bc   : > { %13350 = vmatprep.subr.mxu1 %v16891_v15 }
 0x5bd   : > { %13351 = vmatpush3.msra.mxu1 %v11609_v61  ;;  %v13306_v5 = vpop.f32.mrf.mxu1 }
 0x5be   : > { %13352 = vmatprep.subr.mxu1 %v16891_v15  ;;  %v4788_v5 = vld [vmem:[%s14633_s24 + $0x38] sm:$0xff] }
 0x5bf   : > { %13353 = vmatpush3.msra.mxu1 %v11608_v0  ;;  %v3908_v17 = vpop.f32.mrf.mxu1  ;;  %v4635_v0 = vld [vmem:[%s14628_s19] sm:$0xff] }
 0x5c0   : > { %13355 = vmatmul.mubr.msk.f32.vlgmr.msra.gmra.mxu1 %vm3926_vm4, %v3888_v24  ;;  %13357 = vmatprep.subr.mxu1 %v16891_v15 }
 0x5c1   : > { %13358 = vmatpush3.msra.mxu1 %v11616_v14  ;;  %13365 = vmatprep.mubr.msk.f32.mxu1 %vm14561_vm3, %v16891_v15  ;;  %v13309_v6 = vpop.f32.mrf.mxu1  ;;  %v4787_v14 = vld [vmem:[%s14633_s24 + $0x30] sm:$0xff] }
 0x5c2   : > { %13359 = vmatprep.subr.mxu1 %v16891_v15  ;;  %v4785_v6 = vld [vmem:[%s14633_s24 + $0x20] sm:$0xff] }
 0x5c3   : > { %13360 = vmatpush3.msra.mxu1 %v11615_v2  ;;  %v15290_v26 = vpop.f32.mrf.mxu1  ;;  %v4786_v2 = vld [vmem:[%s14633_s24 + $0x28] sm:$0xff] }
 0x5c4   : > { %13361 = vmatprep.subr.mxu1 %v16891_v15 }
 0x5c5   : > { %13362 = vmatpush3.msra.mxu1 %v11614_v22  ;;  %v13312_v47 = vpop.f32.mrf.mxu1  ;;  %v4637_v22 = vld [vmem:[%s14628_s19 + $0x10] sm:$0xff] }
 0x5c6   : > { %13363 = vmatprep.subr.mxu1 %v16891_v15  ;;  %v4638_v47 = vld [vmem:[%s14628_s19 + $0x18] sm:$0xff] }
 0x5c7   : > { %13364 = vmatpush3.msra.mxu1 %v11613_v42  ;;  %v4783_v42 = vld [vmem:[%s14633_s24 + $0x10] sm:$0xff] }
 0x5c8   : > { %13366 = vmatmul.mubr.msk.f32.vlgmr.msra.gmra.mxu1 %vm3926_vm4, %v3893_v34  ;;  %13368 = vmatprep.subr.mxu1 %v16891_v15 }
 0x5c9   : > { %13369 = vmatpush3.msra.mxu1 %v11621_v60  ;;  %13376 = vmatprep.mubr.msk.f32.mxu1 %vm14561_vm3, %v16891_v15  ;;  %v4782_v60 = vld [vmem:[%s14633_s24 + $0x8] sm:$0xff] }
 0x5ca   : > { %13370 = vmatprep.subr.mxu1 %v16891_v15 }
 0x5cb   : > { %13371 = vmatpush3.msra.mxu1 %v11620_v18  ;;  %v4639_v18 = vld [vmem:[%s14628_s19 + $0x20] sm:$0xff] }
 0x5cc   : > { %13372 = vmatprep.subr.mxu1 %v16891_v15 }
 0x5cd   : > { %13373 = vmatpush3.msra.mxu1 %v11619_v56  ;;  %v4640_v56 = vld [vmem:[%s14628_s19 + $0x28] sm:$0xff] }
 0x5ce   : > { %13374 = vmatprep.subr.mxu1 %v16891_v15 }
 0x5cf   : > { %13375 = vmatpush3.msra.mxu1 %v11618_v58  ;;  %v4641_v58 = vld [vmem:[%s14628_s19 + $0x30] sm:$0xff] }
 0x5d0   : > { %13377 = vmatmul.mubr.msk.f32.vlgmr.msra.gmra.mxu1 %vm3926_vm4, %v3898_v54  ;;  %13379 = vmatprep.subr.mxu1 %v16891_v15  ;;  %v11638_v54 = vld [vmem:[%s14623_s14] ss:$0 sm:$0xff] }
 0x5d1   : > { %13380 = vmatpush3.msra.mxu1 %v11626_v36  ;;  %13387 = vmatprep.mubr.msk.f32.mxu1 %vm14561_vm3, %v16891_v15  ;;  %v4642_v36 = vld [vmem:[%s14628_s19 + $0x38] sm:$0xff] }
 0x5d2   : > { %13381 = vmatprep.subr.mxu1 %v16891_v15 }
 0x5d3   : > { %13382 = vmatpush3.msra.mxu1 %v11625_v59  ;;  %v4643_v59 = vld [vmem:[%s14628_s19 + $0x40] sm:$0xff] }
 0x5d4   : > { %13383 = vmatprep.subr.mxu1 %v16891_v15 }
 0x5d5   : > { %13384 = vmatpush3.msra.mxu1 %v11624_v9  ;;  %v4781_v9 = vld [vmem:[%s14633_s24] sm:$0xff] }
 0x5d6   : > { %13385 = vmatprep.subr.mxu1 %v16891_v15 }
 0x5d7   : > { %13386 = vmatpush3.msra.mxu1 %v11623_v10  ;;  %v11674_v10 = vld [vmem:[%s14633_s24 + $0xf8] sm:$0xff] }
 0x5d8   : > { %13388 = vmatmul.mubr.msk.f32.vlgmr.msra.gmra.mxu1 %vm3926_vm4, %v3903_v62  ;;  %13390 = vmatprep.subr.mxu1 %v16891_v15 }
 0x5d9   : > { %13391 = vmatpush3.msra.mxu1 %v11631_v7  ;;  %13398 = vmatprep.mubr.msk.f32.mxu1 %vm14561_vm3, %v16891_v15 }
 0x5da   : > { %13392 = vmatprep.subr.mxu1 %v16891_v15 }
 0x5db   : > { %13393 = vmatpush3.msra.mxu1 %v11630_v11  ;;  %v11673_v11 = vld [vmem:[%s14633_s24 + $0xf0] sm:$0xff] }
 0x5dc   : > { %13394 = vmatprep.subr.mxu1 %v16891_v15 }
 0x5dd   : > { %13395 = vmatpush3.msra.mxu1 %v11629_v16 }
 0x5de   : > { %13396 = vmatprep.subr.mxu1 %v16891_v15 }
 0x5df   : > { %13397 = vmatpush3.msra.mxu1 %v11628_v38  ;;  %v11665_v38 = vld [vmem:[%s14633_s24 + $0xb8] sm:$0xff] }
 0x5e0   : > { %13399 = vmatmul.mubr.msk.f32.vlgmr.msra.gmra.mxu1 %vm3926_vm4, %v3908_v17  ;;  %13401 = vmatprep.subr.mxu1 %v16891_v15  ;;  %v4636_v17 = vld [vmem:[%s14628_s19 + $0x8] sm:$0xff] }
 0x5e1   : > { %13402 = vmatpush3.msra.mxu1 %v11636_v13  ;;  %13409 = vmatprep.mubr.msk.f32.mxu1 %vm14561_vm3, %v16891_v15  ;;  %v11672_v13 = vld [vmem:[%s14633_s24 + $0xe8] sm:$0xff] }
 0x5e2   : > { %13403 = vmatprep.subr.mxu1 %v16891_v15 }
 0x5e3   : > { %13404 = vmatpush3.msra.mxu1 %v11635_v53 }
 0x5e4   : > { %13405 = vmatprep.subr.mxu1 %v16891_v15 }
 0x5e5   : > { %13406 = vmatpush3.msra.mxu1 %v11634_v21  ;;  %v11664_v21 = vld [vmem:[%s14633_s24 + $0xb0] sm:$0xff] }
 0x5e6   : > { %13407 = vmatprep.subr.mxu1 %v16891_v15 }
 0x5e7   : > { %13408 = vmatpush3.msra.mxu1 %v11633_v1  ;;  %v11671_v1 = vld [vmem:[%s14633_s24 + $0xe0] sm:$0xff] }
 0x5e8   : > { %13410 = vmatmul.mubr.msk.f32.vlgmr.msra.gmra.mxu1 %vm3926_vm4, %v15290_v26  ;;  %13412 = vmatprep.subr.mxu1 %v16891_v15  ;;  %v4784_v26 = vld [vmem:[%s14633_s24 + $0x18] sm:$0xff] }
 0x5e9   : > { %13414 = vmatprep.mubr.msk.f32.mxu1 %vm14561_vm3, %v16891_v15 }
 0x668   : > { %v3996_v32 = vpop.f32.mrf.mxu1 }
 0x66a   : > { %v13323_v33 = vpop.f32.mrf.mxu1 }
 0x670   : > { %v4069_v50 = vpop.f32.mrf.mxu1 }
 0x671   : > { %v4070_v8 = vadd.f32 %v4069_v50, %v3996_v32  ;;  %v11668_v32 = vld [vmem:[%s14633_s24 + $0xc8] sm:$0xff]  ;;  %v11660_v50 = vld [vmem:[%s14633_s24 + $0x90] sm:$0xff] }
 0x672   : > { %v13334_v19 = vpop.f32.mrf.mxu1 }
 0x673   : > { %v11667_v19 = vld [vmem:[%s14633_s24 + $0xc0] sm:$0xff] }
 0x678   : > { %v4147_v27 = vpop.f32.mrf.mxu1 }
 0x679   : > { %v4151_v51 = vadd.f32 %v4147_v27, %v4070_v8  ;;  %v11690_v8 = vld [vmem:[%s14633_s24 + $0x168] sm:$0xff] }
 0x67a   : > { %v13345_v40 = vpop.f32.mrf.mxu1 }
 0x67b   : > { %v11659_v40 = vld [vmem:[%s14633_s24 + $0x88] sm:$0xff] }
 0x680   : > { %v4226_v41 = vpop.f32.mrf.mxu1 }
 0x681   : > { %v4230_v24 = vadd.f32 %v4226_v41, %v4151_v51 }
 0x682   : > { %v13356_v43 = vpop.f32.mrf.mxu1 }
 0x683   : > { %v11658_v43 = vld [vmem:[%s14633_s24 + $0x80] sm:$0xff] }
 0x688   : > { %v4305_v44 = vpop.f32.mrf.mxu1 }
 0x689   : > { %v4309_v48 = vadd.f32 %v4305_v44, %v4230_v24  ;;  %v11692_v44 = vld [vmem:[%s14633_s24 + $0x178] sm:$0xff]  ;;  %v11681_v24 = vld [vmem:[%s14633_s24 + $0x128] sm:$0xff] }
 0x68a   : > { %v13367_v63 = vpop.f32.mrf.mxu1 }
 0x690   : > { %v4384_v28 = vpop.f32.mrf.mxu1 }
 0x691   : > { %v4388_v34 = vadd.f32 %v4384_v28, %v4309_v48  ;;  %v11683_v28 = vld [vmem:[%s14633_s24 + $0x138] sm:$0xff] }
 0x692   : > { %v13378_v46 = vpop.f32.mrf.mxu1 }
 0x693   : > { %v11691_v46 = vld [vmem:[%s14633_s24 + $0x170] sm:$0xff] }
 0x698   : > { %v4463_v37 = vpop.f32.mrf.mxu1 }
 0x699   : > { %v4467_v52 = vadd.f32 %v4463_v37, %v4388_v34  ;;  %v11688_v34 = vld [vmem:[%s14633_s24 + $0x158] sm:$0xff] }
 0x69a   : > { %v13389_v49 = vpop.f32.mrf.mxu1 }
 0x69b   : > { %v11682_v49 = vld [vmem:[%s14633_s24 + $0x130] sm:$0xff] }
 0x6a0   : > { %v4542_v39 = vpop.f32.mrf.mxu1 }
 0x6a1   : > { %v4546_v35 = vadd.f32 %v4542_v39, %v4467_v52  ;;  %v11689_v39 = vld [vmem:[%s14633_s24 + $0x160] sm:$0xff] }
 0x6a2   : > { %v13400_v25 = vpop.f32.mrf.mxu1 }
 0x6a3   : > { %v11680_v25 = vld [vmem:[%s14633_s24 + $0x120] sm:$0xff] }
 0x6a8   : > { %v4621_v45 = vpop.f32.mrf.mxu1 }
 0x6a9   : > { %v4625_v55 = vadd.f32 %v4621_v45, %v4546_v35  ;;  %v11679_v35 = vld [vmem:[%s14633_s24 + $0x118] sm:$0xff]  ;;  %v11687_v45 = vld [vmem:[%s14633_s24 + $0x150] sm:$0xff] }
 0x6aa   : > { %v13411_v57 = vpop.f32.mrf.mxu1 }
 0x6ab   : > { %v4633_v61 = vadd.f32 %v11638_v54, %v4625_v55  ;;  %v11678_v55 = vld [vmem:[%s14633_s24 + $0x110] sm:$0xff] }
 0x6ad   : > { %v4634_v62 = vmax.f32 %v4633_v61, 0.0  ;;  %v11677_v61 = vld [vmem:[%s14633_s24 + $0x108] sm:$0xff] }
 0x6af   : > { %13413 = vmatpush3.msra.mxu1 %v4634_v62  ;;  %v11686_v62 = vld [vmem:[%s14633_s24 + $0x148] sm:$0xff] }
 0x6b0   : > { %13415 = vmatmul.mubr.msk.f32.vlgmr.msra.gmra.mxu1 %vm1507_vm0, %v4635_v0  ;;  %13460 = vmatprep.subr.mxu1 %v16891_v15 }
 0x6b1   : > { %13417 = vmatprep.mubr.msk.f32.mxu1 %vm14561_vm3, %v16891_v15  ;;  %13461 = vmatpush3.msra.mxu1 %v4788_v5  ;;  %v11676_v5 = vld [vmem:[%s14633_s24 + $0x100] sm:$0xff] }
 0x6b2   : > { %13462 = vmatprep.subr.mxu1 %v16891_v15 }
 0x6b3   : > { %13463 = vmatpush3.msra.mxu1 %v4787_v14  ;;  %v11685_v14 = vld [vmem:[%s14633_s24 + $0x140] sm:$0xff] }
 0x6b4   : > { %13418 = vmatmul.mubr.msk.f32.gmra.mxu1 %vm1507_vm0, %v4636_v17  ;;  %13464 = vmatprep.subr.mxu1 %v16891_v15 }
 0x6b5   : > { %13420 = vmatprep.mubr.msk.f32.mxu1 %vm14561_vm3, %v16891_v15  ;;  %13465 = vmatpush3.msra.mxu1 %v4786_v2  ;;  %v11701_v2 = vld [vmem:[%s14633_s24 + $0x1b8] sm:$0xff] }
 0x6b6   : > { %13466 = vmatprep.subr.mxu1 %v16891_v15 }
 0x6b7   : > { %13467 = vmatpush3.msra.mxu1 %v4785_v6  ;;  %v11700_v6 = vld [vmem:[%s14633_s24 + $0x1b0] sm:$0xff] }
 0x6b8   : > { %13421 = vmatmul.mubr.msk.f32.gmra.mxu1 %vm1507_vm0, %v4637_v22  ;;  %13468 = vmatprep.subr.mxu1 %v16891_v15  ;;  %v11710_v22 = vld [vmem:[%s14633_s24 + $0x1f8] sm:$0xff] }
 0x6b9   : > { %13423 = vmatprep.mubr.msk.f32.mxu1 %vm14561_vm3, %v16891_v15  ;;  %13469 = vmatpush3.msra.mxu1 %v4784_v26  ;;  %v11699_v26 = vld [vmem:[%s14633_s24 + $0x1a8] sm:$0xff] }
 0x6ba   : > { %13470 = vmatprep.subr.mxu1 %v16891_v15 }
 0x6bb   : > { %13471 = vmatpush3.msra.mxu1 %v4783_v42  ;;  %v11709_v42 = vld [vmem:[%s14633_s24 + $0x1f0] sm:$0xff] }
 0x6bc   : > { %13424 = vmatmul.mubr.msk.f32.gmra.mxu1 %vm1507_vm0, %v4638_v47  ;;  %13472 = vmatprep.subr.mxu1 %v16891_v15  ;;  %v11698_v47 = vld [vmem:[%s14633_s24 + $0x1a0] sm:$0xff] }
 0x6bd   : > { %13426 = vmatprep.mubr.msk.f32.mxu1 %vm14561_vm3, %v16891_v15  ;;  %13473 = vmatpush3.msra.mxu1 %v4782_v60  ;;  %v11708_v60 = vld [vmem:[%s14633_s24 + $0x1e8] sm:$0xff] }
 0x6be   : > { %13474 = vmatprep.subr.mxu1 %v16891_v15 }
 0x6bf   : > { %13475 = vmatpush3.msra.mxu1 %v4781_v9  ;;  %v11705_v9 = vld [vmem:[%s14633_s24 + $0x1d0] sm:$0xff] }
 0x6c0   : > { %13427 = vmatmul.mubr.msk.f32.gmra.mxu1 %vm1507_vm0, %v4639_v18  ;;  %13498 = vmatprep.subr.mxu1 %v16891_v15  ;;  %v11697_v18 = vld [vmem:[%s14633_s24 + $0x198] sm:$0xff] }
 0x6c1   : > { %13429 = vmatprep.mubr.msk.f32.mxu1 %vm14561_vm3, %v16891_v15 }
 0x6c4   : > { %13430 = vmatmul.mubr.msk.f32.gmra.mxu1 %vm1507_vm0, %v4640_v56  ;;  %v11707_v56 = vld [vmem:[%s14633_s24 + $0x1e0] sm:$0xff] }
 0x6c5   : > { %13432 = vmatprep.mubr.msk.f32.mxu1 %vm14561_vm3, %v16891_v15 }
 0x6c8   : > { %13433 = vmatmul.mubr.msk.f32.gmra.mxu1 %vm1507_vm0, %v4641_v58  ;;  %v11696_v58 = vld [vmem:[%s14633_s24 + $0x190] sm:$0xff] }
 0x6c9   : > { %13435 = vmatprep.mubr.msk.f32.mxu1 %vm14561_vm3, %v16891_v15 }
 0x6cc   : > { %13436 = vmatmul.mubr.msk.f32.gmra.mxu1 %vm1507_vm0, %v4642_v36  ;;  %v11706_v36 = vld [vmem:[%s14633_s24 + $0x1d8] sm:$0xff] }
 0x6cd   : > { %13438 = vmatprep.mubr.msk.f32.mxu1 %vm14561_vm3, %v16891_v15 }
 0x6d0   : > { %13439 = vmatmul.mubr.msk.f32.gmra.mxu1 %vm1507_vm0, %v4643_v59  ;;  %v11695_v59 = vld [vmem:[%s14633_s24 + $0x188] sm:$0xff] }
 0x6d1   : > { %13476 = vmatprep.mubr.msk.f32.mxu1 %vm14561_vm3, %v16891_v15 }
 0x770   : > { %v4737_v7 = vpop.f32.mrf.mxu1 }
 0x771   : > { %13477 = vmatmul.mubr.msk.f32.vlgmr.msra.gmra.mxu1 %vm2780_vm1, %v4737_v7  ;;  %v11704_v7 = vld [vmem:[%s14633_s24 + $0x1c8] sm:$0xff] }
 0x772   : > { %v13416_v16 = vpop.f32.mrf.mxu1  ;;  %13499 = vmatpush3.msra.mxu1 %v11674_v10  ;;  %13514 = vmatprep.mubr.msk.f32.mxu1 %vm14561_vm3, %v16891_v15  ;;  %v11694_v10 = vld [vmem:[%s14633_s24 + $0x180] sm:$0xff] }
 0x773   : > { %13500 = vmatprep.subr.mxu1 %v16891_v15  ;;  %v11719_v16 = vld [vmem:[%s14633_s24 + $0x238] sm:$0xff] }
 0x774   : > { %v4742_v53 = vpop.f32.mrf.mxu1  ;;  %13501 = vmatpush3.msra.mxu1 %v11673_v11  ;;  %v11703_v11 = vld [vmem:[%s14633_s24 + $0x1c0] sm:$0xff] }
 0x775   : > { %13458 = vmatmul.mubr.msk.f32.vlgmr.msra.gmra.mxu0 %vm2780_vm1, %v4742_v53  ;;  %13502 = vmatprep.subr.mxu1 %v16891_v15  ;;  %v11716_v53 = vld [vmem:[%s14633_s24 + $0x220] sm:$0xff] }
 0x776   : > { %13480 = vmatpush3.msra.mxu0 %v11665_v38  ;;  %v13419_v20 = vpop.f32.mrf.mxu1  ;;  %13503 = vmatpush3.msra.mxu1 %v11672_v13  ;;  %v11718_v38 = vld [vmem:[%s14633_s24 + $0x230] sm:$0xff]  ;;  %v11717_v13 = vld [vmem:[%s14633_s24 + $0x228] sm:$0xff] }
 0x777   : > { %13481 = vmatprep.subr.mxu0 %v16891_v15  ;;  %13504 = vmatprep.subr.mxu1 %v16891_v15  ;;  %v11713_v20 = vld [vmem:[%s14633_s24 + $0x208] sm:$0xff] }
 0x778   : > { %13482 = vmatpush3.msra.mxu0 %v11664_v21  ;;  %13505 = vmatpush3.msra.mxu1 %v11671_v1  ;;  %v4747_v4 = vpop.f32.mrf.mxu1  ;;  %v11715_v21 = vld [vmem:[%s14633_s24 + $0x218] sm:$0xff]  ;;  %v11714_v1 = vld [vmem:[%s14633_s24 + $0x210] sm:$0xff] }
 0x779   : > { %13483 = vmatprep.subr.mxu0 %v16891_v15  ;;  %13506 = vmatprep.subr.mxu1 %v16891_v15 }
 0x77a   : > { %13484 = vmatpush3.msra.mxu0 %v11663_v23  ;;  %13507 = vmatpush3.msra.mxu1 %v11670_v31  ;;  %v13422_v29 = vpop.f32.mrf.mxu1  ;;  %v11712_v23 = vld [vmem:[%s14633_s24 + $0x200] sm:$0xff] }
 0x77b   : > { %13485 = vmatprep.subr.mxu0 %v16891_v15  ;;  %13508 = vmatprep.subr.mxu1 %v16891_v15  ;;  %v5534_v31 = vld [vmem:[%s14643_s6] sm:$0xff] }
 0x77c   : > { %13486 = vmatpush3.msra.mxu0 %v11662_v3  ;;  %13509 = vmatpush3.msra.mxu1 %v11669_v12  ;;  %v4752_v33 = vpop.f32.mrf.mxu1  ;;  %v5665_v3 = vld [vmem:[%s14648_s12 + $0xf0] sm:$0xff]  ;;  %v5664_v12 = vld [vmem:[%s14648_s12 + $0xe8] sm:$0xff]  ;;  %v5663_v29 = vld [vmem:[%s14648_s12 + $0xe0] sm:$0xff] }
 0x77d   : > { %13487 = vmatprep.subr.mxu0 %v16891_v15  ;;  %13510 = vmatprep.subr.mxu1 %v16891_v15 }
 0x77e   : > { %13488 = vmatpush3.msra.mxu0 %v11661_v30  ;;  %13495 = vmatprep.mubr.msk.f32.mxu0 %vm14561_vm3, %v16891_v15  ;;  %v13425_v27 = vpop.f32.mrf.mxu1  ;;  %v5662_v30 = vld [vmem:[%s14648_s12 + $0xd8] sm:$0xff] }
 0x77f   : > { %13489 = vmatprep.subr.mxu0 %v16891_v15  ;;  %13511 = vmatpush3.msra.mxu1 %v11668_v32  ;;  %v5661_v32 = vld [vmem:[%s14648_s12 + $0xd0] sm:$0xff] }
 0x780   : > { %13490 = vmatpush3.msra.mxu0 %v11660_v50  ;;  %13512 = vmatprep.subr.mxu1 %v16891_v15  ;;  %v15447_v41 = vpop.f32.mrf.mxu1  ;;  %v5659_v50 = vld [vmem:[%s14648_s12 + $0xc0] sm:$0xff]  ;;  %v5657_v27 = vld [vmem:[%s14648_s12 + $0xb0] sm:$0xff] }
 0x781   : > { %13491 = vmatprep.subr.mxu0 %v16891_v15  ;;  %13513 = vmatpush3.msra.mxu1 %v11667_v19  ;;  %v5658_v19 = vld [vmem:[%s14648_s12 + $0xb8] sm:$0xff] }
 0x782   : > { %13492 = vmatpush3.msra.mxu0 %v11659_v40  ;;  %13515 = vmatmul.mubr.msk.f32.vlgmr.msra.gmra.mxu1 %vm2780_vm1, %v4752_v33  ;;  %v13428_v63 = vpop.f32.mrf.mxu1  ;;  %v5660_v33 = vld [vmem:[%s14648_s12 + $0xc8] sm:$0xff] }
 0x783   : > { %13493 = vmatprep.subr.mxu0 %v16891_v15  ;;  %13536 = vmatprep.subr.mxu1 %v16891_v15  ;;  %v5656_v40 = vld [vmem:[%s14648_s12 + $0xa8] sm:$0xff] }
 0x784   : > { %13494 = vmatpush3.msra.mxu0 %v11658_v43  ;;  %13537 = vmatpush3.msra.mxu1 %v11692_v44  ;;  %v4762_v37 = vpop.f32.mrf.mxu1  ;;  %v5654_v43 = vld [vmem:[%s14648_s12 + $0x98] sm:$0xff]  ;;  %v5653_v44 = vld [vmem:[%s14648_s12 + $0x90] sm:$0xff]  ;;  %v5652_v63 = vld [vmem:[%s14648_s12 + $0x88] sm:$0xff] }
 0x785   : > { %13496 = vmatmul.mubr.msk.f32.vlgmr.msra.gmra.mxu0 %vm2780_vm1, %v4747_v4  ;;  %13517 = vmatprep.subr.mxu0 %v16891_v15  ;;  %v5666_v4 = vld [vmem:[%s14648_s12 + $0xf8] sm:$0xff] }
 0x786   : > { %13518 = vmatpush3.msra.mxu0 %v11683_v28  ;;  %13538 = vmatprep.subr.mxu1 %v16891_v15  ;;  %v13431_v51 = vpop.f32.mrf.mxu1  ;;  %v5651_v28 = vld [vmem:[%s14648_s12 + $0x80] sm:$0xff] }
 0x787   : > { %13519 = vmatprep.subr.mxu0 %v16891_v15  ;;  %13539 = vmatpush3.msra.mxu1 %v11691_v46  ;;  %v5650_v46 = vld [vmem:[%s14648_s12 + $0x78] sm:$0xff] }
 0x788   : > { %13520 = vmatpush3.msra.mxu0 %v11682_v49  ;;  %13540 = vmatprep.subr.mxu1 %v16891_v15  ;;  %v15466_v48 = vpop.f32.mrf.mxu1  ;;  %v5648_v49 = vld [vmem:[%s14648_s12 + $0x68] sm:$0xff]  ;;  %v5646_v51 = vld [vmem:[%s14648_s12 + $0x58] sm:$0xff] }
 0x789   : > { %13521 = vmatprep.subr.mxu0 %v16891_v15  ;;  %13541 = vmatpush3.msra.mxu1 %v11690_v8  ;;  %v5647_v8 = vld [vmem:[%s14648_s12 + $0x60] sm:$0xff] }
 0x78a   : > { %13522 = vmatpush3.msra.mxu0 %v11681_v24  ;;  %13542 = vmatprep.subr.mxu1 %v16891_v15  ;;  %v13434_v52 = vpop.f32.mrf.mxu1  ;;  %v5645_v24 = vld [vmem:[%s14648_s12 + $0x50] sm:$0xff] }
 0x78b   : > { %13523 = vmatprep.subr.mxu0 %v16891_v15  ;;  %13543 = vmatpush3.msra.mxu1 %v11689_v39  ;;  %v5644_v39 = vld [vmem:[%s14648_s12 + $0x48] sm:$0xff] }
 0x78c   : > { %13524 = vmatpush3.msra.mxu0 %v11680_v25  ;;  %13544 = vmatprep.subr.mxu1 %v16891_v15  ;;  %v15476_v54 = vpop.f32.mrf.mxu1  ;;  %v5642_v25 = vld [vmem:[%s14648_s12 + $0x38] sm:$0xff]  ;;  %v5640_v52 = vld [vmem:[%s14648_s12 + $0x28] sm:$0xff] }
 0x78d   : > { %13525 = vmatprep.subr.mxu0 %v16891_v15  ;;  %13545 = vmatpush3.msra.mxu1 %v11688_v34  ;;  %v5641_v34 = vld [vmem:[%s14648_s12 + $0x30] sm:$0xff] }
 0x78e   : > { %13526 = vmatpush3.msra.mxu0 %v11679_v35  ;;  %13546 = vmatprep.subr.mxu1 %v16891_v15  ;;  %v13437_v57 = vpop.f32.mrf.mxu1  ;;  %v5639_v35 = vld [vmem:[%s14648_s12 + $0x20] sm:$0xff] }
 0x78f   : > { %13527 = vmatprep.subr.mxu0 %v16891_v15  ;;  %13547 = vmatpush3.msra.mxu1 %v11687_v45  ;;  %v5638_v45 = vld [vmem:[%s14648_s12 + $0x18] sm:$0xff] }
 0x790   : > { %13528 = vmatpush3.msra.mxu0 %v11678_v55  ;;  %13548 = vmatprep.subr.mxu1 %v16891_v15  ;;  %v15485_v0 = vpop.f32.mrf.mxu1 }
 0x791   : > { %13529 = vmatprep.subr.mxu0 %v16891_v15  ;;  %13533 = vmatprep.mubr.msk.f32.mxu0 %vm14561_vm3, %v16891_v15 }
 0x792   : > { %13530 = vmatpush3.msra.mxu0 %v11677_v61  ;;  %13549 = vmatpush3.msra.mxu1 %v11686_v62  ;;  %v13440_v17 = vpop.f32.mrf.mxu1 }
 0x793   : > { %13531 = vmatprep.subr.mxu0 %v16891_v15  ;;  %13550 = vmatprep.subr.mxu1 %v16891_v15 }
 0x794   : > { %13532 = vmatpush3.msra.mxu0 %v11676_v5  ;;  %13551 = vmatpush3.msra.mxu1 %v11685_v14 }
 0x795   : > { %13534 = vmatmul.mubr.msk.f32.vlgmr.msra.gmra.mxu0 %vm2780_vm1, %v15447_v41  ;;  %13555 = vmatprep.subr.mxu0 %v16891_v15  ;;  %v5655_v41 = vld [vmem:[%s14648_s12 + $0xa0] sm:$0xff] }
 0x796   : > { %13552 = vmatprep.mubr.msk.f32.mxu1 %vm14561_vm3, %v16891_v15  ;;  %13556 = vmatpush3.msra.mxu0 %v11701_v2 }
 0x797   : > { %13553 = vmatmul.mubr.msk.f32.vlgmr.msra.gmra.mxu1 %vm2780_vm1, %v4762_v37  ;;  %13557 = vmatprep.subr.mxu0 %v16891_v15  ;;  %v5649_v37 = vld [vmem:[%s14648_s12 + $0x70] sm:$0xff] }
 0x798   : > { %13574 = vmatprep.subr.mxu1 %v16891_v15  ;;  %13558 = vmatpush3.msra.mxu0 %v11700_v6 }
 0x799   : > { %13575 = vmatpush3.msra.mxu1 %v11710_v22  ;;  %13559 = vmatprep.subr.mxu0 %v16891_v15 }
 0x79a   : > { %13576 = vmatprep.subr.mxu1 %v16891_v15  ;;  %13560 = vmatpush3.msra.mxu0 %v11699_v26 }
 0x79b   : > { %13577 = vmatpush3.msra.mxu1 %v11709_v42  ;;  %13561 = vmatprep.subr.mxu0 %v16891_v15 }
 0x79c   : > { %13578 = vmatprep.subr.mxu1 %v16891_v15  ;;  %13562 = vmatpush3.msra.mxu0 %v11698_v47 }
 0x79d   : > { %13579 = vmatpush3.msra.mxu1 %v11708_v60  ;;  %13563 = vmatprep.subr.mxu0 %v16891_v15 }
 0x79e   : > { %13580 = vmatprep.subr.mxu1 %v16891_v15  ;;  %13564 = vmatpush3.msra.mxu0 %v11697_v18 }
 0x79f   : > { %13581 = vmatpush3.msra.mxu1 %v11707_v56  ;;  %13565 = vmatprep.subr.mxu0 %v16891_v15 }
 0x7a0   : > { %13582 = vmatprep.subr.mxu1 %v16891_v15  ;;  %13566 = vmatpush3.msra.mxu0 %v11696_v58 }
 0x7a1   : > { %13583 = vmatpush3.msra.mxu1 %v11706_v36  ;;  %13567 = vmatprep.subr.mxu0 %v16891_v15 }
 0x7a2   : > { %13584 = vmatprep.subr.mxu1 %v16891_v15  ;;  %13568 = vmatpush3.msra.mxu0 %v11695_v59 }
 0x7a3   : > { %13585 = vmatpush3.msra.mxu1 %v11705_v9  ;;  %13569 = vmatprep.subr.mxu0 %v16891_v15 }
 0x7a4   : > { %13586 = vmatprep.subr.mxu1 %v16891_v15  ;;  %13570 = vmatpush3.msra.mxu0 %v11694_v10 }
 0x7a5   : > { %13571 = vmatprep.mubr.msk.f32.mxu0 %vm14561_vm3, %v16891_v15  ;;  %13587 = vmatpush3.msra.mxu1 %v11704_v7 }
 0x7a6   : > { %13572 = vmatmul.mubr.msk.f32.vlgmr.msra.gmra.mxu0 %vm2780_vm1, %v15466_v48  ;;  %13588 = vmatprep.subr.mxu1 %v16891_v15  ;;  %v5643_v48 = vld [vmem:[%s14648_s12 + $0x40] sm:$0xff] }
 0x7a7   : > { %13593 = vmatprep.subr.mxu0 %v16891_v15  ;;  %13589 = vmatpush3.msra.mxu1 %v11703_v11 }
 0x7a8   : > { %13590 = vmatprep.mubr.msk.f32.mxu1 %vm14561_vm3, %v16891_v15  ;;  %13594 = vmatpush3.msra.mxu0 %v11719_v16  ;;  %v11721_v16 = vld [vmem:[%s16892_s15] ss:$0 sm:$0xff]  ;;  %s16899_s15 = sld [smem:[#allocation9_spill]] }
 0x7a9   : > { %13591 = vmatmul.mubr.msk.f32.vlgmr.msra.gmra.mxu1 %vm2780_vm1, %v15476_v54  ;;  %13595 = vmatprep.subr.mxu0 %v16891_v15  ;;  %v5637_v54 = vld [vmem:[%s14648_s12 + $0x10] sm:$0xff] }
 0x7aa   : > { %13596 = vmatpush3.msra.mxu0 %v11718_v38  ;;  %13609 = vmatprep.mubr.msk.f32.mxu0 %vm14561_vm3, %v16891_v15 }
 0x7ab   : > { %13597 = vmatprep.subr.mxu0 %v16891_v15  ;;  %13614 = vmatprep.mubr.msk.f32.mxu1 %vm1507_vm0, %v5534_v31  ;;  %v11756_v31 = vld [vmem:[%s14648_s12 + $0x1f0] sm:$0xff] }
 0x7ac   : > { %13598 = vmatpush3.msra.mxu0 %v11717_v13 }
 0x7ad   : > { %13599 = vmatprep.subr.mxu0 %v16891_v15 }
 0x7ae   : > { %13600 = vmatpush3.msra.mxu0 %v11716_v53 }
 0x7af   : > { %13601 = vmatprep.subr.mxu0 %v16891_v15 }
 0x7b0   : > { %13602 = vmatpush3.msra.mxu0 %v11715_v21 }
 0x7b1   : > { %13603 = vmatprep.subr.mxu0 %v16891_v15 }
 0x7b2   : > { %13604 = vmatpush3.msra.mxu0 %v11714_v1  ;;  %v5535_v1 = vld [vmem:[%s14643_s6 + $0x8] sm:$0xff] }
 0x7b3   : > { %13605 = vmatprep.subr.mxu0 %v16891_v15 }
 0x7b4   : > { %13606 = vmatpush3.msra.mxu0 %v11713_v20  ;;  %v11757_v20 = vld [vmem:[%s14648_s12 + $0x1f8] sm:$0xff] }
 0x7b5   : > { %13607 = vmatprep.subr.mxu0 %v16891_v15 }
 0x7b6   : > { %13608 = vmatpush3.msra.mxu0 %v11712_v23  ;;  %v5536_v23 = vld [vmem:[%s14643_s6 + $0x10] sm:$0xff] }
 0x7b7   : > { %13610 = vmatmul.mubr.msk.f32.vlgmr.msra.gmra.mxu0 %vm2780_vm1, %v15485_v0  ;;  %5771 = vmatprep.subr.mxu0 %v5666_v4  ;;  %v11755_v4 = vld [vmem:[%s14648_s12 + $0x1e8] sm:$0xff] }
 0x7b8   : > { %5835 = vmatprep.mubr.f32.mxu0 %v16891_v15  ;;  %5772 = vmatpush1.msra.mxu0 %v5665_v3  ;;  %v11754_v3 = vld [vmem:[%s14648_s12 + $0x1e0] sm:$0xff] }
 0x7b9   : > { %5773 = vmatprep.subr.mxu0 %v5664_v12  ;;  %v5537_v12 = vld [vmem:[%s14643_s6 + $0x18] sm:$0xff] }
 0x7ba   : > { %5774 = vmatpush1.msra.mxu0 %v5663_v29  ;;  %v11753_v29 = vld [vmem:[%s14648_s12 + $0x1d8] sm:$0xff] }
 0x7bb   : > { %5775 = vmatprep.subr.mxu0 %v5662_v30  ;;  %v11752_v30 = vld [vmem:[%s14648_s12 + $0x1d0] sm:$0xff] }
 0x7bc   : > { %5776 = vmatpush1.msra.mxu0 %v5661_v32  ;;  %v11751_v32 = vld [vmem:[%s14648_s12 + $0x1c8] sm:$0xff] }
 0x7bd   : > { %5777 = vmatprep.subr.mxu0 %v5660_v33  ;;  %v11750_v33 = vld [vmem:[%s14648_s12 + $0x1c0] sm:$0xff] }
 0x7be   : > { %5778 = vmatpush1.msra.mxu0 %v5659_v50  ;;  %v11749_v50 = vld [vmem:[%s14648_s12 + $0x1b8] sm:$0xff] }
 0x7bf   : > { %5779 = vmatprep.subr.mxu0 %v5658_v19  ;;  %v11748_v19 = vld [vmem:[%s14648_s12 + $0x1b0] sm:$0xff] }
 0x7c0   : > { %5780 = vmatpush1.msra.mxu0 %v5657_v27  ;;  %v11747_v27 = vld [vmem:[%s14648_s12 + $0x1a8] sm:$0xff] }
 0x7c1   : > { %5781 = vmatprep.subr.mxu0 %v5656_v40  ;;  %v11746_v40 = vld [vmem:[%s14648_s12 + $0x1a0] sm:$0xff] }
 0x7c2   : > { %5782 = vmatpush1.msra.mxu0 %v5655_v41  ;;  %v11745_v41 = vld [vmem:[%s14648_s12 + $0x198] sm:$0xff] }
 0x7c3   : > { %5783 = vmatprep.subr.mxu0 %v5654_v43  ;;  %v11744_v43 = vld [vmem:[%s14648_s12 + $0x190] sm:$0xff] }
 0x7c4   : > { %5784 = vmatpush1.msra.mxu0 %v5653_v44  ;;  %v11743_v44 = vld [vmem:[%s14648_s12 + $0x188] sm:$0xff] }
 0x7c5   : > { %5785 = vmatprep.subr.mxu0 %v5652_v63  ;;  %v11742_v63 = vld [vmem:[%s14648_s12 + $0x180] sm:$0xff] }
 0x7c6   : > { %5786 = vmatpush1.msra.mxu0 %v5651_v28  ;;  %v11741_v28 = vld [vmem:[%s14648_s12 + $0x178] sm:$0xff] }
 0x7c7   : > { %5787 = vmatprep.subr.mxu0 %v5650_v46  ;;  %v11740_v46 = vld [vmem:[%s14648_s12 + $0x170] sm:$0xff] }
 0x7c8   : > { %5788 = vmatpush1.msra.mxu0 %v5649_v37  ;;  %v11739_v37 = vld [vmem:[%s14648_s12 + $0x168] sm:$0xff] }
 0x7c9   : > { %5789 = vmatprep.subr.mxu0 %v5648_v49  ;;  %v11738_v49 = vld [vmem:[%s14648_s12 + $0x160] sm:$0xff] }
 0x7ca   : > { %5790 = vmatpush1.msra.mxu0 %v5647_v8  ;;  %v11737_v8 = vld [vmem:[%s14648_s12 + $0x158] sm:$0xff] }
 0x7cb   : > { %5791 = vmatprep.subr.mxu0 %v5646_v51  ;;  %v11736_v51 = vld [vmem:[%s14648_s12 + $0x150] sm:$0xff] }
 0x7cc   : > { %5792 = vmatpush1.msra.mxu0 %v5645_v24  ;;  %v11735_v24 = vld [vmem:[%s14648_s12 + $0x148] sm:$0xff] }
 0x7cd   : > { %5793 = vmatprep.subr.mxu0 %v5644_v39  ;;  %v11734_v39 = vld [vmem:[%s14648_s12 + $0x140] sm:$0xff] }
 0x7ce   : > { %5794 = vmatpush1.msra.mxu0 %v5643_v48  ;;  %v11733_v48 = vld [vmem:[%s14648_s12 + $0x138] sm:$0xff] }
 0x7cf   : > { %5795 = vmatprep.subr.mxu0 %v5642_v25  ;;  %v11732_v25 = vld [vmem:[%s14648_s12 + $0x130] sm:$0xff] }
 0x7d0   : > { %5796 = vmatpush1.msra.mxu0 %v5641_v34  ;;  %v11731_v34 = vld [vmem:[%s14648_s12 + $0x128] sm:$0xff] }
 0x7d1   : > { %5797 = vmatprep.subr.mxu0 %v5640_v52  ;;  %v11730_v52 = vld [vmem:[%s14648_s12 + $0x120] sm:$0xff] }
 0x7d2   : > { %5798 = vmatpush1.msra.mxu0 %v5639_v35  ;;  %v11729_v35 = vld [vmem:[%s14648_s12 + $0x118] sm:$0xff] }
 0x7d3   : > { %5799 = vmatprep.subr.mxu0 %v5638_v45  ;;  %v11728_v45 = vld [vmem:[%s14648_s12 + $0x110] sm:$0xff] }
 0x7d4   : > { %5800 = vmatpush1.msra.mxu0 %v5637_v54  ;;  %v11727_v54 = vld [vmem:[%s14648_s12 + $0x108] sm:$0xff] }
 0x831   : > { %v4940_v55 = vpop.f32.mrf.mxu1 }
 0x833   : > { %v13478_v57 = vpop.f32.mrf.mxu1 }
 0x834   : > { %v5636_v57 = vld [vmem:[%s14648_s12 + $0x8] sm:$0xff] }
 0x835   : > { %v4867_v61 = vpop.f32.mrf.mxu0  ;;  %5801 = vmatprep.subr.mxu0 %v5636_v57  ;;  %v11759_v57 = vld [vmem:[%s14648_s12 + $0x208] sm:$0xff] }
 0x836   : > { %v4941_v42 = vadd.f32 %v4940_v55, %v4867_v61  ;;  %v11726_v55 = vld [vmem:[%s14648_s12 + $0x100] sm:$0xff]  ;;  %v11789_v61 = vld [vmem:[%s14648_s12 + $0x2f8] sm:$0xff] }
 0x837   : > { %v13459_v62 = vpop.f32.mrf.mxu0 }
 0x838   : > { %v5635_v62 = vld [vmem:[%s14648_s12] sm:$0xff] }
 0x839   : > { %5802 = vmatpush1.msra.mxu0 %v5635_v62  ;;  %v11758_v62 = vld [vmem:[%s14648_s12 + $0x200] sm:$0xff] }
 0x842   : > { %v5105_v0 = vpop.f32.mrf.mxu1 }
 0x844   : > { %v13516_v5 = vpop.f32.mrf.mxu1 }
 0x845   : > { %v5022_v14 = vpop.f32.mrf.mxu0  ;;  %v11788_v5 = vld [vmem:[%s14648_s12 + $0x2f0] sm:$0xff] }
 0x846   : > { %v5026_v47 = vadd.f32 %v5022_v14, %v4941_v42  ;;  %v11819_v42 = vld [vmem:[%s14648_s12 + $0x3e8] sm:$0xff] }
 0x847   : > { %v13497_v17 = vpop.f32.mrf.mxu0 }
 0x848   : > { %v5109_v58 = vadd.f32 %v5105_v0, %v5026_v47  ;;  %v11821_v0 = vld [vmem:[%s14648_s12 + $0x3f8] sm:$0xff]  ;;  %v11787_v17 = vld [vmem:[%s14648_s12 + $0x2e8] sm:$0xff]  ;;  %v11784_v47 = vld [vmem:[%s14648_s12 + $0x2d0] sm:$0xff] }
 0x849   : > { %5981 = vmatprep.subr.mxu0 %v11821_v0  ;;  %v11792_v0 = vld [vmem:[%s14648_s12 + $0x310] sm:$0xff] }
 0x855   : > { %v5188_v2 = vpop.f32.mrf.mxu0 }
 0x856   : > { %v5192_v59 = vadd.f32 %v5188_v2, %v5109_v58  ;;  %v11786_v2 = vld [vmem:[%s14648_s12 + $0x2e0] sm:$0xff] }
 0x857   : > { %v13535_v6 = vpop.f32.mrf.mxu0  ;;  %v5271_v22 = vpop.f32.mrf.mxu1  ;;  %v11782_v58 = vld [vmem:[%s14648_s12 + $0x2c0] sm:$0xff] }
 0x858   : > { %v5275_v9 = vadd.f32 %v5271_v22, %v5192_v59  ;;  %v11820_v6 = vld [vmem:[%s14648_s12 + $0x3f0] sm:$0xff]  ;;  %v11781_v59 = vld [vmem:[%s14648_s12 + $0x2b8] sm:$0xff] }
 0x859   : > { %v13554_v26 = vpop.f32.mrf.mxu1 }
 0x85a   : > { %v11785_v26 = vld [vmem:[%s14648_s12 + $0x2d8] sm:$0xff] }
 0x866   : > { %v5354_v60 = vpop.f32.mrf.mxu0 }
 0x867   : > { %v5358_v10 = vadd.f32 %v5354_v60, %v5275_v9  ;;  %v11818_v60 = vld [vmem:[%s14648_s12 + $0x3e0] sm:$0xff]  ;;  %v11815_v9 = vld [vmem:[%s14648_s12 + $0x3c8] sm:$0xff] }
 0x868   : > { %v13573_v18 = vpop.f32.mrf.mxu0 }
 0x869   : > { %v5437_v56 = vpop.f32.mrf.mxu1  ;;  %v11783_v18 = vld [vmem:[%s14648_s12 + $0x2c8] sm:$0xff] }
 0x86a   : > { %v5441_v7 = vadd.f32 %v5437_v56, %v5358_v10  ;;  %v11817_v56 = vld [vmem:[%s14648_s12 + $0x3d8] sm:$0xff]  ;;  %v11780_v10 = vld [vmem:[%s14648_s12 + $0x2b0] sm:$0xff] }
 0x86b   : > { %v13592_v36 = vpop.f32.mrf.mxu1 }
 0x86c   : > { %v11816_v36 = vld [vmem:[%s14648_s12 + $0x3d0] sm:$0xff] }
 0x877   : > { %v5520_v11 = vpop.f32.mrf.mxu0 }
 0x878   : > { %v5524_v38 = vadd.f32 %v5520_v11, %v5441_v7  ;;  %v11814_v7 = vld [vmem:[%s14648_s12 + $0x3c0] sm:$0xff]  ;;  %v11779_v11 = vld [vmem:[%s14648_s12 + $0x2a8] sm:$0xff] }
 0x879   : > { %v13611_v13 = vpop.f32.mrf.mxu0 }
 0x87a   : > { %v5532_v53 = vadd.f32 %v11721_v16, %v5524_v38  ;;  %v11813_v16 = vld [vmem:[%s14648_s12 + $0x3b8] sm:$0xff]  ;;  %v11778_v38 = vld [vmem:[%s14648_s12 + $0x2a0] sm:$0xff]  ;;  %v11812_v13 = vld [vmem:[%s14648_s12 + $0x3b0] sm:$0xff] }
 0x87c   : > { %v5533_v21 = vmax.f32 %v5532_v53, 0.0  ;;  %v11777_v53 = vld [vmem:[%s14648_s12 + $0x298] sm:$0xff] }
 0x87e   : > { %13612 = vmatprep.subr.mxu1 %v5533_v21 }
 0x87f   : > { %13613 = vmatpush3.msra.mxu1 %v5533_v21  ;;  %v11811_v21 = vld [vmem:[%s14648_s12 + $0x3a8] sm:$0xff] }
 0x880   : > { %13615 = vmatmul.mubr.msk.f32.vlgmr.msra.gmra.mxu1 %vm1507_vm0, %v5535_v1  ;;  %5700 = vmatprep.subr.mxu1 %v11757_v20  ;;  %v11776_v1 = vld [vmem:[%s14648_s12 + $0x290] sm:$0xff]  ;;  %v11810_v20 = vld [vmem:[%s14648_s12 + $0x3a0] sm:$0xff] }
 0x881   : > { %13617 = vmatprep.mubr.msk.f32.mxu1 %vm1507_vm0, %v5536_v23  ;;  %5701 = vmatpush1.msra.mxu1 %v11756_v31  ;;  %v11775_v23 = vld [vmem:[%s14648_s12 + $0x288] sm:$0xff]  ;;  %v11809_v31 = vld [vmem:[%s14648_s12 + $0x398] sm:$0xff] }
 0x882   : > { %5702 = vmatprep.subr.mxu1 %v11755_v4  ;;  %v11774_v4 = vld [vmem:[%s14648_s12 + $0x280] sm:$0xff] }
 0x883   : > { %5703 = vmatpush1.msra.mxu1 %v11754_v3  ;;  %v11808_v3 = vld [vmem:[%s14648_s12 + $0x390] sm:$0xff] }
 0x884   : > { %13618 = vmatmul.mubr.msk.f32.gmra.mxu1 %vm1507_vm0, %v5537_v12  ;;  %5704 = vmatprep.subr.mxu1 %v11753_v29  ;;  %v11773_v12 = vld [vmem:[%s14648_s12 + $0x278] sm:$0xff]  ;;  %v11807_v29 = vld [vmem:[%s14648_s12 + $0x388] sm:$0xff] }
 0x885   : > { %5705 = vmatpush1.msra.mxu1 %v11752_v30  ;;  %5764 = vmatprep.mubr.f32.mxu1 %v16891_v15  ;;  %v11772_v30 = vld [vmem:[%s14648_s12 + $0x270] sm:$0xff] }
 0x886   : > { %5706 = vmatprep.subr.mxu1 %v11751_v32  ;;  %v11806_v32 = vld [vmem:[%s14648_s12 + $0x380] sm:$0xff] }
 0x887   : > { %5707 = vmatpush1.msra.mxu1 %v11750_v33  ;;  %v11771_v33 = vld [vmem:[%s14648_s12 + $0x268] sm:$0xff] }
 0x888   : > { %5708 = vmatprep.subr.mxu1 %v11749_v50  ;;  %v11805_v50 = vld [vmem:[%s14648_s12 + $0x378] sm:$0xff] }
 0x889   : > { %5709 = vmatpush1.msra.mxu1 %v11748_v19  ;;  %v11770_v19 = vld [vmem:[%s14648_s12 + $0x260] sm:$0xff] }
 0x88a   : > { %5710 = vmatprep.subr.mxu1 %v11747_v27  ;;  %v11804_v27 = vld [vmem:[%s14648_s12 + $0x370] sm:$0xff] }
 0x88b   : > { %5711 = vmatpush1.msra.mxu1 %v11746_v40  ;;  %v11769_v40 = vld [vmem:[%s14648_s12 + $0x258] sm:$0xff] }
 0x88c   : > { %5712 = vmatprep.subr.mxu1 %v11745_v41  ;;  %v11803_v41 = vld [vmem:[%s14648_s12 + $0x368] sm:$0xff] }
 0x88d   : > { %5713 = vmatpush1.msra.mxu1 %v11744_v43  ;;  %v11768_v43 = vld [vmem:[%s14648_s12 + $0x250] sm:$0xff] }
 0x88e   : > { %5714 = vmatprep.subr.mxu1 %v11743_v44  ;;  %v11802_v44 = vld [vmem:[%s14648_s12 + $0x360] sm:$0xff] }
 0x88f   : > { %5715 = vmatpush1.msra.mxu1 %v11742_v63  ;;  %v11767_v63 = vld [vmem:[%s14648_s12 + $0x248] sm:$0xff] }
 0x890   : > { %5716 = vmatprep.subr.mxu1 %v11741_v28  ;;  %v11801_v28 = vld [vmem:[%s14648_s12 + $0x358] sm:$0xff] }
 0x891   : > { %5717 = vmatpush1.msra.mxu1 %v11740_v46  ;;  %v11766_v46 = vld [vmem:[%s14648_s12 + $0x240] sm:$0xff] }
 0x892   : > { %5718 = vmatprep.subr.mxu1 %v11739_v37  ;;  %v11800_v37 = vld [vmem:[%s14648_s12 + $0x350] sm:$0xff] }
 0x893   : > { %5719 = vmatpush1.msra.mxu1 %v11738_v49  ;;  %v11765_v49 = vld [vmem:[%s14648_s12 + $0x238] sm:$0xff] }
 0x894   : > { %5720 = vmatprep.subr.mxu1 %v11737_v8  ;;  %v11799_v8 = vld [vmem:[%s14648_s12 + $0x348] sm:$0xff] }
 0x895   : > { %5721 = vmatpush1.msra.mxu1 %v11736_v51  ;;  %v11764_v51 = vld [vmem:[%s14648_s12 + $0x230] sm:$0xff] }
 0x896   : > { %5722 = vmatprep.subr.mxu1 %v11735_v24  ;;  %v11798_v24 = vld [vmem:[%s14648_s12 + $0x340] sm:$0xff] }
 0x897   : > { %5723 = vmatpush1.msra.mxu1 %v11734_v39  ;;  %v11763_v39 = vld [vmem:[%s14648_s12 + $0x228] sm:$0xff] }
 0x898   : > { %5724 = vmatprep.subr.mxu1 %v11733_v48  ;;  %v11797_v48 = vld [vmem:[%s14648_s12 + $0x338] sm:$0xff] }
 0x899   : > { %5725 = vmatpush1.msra.mxu1 %v11732_v25  ;;  %v11762_v25 = vld [vmem:[%s14648_s12 + $0x220] sm:$0xff] }
 0x89a   : > { %5726 = vmatprep.subr.mxu1 %v11731_v34  ;;  %v11796_v34 = vld [vmem:[%s14648_s12 + $0x330] sm:$0xff] }
 0x89b   : > { %5727 = vmatpush1.msra.mxu1 %v11730_v52  ;;  %v11761_v52 = vld [vmem:[%s14648_s12 + $0x218] sm:$0xff] }
 0x89c   : > { %5728 = vmatprep.subr.mxu1 %v11729_v35  ;;  %v11795_v35 = vld [vmem:[%s14648_s12 + $0x328] sm:$0xff] }
 0x89d   : > { %5729 = vmatpush1.msra.mxu1 %v11728_v45  ;;  %v11760_v45 = vld [vmem:[%s14648_s12 + $0x210] sm:$0xff] }
 0x89e   : > { %5730 = vmatprep.subr.mxu1 %v11727_v54  ;;  %v11794_v54 = vld [vmem:[%s14648_s12 + $0x320] sm:$0xff] }
 0x89f   : > { %5731 = vmatpush1.msra.mxu1 %v11726_v55 }
 0x8a0   : > { %5875 = vmatprep.subr.mxu1 %v11789_v61  ;;  %v11793_v61 = vld [vmem:[%s14648_s12 + $0x318] sm:$0xff] }
 0x940   : > { %v13616_v14 = vpop.f32.mrf.mxu1 }
 0x941   : > { %5765 = vmatmul.mubr.f32.vlgmr.msra.gmra.mxu1 %v13616_v14  ;;  %v11790_v14 = vld [vmem:[%s14648_s12 + $0x300] sm:$0xff] }
 0x942   : > { %5876 = vmatpush1.msra.mxu1 %v11788_v5  ;;  %v5616_v22 = vpop.f32.mrf.mxu1  ;;  %5939 = vmatprep.mubr.f32.mxu1 %v16891_v15  ;;  %v11791_v5 = vld [vmem:[%s14648_s12 + $0x308] sm:$0xff] }
 0x943   : > { %5877 = vmatprep.subr.mxu1 %v11787_v17  ;;  %5836 = vmatmul.mubr.f32.vlgmr.msra.gmra.mxu0 %v5616_v22 }
 0x944   : > { %5878 = vmatpush1.msra.mxu1 %v11786_v2  ;;  %5982 = vmatpush1.msra.mxu0 %v11820_v6  ;;  %v13619_v55 = vpop.f32.mrf.mxu1  ;;  %v6056_v2 = vlaneseq }
 0x945   : > { %5879 = vmatprep.subr.mxu1 %v11785_v26  ;;  %5983 = vmatprep.subr.mxu0 %v11819_v42 }
 0x946   : > { %5880 = vmatpush1.msra.mxu1 %v11784_v47  ;;  %5984 = vmatpush1.msra.mxu0 %v11818_v60  ;;  %v5626_v17 = vpop.f32.mrf.mxu1  ;;  %v6057_v6 = vshrl.u32 %v6056_v2, 7  ;;  %v6516_v2 = vld [vmem:[%s16896_s26] sm:$0xff] }
 0x947   : > { %5881 = vmatprep.subr.mxu1 %v11783_v18  ;;  %5985 = vmatprep.subr.mxu0 %v11817_v56  ;;  %v6054_v18 = vld [vmem:[%s16893_s16] sm:$0x3]  ;;  %s16900_s16 = sld [smem:[#allocation10_spill]] }
 0x948   : > { %5882 = vmatpush1.msra.mxu1 %v11782_v58  ;;  %5986 = vmatpush1.msra.mxu0 %v11816_v36  ;;  %v6058_v42 = vsub.s32 0, %v6057_v6  ;;  %v6062_v58 = vsub.s32 1, %v6057_v6  ;;  %v11838_v6 = vld [vmem:[%s16896_s26 + $0x48] sm:$0xff] }
 0x949   : > { %5883 = vmatprep.subr.mxu1 %v11781_v59  ;;  %5987 = vmatprep.subr.mxu0 %v11815_v9 }
 0x94a   : > { %5884 = vmatpush1.msra.mxu1 %v11780_v10  ;;  %5988 = vmatpush1.msra.mxu0 %v11814_v7  ;;  %v6059_v10 = vrot.slane %v6054_v18, %v6058_v42  ;;  %v11856_v42 = vld [vmem:[%s16896_s26 + $0xb8] sm:$0xff] }
 0x94b   : > { %5885 = vmatprep.subr.mxu1 %v11779_v11  ;;  %5989 = vmatprep.subr.mxu0 %v11813_v16 }
 0x94c   : > { %5886 = vmatpush1.msra.mxu1 %v11778_v38  ;;  %5990 = vmatpush1.msra.mxu0 %v11812_v13  ;;  %v6063_v13 = vrot.slane %v6054_v18, %v6062_v58  ;;  %v11865_v18 = vld [vmem:[%s16896_s26 + $0xf0] sm:$0xff]  ;;  %v11864_v58 = vld [vmem:[%s16896_s26 + $0xe8] sm:$0xff] }
 0x94d   : > { %5887 = vmatprep.subr.mxu1 %v11777_v53  ;;  %5991 = vmatprep.subr.mxu0 %v11811_v21 }
 0x94e   : > { %5888 = vmatpush1.msra.mxu1 %v11776_v1  ;;  %5992 = vmatpush1.msra.mxu0 %v11810_v20 }
 0x94f   : > { %5889 = vmatprep.subr.mxu1 %v11775_v23  ;;  %5993 = vmatprep.subr.mxu0 %v11809_v31 }
 0x950   : > { %5890 = vmatpush1.msra.mxu1 %v11774_v4  ;;  %5994 = vmatpush1.msra.mxu0 %v11808_v3  ;;  %v11822_v4 = vld [vmem:[%s16894_s18 + $0x8] sm:$0xff] }
 0x951   : > { %5891 = vmatprep.subr.mxu1 %v11773_v12  ;;  %5995 = vmatprep.subr.mxu0 %v11807_v29  ;;  %v6070_v12 = vld [vmem:[%s16894_s18] sm:$0xff]  ;;  %v11825_v29 = vld [vmem:[%s16894_s18 + $0x10] sm:$0xff] }
 0x952   : > { %5892 = vmatpush1.msra.mxu1 %v11772_v30  ;;  %5996 = vmatpush1.msra.mxu0 %v11806_v32  ;;  %v11827_v32 = vld [vmem:[%s16894_s18 + $0x18] sm:$0xff] }
 0x953   : > { %5893 = vmatprep.subr.mxu1 %v11771_v33  ;;  %5997 = vmatprep.subr.mxu0 %v11805_v50  ;;  %v6379_v33 = vld [vmem:[%s16895_s23] sm:$0xff]  ;;  %v11844_v50 = vld [vmem:[%s16896_s26 + $0x78] sm:$0xff] }
 0x954   : > { %5894 = vmatpush1.msra.mxu1 %v11770_v19  ;;  %5998 = vmatpush1.msra.mxu0 %v11804_v27  ;;  %v11843_v19 = vld [vmem:[%s16896_s26 + $0x70] sm:$0xff]  ;;  %v11842_v27 = vld [vmem:[%s16896_s26 + $0x68] sm:$0xff] }
 0x955   : > { %5895 = vmatprep.subr.mxu1 %v11769_v40  ;;  %5999 = vmatprep.subr.mxu0 %v11803_v41  ;;  %v11841_v40 = vld [vmem:[%s16896_s26 + $0x60] sm:$0xff]  ;;  %v11840_v41 = vld [vmem:[%s16896_s26 + $0x58] sm:$0xff] }
 0x956   : > { %5896 = vmatpush1.msra.mxu1 %v11768_v43  ;;  %6000 = vmatpush1.msra.mxu0 %v11802_v44 }
 0x957   : > { %5897 = vmatprep.subr.mxu1 %v11767_v63  ;;  %6001 = vmatprep.subr.mxu0 %v11801_v28 }
 0x958   : > { %5898 = vmatpush1.msra.mxu1 %v11766_v46  ;;  %6002 = vmatpush1.msra.mxu0 %v11800_v37 }
 0x959   : > { %5899 = vmatprep.subr.mxu1 %v11765_v49  ;;  %6003 = vmatprep.subr.mxu0 %v11799_v8 }
 0x95a   : > { %5900 = vmatpush1.msra.mxu1 %v11764_v51  ;;  %6004 = vmatpush1.msra.mxu0 %v11798_v24 }
 0x95b   : > { %5901 = vmatprep.subr.mxu1 %v11763_v39  ;;  %6005 = vmatprep.subr.mxu0 %v11797_v48  ;;  %v6380_v48 = vld [vmem:[%s16895_s23 + $0x8] sm:$0xff] }
 0x95c   : > { %5902 = vmatpush1.msra.mxu1 %v11762_v25  ;;  %6006 = vmatpush1.msra.mxu0 %v11796_v34  ;;  %v6523_v25 = vld [vmem:[%s16896_s26 + $0x38] sm:$0xff]  ;;  %v6381_v34 = vld [vmem:[%s16895_s23 + $0x10] sm:$0xff] }
 0x95d   : > { %5903 = vmatprep.subr.mxu1 %v11761_v52  ;;  %6007 = vmatprep.subr.mxu0 %v11795_v35  ;;  %v6522_v52 = vld [vmem:[%s16896_s26 + $0x30] sm:$0xff]  ;;  %v6382_v35 = vld [vmem:[%s16895_s23 + $0x18] sm:$0xff] }
 0x95e   : > { %5904 = vmatpush1.msra.mxu1 %v11760_v45  ;;  %6008 = vmatpush1.msra.mxu0 %v11794_v54  ;;  %v6521_v45 = vld [vmem:[%s16896_s26 + $0x28] sm:$0xff]  ;;  %v6383_v54 = vld [vmem:[%s16895_s23 + $0x20] sm:$0xff] }
 0x95f   : > { %5905 = vmatprep.subr.mxu1 %v11759_v57  ;;  %6009 = vmatprep.subr.mxu0 %v11793_v61  ;;  %v6384_v57 = vld [vmem:[%s16895_s23 + $0x28] sm:$0xff]  ;;  %v6519_v61 = vld [vmem:[%s16896_s26 + $0x18] sm:$0xff] }
 0x960   : > { %5906 = vmatpush1.msra.mxu1 %v11758_v62  ;;  %6010 = vmatpush1.msra.mxu0 %v11792_v0  ;;  %v6385_v62 = vld [vmem:[%s16895_s23 + $0x30] sm:$0xff] }
 0x961   : > { %5940 = vmatmul.mubr.f32.vlgmr.msra.gmra.mxu1 %v5626_v17  ;;  %6011 = vmatprep.subr.mxu0 %v11791_v5  ;;  %v6518_v0 = vld [vmem:[%s16896_s26 + $0x10] sm:$0xff]  ;;  %v6386_v5 = vld [vmem:[%s16895_s23 + $0x38] sm:$0xff] }
 0x962   : > { %6012 = vmatpush1.msra.mxu0 %v11790_v14  ;;  %6045 = vmatprep.mubr.f32.mxu0 %v16891_v15  ;;  %v6517_v14 = vld [vmem:[%s16896_s26 + $0x8] sm:$0xff]  ;;  %v11839_v17 = vld [vmem:[%s16896_s26 + $0x50] sm:$0xff] }
 0x963   : > { %6046 = vmatmul.mubr.f32.vlgmr.msra.gmra.mxu0 %v13619_v55  ;;  %13620 = vmatprep.subr.mxu1 %v16891_v15  ;;  %v6520_v55 = vld [vmem:[%s16896_s26 + $0x20] sm:$0xff] }
 0x964   : > { %13622 = vmatprep.mubr.msk.f32.mxu1 %vm14561_vm3, %v16891_v15  ;;  %13642 = vmatprep.mubr.msk.f32.mxu0 %vm1507_vm0, %v6379_v33 }
 0xa01   : > { %v5766_v22 = vpop.f32.mrf.mxu1 }
 0xa03   : > { %v5837_v26 = vpop.f32.mrf.mxu0  ;;  %v5768_v47 = vpop.f32.mrf.mxu1 }
 0xa04   : > { %v5838_v56 = vadd.f32 %v5837_v26, %v5766_v22  ;;  %v11866_v22 = vld [vmem:[%s16896_s26 + $0xf8] sm:$0xff]  ;;  %v11837_v26 = vld [vmem:[%s16896_s26 + $0x40] sm:$0xff] }
 0xa05   : > { %v5839_v60 = vpop.f32.mrf.mxu0 }
 0xa06   : > { %v5840_v59 = vadd.f32 %v5839_v60, %v5768_v47 }
 0xa21   : > { %v5941_v36 = vpop.f32.mrf.mxu1 }
 0xa22   : > { %v5946_v9 = vadd.f32 %v5941_v36, %v5838_v56 }
 0xa23   : > { %v5943_v7 = vpop.f32.mrf.mxu1  ;;  %v6047_v11 = vpop.f32.mrf.mxu0 }
 0xa24   : > { %v5947_v16 = vadd.f32 %v5943_v7, %v5840_v59  ;;  %v6052_v38 = vadd.f32 %v6047_v11, %v5946_v9  ;;  %v11855_v59 = vld [vmem:[%s16896_s26 + $0xb0] sm:$0xff]  ;;  %v11863_v9 = vld [vmem:[%s16896_s26 + $0xe0] sm:$0xff]  ;;  %v11854_v7 = vld [vmem:[%s16896_s26 + $0xa8] sm:$0xff] }
 0xa25   : > { %v6049_v53 = vpop.f32.mrf.mxu0  ;;  %v11862_v11 = vld [vmem:[%s16896_s26 + $0xd8] sm:$0xff] }
 0xa26   : > { %v6053_v21 = vadd.f32 %v6049_v53, %v5947_v16  ;;  %v6066_v1 = vadd.f32 %v6059_v10, %v6052_v38  ;;  %v11853_v38 = vld [vmem:[%s16896_s26 + $0xa0] sm:$0xff]  ;;  %v11852_v53 = vld [vmem:[%s16896_s26 + $0x98] sm:$0xff] }
 0xa28   : > { %v6067_v20 = vadd.f32 %v6063_v13, %v6053_v21  ;;  %v6068_v23 = vmax.f32 %v6066_v1, 0.0  ;;  %v11861_v13 = vld [vmem:[%s16896_s26 + $0xd0] sm:$0xff]  ;;  %v11860_v21 = vld [vmem:[%s16896_s26 + $0xc8] sm:$0xff] }
 0xa2a   : > { %6074 = vrot.lane.b32.xlu0 %v6068_v23, %s14562_s22  ;;  %v6069_v31 = vmax.f32 %v6067_v20, 0.0  ;;  %v11851_v20 = vld [vmem:[%s16896_s26 + $0x90] sm:$0xff] }
 0xa2e   : > { %6302 = vrot.lane.b32.xlu0 %v6069_v31, %s14562_s22 }
 0xa9c   : > { %v6075_v3 = vpop.permute.xlu0 %6074 }
 0xa9d   : > { %13621 = vmatpush3.msra.mxu1 %v6075_v3  ;;  %v11849_v3 = vld [vmem:[%s16896_s26 + $0x80] sm:$0xff] }
 0xa9e   : > { %13623 = vmatmul.mubr.msk.f32.vlgmr.msra.gmra.mxu1 %vm1507_vm0, %v11822_v4  ;;  %13625 = vmatprep.subr.mxu1 %v16891_v15 }
 0xa9f   : > { %13626 = vmatpush3.msra.mxu1 %v6068_v23  ;;  %13627 = vmatprep.mubr.msk.f32.mxu1 %vm14561_vm3, %v16891_v15  ;;  %v11859_v23 = vld [vmem:[%s16896_s26 + $0xc0] sm:$0xff] }
 0xaa0   : > { %13630 = vmatprep.subr.mxu1 %v16891_v15  ;;  %v6303_v30 = vpop.permute.xlu0 %6302 }
 0xaa2   : > { %13628 = vmatmul.mubr.msk.f32.vlgmr.msra.gmra.mxu1 %vm1507_vm0, %v6070_v12 }
 0xaa3   : > { %13631 = vmatpush3.msra.mxu1 %v6069_v31  ;;  %13632 = vmatprep.mubr.msk.f32.mxu1 %vm14561_vm3, %v16891_v15  ;;  %v11850_v31 = vld [vmem:[%s16896_s26 + $0x88] sm:$0xff] }
 0xaa4   : > { %13635 = vmatprep.subr.mxu1 %v16891_v15 }
 0xaa6   : > { %13633 = vmatmul.mubr.msk.f32.vlgmr.msra.gmra.mxu1 %vm1507_vm0, %v11825_v29 }
 0xaa7   : > { %13636 = vmatpush3.msra.mxu1 %v6303_v30  ;;  %13637 = vmatprep.mubr.msk.f32.mxu1 %vm14561_vm3, %v16891_v15 }
 0xaa8   : > { %13654 = vmatprep.subr.mxu1 %v11844_v50 }
 0xaaa   : > { %13638 = vmatmul.mubr.msk.f32.vlgmr.msra.gmra.mxu1 %vm1507_vm0, %v11827_v32 }
 0xaab   : > { %13655 = vmatpush3.msra.mxu1 %v11844_v50 }
 0xaac   : > { %13656 = vmatprep.subr.mxu1 %v11843_v19 }
 0xaad   : > { %13657 = vmatpush3.msra.mxu1 %v11843_v19 }
 0xaae   : > { %13658 = vmatprep.subr.mxu1 %v11842_v27 }
 0xaaf   : > { %13659 = vmatpush3.msra.mxu1 %v11842_v27  ;;  %v6890_v27 = vld [vmem:[%s16897_s28] sm:$0xff] }
 0xab0   : > { %13660 = vmatprep.subr.mxu1 %v11841_v40 }
 0xab1   : > { %13661 = vmatpush3.msra.mxu1 %v11841_v40 }
 0xab2   : > { %13662 = vmatprep.subr.mxu1 %v11840_v41 }
 0xab3   : > { %13663 = vmatpush3.msra.mxu1 %v11840_v41 }
 0xab4   : > { %13664 = vmatprep.subr.mxu1 %v11839_v17 }
 0xab5   : > { %13665 = vmatpush3.msra.mxu1 %v11839_v17 }
 0xab6   : > { %13666 = vmatprep.subr.mxu1 %v11838_v6 }
 0xab7   : > { %13667 = vmatpush3.msra.mxu1 %v11838_v6 }
 0xab8   : > { %13668 = vmatprep.subr.mxu1 %v11837_v26 }
 0xab9   : > { %13669 = vmatpush3.msra.mxu1 %v11837_v26 }
 0xaba   : > { %13692 = vmatprep.subr.mxu1 %v11856_v42 }
 0xb5e   : > { %v6146_v43 = vpop.f32.mrf.mxu1 }
 0xb60   : > { %v13624_v44 = vpop.f32.mrf.mxu1 }
 0xb61   : > { %v11869_v44 = vld [vmem:[%s16898_s1] ss:$0 sm:$0xff]  ;;  %s16902_s1 = sld [smem:[#allocation11_spill]] }
 0xb62   : > { %v6219_v63 = vpop.f32.mrf.mxu1 }
 0xb63   : > { %v6220_v37 = vadd.f32 %v6219_v63, %v6146_v43  ;;  %v11870_v43 = vld [vmem:[%s16897_s28 + $0x10] sm:$0xff] }
 0xb64   : > { %v13629_v28 = vpop.f32.mrf.mxu1 }
 0xb66   : > { %v6294_v46 = vpop.f32.mrf.mxu1 }
 0xb67   : > { %v6298_v8 = vadd.f32 %v6294_v46, %v6220_v37 }
 0xb68   : > { %v13634_v49 = vpop.f32.mrf.mxu1 }
 0xb6a   : > { %v6374_v51 = vpop.f32.mrf.mxu1 }
 0xb6b   : > { %v6378_v24 = vadd.f32 %v6374_v51, %v6298_v8 }
 0xb6c   : > { %v13639_v39 = vpop.f32.mrf.mxu1 }
 0xb6d   : > { %13640 = vmatprep.subr.mxu0 %v6378_v24 }
 0xb6e   : > { %13641 = vmatpush3.msra.mxu0 %v6378_v24 }
 0xb6f   : > { %13643 = vmatmul.mubr.msk.f32.vlgmr.msra.gmra.mxu0 %vm1507_vm0, %v6380_v48  ;;  %13673 = vmatprep.subr.mxu0 %v6523_v25  ;;  %v6891_v48 = vld [vmem:[%s16897_s28 + $0x8] sm:$0xff] }
 0xb70   : > { %13645 = vmatprep.mubr.msk.f32.mxu0 %vm1507_vm0, %v6381_v34  ;;  %13674 = vmatpush3.msra.mxu0 %v6523_v25  ;;  %v11880_v25 = vld [vmem:[%s16897_s28 + $0x30] sm:$0xff] }
 0xb71   : > { %13675 = vmatprep.subr.mxu0 %v6522_v52 }
 0xb72   : > { %13676 = vmatpush3.msra.mxu0 %v6522_v52 }
 0xb73   : > { %13646 = vmatmul.mubr.msk.f32.gmra.mxu0 %vm1507_vm0, %v6382_v35  ;;  %13677 = vmatprep.subr.mxu0 %v6521_v45 }
 0xb74   : > { %13648 = vmatprep.mubr.msk.f32.mxu0 %vm1507_vm0, %v6383_v54  ;;  %13678 = vmatpush3.msra.mxu0 %v6521_v45  ;;  %v11871_v54 = vld [vmem:[%s16897_s28 + $0x18] sm:$0xff] }
 0xb75   : > { %13679 = vmatprep.subr.mxu0 %v6520_v55 }
 0xb76   : > { %13680 = vmatpush3.msra.mxu0 %v6520_v55  ;;  %v11876_v55 = vld [vmem:[%s16897_s28 + $0x20] sm:$0xff] }
 0xb77   : > { %13649 = vmatmul.mubr.msk.f32.gmra.mxu0 %vm1507_vm0, %v6384_v57  ;;  %13681 = vmatprep.subr.mxu0 %v6519_v61 }
 0xb78   : > { %13651 = vmatprep.mubr.msk.f32.mxu0 %vm1507_vm0, %v6385_v62  ;;  %13682 = vmatpush3.msra.mxu0 %v6519_v61  ;;  %v11877_v61 = vld [vmem:[%s16897_s28 + $0x28] sm:$0xff] }
 0xb79   : > { %13683 = vmatprep.subr.mxu0 %v6518_v0 }
 0xb7a   : > { %13684 = vmatpush3.msra.mxu0 %v6518_v0  ;;  %v11881_v0 = vld [vmem:[%s16897_s28 + $0x38] sm:$0xff] }
 0xb7b   : > { %13652 = vmatmul.mubr.msk.f32.gmra.mxu0 %vm1507_vm0, %v6386_v5  ;;  %13685 = vmatprep.subr.mxu0 %v6517_v14  ;;  %v7249_v5 = vld [vmem:[%s16899_s15] sm:$0xff] }
 0xb7c   : > { %13686 = vmatpush3.msra.mxu0 %v6517_v14 }
 0xb7d   : > { %13687 = vmatprep.subr.mxu0 %v6516_v2 }
 0xb7e   : > { %13688 = vmatpush3.msra.mxu0 %v6516_v2 }
 0xb7f   : > { %13711 = vmatprep.subr.mxu0 %v11866_v22 }
 0xc2f   : > { %v13644_v47 = vpop.f32.mrf.mxu0 }
 0xc31   : > { %v6477_v60 = vpop.f32.mrf.mxu0 }
 0xc32   : > { %13689 = vmatprep.mubr.msk.f32.mxu0 %vm2780_vm1, %v6477_v60 }
 0xc33   : > { %v13647_v56 = vpop.f32.mrf.mxu0  ;;  %13690 = vmatmul.mubr.msk.f32.vlgmr.msra.gmra.mxu0 %vm2780_vm1, %v13644_v47 }
 0xc34   : > { %13712 = vmatpush3.msra.mxu0 %v11866_v22 }
 0xc35   : > { %v6487_v36 = vpop.f32.mrf.mxu0  ;;  %13713 = vmatprep.subr.mxu0 %v11865_v18 }
 0xc36   : > { %13670 = vmatprep.mubr.msk.f32.mxu1 %vm2780_vm1, %v6487_v36  ;;  %13714 = vmatpush3.msra.mxu0 %v11865_v18 }
 0xc37   : > { %13671 = vmatmul.mubr.msk.f32.vlgmr.msra.gmra.mxu1 %vm2780_vm1, %v13647_v56  ;;  %13715 = vmatprep.subr.mxu0 %v11864_v58  ;;  %v13650_v10 = vpop.f32.mrf.mxu0 }
 0xc38   : > { %13693 = vmatpush3.msra.mxu1 %v11856_v42  ;;  %13716 = vmatpush3.msra.mxu0 %v11864_v58 }
 0xc39   : > { %13694 = vmatprep.subr.mxu1 %v11855_v59  ;;  %13717 = vmatprep.subr.mxu0 %v11863_v9  ;;  %v6497_v16 = vpop.f32.mrf.mxu0 }
 0xc3a   : > { %13695 = vmatpush3.msra.mxu1 %v11855_v59  ;;  %13718 = vmatpush3.msra.mxu0 %v11863_v9  ;;  %v7250_v9 = vld [vmem:[%s16899_s15 + $0x8] sm:$0xff] }
 0xc3b   : > { %13696 = vmatprep.subr.mxu1 %v11854_v7  ;;  %13719 = vmatprep.subr.mxu0 %v11862_v11  ;;  %v13653_v1 = vpop.f32.mrf.mxu0 }
 0xc3c   : > { %13697 = vmatpush3.msra.mxu1 %v11854_v7  ;;  %13720 = vmatpush3.msra.mxu0 %v11862_v11  ;;  %v7252_v7 = vld [vmem:[%s16899_s15 + $0x18] sm:$0xff]  ;;  %v7253_v11 = vld [vmem:[%s16899_s15 + $0x20] sm:$0xff] }
 0xc3d   : > { %13698 = vmatprep.subr.mxu1 %v11853_v38  ;;  %13721 = vmatprep.subr.mxu0 %v11861_v13  ;;  %v6507_v4 = vpop.f32.mrf.mxu0 }
 0xc3e   : > { %13699 = vmatpush3.msra.mxu1 %v11853_v38  ;;  %13722 = vmatpush3.msra.mxu0 %v11861_v13  ;;  %v7255_v38 = vld [vmem:[%s16899_s15 + $0x30] sm:$0xff]  ;;  %v7256_v13 = vld [vmem:[%s16899_s15 + $0x38] sm:$0xff] }
 0xc3f   : > { %13700 = vmatprep.subr.mxu1 %v11852_v53  ;;  %13723 = vmatprep.subr.mxu0 %v11860_v21 }
 0xc40   : > { %13701 = vmatpush3.msra.mxu1 %v11852_v53  ;;  %13724 = vmatpush3.msra.mxu0 %v11860_v21  ;;  %v7257_v53 = vld [vmem:[%s16899_s15 + $0x40] sm:$0xff]  ;;  %v7258_v21 = vld [vmem:[%s16899_s15 + $0x48] sm:$0xff] }
 0xc41   : > { %13702 = vmatprep.subr.mxu1 %v11851_v20  ;;  %13708 = vmatprep.mubr.msk.f32.mxu1 %vm2780_vm1, %v6497_v16  ;;  %v7254_v16 = vld [vmem:[%s16899_s15 + $0x28] sm:$0xff] }
 0xc42   : > { %13703 = vmatpush3.msra.mxu1 %v11851_v20  ;;  %13725 = vmatprep.subr.mxu0 %v11859_v23  ;;  %v7260_v20 = vld [vmem:[%s16899_s15 + $0x58] sm:$0xff] }
 0xc43   : > { %13704 = vmatprep.subr.mxu1 %v11850_v31  ;;  %13726 = vmatpush3.msra.mxu0 %v11859_v23  ;;  %v7261_v23 = vld [vmem:[%s16899_s15 + $0x60] sm:$0xff] }
 0xc44   : > { %13727 = vmatprep.mubr.msk.f32.mxu0 %vm2780_vm1, %v6507_v4  ;;  %13705 = vmatpush3.msra.mxu1 %v11850_v31  ;;  %v7262_v31 = vld [vmem:[%s16899_s15 + $0x68] sm:$0xff]  ;;  %v7263_v4 = vld [vmem:[%s16899_s15 + $0x70] sm:$0xff] }
 0xc45   : > { %13728 = vmatmul.mubr.msk.f32.vlgmr.msra.gmra.mxu0 %vm2780_vm1, %v13653_v1  ;;  %13706 = vmatprep.subr.mxu1 %v11849_v3  ;;  %v7259_v1 = vld [vmem:[%s16899_s15 + $0x50] sm:$0xff] }
 0xc46   : > { %13707 = vmatpush3.msra.mxu1 %v11849_v3  ;;  %13741 = vmatprep.mubr.msk.f32.mxu0 %vm2995_vm2, %v6890_v27  ;;  %v7264_v3 = vld [vmem:[%s16899_s15 + $0x78] sm:$0xff] }
 0xc47   : > { %13709 = vmatmul.mubr.msk.f32.vlgmr.msra.gmra.mxu1 %vm2780_vm1, %v13650_v10  ;;  %v7251_v10 = vld [vmem:[%s16899_s15 + $0x10] sm:$0xff] }
 0xc48   : > { %13734 = vmatprep.mubr.msk.f32.mxu1 %vm2995_vm2, %v11870_v43 }
 0xcf3   : > { %v13691_v12 = vpop.f32.mrf.mxu0 }
 0xcf5   : > { %v6686_v30 = vpop.f32.mrf.mxu0 }
 0xcf7   : > { %v13672_v29 = vpop.f32.mrf.mxu1 }
 0xcf8   : > { %v6692_v33 = vadd.f32 %v13691_v12, %v13672_v29  ;;  %v11903_v12 = vld [vmem:[%s16900_s16 + $0x38] sm:$0xff]  ;;  %v11902_v29 = vld [vmem:[%s16900_s16 + $0x30] sm:$0xff] }
 0xcf9   : > { %v6605_v32 = vpop.f32.mrf.mxu1 }
 0xcfa   : > { %v6687_v40 = vadd.f32 %v6686_v30, %v6605_v32  ;;  %v11901_v30 = vld [vmem:[%s16900_s16 + $0x28] sm:$0xff]  ;;  %v11900_v32 = vld [vmem:[%s16900_s16 + $0x20] sm:$0xff] }
 0xd05   : > { %v13729_v50 = vpop.f32.mrf.mxu0 }
 0xd07   : > { %v13710_v19 = vpop.f32.mrf.mxu1  ;;  %v6868_v37 = vpop.f32.mrf.mxu0 }
 0xd08   : > { %v6786_v41 = vadd.f32 %v13710_v19, %v6692_v33  ;;  %v7461_v33 = vld [vmem:[%s16900_s16 + $0x18] sm:$0xff] }
 0xd09   : > { %v6776_v63 = vpop.f32.mrf.mxu1 }
 0xd0a   : > { %v6878_v28 = vadd.f32 %v13729_v50, %v6786_v41  ;;  %v6785_v46 = vadd.f32 %v6776_v63, %v6687_v40 }
 0xd0c   : > { %v6887_v49 = vadd.f32 %v11869_v44, %v6878_v28  ;;  %v6877_v8 = vadd.f32 %v6868_v37, %v6785_v46  ;;  %v7459_v28 = vld [vmem:[%s16900_s16 + $0x8] sm:$0xff]  ;;  %v7458_v37 = vld [vmem:[%s16900_s16] sm:$0xff] }
 0xd0e   : > { %v6889_v51 = vmax.f32 %v6887_v49, 0.0  ;;  %v6886_v24 = vadd.f32 %v11869_v44, %v6877_v8  ;;  %v7460_v44 = vld [vmem:[%s16900_s16 + $0x10] sm:$0xff]  ;;  %v11915_v8 = vld [vmem:[%s16900_s16 + $0x58] sm:$0xff] }
 0xd10   : > { %v6888_v39 = vmax.f32 %v6886_v24, 0.0  ;;  %7070 = vrot.lane.b32.xlu0 %v6889_v51, %s14562_s22  ;;  %6899 = vrot.lane.b32.xlu1 %v6889_v51, %s14563_s2  ;;  %v11914_v24 = vld [vmem:[%s16900_s16 + $0x50] sm:$0xff] }
 0xd11   : > { %13737 = vmatprep.subr.mxu0 %v6889_v51 }
 0xd12   : > { %13738 = vmatpush3.msra.mxu0 %v6889_v51 }
 0xd13   : > { %13739 = vmatprep.subr.mxu0 %v6888_v39 }
 0xd14   : > { %13740 = vmatpush3.msra.mxu0 %v6888_v39  ;;  %7162 = vrot.lane.b32.xlu0 %v6889_v51, %s14564_s11 }
 0xd15   : > { %6897 = vrot.lane.b32.xlu1 %v6888_v39, %s14563_s2  ;;  %13742 = vmatmul.mubr.msk.f32.vlgmr.msra.gmra.mxu0 %vm2995_vm2, %v6891_v48  ;;  %v11913_v48 = vld [vmem:[%s16900_s16 + $0x48] sm:$0xff] }
 0xd16   : > { %13755 = vmatprep.mubr.msk.f32.mxu0 %vm2995_vm2, %v11880_v25 }
 0xd19   : > { %7068 = vrot.lane.b32.xlu1 %v6888_v39, %s14562_s22  ;;  %s16901_s22 = sld [smem:[#allocation12_spill]] }
 0xd1d   : > { %7160 = vrot.lane.b32.xlu1 %v6888_v39, %s14564_s11  ;;  %s14565_s11 = smov 112  }
 0xd82   : > { %v7071_v34 = vpop.permute.xlu0 %7070  ;;  %v6900_v52 = vpop.permute.xlu1 %6899 }
 0xd83   : > { %13730 = vmatprep.subr.mxu1 %v6900_v52 }
 0xd84   : > { %13731 = vmatpush3.msra.mxu1 %v6900_v52 }
 0xd86   : > { %v7163_v35 = vpop.permute.xlu0 %7162 }
 0xd87   : > { %v6898_v45 = vpop.permute.xlu1 %6897  ;;  %13751 = vmatprep.subr.mxu0 %v7163_v35 }
 0xd88   : > { %13732 = vmatprep.subr.mxu1 %v6898_v45  ;;  %13752 = vmatpush3.msra.mxu0 %v7163_v35  ;;  %v11923_v35 = vld [vmem:[%s16900_s16 + $0x78] sm:$0xff] }
 0xd89   : > { %13733 = vmatpush3.msra.mxu1 %v6898_v45 }
 0xd8a   : > { %13735 = vmatmul.mubr.msk.f32.vlgmr.msra.gmra.mxu1 %vm2995_vm2, %v11871_v54  ;;  %13744 = vmatprep.subr.mxu1 %v7071_v34  ;;  %v11922_v54 = vld [vmem:[%s16900_s16 + $0x70] sm:$0xff] }
 0xd8b   : > { %13745 = vmatpush3.msra.mxu1 %v7071_v34  ;;  %v7069_v57 = vpop.permute.xlu1 %7068  ;;  %13748 = vmatprep.mubr.msk.f32.mxu1 %vm2995_vm2, %v11876_v55  ;;  %v11912_v34 = vld [vmem:[%s16900_s16 + $0x40] sm:$0xff]  ;;  %v11921_v55 = vld [vmem:[%s16900_s16 + $0x68] sm:$0xff] }
 0xd8c   : > { %13746 = vmatprep.subr.mxu1 %v7069_v57 }
 0xd8d   : > { %13747 = vmatpush3.msra.mxu1 %v7069_v57 }
 0xd8e   : > { %13749 = vmatmul.mubr.msk.f32.vlgmr.msra.gmra.mxu1 %vm2995_vm2, %v11877_v61  ;;  %v11920_v61 = vld [vmem:[%s16900_s16 + $0x60] sm:$0xff] }
 0xd8f   : > { %v7161_v62 = vpop.permute.xlu1 %7160  ;;  %13762 = vmatprep.mubr.msk.f32.mxu1 %vm2995_vm2, %v7249_v5 }
 0xd90   : > { %13753 = vmatprep.subr.mxu0 %v7161_v62 }
 0xd91   : > { %13754 = vmatpush3.msra.mxu0 %v7161_v62 }
 0xd92   : > { %13756 = vmatmul.mubr.msk.f32.vlgmr.msra.gmra.mxu0 %vm2995_vm2, %v11881_v0  ;;  %13786 = vmatprep.subr.mxu0 %v11903_v12 }
 0xd93   : > { %13787 = vmatpush3.msra.mxu0 %v11903_v12 }
 0xd94   : > { %13788 = vmatprep.subr.mxu0 %v11902_v29 }
 0xd95   : > { %13789 = vmatpush3.msra.mxu0 %v11902_v29 }
 0xd96   : > { %13790 = vmatprep.subr.mxu0 %v11901_v30 }
 0xd97   : > { %13791 = vmatpush3.msra.mxu0 %v11901_v30 }
 0xd98   : > { %13792 = vmatprep.subr.mxu0 %v11900_v32 }
 0xd99   : > { %13793 = vmatpush3.msra.mxu0 %v11900_v32 }
 0xd9a   : > { %13800 = vmatprep.subr.mxu0 %v7461_v33 }
 0xdd5   : > { %v13743_v17 = vpop.f32.mrf.mxu0 }
 0xdd7   : > { %v7056_v22 = vpop.f32.mrf.mxu0 }
 0xe4a   : > { %v13736_v14 = vpop.f32.mrf.mxu1 }
 0xe4b   : > { %v7062_v6 = vadd.f32 %v13743_v17, %v13736_v14 }
 0xe4c   : > { %v6975_v2 = vpop.f32.mrf.mxu1 }
 0xe4d   : > { %v7057_v47 = vadd.f32 %v7056_v22, %v6975_v2 }
 0xe4e   : > { %v13750_v26 = vpop.f32.mrf.mxu1 }
 0xe4f   : > { %v7156_v60 = vadd.f32 %v13750_v26, %v7062_v6 }
 0xe50   : > { %v7146_v42 = vpop.f32.mrf.mxu1 }
 0xe51   : > { %v7155_v56 = vadd.f32 %v7146_v42, %v7057_v47 }
 0xe52   : > { %v13757_v18 = vpop.f32.mrf.mxu0 }
 0xe53   : > { %v7248_v58 = vadd.f32 %v13757_v18, %v7156_v60 }
 0xe54   : > { %v7238_v36 = vpop.f32.mrf.mxu0 }
 0xe55   : > { %v7247_v59 = vadd.f32 %v7238_v36, %v7155_v56  ;;  %13758 = vmatprep.subr.mxu1 %v7248_v58 }
 0xe56   : > { %13759 = vmatpush3.msra.mxu1 %v7248_v58 }
 0xe57   : > { %13760 = vmatprep.subr.mxu1 %v7247_v59 }
 0xe58   : > { %13761 = vmatpush3.msra.mxu1 %v7247_v59 }
 0xe59   : > { %13763 = vmatmul.mubr.msk.f32.vlgmr.msra.gmra.mxu1 %vm2995_vm2, %v7250_v9 }
 0xe5a   : > { %13765 = vmatprep.mubr.msk.f32.mxu1 %vm2995_vm2, %v7251_v10 }
 0xe5d   : > { %13766 = vmatmul.mubr.msk.f32.gmra.mxu1 %vm2995_vm2, %v7252_v7 }
 0xe5e   : > { %13768 = vmatprep.mubr.msk.f32.mxu1 %vm2995_vm2, %v7253_v11 }
 0xe61   : > { %13769 = vmatmul.mubr.msk.f32.gmra.mxu1 %vm2995_vm2, %v7254_v16 }
 0xe62   : > { %13771 = vmatprep.mubr.msk.f32.mxu1 %vm2995_vm2, %v7255_v38 }
 0xe65   : > { %13772 = vmatmul.mubr.msk.f32.gmra.mxu1 %vm2995_vm2, %v7256_v13  ;;  %v11929_v13 = vld [vmem:[%s16901_s22 + $0x40] sm:$0xff] }
 0xe66   : > { %13774 = vmatprep.mubr.msk.f32.mxu1 %vm2995_vm2, %v7257_v53  ;;  %v7888_v53 = vld [vmem:[%s16901_s22] sm:$0xff] }
 0xe69   : > { %13775 = vmatmul.mubr.msk.f32.gmra.mxu1 %vm2995_vm2, %v7258_v21 }
 0xe6a   : > { %13777 = vmatprep.mubr.msk.f32.mxu1 %vm2995_vm2, %v7259_v1 }
 0xe6d   : > { %13778 = vmatmul.mubr.msk.f32.gmra.mxu1 %vm2995_vm2, %v7260_v20 }
 0xe6e   : > { %13780 = vmatprep.mubr.msk.f32.mxu1 %vm2995_vm2, %v7261_v23  ;;  %v11928_v23 = vld [vmem:[%s16902_s1] ss:$0 sm:$0xff]  ;;  %s14566_s1 = smov 80  }
 0xe71   : > { %13781 = vmatmul.mubr.msk.f32.gmra.mxu1 %vm2995_vm2, %v7262_v31 }
 0xe72   : > { %13783 = vmatprep.mubr.msk.f32.mxu1 %vm2995_vm2, %v7263_v4 }
 0xe75   : > { %13784 = vmatmul.mubr.msk.f32.gmra.mxu1 %vm2995_vm2, %v7264_v3 }
 0xe76   : > { %13850 = vmatprep.mubr.msk.f32.mxu1 %vm3926_vm4, %v11929_v13 }
 0xf19   : > { %v13764_v50 = vpop.f32.mrf.mxu1 }
 0xf1b   : > { %v7379_v19 = vpop.f32.mrf.mxu1 }
 0xf1d   : > { %v13767_v27 = vpop.f32.mrf.mxu1 }
 0xf1f   : > { %v7389_v40 = vpop.f32.mrf.mxu1 }
 0xf21   : > { %v13770_v41 = vpop.f32.mrf.mxu1 }
 0xf23   : > { %v7399_v43 = vpop.f32.mrf.mxu1 }
 0xf24   : > { %13794 = vmatprep.mubr.msk.f32.mxu0 %vm3926_vm4, %v7399_v43  ;;  %v7891_v43 = vld [vmem:[%s16901_s22 + $0x18] sm:$0xff] }
 0xf25   : > { %v13773_v63 = vpop.f32.mrf.mxu1  ;;  %13795 = vmatmul.mubr.msk.f32.vlgmr.msra.gmra.mxu0 %vm3926_vm4, %v13770_v41  ;;  %v7890_v41 = vld [vmem:[%s16901_s22 + $0x10] sm:$0xff] }
 0xf26   : > { %13801 = vmatpush3.msra.mxu0 %v7461_v33 }
 0xf27   : > { %v7409_v46 = vpop.f32.mrf.mxu1  ;;  %13802 = vmatprep.subr.mxu0 %v7460_v44 }
 0xf28   : > { %13797 = vmatprep.mubr.msk.f32.mxu0 %vm3926_vm4, %v7409_v46  ;;  %13803 = vmatpush3.msra.mxu0 %v7460_v44  ;;  %v7892_v44 = vld [vmem:[%s16901_s22 + $0x20] sm:$0xff]  ;;  %v7895_v46 = vld [vmem:[%s16901_s22 + $0x38] sm:$0xff] }
 0xf29   : > { %13798 = vmatmul.mubr.msk.f32.gmra.mxu0 %vm3926_vm4, %v13773_v63  ;;  %13804 = vmatprep.subr.mxu0 %v7459_v28  ;;  %v13776_v49 = vpop.f32.mrf.mxu1  ;;  %v7893_v63 = vld [vmem:[%s16901_s22 + $0x28] sm:$0xff] }
 0xf2a   : > { %13805 = vmatpush3.msra.mxu0 %v7459_v28  ;;  %13808 = vmatprep.mubr.msk.f32.mxu0 %vm3926_vm4, %v7379_v19  ;;  %v7894_v28 = vld [vmem:[%s16901_s22 + $0x30] sm:$0xff] }
 0xf2b   : > { %13806 = vmatprep.subr.mxu0 %v7458_v37  ;;  %v7419_v51 = vpop.f32.mrf.mxu1 }
 0xf2c   : > { %13807 = vmatpush3.msra.mxu0 %v7458_v37  ;;  %v11969_v37 = vld [vmem:[%s16901_s22 + $0xc0] sm:$0xff] }
 0xf2d   : > { %13809 = vmatmul.mubr.msk.f32.vlgmr.msra.gmra.mxu0 %vm3926_vm4, %v13764_v50  ;;  %13814 = vmatprep.subr.mxu0 %v11915_v8  ;;  %v13779_v39 = vpop.f32.mrf.mxu1 }
 0xf2e   : > { %13811 = vmatprep.mubr.msk.f32.mxu0 %vm3926_vm4, %v7389_v40  ;;  %13815 = vmatpush3.msra.mxu0 %v11915_v8  ;;  %v7889_v40 = vld [vmem:[%s16901_s22 + $0x8] sm:$0xff] }
 0xf2f   : > { %13816 = vmatprep.subr.mxu0 %v11914_v24  ;;  %v7429_v25 = vpop.f32.mrf.mxu1 }
 0xf30   : > { %13817 = vmatpush3.msra.mxu0 %v11914_v24 }
 0xf31   : > { %13812 = vmatmul.mubr.msk.f32.gmra.mxu0 %vm3926_vm4, %v13767_v27  ;;  %13818 = vmatprep.subr.mxu0 %v11913_v48  ;;  %v13782_v52 = vpop.f32.mrf.mxu1 }
 0xf32   : > { %13819 = vmatpush3.msra.mxu0 %v11913_v48  ;;  %13822 = vmatprep.mubr.msk.f32.mxu0 %vm3926_vm4, %v7419_v51  ;;  %v11931_v48 = vld [vmem:[%s16901_s22 + $0x50] sm:$0xff] }
 0xf33   : > { %13820 = vmatprep.subr.mxu0 %v11912_v34  ;;  %v7439_v45 = vpop.f32.mrf.mxu1 }
 0xf34   : > { %13821 = vmatpush3.msra.mxu0 %v11912_v34 }
 0xf35   : > { %13823 = vmatmul.mubr.msk.f32.vlgmr.msra.gmra.mxu0 %vm3926_vm4, %v13776_v49  ;;  %13828 = vmatprep.subr.mxu0 %v11923_v35  ;;  %v13785_v57 = vpop.f32.mrf.mxu1 }
 0xf36   : > { %13825 = vmatprep.mubr.msk.f32.mxu0 %vm3926_vm4, %v7429_v25  ;;  %13829 = vmatpush3.msra.mxu0 %v11923_v35  ;;  %v11933_v35 = vld [vmem:[%s16901_s22 + $0x60] sm:$0xff] }
 0xf37   : > { %13830 = vmatprep.subr.mxu0 %v11922_v54  ;;  %v7449_v62 = vpop.f32.mrf.mxu1 }
 0xf38   : > { %13831 = vmatpush3.msra.mxu0 %v11922_v54 }
 0xf39   : > { %13826 = vmatmul.mubr.msk.f32.gmra.mxu0 %vm3926_vm4, %v13779_v39  ;;  %13832 = vmatprep.subr.mxu0 %v11921_v55  ;;  %v11930_v39 = vld [vmem:[%s16901_s22 + $0x48] sm:$0xff] }
 0xf3a   : > { %13833 = vmatpush3.msra.mxu0 %v11921_v55  ;;  %13836 = vmatprep.mubr.msk.f32.mxu0 %vm3926_vm4, %v7439_v45  ;;  %v11934_v55 = vld [vmem:[%s16901_s22 + $0x68] sm:$0xff] }
 0xf3b   : > { %13834 = vmatprep.subr.mxu0 %v11920_v61 }
 0xf3c   : > { %13835 = vmatpush3.msra.mxu0 %v11920_v61  ;;  %v11935_v61 = vld [vmem:[%s16901_s22 + $0x70] sm:$0xff] }
 0xf3d   : > { %13837 = vmatmul.mubr.msk.f32.vlgmr.msra.gmra.mxu0 %vm3926_vm4, %v13782_v52  ;;  %v11932_v52 = vld [vmem:[%s16901_s22 + $0x58] sm:$0xff] }
 0xf3e   : > { %13839 = vmatprep.mubr.msk.f32.mxu0 %vm3926_vm4, %v7449_v62 }
 0xf41   : > { %13840 = vmatmul.mubr.msk.f32.gmra.mxu0 %vm3926_vm4, %v13785_v57 }
 0xf42   : > { %13870 = vmatprep.mubr.msk.f32.mxu0 %vm3926_vm4, %v7888_v53 }
 0xfe5   : > { %v13796_v0 = vpop.f32.mrf.mxu0 }
 0xfe7   : > { %v7545_v5 = vpop.f32.mrf.mxu0 }
 0xfe9   : > { %v13799_v14 = vpop.f32.mrf.mxu0 }
 0xfeb   : > { %v7555_v17 = vpop.f32.mrf.mxu0 }
 0xfed   : > { %v13810_v2 = vpop.f32.mrf.mxu0 }
 0xfee   : > { %v7648_v58 = vadd.f32 %v13810_v2, %v13796_v0  ;;  %v11936_v0 = vld [vmem:[%s16901_s22 + $0x78] sm:$0xff]  ;;  %v11954_v2 = vld [vmem:[%s16901_s22 + $0x88] sm:$0xff] }
 0xfef   : > { %v7642_v6 = vpop.f32.mrf.mxu0 }
 0xff0   : > { %v7643_v59 = vadd.f32 %v7642_v6, %v7545_v5  ;;  %v11953_v5 = vld [vmem:[%s16901_s22 + $0x80] sm:$0xff]  ;;  %v11970_v6 = vld [vmem:[%s16901_s22 + $0xc8] sm:$0xff] }
 0xff1   : > { %v13813_v22 = vpop.f32.mrf.mxu0 }
 0xff2   : > { %v7658_v36 = vadd.f32 %v13813_v22, %v13799_v14  ;;  %v11955_v22 = vld [vmem:[%s16901_s22 + $0x90] sm:$0xff] }
 0xff3   : > { %v7652_v26 = vpop.f32.mrf.mxu0 }
 0xff4   : > { %v7653_v10 = vadd.f32 %v7652_v26, %v7555_v17  ;;  %v11971_v26 = vld [vmem:[%s16901_s22 + $0xd0] sm:$0xff] }
 0xff5   : > { %v13824_v42 = vpop.f32.mrf.mxu0 }
 0xff6   : > { %v7764_v7 = vadd.f32 %v13824_v42, %v7648_v58  ;;  %v11956_v42 = vld [vmem:[%s16901_s22 + $0x98] sm:$0xff]  ;;  %v11974_v58 = vld [vmem:[%s16901_s22 + $0xe8] sm:$0xff] }
 0xff7   : > { %v7744_v47 = vpop.f32.mrf.mxu0 }
 0xff8   : > { %v7763_v16 = vadd.f32 %v7744_v47, %v7643_v59  ;;  %v11972_v47 = vld [vmem:[%s16901_s22 + $0xd8] sm:$0xff]  ;;  %v11975_v59 = vld [vmem:[%s16901_s22 + $0xf0] sm:$0xff] }
 0xff9   : > { %v13827_v60 = vpop.f32.mrf.mxu0 }
 0xffa   : > { %v7766_v11 = vadd.f32 %v13827_v60, %v7658_v36  ;;  %v11957_v60 = vld [vmem:[%s16901_s22 + $0xa0] sm:$0xff]  ;;  %v11959_v36 = vld [vmem:[%s16901_s22 + $0xb0] sm:$0xff] }
 0xffb   : > { %v7754_v18 = vpop.f32.mrf.mxu0 }
 0xffc   : > { %v7765_v21 = vadd.f32 %v7754_v18, %v7653_v10  ;;  %v11973_v18 = vld [vmem:[%s16901_s22 + $0xe0] sm:$0xff]  ;;  %v11976_v10 = vld [vmem:[%s16901_s22 + $0xf8] sm:$0xff] }
 0xffd   : > { %v13838_v56 = vpop.f32.mrf.mxu0 }
 0xffe   : > { %v7870_v1 = vadd.f32 %v13838_v56, %v7764_v7  ;;  %v11958_v56 = vld [vmem:[%s16901_s22 + $0xa8] sm:$0xff] }
 0xfff   : > { %v7850_v9 = vpop.f32.mrf.mxu0 }
0x1000   : > { %v7869_v4 = vadd.f32 %v7850_v9, %v7763_v16  ;;  %v7881_v29 = vadd.f32 %v11928_v23, %v7870_v1  ;;  %v11960_v9 = vld [vmem:[%s16901_s22 + $0xb8] sm:$0xff] }
0x1001   : > { %v13841_v38 = vpop.f32.mrf.mxu0 }
0x1002   : > { %v7872_v20 = vadd.f32 %v13841_v38, %v7766_v11  ;;  %v7880_v33 = vadd.f32 %v11928_v23, %v7869_v4  ;;  %v7885_v19 = vmax.f32 %v7881_v29, 0.0 }
0x1003   : > { %v7860_v31 = vpop.f32.mrf.mxu0 }
0x1004   : > { %v7883_v3 = vadd.f32 %v11928_v23, %v7872_v20  ;;  %v7871_v12 = vadd.f32 %v7860_v31, %v7765_v21  ;;  %v7884_v27 = vmax.f32 %v7880_v33, 0.0 }
0x1006   : > { %v7887_v30 = vmax.f32 %v7883_v3, 0.0  ;;  %v7882_v32 = vadd.f32 %v11928_v23, %v7871_v12 }
0x1008   : > { %v7886_v50 = vmax.f32 %v7882_v32, 0.0  ;;  %7915 = vrot.lane.b32.xlu0 %v7887_v30, %s14565_s11  ;;  %13862 = vmatprep.subr.mxu0 %v7887_v30 }
0x1009   : > { %13863 = vmatpush3.msra.mxu0 %v7887_v30 }
0x100a   : > { %7913 = vrot.lane.b32.xlu1 %v7886_v50, %s14565_s11  ;;  %13864 = vmatprep.subr.mxu0 %v7886_v50 }
0x100b   : > { %13865 = vmatpush3.msra.mxu0 %v7886_v50 }
0x100c   : > { %7911 = vrot.lane.b32.xlu0 %v7885_v19, %s14565_s11  ;;  %13866 = vmatprep.subr.mxu0 %v7885_v19 }
0x100d   : > { %13867 = vmatpush3.msra.mxu0 %v7885_v19 }
0x100e   : > { %7909 = vrot.lane.b32.xlu1 %v7884_v27, %s14565_s11  ;;  %13868 = vmatprep.subr.mxu0 %v7884_v27  ;;  %s14567_s11 = smov 125  }
0x100f   : > { %13869 = vmatpush3.msra.mxu0 %v7884_v27 }
0x1010   : > { %8194 = vrot.lane.b32.xlu0 %v7887_v30, %s14563_s2  ;;  %13871 = vmatmul.mubr.msk.f32.vlgmr.msra.gmra.mxu0 %vm3926_vm4, %v7889_v40 }
0x1011   : > { %13873 = vmatprep.mubr.msk.f32.mxu0 %vm3926_vm4, %v7890_v41 }
0x1012   : > { %8190 = vrot.lane.b32.xlu1 %v7885_v19, %s14563_s2 }
0x1014   : > { %8352 = vrot.lane.b32.xlu0 %v7887_v30, %s14566_s1  ;;  %13874 = vmatmul.mubr.msk.f32.gmra.mxu0 %vm3926_vm4, %v7891_v43 }
0x1015   : > { %13876 = vmatprep.mubr.msk.f32.mxu0 %vm3926_vm4, %v7892_v44 }
0x1016   : > { %8192 = vrot.lane.b32.xlu1 %v7886_v50, %s14563_s2 }
0x1018   : > { %8350 = vrot.lane.b32.xlu0 %v7886_v50, %s14566_s1  ;;  %13877 = vmatmul.mubr.msk.f32.gmra.mxu0 %vm3926_vm4, %v7893_v63 }
0x1019   : > { %13879 = vmatprep.mubr.msk.f32.mxu0 %vm3926_vm4, %v7894_v28 }
0x101a   : > { %8188 = vrot.lane.b32.xlu1 %v7884_v27, %s14563_s2  ;;  %s16903_s2 = sld [smem:[#allocation13_spill]] }
0x101c   : > { %8348 = vrot.lane.b32.xlu0 %v7885_v19, %s14566_s1  ;;  %13880 = vmatmul.mubr.msk.f32.gmra.mxu0 %vm3926_vm4, %v7895_v46 }
0x101d   : > { %13910 = vmatprep.mubr.msk.f32.mxu0 %vm3926_vm4, %v11969_v37 }
0x101e   : > { %8346 = vrot.lane.b32.xlu1 %v7884_v27, %s14566_s1  ;;  %s14568_s1 = smov 119  }
0x1020   : > { %v8495_v7 = vld [vmem:[%s16903_s2] sm:$0xff] }
0x107a   : > { %v7916_v49 = vpop.permute.xlu0 %7915 }
0x107b   : > { %13842 = vmatprep.subr.mxu1 %v7916_v49 }
0x107c   : > { %13843 = vmatpush3.msra.mxu1 %v7916_v49  ;;  %v7914_v8 = vpop.permute.xlu1 %7913 }
0x107d   : > { %13844 = vmatprep.subr.mxu1 %v7914_v8 }
0x107e   : > { %v7912_v51 = vpop.permute.xlu0 %7911  ;;  %13845 = vmatpush3.msra.mxu1 %v7914_v8 }
0x107f   : > { %13846 = vmatprep.subr.mxu1 %v7912_v51 }
0x1080   : > { %13847 = vmatpush3.msra.mxu1 %v7912_v51  ;;  %v7910_v24 = vpop.permute.xlu1 %7909 }
0x1081   : > { %13848 = vmatprep.subr.mxu1 %v7910_v24 }
0x1082   : > { %v8195_v25 = vpop.permute.xlu0 %8194  ;;  %13849 = vmatpush3.msra.mxu1 %v7910_v24 }
0x1083   : > { %13851 = vmatmul.mubr.msk.f32.vlgmr.msra.gmra.mxu1 %vm3926_vm4, %v11930_v39  ;;  %13882 = vmatprep.subr.mxu1 %v8195_v25 }
0x1084   : > { %13883 = vmatpush3.msra.mxu1 %v8195_v25  ;;  %v8191_v34 = vpop.permute.xlu1 %8190  ;;  %13853 = vmatprep.mubr.msk.f32.mxu1 %vm3926_vm4, %v11931_v48 }
0x1086   : > { %v8353_v45 = vpop.permute.xlu0 %8352 }
0x1087   : > { %13854 = vmatmul.mubr.msk.f32.gmra.mxu1 %vm3926_vm4, %v11932_v52  ;;  %13902 = vmatprep.subr.mxu0 %v8353_v45 }
0x1088   : > { %v8193_v54 = vpop.permute.xlu1 %8192  ;;  %13903 = vmatpush3.msra.mxu0 %v8353_v45  ;;  %13856 = vmatprep.mubr.msk.f32.mxu1 %vm3926_vm4, %v11933_v35 }
0x1089   : > { %13884 = vmatprep.subr.mxu1 %v8193_v54 }
0x108a   : > { %v8351_v57 = vpop.permute.xlu0 %8350  ;;  %13885 = vmatpush3.msra.mxu1 %v8193_v54 }
0x108b   : > { %13857 = vmatmul.mubr.msk.f32.gmra.mxu1 %vm3926_vm4, %v11934_v55  ;;  %13886 = vmatprep.subr.mxu1 %v8191_v34 }
0x108c   : > { %13904 = vmatprep.subr.mxu0 %v8351_v57  ;;  %13887 = vmatpush3.msra.mxu1 %v8191_v34  ;;  %v8189_v62 = vpop.permute.xlu1 %8188 }
0x108d   : > { %13905 = vmatpush3.msra.mxu0 %v8351_v57  ;;  %13888 = vmatprep.subr.mxu1 %v8189_v62 }
0x108e   : > { %v8349_v14 = vpop.permute.xlu0 %8348  ;;  %13859 = vmatprep.mubr.msk.f32.mxu1 %vm3926_vm4, %v11935_v61  ;;  %13889 = vmatpush3.msra.mxu1 %v8189_v62 }
0x108f   : > { %13860 = vmatmul.mubr.msk.f32.gmra.mxu1 %vm3926_vm4, %v11936_v0  ;;  %13906 = vmatprep.subr.mxu0 %v8349_v14 }
0x1090   : > { %v8347_v17 = vpop.permute.xlu1 %8346  ;;  %13907 = vmatpush3.msra.mxu0 %v8349_v14  ;;  %13890 = vmatprep.mubr.msk.f32.mxu1 %vm3926_vm4, %v11953_v5 }
0x1091   : > { %13908 = vmatprep.subr.mxu0 %v8347_v17 }
0x1092   : > { %13909 = vmatpush3.msra.mxu0 %v8347_v17 }
0x1093   : > { %13891 = vmatmul.mubr.msk.f32.vlgmr.msra.gmra.mxu1 %vm3926_vm4, %v11954_v2  ;;  %13911 = vmatmul.mubr.msk.f32.vlgmr.msra.gmra.mxu0 %vm3926_vm4, %v11970_v6 }
0x1094   : > { %13893 = vmatprep.mubr.msk.f32.mxu1 %vm3926_vm4, %v11955_v22  ;;  %13913 = vmatprep.mubr.msk.f32.mxu0 %vm3926_vm4, %v11971_v26 }
0x1095   : > { %14004 = vmatprep.subr.mxu0 %v16891_v15 }
0x1097   : > { %13894 = vmatmul.mubr.msk.f32.gmra.mxu1 %vm3926_vm4, %v11956_v42  ;;  %13914 = vmatmul.mubr.msk.f32.gmra.mxu0 %vm3926_vm4, %v11972_v47 }
0x1098   : > { %13896 = vmatprep.mubr.msk.f32.mxu1 %vm3926_vm4, %v11957_v60  ;;  %13916 = vmatprep.mubr.msk.f32.mxu0 %vm3926_vm4, %v11973_v18 }
0x109b   : > { %13897 = vmatmul.mubr.msk.f32.gmra.mxu1 %vm3926_vm4, %v11958_v56  ;;  %13917 = vmatmul.mubr.msk.f32.gmra.mxu0 %vm3926_vm4, %v11974_v58  ;;  %v8496_v56 = vld [vmem:[%s16903_s2 + $0x8] sm:$0xff]  ;;  %v8497_v58 = vld [vmem:[%s16903_s2 + $0x10] sm:$0xff] }
0x109c   : > { %13899 = vmatprep.mubr.msk.f32.mxu1 %vm3926_vm4, %v11959_v36  ;;  %13919 = vmatprep.mubr.msk.f32.mxu0 %vm3926_vm4, %v11975_v59  ;;  %v8498_v36 = vld [vmem:[%s16903_s2 + $0x18] sm:$0xff]  ;;  %v8499_v59 = vld [vmem:[%s16903_s2 + $0x20] sm:$0xff] }
0x109f   : > { %13900 = vmatmul.mubr.msk.f32.gmra.mxu1 %vm3926_vm4, %v11960_v9  ;;  %13920 = vmatmul.mubr.msk.f32.gmra.mxu0 %vm3926_vm4, %v11976_v10  ;;  %v8500_v9 = vld [vmem:[%s16903_s2 + $0x28] sm:$0xff]  ;;  %v8501_v10 = vld [vmem:[%s16903_s2 + $0x30] sm:$0xff] }
0x10a0   : > { %14008 = vmatprep.mubr.msk.f32.mxu0 %vm14561_vm3, %v16891_v15  ;;  %13938 = vmatprep.mubr.msk.f32.mxu1 %vm2780_vm1, %v8495_v7  ;;  %v8502_v7 = vld [vmem:[%s16903_s2 + $0x38] sm:$0xff] }
0x10d0   : > { %v13872_v11 = vpop.f32.mrf.mxu0 }
0x10d2   : > { %v8140_v16 = vpop.f32.mrf.mxu0 }
0x10d4   : > { %v13875_v38 = vpop.f32.mrf.mxu0 }
0x10d6   : > { %v8150_v13 = vpop.f32.mrf.mxu0 }
0x10d8   : > { %v13878_v21 = vpop.f32.mrf.mxu0 }
0x10da   : > { %v8160_v23 = vpop.f32.mrf.mxu0 }
0x10dc   : > { %v13881_v3 = vpop.f32.mrf.mxu0 }
0x10de   : > { %v8170_v30 = vpop.f32.mrf.mxu0 }
0x1143   : > { %v13852_v53 = vpop.f32.mrf.mxu1 }
0x1144   : > { %v8146_v14 = vadd.f32 %v13872_v11, %v13852_v53  ;;  %v8503_v11 = vld [vmem:[%s16903_s2 + $0x40] sm:$0xff] }
0x1145   : > { %v8011_v1 = vpop.f32.mrf.mxu1  ;;  %v8507_v53 = vld [vmem:[%s16903_s2 + $0x60] sm:$0xff] }
0x1146   : > { %v8141_v6 = vadd.f32 %v8140_v16, %v8011_v1  ;;  %v8504_v16 = vld [vmem:[%s16903_s2 + $0x48] sm:$0xff]  ;;  %v8509_v1 = vld [vmem:[%s16903_s2 + $0x70] sm:$0xff] }
0x1147   : > { %v13855_v20 = vpop.f32.mrf.mxu1 }
0x1148   : > { %v8156_v55 = vadd.f32 %v13875_v38, %v13855_v20  ;;  %v8505_v38 = vld [vmem:[%s16903_s2 + $0x50] sm:$0xff]  ;;  %v8510_v20 = vld [vmem:[%s16903_s2 + $0x78] sm:$0xff] }
0x1149   : > { %v8021_v31 = vpop.f32.mrf.mxu1 }
0x114a   : > { %v8151_v62 = vadd.f32 %v8150_v13, %v8021_v31  ;;  %v8506_v13 = vld [vmem:[%s16903_s2 + $0x58] sm:$0xff]  ;;  %v8512_v31 = vld [vmem:[%s16903_s2 + $0x88] sm:$0xff] }
0x114b   : > { %v13858_v4 = vpop.f32.mrf.mxu1 }
0x114c   : > { %v8166_v24 = vadd.f32 %v13878_v21, %v13858_v4  ;;  %v8508_v21 = vld [vmem:[%s16903_s2 + $0x68] sm:$0xff]  ;;  %v8513_v4 = vld [vmem:[%s16903_s2 + $0x90] sm:$0xff] }
0x114d   : > { %v8031_v12 = vpop.f32.mrf.mxu1 }
0x114e   : > { %v8161_v34 = vadd.f32 %v8160_v23, %v8031_v12  ;;  %v8511_v23 = vld [vmem:[%s16903_s2 + $0x80] sm:$0xff] }
0x114f   : > { %v13861_v29 = vpop.f32.mrf.mxu1  ;;  %v8515_v12 = vld [vmem:[%s16903_s2 + $0xa0] sm:$0xff] }
0x1150   : > { %v8176_v49 = vadd.f32 %v13881_v3, %v13861_v29  ;;  %v8514_v3 = vld [vmem:[%s16903_s2 + $0x98] sm:$0xff]  ;;  %v8516_v29 = vld [vmem:[%s16903_s2 + $0xa8] sm:$0xff] }
0x1151   : > { %v8041_v32 = vpop.f32.mrf.mxu1 }
0x1152   : > { %v8171_v39 = vadd.f32 %v8170_v30, %v8041_v32  ;;  %v8517_v30 = vld [vmem:[%s16903_s2 + $0xb0] sm:$0xff]  ;;  %v8518_v32 = vld [vmem:[%s16903_s2 + $0xb8] sm:$0xff] }
0x1153   : > { %v13892_v33 = vpop.f32.mrf.mxu1  ;;  %v13912_v50 = vpop.f32.mrf.mxu0 }
0x1154   : > { %v8330_v22 = vadd.f32 %v13892_v33, %v8146_v14  ;;  %v8519_v33 = vld [vmem:[%s16903_s2 + $0xc0] sm:$0xff] }
0x1155   : > { %v8290_v19 = vpop.f32.mrf.mxu1  ;;  %v8448_v27 = vpop.f32.mrf.mxu0 }
0x1156   : > { %v8329_v42 = vadd.f32 %v8290_v19, %v8141_v6  ;;  %v8488_v60 = vadd.f32 %v13912_v50, %v8330_v22  ;;  %v8520_v50 = vld [vmem:[%s16903_s2 + $0xc8] sm:$0xff]  ;;  %v8521_v19 = vld [vmem:[%s16903_s2 + $0xd0] sm:$0xff] }
0x1157   : > { %v13895_v40 = vpop.f32.mrf.mxu1  ;;  %v13915_v41 = vpop.f32.mrf.mxu0  ;;  %v8957_v22 = vld [vmem:[%s14708_s30 + $0x8] sm:$0xff] }
0x1158   : > { %v8332_v0 = vadd.f32 %v13895_v40, %v8156_v55  ;;  %v8487_v18 = vadd.f32 %v8448_v27, %v8329_v42  ;;  %v8522_v27 = vld [vmem:[%s16903_s2 + $0xd8] sm:$0xff]  ;;  %v8523_v40 = vld [vmem:[%s16903_s2 + $0xe0] sm:$0xff] }
0x1159   : > { %v8300_v43 = vpop.f32.mrf.mxu1  ;;  %v8458_v44 = vpop.f32.mrf.mxu0  ;;  %v8956_v42 = vld [vmem:[%s14708_s30] sm:$0xff] }
0x115a   : > { %v8331_v17 = vadd.f32 %v8300_v43, %v8151_v62  ;;  %v8490_v26 = vadd.f32 %v13915_v41, %v8332_v0  ;;  %v8524_v41 = vld [vmem:[%s16903_s2 + $0xe8] sm:$0xff]  ;;  %v8525_v43 = vld [vmem:[%s16903_s2 + $0xf0] sm:$0xff] }
0x115b   : > { %v13898_v63 = vpop.f32.mrf.mxu1  ;;  %v13918_v28 = vpop.f32.mrf.mxu0 }
0x115c   : > { %v8334_v52 = vadd.f32 %v13898_v63, %v8166_v24  ;;  %v8489_v47 = vadd.f32 %v8458_v44, %v8331_v17  ;;  %v8526_v44 = vld [vmem:[%s16903_s2 + $0xf8] sm:$0xff]  ;;  %v8527_v63 = vld [vmem:[%s16903_s2 + $0x100] sm:$0xff] }
0x115d   : > { %v8310_v46 = vpop.f32.mrf.mxu1  ;;  %v8468_v37 = vpop.f32.mrf.mxu0  ;;  %v8534_v24 = vld [vmem:[%s16903_s2 + $0x138] sm:$0xff] }
0x115e   : > { %v8333_v57 = vadd.f32 %v8310_v46, %v8161_v34  ;;  %v8492_v5 = vadd.f32 %v13918_v28, %v8334_v52  ;;  %v8528_v28 = vld [vmem:[%s16903_s2 + $0x108] sm:$0xff]  ;;  %v8529_v46 = vld [vmem:[%s16903_s2 + $0x110] sm:$0xff]  ;;  %v8538_v34 = vld [vmem:[%s16903_s2 + $0x158] sm:$0xff] }
0x115f   : > { %v13901_v8 = vpop.f32.mrf.mxu1  ;;  %v13921_v51 = vpop.f32.mrf.mxu0  ;;  %v12030_v52 = vld [vmem:[%s14708_s30 + $0x18] sm:$0xff] }
0x1160   : > { %v8336_v48 = vadd.f32 %v13901_v8, %v8176_v49  ;;  %v8491_v2 = vadd.f32 %v8468_v37, %v8333_v57  ;;  %v8530_v37 = vld [vmem:[%s16903_s2 + $0x118] sm:$0xff]  ;;  %v8531_v49 = vld [vmem:[%s16903_s2 + $0x120] sm:$0xff]  ;;  %v8532_v8 = vld [vmem:[%s16903_s2 + $0x128] sm:$0xff]  ;;  %14005 = vmatpush3.msra.mxu0 %v12030_v52 }
0x1161   : > { %v8320_v25 = vpop.f32.mrf.mxu1  ;;  %v8478_v54 = vpop.f32.mrf.mxu0  ;;  %14006 = vmatprep.subr.mxu0 %v16891_v15 }
0x1162   : > { %v8335_v35 = vadd.f32 %v8320_v25, %v8171_v39  ;;  %v8494_v45 = vadd.f32 %v13921_v51, %v8336_v48  ;;  %v8533_v51 = vld [vmem:[%s16903_s2 + $0x130] sm:$0xff]  ;;  %v8535_v39 = vld [vmem:[%s16903_s2 + $0x140] sm:$0xff]  ;;  %v8536_v48 = vld [vmem:[%s16903_s2 + $0x148] sm:$0xff] }
0x1163   : > { %v8537_v25 = vld [vmem:[%s16903_s2 + $0x150] sm:$0xff] }
0x1164   : > { %v8493_v61 = vadd.f32 %v8478_v54, %v8335_v35  ;;  %13922 = vmatprep.subr.mxu1 %v8494_v45  ;;  %v12029_v35 = vld [vmem:[%s14708_s30 + $0x10] sm:$0xff]  ;;  %v12053_v54 = vld [vmem:[%s14708_s30 + $0x20] sm:$0xff] }
0x1165   : > { %13923 = vmatpush3.msra.mxu1 %v8494_v45  ;;  %14007 = vmatpush3.msra.mxu0 %v12029_v35  ;;  %v12054_v45 = vld [vmem:[%s14708_s30 + $0x28] sm:$0xff] }
0x1166   : > { %13924 = vmatprep.subr.mxu1 %v8493_v61  ;;  %14041 = vmatprep.subr.mxu0 %v16891_v15 }
0x1167   : > { %13925 = vmatpush3.msra.mxu1 %v8493_v61 }
0x1168   : > { %13926 = vmatprep.subr.mxu1 %v8492_v5 }
0x1169   : > { %13927 = vmatpush3.msra.mxu1 %v8492_v5 }
0x116a   : > { %13928 = vmatprep.subr.mxu1 %v8491_v2 }
0x116b   : > { %13929 = vmatpush3.msra.mxu1 %v8491_v2 }
0x116c   : > { %13930 = vmatprep.subr.mxu1 %v8490_v26 }
0x116d   : > { %13931 = vmatpush3.msra.mxu1 %v8490_v26 }
0x116e   : > { %13932 = vmatprep.subr.mxu1 %v8489_v47 }
0x116f   : > { %13933 = vmatpush3.msra.mxu1 %v8489_v47 }
0x1170   : > { %13934 = vmatprep.subr.mxu1 %v8488_v60 }
0x1171   : > { %13935 = vmatpush3.msra.mxu1 %v8488_v60 }
0x1172   : > { %13936 = vmatprep.subr.mxu1 %v8487_v18 }
0x1173   : > { %13937 = vmatpush3.msra.mxu1 %v8487_v18 }
0x1174   : > { %13939 = vmatmul.mubr.msk.f32.vlgmr.msra.gmra.mxu1 %vm2780_vm1, %v8496_v56  ;;  %14078 = vmatprep.subr.mxu1 %v16891_v15 }
0x1175   : > { %13941 = vmatprep.mubr.msk.f32.mxu1 %vm2780_vm1, %v8497_v58  ;;  %14079 = vmatpush3.msra.mxu1 %v12054_v45 }
0x1176   : > { %14080 = vmatprep.subr.mxu1 %v16891_v15 }
0x1177   : > { %14081 = vmatpush3.msra.mxu1 %v12053_v54 }
0x1178   : > { %13942 = vmatmul.mubr.msk.f32.gmra.mxu1 %vm2780_vm1, %v8498_v36 }
0x1179   : > { %13944 = vmatprep.mubr.msk.f32.mxu1 %vm2780_vm1, %v8499_v59 }
0x117c   : > { %13945 = vmatmul.mubr.msk.f32.gmra.mxu1 %vm2780_vm1, %v8500_v9 }
0x117d   : > { %13947 = vmatprep.mubr.msk.f32.mxu1 %vm2780_vm1, %v8501_v10 }
0x1180   : > { %13948 = vmatmul.mubr.msk.f32.gmra.mxu1 %vm2780_vm1, %v8502_v7 }
0x1181   : > { %13950 = vmatprep.mubr.msk.f32.mxu1 %vm2780_vm1, %v8503_v11 }
0x1184   : > { %13951 = vmatmul.mubr.msk.f32.gmra.mxu1 %vm2780_vm1, %v8504_v16 }
0x1185   : > { %13953 = vmatprep.mubr.msk.f32.mxu1 %vm2780_vm1, %v8505_v38 }
0x1188   : > { %13954 = vmatmul.mubr.msk.f32.gmra.mxu1 %vm2780_vm1, %v8506_v13 }
0x1189   : > { %13956 = vmatprep.mubr.msk.f32.mxu1 %vm2780_vm1, %v8507_v53 }
0x118c   : > { %13957 = vmatmul.mubr.msk.f32.gmra.mxu1 %vm2780_vm1, %v8508_v21 }
0x118d   : > { %13959 = vmatprep.mubr.msk.f32.mxu1 %vm2780_vm1, %v8509_v1 }
0x1190   : > { %13960 = vmatmul.mubr.msk.f32.gmra.mxu1 %vm2780_vm1, %v8510_v20 }
0x1191   : > { %13962 = vmatprep.mubr.msk.f32.mxu1 %vm2780_vm1, %v8511_v23  ;;  %v12067_v23 = vld [vmem:[%s14708_s30 + $0x38] sm:$0xff] }
0x1194   : > { %13963 = vmatmul.mubr.msk.f32.gmra.mxu1 %vm2780_vm1, %v8512_v31 }
0x1195   : > { %13965 = vmatprep.mubr.msk.f32.mxu1 %vm2780_vm1, %v8513_v4  ;;  %v12066_v4 = vld [vmem:[%s14708_s30 + $0x30] sm:$0xff] }
0x1198   : > { %13966 = vmatmul.mubr.msk.f32.gmra.mxu1 %vm2780_vm1, %v8514_v3 }
0x1199   : > { %13968 = vmatprep.mubr.msk.f32.mxu1 %vm2780_vm1, %v8515_v12 }
0x119c   : > { %13969 = vmatmul.mubr.msk.f32.gmra.mxu1 %vm2780_vm1, %v8516_v29 }
0x119d   : > { %13971 = vmatprep.mubr.msk.f32.mxu1 %vm2780_vm1, %v8517_v30 }
0x11a0   : > { %13972 = vmatmul.mubr.msk.f32.gmra.mxu1 %vm2780_vm1, %v8518_v32 }
0x11a1   : > { %13974 = vmatprep.mubr.msk.f32.mxu1 %vm2780_vm1, %v8519_v33 }
0x11a4   : > { %13975 = vmatmul.mubr.msk.f32.gmra.mxu1 %vm2780_vm1, %v8520_v50 }
0x11a5   : > { %13977 = vmatprep.mubr.msk.f32.mxu1 %vm2780_vm1, %v8521_v19 }
0x11a8   : > { %13978 = vmatmul.mubr.msk.f32.gmra.mxu1 %vm2780_vm1, %v8522_v27 }
0x11a9   : > { %13980 = vmatprep.mubr.msk.f32.mxu1 %vm2780_vm1, %v8523_v40 }
0x11ac   : > { %13981 = vmatmul.mubr.msk.f32.gmra.mxu1 %vm2780_vm1, %v8524_v41 }
0x11ad   : > { %13983 = vmatprep.mubr.msk.f32.mxu1 %vm2780_vm1, %v8525_v43 }
0x11b0   : > { %13984 = vmatmul.mubr.msk.f32.gmra.mxu1 %vm2780_vm1, %v8526_v44 }
0x11b1   : > { %13986 = vmatprep.mubr.msk.f32.mxu1 %vm2780_vm1, %v8527_v63 }
0x11b4   : > { %13987 = vmatmul.mubr.msk.f32.gmra.mxu1 %vm2780_vm1, %v8528_v28 }
0x11b5   : > { %13989 = vmatprep.mubr.msk.f32.mxu1 %vm2780_vm1, %v8529_v46 }
0x11b8   : > { %13990 = vmatmul.mubr.msk.f32.gmra.mxu1 %vm2780_vm1, %v8530_v37 }
0x11b9   : > { %13992 = vmatprep.mubr.msk.f32.mxu1 %vm2780_vm1, %v8531_v49 }
0x11bc   : > { %13993 = vmatmul.mubr.msk.f32.gmra.mxu1 %vm2780_vm1, %v8532_v8 }
0x11bd   : > { %13995 = vmatprep.mubr.msk.f32.mxu1 %vm2780_vm1, %v8533_v51 }
0x11c0   : > { %13996 = vmatmul.mubr.msk.f32.gmra.mxu1 %vm2780_vm1, %v8534_v24 }
0x11c1   : > { %13998 = vmatprep.mubr.msk.f32.mxu1 %vm2780_vm1, %v8535_v39 }
0x11c4   : > { %13999 = vmatmul.mubr.msk.f32.gmra.mxu1 %vm2780_vm1, %v8536_v48 }
0x11c5   : > { %14001 = vmatprep.mubr.msk.f32.mxu1 %vm2780_vm1, %v8537_v25 }
0x11c8   : > { %14002 = vmatmul.mubr.msk.f32.gmra.mxu1 %vm2780_vm1, %v8538_v34 }
0x11c9   : > { %14082 = vmatprep.mubr.msk.f32.mxu1 %vm14561_vm3, %v16891_v15 }
0x1234   : > { %v16034_v55 = vpop.f32.mrf.mxu1 }
0x1236   : > { %v16036_v57 = vpop.f32.mrf.mxu1 }
0x1238   : > { %v16038_v61 = vpop.f32.mrf.mxu1 }
0x123a   : > { %v16040_v62 = vpop.f32.mrf.mxu1 }
0x123c   : > { %v16042_v0 = vpop.f32.mrf.mxu1 }
0x123e   : > { %v16044_v5 = vpop.f32.mrf.mxu1 }
0x1240   : > { %v16046_v14 = vpop.f32.mrf.mxu1 }
0x1242   : > { %v16048_v17 = vpop.f32.mrf.mxu1 }
0x1244   : > { %v16050_v2 = vpop.f32.mrf.mxu1 }
0x1246   : > { %v16052_v6 = vpop.f32.mrf.mxu1 }
0x1248   : > { %v13955_v26 = vpop.f32.mrf.mxu1 }
0x1249   : > { %14009 = vmatmul.mubr.msk.f32.vlgmr.msra.gmra.mxu0 %vm2995_vm2, %v13955_v26 }
0x124a   : > { %v16057_v47 = vpop.f32.mrf.mxu1  ;;  %14011 = vmatprep.mubr.msk.f32.mxu0 %vm14561_vm3, %v16891_v15  ;;  %14042 = vmatpush3.msra.mxu0 %v8957_v22 }
0x124b   : > { %14043 = vmatprep.subr.mxu0 %v16891_v15 }
0x124c   : > { %v13958_v60 = vpop.f32.mrf.mxu1  ;;  %14044 = vmatpush3.msra.mxu0 %v8956_v42 }
0x124d   : > { %14115 = vmatprep.subr.mxu0 %v16891_v15 }
0x124e   : > { %v8797_v18 = vpop.f32.mrf.mxu1 }
0x124f   : > { %14012 = vmatmul.mubr.msk.f32.gmra.mxu0 %vm2995_vm2, %v8797_v18 }
0x1250   : > { %14014 = vmatprep.mubr.msk.f32.mxu0 %vm14561_vm3, %v16891_v15  ;;  %v13961_v56 = vpop.f32.mrf.mxu1 }
0x1252   : > { %v8807_v58 = vpop.f32.mrf.mxu1 }
0x1253   : > { %14015 = vmatmul.mubr.msk.f32.gmra.mxu0 %vm2995_vm2, %v13958_v60 }
0x1254   : > { %14017 = vmatprep.mubr.msk.f32.mxu0 %vm14561_vm3, %v16891_v15  ;;  %v13964_v36 = vpop.f32.mrf.mxu1 }
0x1256   : > { %v8817_v59 = vpop.f32.mrf.mxu1 }
0x1257   : > { %14018 = vmatmul.mubr.msk.f32.gmra.mxu0 %vm2995_vm2, %v8807_v58 }
0x1258   : > { %14020 = vmatprep.mubr.msk.f32.mxu0 %vm14561_vm3, %v16891_v15  ;;  %v13967_v9 = vpop.f32.mrf.mxu1 }
0x125a   : > { %v8827_v10 = vpop.f32.mrf.mxu1 }
0x125b   : > { %14021 = vmatmul.mubr.msk.f32.gmra.mxu0 %vm2995_vm2, %v13961_v56 }
0x125c   : > { %14023 = vmatprep.mubr.msk.f32.mxu0 %vm14561_vm3, %v16891_v15  ;;  %v13970_v7 = vpop.f32.mrf.mxu1 }
0x125e   : > { %v8837_v11 = vpop.f32.mrf.mxu1 }
0x125f   : > { %14024 = vmatmul.mubr.msk.f32.gmra.mxu0 %vm2995_vm2, %v8817_v59 }
0x1260   : > { %14026 = vmatprep.mubr.msk.f32.mxu0 %vm14561_vm3, %v16891_v15  ;;  %v13973_v16 = vpop.f32.mrf.mxu1 }
0x1262   : > { %v8847_v38 = vpop.f32.mrf.mxu1 }
0x1263   : > { %14027 = vmatmul.mubr.msk.f32.gmra.mxu0 %vm2995_vm2, %v13964_v36  ;;  %14083 = vmatmul.mubr.msk.f32.vlgmr.msra.gmra.mxu1 %vm2995_vm2, %v8847_v38 }
0x1264   : > { %14029 = vmatprep.mubr.msk.f32.mxu0 %vm14561_vm3, %v16891_v15  ;;  %14085 = vmatprep.mubr.msk.f32.mxu1 %vm14561_vm3, %v16891_v15  ;;  %v13976_v13 = vpop.f32.mrf.mxu1 }
0x1266   : > { %v8857_v53 = vpop.f32.mrf.mxu1 }
0x1267   : > { %14030 = vmatmul.mubr.msk.f32.gmra.mxu0 %vm2995_vm2, %v8827_v10  ;;  %14086 = vmatmul.mubr.msk.f32.gmra.mxu1 %vm2995_vm2, %v13973_v16 }
0x1268   : > { %14032 = vmatprep.mubr.msk.f32.mxu0 %vm14561_vm3, %v16891_v15  ;;  %14088 = vmatprep.mubr.msk.f32.mxu1 %vm14561_vm3, %v16891_v15  ;;  %v13979_v21 = vpop.f32.mrf.mxu1 }
0x126a   : > { %v8867_v1 = vpop.f32.mrf.mxu1 }
0x126b   : > { %14033 = vmatmul.mubr.msk.f32.gmra.mxu0 %vm2995_vm2, %v13967_v9  ;;  %14089 = vmatmul.mubr.msk.f32.gmra.mxu1 %vm2995_vm2, %v8857_v53 }
0x126c   : > { %14035 = vmatprep.mubr.msk.f32.mxu0 %vm14561_vm3, %v16891_v15  ;;  %14091 = vmatprep.mubr.msk.f32.mxu1 %vm14561_vm3, %v16891_v15  ;;  %v13982_v20 = vpop.f32.mrf.mxu1 }
0x126e   : > { %v8877_v31 = vpop.f32.mrf.mxu1 }
0x126f   : > { %14036 = vmatmul.mubr.msk.f32.gmra.mxu0 %vm2995_vm2, %v8837_v11  ;;  %14092 = vmatmul.mubr.msk.f32.gmra.mxu1 %vm2995_vm2, %v13976_v13 }
0x1270   : > { %14038 = vmatprep.mubr.msk.f32.mxu0 %vm14561_vm3, %v16891_v15  ;;  %14094 = vmatprep.mubr.msk.f32.mxu1 %vm14561_vm3, %v16891_v15  ;;  %v13985_v3 = vpop.f32.mrf.mxu1 }
0x1272   : > { %v8887_v12 = vpop.f32.mrf.mxu1 }
0x1273   : > { %14039 = vmatmul.mubr.msk.f32.gmra.mxu0 %vm2995_vm2, %v13970_v7  ;;  %14095 = vmatmul.mubr.msk.f32.gmra.mxu1 %vm2995_vm2, %v8867_v1 }
0x1274   : > { %14045 = vmatprep.mubr.msk.f32.mxu0 %vm14561_vm3, %v16891_v15  ;;  %14097 = vmatprep.mubr.msk.f32.mxu1 %vm14561_vm3, %v16891_v15  ;;  %v13988_v29 = vpop.f32.mrf.mxu1 }
0x1276   : > { %v8897_v30 = vpop.f32.mrf.mxu1 }
0x1277   : > { %14046 = vmatmul.mubr.msk.f32.vlgmr.msra.gmra.mxu0 %vm2995_vm2, %v16036_v57  ;;  %14098 = vmatmul.mubr.msk.f32.gmra.mxu1 %vm2995_vm2, %v13979_v21 }
0x1278   : > { %14048 = vmatprep.mubr.msk.f32.mxu0 %vm14561_vm3, %v16891_v15  ;;  %14100 = vmatprep.mubr.msk.f32.mxu1 %vm14561_vm3, %v16891_v15  ;;  %v13991_v32 = vpop.f32.mrf.mxu1 }
0x1279   : > { %14116 = vmatpush3.msra.mxu0 %v12067_v23 }
0x127a   : > { %14117 = vmatprep.subr.mxu0 %v16891_v15  ;;  %v8907_v33 = vpop.f32.mrf.mxu1 }
0x127b   : > { %14049 = vmatmul.mubr.msk.f32.gmra.mxu0 %vm2995_vm2, %v16034_v55  ;;  %14101 = vmatmul.mubr.msk.f32.gmra.mxu1 %vm2995_vm2, %v8877_v31 }
0x127c   : > { %14051 = vmatprep.mubr.msk.f32.mxu0 %vm14561_vm3, %v16891_v15  ;;  %14103 = vmatprep.mubr.msk.f32.mxu1 %vm14561_vm3, %v16891_v15  ;;  %v13994_v50 = vpop.f32.mrf.mxu1 }
0x127d   : > { %14118 = vmatpush3.msra.mxu0 %v12066_v4 }
0x127e   : > { %v8917_v19 = vpop.f32.mrf.mxu1 }
0x127f   : > { %14052 = vmatmul.mubr.msk.f32.gmra.mxu0 %vm2995_vm2, %v16040_v62  ;;  %14104 = vmatmul.mubr.msk.f32.gmra.mxu1 %vm2995_vm2, %v13982_v20 }
0x1280   : > { %14054 = vmatprep.mubr.msk.f32.mxu0 %vm14561_vm3, %v16891_v15  ;;  %14106 = vmatprep.mubr.msk.f32.mxu1 %vm14561_vm3, %v16891_v15  ;;  %v13997_v27 = vpop.f32.mrf.mxu1 }
0x1282   : > { %v8927_v40 = vpop.f32.mrf.mxu1 }
0x1283   : > { %14055 = vmatmul.mubr.msk.f32.gmra.mxu0 %vm2995_vm2, %v16038_v61  ;;  %14107 = vmatmul.mubr.msk.f32.gmra.mxu1 %vm2995_vm2, %v8887_v12 }
0x1284   : > { %14057 = vmatprep.mubr.msk.f32.mxu0 %vm14561_vm3, %v16891_v15  ;;  %14109 = vmatprep.mubr.msk.f32.mxu1 %vm14561_vm3, %v16891_v15  ;;  %v14000_v41 = vpop.f32.mrf.mxu1 }
0x1286   : > { %v8937_v43 = vpop.f32.mrf.mxu1 }
0x1287   : > { %14058 = vmatmul.mubr.msk.f32.gmra.mxu0 %vm2995_vm2, %v16044_v5  ;;  %14110 = vmatmul.mubr.msk.f32.gmra.mxu1 %vm2995_vm2, %v13985_v3 }
0x1288   : > { %14060 = vmatprep.mubr.msk.f32.mxu0 %vm14561_vm3, %v16891_v15  ;;  %14112 = vmatprep.mubr.msk.f32.mxu1 %vm14561_vm3, %v16891_v15  ;;  %v14003_v44 = vpop.f32.mrf.mxu1 }
0x128a   : > { %v8947_v63 = vpop.f32.mrf.mxu1 }
0x128b   : > { %14061 = vmatmul.mubr.msk.f32.gmra.mxu0 %vm2995_vm2, %v16042_v0  ;;  %14113 = vmatmul.mubr.msk.f32.gmra.mxu1 %vm2995_vm2, %v8897_v30 }
0x128c   : > { %14063 = vmatprep.mubr.msk.f32.mxu0 %vm14561_vm3, %v16891_v15 }
0x128f   : > { %14064 = vmatmul.mubr.msk.f32.gmra.mxu0 %vm2995_vm2, %v16048_v17 }
0x1290   : > { %14066 = vmatprep.mubr.msk.f32.mxu0 %vm14561_vm3, %v16891_v15 }
0x1293   : > { %14067 = vmatmul.mubr.msk.f32.gmra.mxu0 %vm2995_vm2, %v16046_v14 }
0x1294   : > { %14069 = vmatprep.mubr.msk.f32.mxu0 %vm14561_vm3, %v16891_v15 }
0x1297   : > { %14070 = vmatmul.mubr.msk.f32.gmra.mxu0 %vm2995_vm2, %v16052_v6 }
0x1298   : > { %14072 = vmatprep.mubr.msk.f32.mxu0 %vm14561_vm3, %v16891_v15 }
0x129b   : > { %14073 = vmatmul.mubr.msk.f32.gmra.mxu0 %vm2995_vm2, %v16050_v2 }
0x129c   : > { %14075 = vmatprep.mubr.msk.f32.mxu0 %vm14561_vm3, %v16891_v15 }
0x129f   : > { %14076 = vmatmul.mubr.msk.f32.gmra.mxu0 %vm2995_vm2, %v16057_v47 }
0x12a0   : > { %14119 = vmatprep.mubr.msk.f32.mxu0 %vm14561_vm3, %v16891_v15 }
0x12a3   : > { %14120 = vmatmul.mubr.msk.f32.vlgmr.msra.gmra.mxu0 %vm2995_vm2, %v13988_v29 }
0x12a4   : > { %14122 = vmatprep.mubr.msk.f32.mxu0 %vm14561_vm3, %v16891_v15 }
0x12a7   : > { %14123 = vmatmul.mubr.msk.f32.gmra.mxu0 %vm2995_vm2, %v8907_v33 }
0x12a8   : > { %14125 = vmatprep.mubr.msk.f32.mxu0 %vm14561_vm3, %v16891_v15 }
0x12ab   : > { %14126 = vmatmul.mubr.msk.f32.gmra.mxu0 %vm2995_vm2, %v13991_v32 }
0x12ac   : > { %14128 = vmatprep.mubr.msk.f32.mxu0 %vm14561_vm3, %v16891_v15 }
0x12af   : > { %14129 = vmatmul.mubr.msk.f32.gmra.mxu0 %vm2995_vm2, %v8917_v19 }
0x12b0   : > { %14131 = vmatprep.mubr.msk.f32.mxu0 %vm14561_vm3, %v16891_v15 }
0x12b3   : > { %14132 = vmatmul.mubr.msk.f32.gmra.mxu0 %vm2995_vm2, %v13994_v50 }
0x12b4   : > { %14134 = vmatprep.mubr.msk.f32.mxu0 %vm14561_vm3, %v16891_v15 }
0x12b7   : > { %14135 = vmatmul.mubr.msk.f32.gmra.mxu0 %vm2995_vm2, %v8927_v40 }
0x12b8   : > { %14137 = vmatprep.mubr.msk.f32.mxu0 %vm14561_vm3, %v16891_v15 }
0x12bb   : > { %14138 = vmatmul.mubr.msk.f32.gmra.mxu0 %vm2995_vm2, %v13997_v27 }
0x12bc   : > { %14140 = vmatprep.mubr.msk.f32.mxu0 %vm14561_vm3, %v16891_v15 }
0x12bf   : > { %14141 = vmatmul.mubr.msk.f32.gmra.mxu0 %vm2995_vm2, %v8937_v43 }
0x12c0   : > { %14143 = vmatprep.mubr.msk.f32.mxu0 %vm14561_vm3, %v16891_v15 }
0x12c3   : > { %14144 = vmatmul.mubr.msk.f32.gmra.mxu0 %vm2995_vm2, %v14000_v41 }
0x12c4   : > { %14146 = vmatprep.mubr.msk.f32.mxu0 %vm14561_vm3, %v16891_v15 }
0x12c7   : > { %14147 = vmatmul.mubr.msk.f32.gmra.mxu0 %vm2995_vm2, %v8947_v63 }
0x12c8   : > { %14149 = vmatprep.mubr.msk.f32.mxu0 %vm14561_vm3, %v16891_v15 }
0x12cb   : > { %14150 = vmatmul.mubr.msk.f32.gmra.mxu0 %vm2995_vm2, %v14003_v44 }
0x1309   : > { %v9060_v28 = vpop.f32.mrf.mxu0 }
0x130b   : > { %v14010_v46 = vpop.f32.mrf.mxu0 }
0x130f   : > { %v9065_v37 = vpop.f32.mrf.mxu0 }
0x1311   : > { %v14013_v49 = vpop.f32.mrf.mxu0 }
0x1313   : > { %v9070_v8 = vpop.f32.mrf.mxu0 }
0x1315   : > { %v14016_v51 = vpop.f32.mrf.mxu0 }
0x1317   : > { %v9075_v24 = vpop.f32.mrf.mxu0 }
0x1319   : > { %v14019_v39 = vpop.f32.mrf.mxu0 }
0x131b   : > { %v9080_v48 = vpop.f32.mrf.mxu0 }
0x131d   : > { %v14022_v25 = vpop.f32.mrf.mxu0 }
0x131f   : > { %v9085_v34 = vpop.f32.mrf.mxu0 }
0x1321   : > { %v14025_v52 = vpop.f32.mrf.mxu0 }
0x1323   : > { %v9090_v35 = vpop.f32.mrf.mxu0  ;;  %v9369_v45 = vpop.f32.mrf.mxu1 }
0x1325   : > { %v14028_v54 = vpop.f32.mrf.mxu0  ;;  %v14084_v55 = vpop.f32.mrf.mxu1 }
0x1327   : > { %v9095_v57 = vpop.f32.mrf.mxu0  ;;  %v9374_v15 = vpop.f32.mrf.mxu1 }
0x1329   : > { %v14031_v61 = vpop.f32.mrf.mxu0  ;;  %v14087_v62 = vpop.f32.mrf.mxu1 }
0x132b   : > { %v9100_v0 = vpop.f32.mrf.mxu0  ;;  %v9379_v5 = vpop.f32.mrf.mxu1 }
0x132d   : > { %v14034_v14 = vpop.f32.mrf.mxu0  ;;  %v14090_v17 = vpop.f32.mrf.mxu1 }
0x132f   : > { %v16202_v2 = vpop.f32.mrf.mxu0  ;;  %v9384_v6 = vpop.f32.mrf.mxu1 }
0x1331   : > { %v14037_v22 = vpop.f32.mrf.mxu0  ;;  %v14093_v26 = vpop.f32.mrf.mxu1 }
0x1333   : > { %v16204_v42 = vpop.f32.mrf.mxu0  ;;  %v9389_v47 = vpop.f32.mrf.mxu1 }
0x1335   : > { %v14040_v60 = vpop.f32.mrf.mxu0  ;;  %v14096_v18 = vpop.f32.mrf.mxu1 }
0x1337   : > { %v9213_v56 = vpop.f32.mrf.mxu0  ;;  %v9394_v58 = vpop.f32.mrf.mxu1 }
0x1338   : > { %v9214_v36 = vadd.f32 %v9213_v56, %v9060_v28 }
0x1339   : > { %v14047_v59 = vpop.f32.mrf.mxu0  ;;  %v14099_v9 = vpop.f32.mrf.mxu1 }
0x133a   : > { %v16206_v10 = vadd.f32 %v9369_v45, %v9214_v36 }
0x133b   : > { %v9218_v7 = vpop.f32.mrf.mxu0  ;;  %v9399_v11 = vpop.f32.mrf.mxu1 }
0x133c   : > { %v9219_v16 = vadd.f32 %v9218_v7, %v9065_v37 }
0x133d   : > { %v14050_v38 = vpop.f32.mrf.mxu0  ;;  %v14102_v13 = vpop.f32.mrf.mxu1 }
0x133e   : > { %v16208_v53 = vadd.f32 %v9374_v15, %v9219_v16  ;;  %v12079_v38 = vld [vmem:[%s14713_s20] ss:$0 sm:$0xff] }
0x133f   : > { %v9223_v21 = vpop.f32.mrf.mxu0  ;;  %v9404_v1 = vpop.f32.mrf.mxu1 }
0x1340   : > { %v9224_v20 = vadd.f32 %v9223_v21, %v9070_v8 }
0x1341   : > { %v14053_v23 = vpop.f32.mrf.mxu0  ;;  %v14105_v31 = vpop.f32.mrf.mxu1 }
0x1342   : > { %v16210_v4 = vadd.f32 %v9379_v5, %v9224_v20 }
0x1343   : > { %v9228_v3 = vpop.f32.mrf.mxu0  ;;  %v9409_v12 = vpop.f32.mrf.mxu1 }
0x1344   : > { %v9229_v29 = vadd.f32 %v9228_v3, %v9075_v24 }
0x1345   : > { %v14056_v30 = vpop.f32.mrf.mxu0  ;;  %v14108_v32 = vpop.f32.mrf.mxu1 }
0x1346   : > { %v9426_v33 = vadd.f32 %v9384_v6, %v9229_v29 }
0x1347   : > { %v9233_v50 = vpop.f32.mrf.mxu0  ;;  %v9414_v19 = vpop.f32.mrf.mxu1 }
0x1348   : > { %v9234_v27 = vadd.f32 %v9233_v50, %v9080_v48 }
0x1349   : > { %v14059_v40 = vpop.f32.mrf.mxu0  ;;  %v14111_v41 = vpop.f32.mrf.mxu1 }
0x134a   : > { %v16212_v43 = vadd.f32 %v9389_v47, %v9234_v27 }
0x134b   : > { %v9238_v44 = vpop.f32.mrf.mxu0  ;;  %v9419_v63 = vpop.f32.mrf.mxu1 }
0x134c   : > { %v9239_v28 = vadd.f32 %v9238_v44, %v9085_v34 }
0x134d   : > { %v14062_v46 = vpop.f32.mrf.mxu0  ;;  %v14114_v37 = vpop.f32.mrf.mxu1 }
0x134e   : > { %v9428_v49 = vadd.f32 %v9394_v58, %v9239_v28 }
0x134f   : > { %v9243_v8 = vpop.f32.mrf.mxu0 }
0x1350   : > { %v9244_v51 = vadd.f32 %v9243_v8, %v9090_v35 }
0x1351   : > { %v14065_v39 = vpop.f32.mrf.mxu0 }
0x1352   : > { %v9429_v24 = vadd.f32 %v9399_v11, %v9244_v51 }
0x1353   : > { %v9248_v25 = vpop.f32.mrf.mxu0 }
0x1354   : > { %v9249_v52 = vadd.f32 %v9248_v25, %v9095_v57 }
0x1355   : > { %v14068_v45 = vpop.f32.mrf.mxu0 }
0x1356   : > { %v9430_v54 = vadd.f32 %v9404_v1, %v9249_v52 }
0x1357   : > { %v9253_v55 = vpop.f32.mrf.mxu0 }
0x1358   : > { %v9254_v48 = vadd.f32 %v9253_v55, %v9100_v0 }
0x1359   : > { %v14071_v15 = vpop.f32.mrf.mxu0 }
0x135a   : > { %v9431_v61 = vadd.f32 %v9409_v12, %v9254_v48 }
0x135b   : > { %v9258_v62 = vpop.f32.mrf.mxu0 }
0x135c   : > { %v9259_v16 = vadd.f32 %v9258_v62, %v16202_v2 }
0x135d   : > { %v14074_v5 = vpop.f32.mrf.mxu0 }
0x135e   : > { %v9432_v31 = vadd.f32 %v9414_v19, %v9259_v16 }
0x135f   : > { %v9263_v14 = vpop.f32.mrf.mxu0 }
0x1360   : > { %v9264_v3 = vadd.f32 %v9263_v14, %v16204_v42 }
0x1361   : > { %v14077_v17 = vpop.f32.mrf.mxu0 }
0x1362   : > { %v9433_v44 = vadd.f32 %v9419_v63, %v9264_v3 }
0x1363   : > { %v9536_v34 = vpop.f32.mrf.mxu0 }
0x1365   : > { %v14121_v6 = vpop.f32.mrf.mxu0 }
0x1367   : > { %v9541_v22 = vpop.f32.mrf.mxu0 }
0x1369   : > { %v14124_v26 = vpop.f32.mrf.mxu0 }
0x136b   : > { %v9546_v35 = vpop.f32.mrf.mxu0 }
0x136c   : > { %v9592_v48 = vadd.f32 %v9546_v35, %v16210_v4 }
0x136d   : > { %v14127_v47 = vpop.f32.mrf.mxu0 }
0x136e   : > { %v9610_v17 = vadd.f32 %v12079_v38, %v9592_v48  ;;  %v9686_v48 = vld [vmem:[%s14718_s27 + $0x60] sm:$0xff] }
0x136f   : > { %v9551_v60 = vpop.f32.mrf.mxu0 }
0x1370   : > { %v9593_v32 = vadd.f32 %v9551_v60, %v9426_v33  ;;  %v9621_v60 = vsub.f32 0.0, %v9610_v17  ;;  %v9694_v17 = vld [vmem:[%s14718_s27 + $0xa0] sm:$0xff] }
0x1371   : > { %v14130_v18 = vpop.f32.mrf.mxu0 }
0x1372   : > { %v9611_v8 = vadd.f32 %v12079_v38, %v9593_v32 }
0x1373   : > { %v9556_v57 = vpop.f32.mrf.mxu0 }
0x1374   : > { %v9594_v42 = vadd.f32 %v9556_v57, %v16212_v43  ;;  %v9622_v63 = vsub.f32 0.0, %v9611_v8  ;;  %v9590_v43 = vadd.f32 %v9536_v34, %v16206_v10 }
0x1375   : > { %v14133_v56 = vpop.f32.mrf.mxu0 }
0x1376   : > { %v9612_v15 = vadd.f32 %v12079_v38, %v9594_v42  ;;  %v9636_v14 = vmul.f32 1.442695, %v9622_v63  ;;  %v9608_v47 = vadd.f32 %v12079_v38, %v9590_v43  ;;  %v9634_v56 = vmul.f32 1.442695, %v9621_v60  ;;  %v9676_v42 = vld [vmem:[%s14718_s27 + $0x10] sm:$0xff]  ;;  %v9691_v43 = vld [vmem:[%s14718_s27 + $0x88] sm:$0xff] }
0x1377   : > { %v9561_v58 = vpop.f32.mrf.mxu0  ;;  %v9684_v63 = vld [vmem:[%s14718_s27 + $0x50] sm:$0xff]  ;;  %v9699_v60 = vld [vmem:[%s14718_s27 + $0xc8] sm:$0xff] }
0x1378   : > { %v9595_v13 = vadd.f32 %v9561_v58, %v9428_v49  ;;  %v9591_v49 = vadd.f32 %v9541_v22, %v16208_v53  ;;  %v9623_v6 = vsub.f32 0.0, %v9612_v15  ;;  %v9619_v57 = vsub.f32 0.0, %v9608_v47  ;;  %v9687_v15 = vld [vmem:[%s14718_s27 + $0x68] sm:$0xff]  ;;  %v9698_v47 = vld [vmem:[%s14718_s27 + $0xc0] sm:$0xff] }
0x1379   : > { %v14136_v36 = vpop.f32.mrf.mxu0 }
0x137a   : > { %v9613_v12 = vadd.f32 %v12079_v38, %v9595_v13  ;;  %v9638_v18 = vmul.f32 1.442695, %v9623_v6  ;;  %v9695_v6 = vld [vmem:[%s14718_s27 + $0xa8] sm:$0xff] }
0x137b   : > { %v9566_v0 = vpop.f32.mrf.mxu0 }
0x137c   : > { %v9596_v27 = vadd.f32 %v9566_v0, %v9429_v24  ;;  %v9624_v2 = vsub.f32 0.0, %v9613_v12  ;;  %v9630_v0 = vmul.f32 1.442695, %v9619_v57  ;;  %v9703_v57 = vld [vmem:[%s14718_s27 + $0xe8] sm:$0xff] }
0x137d   : > { %v14139_v59 = vpop.f32.mrf.mxu0 }
0x137e   : > { %v9614_v39 = vadd.f32 %v12079_v38, %v9596_v27  ;;  %v9640_v24 = vmul.f32 1.442695, %v9624_v2  ;;  %v12080_v2 = vld [vmem:[%s14718_s27 + $0x100] sm:$0xff] }
0x137f   : > { %v9571_v9 = vpop.f32.mrf.mxu0  ;;  %14174 = vmatprep.mubr.msk.f32.mxu1 %vm9783_vm5, %v12080_v2  ;;  %v12088_v2 = vld [vmem:[%s14718_s27 + $0x140] sm:$0xff] }
0x1380   : > { %v9597_v7 = vadd.f32 %v9571_v9, %v9430_v54  ;;  %v9609_v54 = vadd.f32 %v12079_v38, %v9591_v49  ;;  %v9625_v53 = vsub.f32 0.0, %v9614_v39  ;;  %v9677_v39 = vld [vmem:[%s14718_s27 + $0x18] sm:$0xff] }
0x1381   : > { %v14142_v11 = vpop.f32.mrf.mxu0 }
0x1382   : > { %v9615_v21 = vadd.f32 %v12079_v38, %v9597_v7  ;;  %v9620_v5 = vsub.f32 0.0, %v9609_v54  ;;  %v9642_v22 = vmul.f32 1.442695, %v9625_v53  ;;  %v9683_v54 = vld [vmem:[%s14718_s27 + $0x48] sm:$0xff]  ;;  %v9688_v53 = vld [vmem:[%s14718_s27 + $0x70] sm:$0xff] }
0x1383   : > { %v9576_v1 = vpop.f32.mrf.mxu0 }
0x1384   : > { %v9598_v20 = vadd.f32 %v9576_v1, %v9431_v61  ;;  %v9626_v29 = vsub.f32 0.0, %v9615_v21  ;;  %v9632_v26 = vmul.f32 1.442695, %v9620_v5  ;;  %v9692_v5 = vld [vmem:[%s14718_s27 + $0x90] sm:$0xff] }
0x1385   : > { %v14145_v23 = vpop.f32.mrf.mxu0 }
0x1386   : > { %v9616_v40 = vadd.f32 %v12079_v38, %v9598_v20  ;;  %v9644_v46 = vmul.f32 1.442695, %v9626_v29 }
0x1387   : > { %v9581_v30 = vpop.f32.mrf.mxu0 }
0x1388   : > { %v9599_v50 = vadd.f32 %v9581_v30, %v9432_v31  ;;  %v9627_v25 = vsub.f32 0.0, %v9616_v40  ;;  %14479 = vpow2.f32 %v9644_v46  ;;  %v9674_v46 = vld [vmem:[%s14718_s27] sm:$0xff] }
0x1389   : > { %v14148_v41 = vpop.f32.mrf.mxu0  ;;  %14244 = vmatprep.mubr.msk.f32.mxu0 %vm9783_vm5, %v9674_v46 }
0x138a   : > { %v9617_v28 = vadd.f32 %v12079_v38, %v9599_v50  ;;  %v9646_v61 = vmul.f32 1.442695, %v9627_v25  ;;  %v9678_v25 = vld [vmem:[%s14718_s27 + $0x20] sm:$0xff] }
0x138b   : > { %v9586_v37 = vpop.f32.mrf.mxu0 }
0x138c   : > { %v9628_v51 = vsub.f32 0.0, %v9617_v28  ;;  %v9600_v19 = vadd.f32 %v9586_v37, %v9433_v44 }
0x138d   : > { %v14151_v52 = vpop.f32.mrf.mxu0 }
0x138e   : > { %v9648_v33 = vmul.f32 1.442695, %v9628_v51  ;;  %v9618_v45 = vadd.f32 %v12079_v38, %v9600_v19  ;;  %v9675_v19 = vld [vmem:[%s14718_s27 + $0x8] sm:$0xff] }
0x138f   : > { %v9679_v52 = vld [vmem:[%s14718_s27 + $0x28] sm:$0xff] }
0x1390   : > { %14481 = vpow2.f32 %v9648_v33  ;;  %v9629_v55 = vsub.f32 0.0, %v9618_v45  ;;  %v9680_v33 = vld [vmem:[%s14718_s27 + $0x30] sm:$0xff]  ;;  %v9681_v45 = vld [vmem:[%s14718_s27 + $0x38] sm:$0xff] }
0x1391   : > { %14483 = vpow2.f32 %v9640_v24  ;;  %v9682_v24 = vld [vmem:[%s14718_s27 + $0x40] sm:$0xff] }
0x1392   : > { %v9650_v62 = vmul.f32 1.442695, %v9629_v55  ;;  %v9685_v55 = vld [vmem:[%s14718_s27 + $0x58] sm:$0xff] }
0x1394   : > { %14485 = vpow2.f32 %v9650_v62  ;;  %v9690_v62 = vld [vmem:[%s14718_s27 + $0x80] sm:$0xff] }
0x1395   : > { %14487 = vpow2.f32 %v9646_v61  ;;  %v14480_v4 = vpop.eup %14479  ;;  %v9689_v61 = vld [vmem:[%s14718_s27 + $0x78] sm:$0xff] }
0x1396   : > { %14489 = vpow2.f32 %v9636_v14  ;;  %v9659_v34 = vadd.f32 1.0, %v14480_v4  ;;  %v9693_v14 = vld [vmem:[%s14718_s27 + $0x98] sm:$0xff] }
0x1397   : > { %14491 = vpow2.f32 %v9642_v22  ;;  %v9696_v22 = vld [vmem:[%s14718_s27 + $0xb0] sm:$0xff]  ;;  %v9701_v4 = vld [vmem:[%s14718_s27 + $0xd8] sm:$0xff] }
0x1398   : > { %14493 = vpow2.f32 %v9632_v26  ;;  %v9697_v26 = vld [vmem:[%s14718_s27 + $0xb8] sm:$0xff] }
0x1399   : > { %14495 = vpow2.f32 %v9638_v18  ;;  %v9700_v18 = vld [vmem:[%s14718_s27 + $0xd0] sm:$0xff] }
0x139d   : > { %v14482_v35 = vpop.eup %14481 }
0x139e   : > { %v9661_v10 = vadd.f32 1.0, %v14482_v35  ;;  %v14484_v58 = vpop.eup %14483  ;;  %v9702_v35 = vld [vmem:[%s14718_s27 + $0xe0] sm:$0xff] }
0x139f   : > { %v9657_v7 = vadd.f32 1.0, %v14484_v58 }
0x13a0   : > { %14497 = vrcp.f32 %v9661_v10  ;;  %v9705_v10 = vld [vmem:[%s14718_s27 + $0xf8] sm:$0xff] }
0x13a1   : > { %v14486_v36 = vpop.eup %14485  ;;  %14499 = vpow2.f32 %v9634_v56  ;;  %v9704_v56 = vld [vmem:[%s14718_s27 + $0xf0] sm:$0xff] }
0x13a2   : > { %v14488_v59 = vpop.eup %14487  ;;  %v9662_v9 = vadd.f32 1.0, %v14486_v36  ;;  %14501 = vrcp.f32 %v9659_v34  ;;  %v12240_v34 = vld [vmem:[%s14718_s27 + $0x300] sm:$0xff] }
0x13a3   : > { %v14490_v11 = vpop.eup %14489  ;;  %v9660_v16 = vadd.f32 1.0, %v14488_v59 }
0x13a4   : > { %14503 = vrcp.f32 %v9662_v9  ;;  %v14492_v38 = vpop.eup %14491  ;;  %v9655_v13 = vadd.f32 1.0, %v14490_v11 }
0x13a5   : > { %14505 = vpow2.f32 %v9630_v0  ;;  %v14494_v21 = vpop.eup %14493  ;;  %v9658_v1 = vadd.f32 1.0, %v14492_v38 }
0x13a6   : > { %14507 = vrcp.f32 %v9657_v7  ;;  %v14496_v20 = vpop.eup %14495  ;;  %v9653_v23 = vadd.f32 1.0, %v14494_v21 }
0x13a7   : > { %14509 = vrcp.f32 %v9660_v16  ;;  %v9656_v3 = vadd.f32 1.0, %v14496_v20 }
0x13a8   : > { %14511 = vrcp.f32 %v9655_v13 }
0x13a9   : > { %14513 = vrcp.f32 %v9658_v1 }
0x13aa   : > { %14515 = vrcp.f32 %v9653_v23  ;;  %v12081_v23 = vld [vmem:[%s14718_s27 + $0x108] sm:$0xff] }
0x13ab   : > { %14517 = vrcp.f32 %v9656_v3 }
0x13ad   : > { %v16221_v31 = vpop.eup %14497 }
0x13ae   : > { %v14500_v12 = vpop.eup %14499  ;;  %9768 = vrot.lane.b32.xlu1 %v16221_v31, %s14567_s11 }
0x13af   : > { %v16225_v29 = vpop.eup %14501  ;;  %v9654_v32 = vadd.f32 1.0, %v14500_v12 }
0x13b1   : > { %v16227_v30 = vpop.eup %14503  ;;  %14519 = vrcp.f32 %v9654_v32 }
0x13b2   : > { %v14506_v50 = vpop.eup %14505  ;;  %9764 = vrot.lane.b32.xlu1 %v16225_v29, %s14567_s11  ;;  %9770 = vrot.lane.b32.xlu0 %v16227_v30, %s14567_s11 }
0x13b3   : > { %14222 = vmatprep.subr.mxu0 %v16227_v30  ;;  %v16235_v27 = vpop.eup %14507  ;;  %v9652_v40 = vadd.f32 1.0, %v14506_v50 }
0x13b4   : > { %14223 = vmatpush3.msra.mxu0 %v16227_v30  ;;  %v14510_v41 = vpop.eup %14509 }
0x13b5   : > { %14224 = vmatprep.subr.mxu0 %v16221_v31  ;;  %v16242_v44 = vpop.eup %14511  ;;  %14521 = vrcp.f32 %v9652_v40  ;;  %v12086_v40 = vld [vmem:[%s14718_s27 + $0x130] sm:$0xff] }
0x13b6   : > { %14225 = vmatpush3.msra.mxu0 %v16221_v31  ;;  %9760 = vrot.lane.b32.xlu1 %v16235_v27, %s14567_s11  ;;  %v14514_v28 = vpop.eup %14513 }
0x13b7   : > { %9766 = vrot.lane.b32.xlu0 %v14510_v41, %s14567_s11  ;;  %14226 = vmatprep.subr.mxu0 %v14510_v41  ;;  %v16252_v37 = vpop.eup %14515 }
0x13b8   : > { %14227 = vmatpush3.msra.mxu0 %v14510_v41  ;;  %v14518_v49 = vpop.eup %14517 }
0x13b9   : > { %14228 = vmatprep.subr.mxu0 %v16225_v29 }
0x13ba   : > { %14229 = vmatpush3.msra.mxu0 %v16225_v29  ;;  %9756 = vrot.lane.b32.xlu1 %v16242_v44, %s14567_s11 }
0x13bb   : > { %9762 = vrot.lane.b32.xlu0 %v14514_v28, %s14567_s11  ;;  %14230 = vmatprep.subr.mxu0 %v14514_v28 }
0x13bc   : > { %14231 = vmatpush3.msra.mxu0 %v14514_v28 }
0x13bd   : > { %14232 = vmatprep.subr.mxu0 %v16235_v27 }
0x13be   : > { %14233 = vmatpush3.msra.mxu0 %v16235_v27  ;;  %9752 = vrot.lane.b32.xlu1 %v16252_v37, %s14567_s11  ;;  %v14520_v8 = vpop.eup %14519 }
0x13bf   : > { %9758 = vrot.lane.b32.xlu0 %v14518_v49, %s14567_s11  ;;  %14234 = vmatprep.subr.mxu0 %v14518_v49 }
0x13c0   : > { %14235 = vmatpush3.msra.mxu0 %v14518_v49 }
0x13c1   : > { %14236 = vmatprep.subr.mxu0 %v16242_v44 }
0x13c2   : > { %14237 = vmatpush3.msra.mxu0 %v16242_v44  ;;  %10896 = vrot.lane.b32.xlu1 %v16221_v31, %s14568_s1  ;;  %v16266_v51 = vpop.eup %14521 }
0x13c3   : > { %9754 = vrot.lane.b32.xlu0 %v14520_v8, %s14567_s11  ;;  %14238 = vmatprep.subr.mxu0 %v14520_v8 }
0x13c4   : > { %14239 = vmatpush3.msra.mxu0 %v14520_v8 }
0x13c5   : > { %14240 = vmatprep.subr.mxu0 %v16252_v37 }
0x13c6   : > { %14241 = vmatpush3.msra.mxu0 %v16252_v37  ;;  %10894 = vrot.lane.b32.xlu1 %v14510_v41, %s14568_s1 }
0x13c7   : > { %9750 = vrot.lane.b32.xlu0 %v16266_v51, %s14567_s11  ;;  %14242 = vmatprep.subr.mxu0 %v16266_v51 }
0x13c8   : > { %14243 = vmatpush3.msra.mxu0 %v16266_v51 }
0x13c9   : > { %14245 = vmatmul.mubr.msk.f32.vlgmr.msra.gmra.mxu0 %vm9783_vm5, %v9675_v19 }
0x13ca   : > { %10892 = vrot.lane.b32.xlu1 %v16225_v29, %s14568_s1  ;;  %14247 = vmatprep.mubr.msk.f32.mxu0 %vm9783_vm5, %v9676_v42  ;;  %v12091_v42 = vld [vmem:[%s14718_s27 + $0x158] sm:$0xff] }
0x13cb   : > { %10477 = vrot.lane.b32.xlu0 %v16221_v31, %s14569_s0  ;;  %v12082_v31 = vld [vmem:[%s14718_s27 + $0x110] sm:$0xff] }
0x13cd   : > { %14248 = vmatmul.mubr.msk.f32.gmra.mxu0 %vm9783_vm5, %v9677_v39 }
0x13ce   : > { %10890 = vrot.lane.b32.xlu1 %v14514_v28, %s14568_s1  ;;  %14250 = vmatprep.mubr.msk.f32.mxu0 %vm9783_vm5, %v9678_v25 }
0x13cf   : > { %10475 = vrot.lane.b32.xlu0 %v14510_v41, %s14569_s0 }
0x13d1   : > { %14251 = vmatmul.mubr.msk.f32.gmra.mxu0 %vm9783_vm5, %v9679_v52  ;;  %v12092_v52 = vld [vmem:[%s14718_s27 + $0x160] sm:$0xff] }
0x13d2   : > { %10479 = vrot.lane.b32.xlu1 %v16227_v30, %s14569_s0  ;;  %14253 = vmatprep.mubr.msk.f32.mxu0 %vm9783_vm5, %v9680_v33  ;;  %v12093_v33 = vld [vmem:[%s14718_s27 + $0x168] sm:$0xff] }
0x13d3   : > { %10473 = vrot.lane.b32.xlu0 %v16225_v29, %s14569_s0  ;;  %v12083_v29 = vld [vmem:[%s14718_s27 + $0x118] sm:$0xff] }
0x13d5   : > { %14254 = vmatmul.mubr.msk.f32.gmra.mxu0 %vm9783_vm5, %v9681_v45 }
0x13d6   : > { %10898 = vrot.lane.b32.xlu1 %v16227_v30, %s14568_s1  ;;  %14256 = vmatprep.mubr.msk.f32.mxu0 %vm9783_vm5, %v9682_v24  ;;  %v12084_v30 = vld [vmem:[%s14718_s27 + $0x120] sm:$0xff] }
0x13d7   : > { %10471 = vrot.lane.b32.xlu0 %v14514_v28, %s14569_s0  ;;  %v12087_v28 = vld [vmem:[%s14718_s27 + $0x138] sm:$0xff] }
0x13d9   : > { %14257 = vmatmul.mubr.msk.f32.gmra.mxu0 %vm9783_vm5, %v9683_v54  ;;  %v12094_v54 = vld [vmem:[%s14718_s27 + $0x170] sm:$0xff] }
0x13da   : > { %10888 = vrot.lane.b32.xlu1 %v16235_v27, %s14568_s1  ;;  %14259 = vmatprep.mubr.msk.f32.mxu0 %vm9783_vm5, %v9684_v63  ;;  %v12095_v63 = vld [vmem:[%s14718_s27 + $0x178] sm:$0xff] }
0x13db   : > { %10469 = vrot.lane.b32.xlu0 %v16235_v27, %s14569_s0  ;;  %v12085_v27 = vld [vmem:[%s14718_s27 + $0x128] sm:$0xff] }
0x13dd   : > { %14260 = vmatmul.mubr.msk.f32.gmra.mxu0 %vm9783_vm5, %v9685_v55 }
0x13de   : > { %10886 = vrot.lane.b32.xlu1 %v14518_v49, %s14568_s1  ;;  %14262 = vmatprep.mubr.msk.f32.mxu0 %vm9783_vm5, %v9686_v48 }
0x13df   : > { %10467 = vrot.lane.b32.xlu0 %v14518_v49, %s14569_s0  ;;  %v12089_v49 = vld [vmem:[%s14718_s27 + $0x148] sm:$0xff] }
0x13e1   : > { %14263 = vmatmul.mubr.msk.f32.gmra.mxu0 %vm9783_vm5, %v9687_v15  ;;  %v12096_v15 = vld [vmem:[%s14718_s27 + $0x180] sm:$0xff] }
0x13e2   : > { %10884 = vrot.lane.b32.xlu1 %v16242_v44, %s14568_s1  ;;  %14265 = vmatprep.mubr.msk.f32.mxu0 %vm9783_vm5, %v9688_v53  ;;  %v12097_v53 = vld [vmem:[%s14718_s27 + $0x188] sm:$0xff] }
0x13e3   : > { %10465 = vrot.lane.b32.xlu0 %v16242_v44, %s14569_s0 }
0x13e5   : > { %14266 = vmatmul.mubr.msk.f32.gmra.mxu0 %vm9783_vm5, %v9689_v61 }
0x13e6   : > { %10882 = vrot.lane.b32.xlu1 %v14520_v8, %s14568_s1  ;;  %14268 = vmatprep.mubr.msk.f32.mxu0 %vm9783_vm5, %v9690_v62  ;;  %v12098_v62 = vld [vmem:[%s14718_s27 + $0x190] sm:$0xff] }
0x13e7   : > { %10463 = vrot.lane.b32.xlu0 %v14520_v8, %s14569_s0 }
0x13e9   : > { %14269 = vmatmul.mubr.msk.f32.gmra.mxu0 %vm9783_vm5, %v9691_v43 }
0x13ea   : > { %10880 = vrot.lane.b32.xlu1 %v16252_v37, %s14568_s1  ;;  %14271 = vmatprep.mubr.msk.f32.mxu0 %vm9783_vm5, %v9692_v5  ;;  %v12099_v5 = vld [vmem:[%s14718_s27 + $0x198] sm:$0xff] }
0x13eb   : > { %10461 = vrot.lane.b32.xlu0 %v16252_v37, %s14569_s0 }
0x13ed   : > { %14272 = vmatmul.mubr.msk.f32.gmra.mxu0 %vm9783_vm5, %v9693_v14  ;;  %v12100_v14 = vld [vmem:[%s14718_s27 + $0x1a0] sm:$0xff] }
0x13ee   : > { %14274 = vmatprep.mubr.msk.f32.mxu0 %vm9783_vm5, %v9694_v17 }
0x13ef   : > { %10459 = vrot.lane.b32.xlu0 %v16266_v51, %s14569_s0  ;;  %s16929_s0 = sshll.u32 %s16956_s10, 8 }
0x13f0   : > { %s16702_s11 = scalar_lea.vmem %s14723_s4, %s16929_s0 }
0x13f1   : > { %14275 = vmatmul.mubr.msk.f32.gmra.mxu0 %vm9783_vm5, %v9695_v6  ;;  %v12101_v6 = vld [vmem:[%s14718_s27 + $0x1a8] sm:$0xff] }
0x13f2   : > { %14277 = vmatprep.mubr.msk.f32.mxu0 %vm9783_vm5, %v9696_v22  ;;  %v12102_v22 = vld [vmem:[%s14718_s27 + $0x1b0] sm:$0xff] }
0x13f3   : > { %10878 = vrot.lane.b32.xlu0 %v16266_v51, %s14568_s1  ;;  %v12090_v51 = vld [vmem:[%s14718_s27 + $0x150] sm:$0xff] }
0x13f5   : > { %14278 = vmatmul.mubr.msk.f32.gmra.mxu0 %vm9783_vm5, %v9697_v26 }
0x13f6   : > { %14280 = vmatprep.mubr.msk.f32.mxu0 %vm9783_vm5, %v9698_v47  ;;  %v12241_v47 = vld [vmem:[%s14718_s27 + $0x308] sm:$0xff] }
0x13f9   : > { %14281 = vmatmul.mubr.msk.f32.gmra.mxu0 %vm9783_vm5, %v9699_v60  ;;  %v12242_v60 = vld [vmem:[%s14718_s27 + $0x310] sm:$0xff] }
0x13fa   : > { %14283 = vmatprep.mubr.msk.f32.mxu0 %vm9783_vm5, %v9700_v18  ;;  %v12103_v18 = vld [vmem:[%s14718_s27 + $0x1b8] sm:$0xff] }
0x13fd   : > { %14284 = vmatmul.mubr.msk.f32.gmra.mxu0 %vm9783_vm5, %v9701_v4  ;;  %v12104_v4 = vld [vmem:[%s14718_s27 + $0x1c0] sm:$0xff] }
0x13fe   : > { %14286 = vmatprep.mubr.msk.f32.mxu0 %vm9783_vm5, %v9702_v35  ;;  %v12243_v35 = vld [vmem:[%s14718_s27 + $0x318] sm:$0xff] }
0x1401   : > { %14287 = vmatmul.mubr.msk.f32.gmra.mxu0 %vm9783_vm5, %v9703_v57  ;;  %v12244_v57 = vld [vmem:[%s14718_s27 + $0x320] sm:$0xff] }
0x1402   : > { %14289 = vmatprep.mubr.msk.f32.mxu0 %vm9783_vm5, %v9704_v56  ;;  %v12105_v56 = vld [vmem:[%s14718_s27 + $0x1c8] sm:$0xff] }
0x1405   : > { %14290 = vmatmul.mubr.msk.f32.gmra.mxu0 %vm9783_vm5, %v9705_v10  ;;  %v12106_v10 = vld [vmem:[%s14718_s27 + $0x1d0] sm:$0xff] }
0x1406   : > { %14384 = vmatprep.mubr.msk.f32.mxu0 %vm9783_vm5, %v12240_v34  ;;  %v12245_v34 = vld [vmem:[%s14718_s27 + $0x328] sm:$0xff] }
0x1420   : > { %v9769_v58 = vpop.permute.xlu1 %9768 }
0x1424   : > { %v9765_v36 = vpop.permute.xlu1 %9764  ;;  %v9771_v0 = vpop.permute.xlu0 %9770 }
0x1425   : > { %14152 = vmatprep.subr.mxu1 %v9771_v0 }
0x1426   : > { %14153 = vmatpush3.msra.mxu1 %v9771_v0  ;;  %v12108_v0 = vld [vmem:[%s14718_s27 + $0x1e0] sm:$0xff] }
0x1427   : > { %14154 = vmatprep.subr.mxu1 %v9769_v58 }
0x1428   : > { %v9761_v59 = vpop.permute.xlu1 %9760  ;;  %14155 = vmatpush3.msra.mxu1 %v9769_v58  ;;  %v12246_v58 = vld [vmem:[%s14718_s27 + $0x330] sm:$0xff] }
0x1429   : > { %v9767_v9 = vpop.permute.xlu0 %9766 }
0x142a   : > { %14156 = vmatprep.subr.mxu1 %v9767_v9 }
0x142b   : > { %14157 = vmatpush3.msra.mxu1 %v9767_v9  ;;  %v12248_v9 = vld [vmem:[%s14718_s27 + $0x340] sm:$0xff] }
0x142c   : > { %14158 = vmatprep.subr.mxu1 %v9765_v36  ;;  %v9757_v7 = vpop.permute.xlu1 %9756 }
0x142d   : > { %14159 = vmatpush3.msra.mxu1 %v9765_v36  ;;  %v9763_v11 = vpop.permute.xlu0 %9762  ;;  %v12107_v36 = vld [vmem:[%s14718_s27 + $0x1d8] sm:$0xff] }
0x142e   : > { %14160 = vmatprep.subr.mxu1 %v9763_v11 }
0x142f   : > { %14161 = vmatpush3.msra.mxu1 %v9763_v11  ;;  %v12110_v11 = vld [vmem:[%s14718_s27 + $0x1f0] sm:$0xff] }
0x1430   : > { %14162 = vmatprep.subr.mxu1 %v9761_v59  ;;  %v9753_v16 = vpop.permute.xlu1 %9752 }
0x1431   : > { %14163 = vmatpush3.msra.mxu1 %v9761_v59  ;;  %v9759_v38 = vpop.permute.xlu0 %9758  ;;  %v12247_v59 = vld [vmem:[%s14718_s27 + $0x338] sm:$0xff] }
0x1432   : > { %14164 = vmatprep.subr.mxu1 %v9759_v38 }
0x1433   : > { %14165 = vmatpush3.msra.mxu1 %v9759_v38  ;;  %v12250_v38 = vld [vmem:[%s14718_s27 + $0x350] sm:$0xff] }
0x1434   : > { %14166 = vmatprep.subr.mxu1 %v9757_v7  ;;  %v10897_v13 = vpop.permute.xlu1 %10896 }
0x1435   : > { %14167 = vmatpush3.msra.mxu1 %v9757_v7  ;;  %v9755_v21 = vpop.permute.xlu0 %9754  ;;  %v12109_v7 = vld [vmem:[%s14718_s27 + $0x1e8] sm:$0xff] }
0x1436   : > { %14168 = vmatprep.subr.mxu1 %v9755_v21 }
0x1437   : > { %14169 = vmatpush3.msra.mxu1 %v9755_v21  ;;  %v12176_v21 = vld [vmem:[%s14718_s27 + $0x200] sm:$0xff] }
0x1438   : > { %14170 = vmatprep.subr.mxu1 %v9753_v16  ;;  %v10895_v1 = vpop.permute.xlu1 %10894 }
0x1439   : > { %14171 = vmatpush3.msra.mxu1 %v9753_v16  ;;  %v9751_v20 = vpop.permute.xlu0 %9750  ;;  %v12249_v16 = vld [vmem:[%s14718_s27 + $0x348] sm:$0xff] }
0x143a   : > { %14172 = vmatprep.subr.mxu1 %v9751_v20 }
0x143b   : > { %14173 = vmatpush3.msra.mxu1 %v9751_v20  ;;  %v12252_v20 = vld [vmem:[%s14718_s27 + $0x360] sm:$0xff] }
0x143c   : > { %14175 = vmatmul.mubr.msk.f32.vlgmr.msra.gmra.mxu1 %vm9783_vm5, %v12081_v23  ;;  %v10893_v3 = vpop.permute.xlu1 %10892  ;;  %v12177_v23 = vld [vmem:[%s14718_s27 + $0x208] sm:$0xff] }
0x143d   : > { %v10478_v12 = vpop.permute.xlu0 %10477  ;;  %14177 = vmatprep.mubr.msk.f32.mxu1 %vm9783_vm5, %v12082_v31  ;;  %v12178_v31 = vld [vmem:[%s14718_s27 + $0x210] sm:$0xff] }
0x1440   : > { %14178 = vmatmul.mubr.msk.f32.gmra.mxu1 %vm9783_vm5, %v12083_v29  ;;  %v10891_v32 = vpop.permute.xlu1 %10890  ;;  %v12179_v29 = vld [vmem:[%s14718_s27 + $0x218] sm:$0xff] }
0x1441   : > { %v10476_v50 = vpop.permute.xlu0 %10475  ;;  %14180 = vmatprep.mubr.msk.f32.mxu1 %vm9783_vm5, %v12084_v30  ;;  %v12180_v30 = vld [vmem:[%s14718_s27 + $0x220] sm:$0xff] }
0x1444   : > { %14181 = vmatmul.mubr.msk.f32.gmra.mxu1 %vm9783_vm5, %v12085_v27  ;;  %v10480_v41 = vpop.permute.xlu1 %10479  ;;  %v12181_v27 = vld [vmem:[%s14718_s27 + $0x228] sm:$0xff] }
0x1445   : > { %v10474_v44 = vpop.permute.xlu0 %10473  ;;  %14292 = vmatprep.subr.mxu1 %v10480_v41  ;;  %14183 = vmatprep.mubr.msk.f32.mxu1 %vm9783_vm5, %v12086_v40  ;;  %v12182_v40 = vld [vmem:[%s14718_s27 + $0x230] sm:$0xff] }
0x1446   : > { %14293 = vmatpush3.msra.mxu1 %v10480_v41  ;;  %v12257_v41 = vld [vmem:[%s14718_s27 + $0x388] sm:$0xff] }
0x1447   : > { %14294 = vmatprep.subr.mxu1 %v10478_v12 }
0x1448   : > { %14184 = vmatmul.mubr.msk.f32.gmra.mxu1 %vm9783_vm5, %v12087_v28  ;;  %v10899_v46 = vpop.permute.xlu1 %10898  ;;  %v12183_v28 = vld [vmem:[%s14718_s27 + $0x238] sm:$0xff] }
0x1449   : > { %14295 = vmatpush3.msra.mxu1 %v10478_v12  ;;  %v10472_v37 = vpop.permute.xlu0 %10471  ;;  %14362 = vmatprep.subr.mxu0 %v10899_v46  ;;  %v12254_v12 = vld [vmem:[%s14718_s27 + $0x370] sm:$0xff] }
0x144a   : > { %14296 = vmatprep.subr.mxu1 %v10476_v50  ;;  %14186 = vmatprep.mubr.msk.f32.mxu1 %vm9783_vm5, %v12088_v2  ;;  %v12184_v2 = vld [vmem:[%s14718_s27 + $0x240] sm:$0xff] }
0x144b   : > { %14297 = vmatpush3.msra.mxu1 %v10476_v50  ;;  %14363 = vmatpush3.msra.mxu0 %v10899_v46  ;;  %v12256_v50 = vld [vmem:[%s14718_s27 + $0x380] sm:$0xff]  ;;  %v12259_v46 = vld [vmem:[%s14718_s27 + $0x398] sm:$0xff] }
0x144c   : > { %14187 = vmatmul.mubr.msk.f32.gmra.mxu1 %vm9783_vm5, %v12089_v49  ;;  %14298 = vmatprep.subr.mxu1 %v10474_v44  ;;  %v10889_v8 = vpop.permute.xlu1 %10888  ;;  %v12185_v49 = vld [vmem:[%s14718_s27 + $0x248] sm:$0xff] }
0x144d   : > { %14364 = vmatprep.subr.mxu0 %v10897_v13  ;;  %14299 = vmatpush3.msra.mxu1 %v10474_v44  ;;  %v10470_v19 = vpop.permute.xlu0 %10469  ;;  %v12258_v44 = vld [vmem:[%s14718_s27 + $0x390] sm:$0xff] }
0x144e   : > { %14365 = vmatpush3.msra.mxu0 %v10897_v13  ;;  %14300 = vmatprep.subr.mxu1 %v10472_v37  ;;  %v12111_v13 = vld [vmem:[%s14718_s27 + $0x1f8] sm:$0xff] }
0x144f   : > { %14366 = vmatprep.subr.mxu0 %v10895_v1  ;;  %14189 = vmatprep.mubr.msk.f32.mxu1 %vm9783_vm5, %v12090_v51  ;;  %v12261_v51 = vld [vmem:[%s14718_s27 + $0x3a8] sm:$0xff] }
0x1450   : > { %14301 = vmatpush3.msra.mxu1 %v10472_v37  ;;  %14367 = vmatpush3.msra.mxu0 %v10895_v1  ;;  %v10887_v39 = vpop.permute.xlu1 %10886  ;;  %v12251_v1 = vld [vmem:[%s14718_s27 + $0x358] sm:$0xff]  ;;  %v12260_v37 = vld [vmem:[%s14718_s27 + $0x3a0] sm:$0xff] }
0x1451   : > { %14190 = vmatmul.mubr.msk.f32.gmra.mxu1 %vm9783_vm5, %v12091_v42  ;;  %14302 = vmatprep.subr.mxu1 %v10470_v19  ;;  %v10468_v25 = vpop.permute.xlu0 %10467  ;;  %v12187_v42 = vld [vmem:[%s14718_s27 + $0x258] sm:$0xff] }
0x1452   : > { %14368 = vmatprep.subr.mxu0 %v10893_v3  ;;  %14303 = vmatpush3.msra.mxu1 %v10470_v19  ;;  %v12262_v19 = vld [vmem:[%s14718_s27 + $0x3b0] sm:$0xff] }
0x1453   : > { %14369 = vmatpush3.msra.mxu0 %v10893_v3  ;;  %14304 = vmatprep.subr.mxu1 %v10468_v25  ;;  %v12253_v3 = vld [vmem:[%s14718_s27 + $0x368] sm:$0xff] }
0x1454   : > { %14370 = vmatprep.subr.mxu0 %v10891_v32  ;;  %14192 = vmatprep.mubr.msk.f32.mxu1 %vm9783_vm5, %v12092_v52  ;;  %v10885_v45 = vpop.permute.xlu1 %10884  ;;  %v12264_v52 = vld [vmem:[%s14718_s27 + $0x3c0] sm:$0xff] }
0x1455   : > { %14305 = vmatpush3.msra.mxu1 %v10468_v25  ;;  %14371 = vmatpush3.msra.mxu0 %v10891_v32  ;;  %v10466_v24 = vpop.permute.xlu0 %10465  ;;  %v12255_v32 = vld [vmem:[%s14718_s27 + $0x378] sm:$0xff] }
0x1456   : > { %14193 = vmatmul.mubr.msk.f32.gmra.mxu1 %vm9783_vm5, %v12093_v33  ;;  %14372 = vmatprep.subr.mxu0 %v10889_v8  ;;  %v12263_v25 = vld [vmem:[%s14718_s27 + $0x3b8] sm:$0xff]  ;;  %v12189_v33 = vld [vmem:[%s14718_s27 + $0x268] sm:$0xff] }
0x1457   : > { %14373 = vmatpush3.msra.mxu0 %v10889_v8  ;;  %14306 = vmatprep.subr.mxu1 %v10466_v24  ;;  %v12186_v8 = vld [vmem:[%s14718_s27 + $0x250] sm:$0xff] }
0x1458   : > { %14374 = vmatprep.subr.mxu0 %v10887_v39  ;;  %14195 = vmatprep.mubr.msk.f32.mxu1 %vm9783_vm5, %v12094_v54  ;;  %v10883_v55 = vpop.permute.xlu1 %10882  ;;  %v12266_v54 = vld [vmem:[%s14718_s27 + $0x3d0] sm:$0xff] }
0x1459   : > { %14307 = vmatpush3.msra.mxu1 %v10466_v24  ;;  %14375 = vmatpush3.msra.mxu0 %v10887_v39  ;;  %v10464_v48 = vpop.permute.xlu0 %10463  ;;  %v12188_v39 = vld [vmem:[%s14718_s27 + $0x260] sm:$0xff]  ;;  %v12265_v24 = vld [vmem:[%s14718_s27 + $0x3c8] sm:$0xff] }
0x145a   : > { %14196 = vmatmul.mubr.msk.f32.gmra.mxu1 %vm9783_vm5, %v12095_v63  ;;  %14376 = vmatprep.subr.mxu0 %v10885_v45  ;;  %v12191_v63 = vld [vmem:[%s14718_s27 + $0x278] sm:$0xff] }
0x145b   : > { %14377 = vmatpush3.msra.mxu0 %v10885_v45  ;;  %14308 = vmatprep.subr.mxu1 %v10464_v48  ;;  %v12190_v45 = vld [vmem:[%s14718_s27 + $0x270] sm:$0xff] }
0x145c   : > { %14378 = vmatprep.subr.mxu0 %v10883_v55  ;;  %14198 = vmatprep.mubr.msk.f32.mxu1 %vm9783_vm5, %v12096_v15  ;;  %v10881_v61 = vpop.permute.xlu1 %10880  ;;  %v12268_v15 = vld [vmem:[%s14718_s27 + $0x3e0] sm:$0xff] }
0x145d   : > { %14309 = vmatpush3.msra.mxu1 %v10464_v48  ;;  %14379 = vmatpush3.msra.mxu0 %v10883_v55  ;;  %v10462_v43 = vpop.permute.xlu0 %10461  ;;  %v12192_v55 = vld [vmem:[%s14718_s27 + $0x280] sm:$0xff]  ;;  %v12267_v48 = vld [vmem:[%s14718_s27 + $0x3d8] sm:$0xff] }
0x145e   : > { %14199 = vmatmul.mubr.msk.f32.gmra.mxu1 %vm9783_vm5, %v12097_v53  ;;  %14310 = vmatprep.subr.mxu1 %v10462_v43  ;;  %v12193_v53 = vld [vmem:[%s14718_s27 + $0x288] sm:$0xff] }
0x145f   : > { %14380 = vmatprep.subr.mxu0 %v10881_v61  ;;  %14201 = vmatprep.mubr.msk.f32.mxu1 %vm9783_vm5, %v12098_v62  ;;  %v12269_v62 = vld [vmem:[%s14718_s27 + $0x3e8] sm:$0xff] }
0x1460   : > { %14311 = vmatpush3.msra.mxu1 %v10462_v43  ;;  %14381 = vmatpush3.msra.mxu0 %v10881_v61  ;;  %v12194_v61 = vld [vmem:[%s14718_s27 + $0x290] sm:$0xff] }
0x1461   : > { %v10460_v17 = vpop.permute.xlu0 %10459  ;;  %v12270_v43 = vld [vmem:[%s14718_s27 + $0x3f0] sm:$0xff] }
0x1462   : > { %14202 = vmatmul.mubr.msk.f32.gmra.mxu1 %vm9783_vm5, %v12099_v5  ;;  %14312 = vmatprep.subr.mxu1 %v10460_v17  ;;  %v12195_v5 = vld [vmem:[%s14718_s27 + $0x298] sm:$0xff] }
0x1463   : > { %14204 = vmatprep.mubr.msk.f32.mxu1 %vm9783_vm5, %v12100_v14  ;;  %14313 = vmatpush3.msra.mxu1 %v10460_v17  ;;  %v12196_v14 = vld [vmem:[%s14718_s27 + $0x2a0] sm:$0xff]  ;;  %v12271_v17 = vld [vmem:[%s14718_s27 + $0x3f8] sm:$0xff] }
0x1465   : > { %v10879_v26 = vpop.permute.xlu0 %10878 }
0x1466   : > { %14205 = vmatmul.mubr.msk.f32.gmra.mxu1 %vm9783_vm5, %v12101_v6  ;;  %14382 = vmatprep.subr.mxu0 %v10879_v26  ;;  %v12197_v6 = vld [vmem:[%s14718_s27 + $0x2a8] sm:$0xff] }
0x1467   : > { %14207 = vmatprep.mubr.msk.f32.mxu1 %vm9783_vm5, %v12102_v22  ;;  %14383 = vmatpush3.msra.mxu0 %v10879_v26  ;;  %v12198_v22 = vld [vmem:[%s14718_s27 + $0x2b0] sm:$0xff]  ;;  %v12199_v26 = vld [vmem:[%s14718_s27 + $0x2b8] sm:$0xff] }
0x1468   : > { %14385 = vmatmul.mubr.msk.f32.vlgmr.msra.gmra.mxu0 %vm9783_vm5, %v12241_v47  ;;  %v12200_v47 = vld [vmem:[%s14718_s27 + $0x2c0] sm:$0xff] }
0x1469   : > { %14387 = vmatprep.mubr.msk.f32.mxu0 %vm9783_vm5, %v12242_v60 }
0x146a   : > { %14208 = vmatmul.mubr.msk.f32.gmra.mxu1 %vm9783_vm5, %v12103_v18  ;;  %v12201_v18 = vld [vmem:[%s14718_s27 + $0x2c8] sm:$0xff] }
0x146b   : > { %14210 = vmatprep.mubr.msk.f32.mxu1 %vm9783_vm5, %v12104_v4  ;;  %v12202_v4 = vld [vmem:[%s14718_s27 + $0x2d0] sm:$0xff] }
0x146c   : > { %14388 = vmatmul.mubr.msk.f32.gmra.mxu0 %vm9783_vm5, %v12243_v35 }
0x146d   : > { %14390 = vmatprep.mubr.msk.f32.mxu0 %vm9783_vm5, %v12244_v57  ;;  %v12203_v57 = vld [vmem:[%s14718_s27 + $0x2d8] sm:$0xff] }
0x146e   : > { %14211 = vmatmul.mubr.msk.f32.gmra.mxu1 %vm9783_vm5, %v12105_v56  ;;  %v12204_v56 = vld [vmem:[%s14718_s27 + $0x2e0] sm:$0xff] }
0x146f   : > { %14213 = vmatprep.mubr.msk.f32.mxu1 %vm9783_vm5, %v12106_v10 }
0x1470   : > { %14391 = vmatmul.mubr.msk.f32.gmra.mxu0 %vm9783_vm5, %v12245_v34  ;;  %v12205_v34 = vld [vmem:[%s14718_s27 + $0x2e8] sm:$0xff] }
0x1471   : > { %14393 = vmatprep.mubr.msk.f32.mxu0 %vm9783_vm5, %v12246_v58  ;;  %v12206_v58 = vld [vmem:[%s14718_s27 + $0x2f0] sm:$0xff] }
0x1472   : > { %14214 = vmatmul.mubr.msk.f32.gmra.mxu1 %vm9783_vm5, %v12107_v36 }
0x1473   : > { %14216 = vmatprep.mubr.msk.f32.mxu1 %vm9783_vm5, %v12108_v0  ;;  %v12207_v0 = vld [vmem:[%s14718_s27 + $0x2f8] sm:$0xff] }
0x1474   : > { %14394 = vmatmul.mubr.msk.f32.gmra.mxu0 %vm9783_vm5, %v12247_v59 }
0x1475   : > { %14396 = vmatprep.mubr.msk.f32.mxu0 %vm9783_vm5, %v12248_v9 }
0x1476   : > { %14217 = vmatmul.mubr.msk.f32.gmra.mxu1 %vm9783_vm5, %v12109_v7 }
0x1477   : > { %14219 = vmatprep.mubr.msk.f32.mxu1 %vm9783_vm5, %v12110_v11 }
0x1478   : > { %14397 = vmatmul.mubr.msk.f32.gmra.mxu0 %vm9783_vm5, %v12249_v16 }
0x1479   : > { %14399 = vmatprep.mubr.msk.f32.mxu0 %vm9783_vm5, %v12250_v38 }
0x147a   : > { %14220 = vmatmul.mubr.msk.f32.gmra.mxu1 %vm9783_vm5, %v12111_v13 }
0x147b   : > { %14314 = vmatprep.mubr.msk.f32.mxu1 %vm9783_vm5, %v12176_v21 }
0x147c   : > { %14400 = vmatmul.mubr.msk.f32.gmra.mxu0 %vm9783_vm5, %v12251_v1 }
0x147d   : > { %14402 = vmatprep.mubr.msk.f32.mxu0 %vm9783_vm5, %v12252_v20 }
0x147e   : > { %14315 = vmatmul.mubr.msk.f32.vlgmr.msra.gmra.mxu1 %vm9783_vm5, %v12177_v23 }
0x147f   : > { %14317 = vmatprep.mubr.msk.f32.mxu1 %vm9783_vm5, %v12178_v31 }
0x1480   : > { %14403 = vmatmul.mubr.msk.f32.gmra.mxu0 %vm9783_vm5, %v12253_v3 }
0x1481   : > { %14405 = vmatprep.mubr.msk.f32.mxu0 %vm9783_vm5, %v12254_v12 }
0x1482   : > { %14318 = vmatmul.mubr.msk.f32.gmra.mxu1 %vm9783_vm5, %v12179_v29 }
0x1483   : > { %14320 = vmatprep.mubr.msk.f32.mxu1 %vm9783_vm5, %v12180_v30 }
0x1484   : > { %14406 = vmatmul.mubr.msk.f32.gmra.mxu0 %vm9783_vm5, %v12255_v32 }
0x1485   : > { %14408 = vmatprep.mubr.msk.f32.mxu0 %vm9783_vm5, %v12256_v50 }
0x1486   : > { %14321 = vmatmul.mubr.msk.f32.gmra.mxu1 %vm9783_vm5, %v12181_v27 }
0x1487   : > { %14323 = vmatprep.mubr.msk.f32.mxu1 %vm9783_vm5, %v12182_v40 }
0x1488   : > { %14409 = vmatmul.mubr.msk.f32.gmra.mxu0 %vm9783_vm5, %v12257_v41 }
0x1489   : > { %14411 = vmatprep.mubr.msk.f32.mxu0 %vm9783_vm5, %v12258_v44  ;;  %v16543_v60 = vpop.f32.mrf.mxu0 }
0x148a   : > { %14324 = vmatmul.mubr.msk.f32.gmra.mxu1 %vm9783_vm5, %v12183_v28 }
0x148b   : > { %14326 = vmatprep.mubr.msk.f32.mxu1 %vm9783_vm5, %v12184_v2  ;;  %v16549_v35 = vpop.f32.mrf.mxu0 }
0x148c   : > { %14412 = vmatmul.mubr.msk.f32.gmra.mxu0 %vm9783_vm5, %v12259_v46 }
0x148d   : > { %14414 = vmatprep.mubr.msk.f32.mxu0 %vm9783_vm5, %v12260_v37  ;;  %v16555_v10 = vpop.f32.mrf.mxu0 }
0x148e   : > { %14327 = vmatmul.mubr.msk.f32.gmra.mxu1 %vm9783_vm5, %v12185_v49 }
0x148f   : > { %14329 = vmatprep.mubr.msk.f32.mxu1 %vm9783_vm5, %v12186_v8  ;;  %v16561_v36 = vpop.f32.mrf.mxu0 }
0x1490   : > { %14415 = vmatmul.mubr.msk.f32.gmra.mxu0 %vm9783_vm5, %v12261_v51 }
0x1491   : > { %14417 = vmatprep.mubr.msk.f32.mxu0 %vm9783_vm5, %v12262_v19  ;;  %v16566_v59 = vpop.f32.mrf.mxu0 }
0x1492   : > { %14330 = vmatmul.mubr.msk.f32.gmra.mxu1 %vm9783_vm5, %v12187_v42 }
0x1493   : > { %14332 = vmatprep.mubr.msk.f32.mxu1 %vm9783_vm5, %v12188_v39  ;;  %v16569_v9 = vpop.f32.mrf.mxu0 }
0x1494   : > { %14418 = vmatmul.mubr.msk.f32.gmra.mxu0 %vm9783_vm5, %v12263_v25 }
0x1495   : > { %14420 = vmatprep.mubr.msk.f32.mxu0 %vm9783_vm5, %v12264_v52  ;;  %v16571_v7 = vpop.f32.mrf.mxu0 }
0x1496   : > { %14333 = vmatmul.mubr.msk.f32.gmra.mxu1 %vm9783_vm5, %v12189_v33 }
0x1497   : > { %14335 = vmatprep.mubr.msk.f32.mxu1 %vm9783_vm5, %v12190_v45  ;;  %v16573_v11 = vpop.f32.mrf.mxu0 }
0x1498   : > { %14421 = vmatmul.mubr.msk.f32.gmra.mxu0 %vm9783_vm5, %v12265_v24 }
0x1499   : > { %14423 = vmatprep.mubr.msk.f32.mxu0 %vm9783_vm5, %v12266_v54  ;;  %v16575_v16 = vpop.f32.mrf.mxu0 }
0x149a   : > { %14336 = vmatmul.mubr.msk.f32.gmra.mxu1 %vm9783_vm5, %v12191_v63 }
0x149b   : > { %14338 = vmatprep.mubr.msk.f32.mxu1 %vm9783_vm5, %v12192_v55  ;;  %v16577_v38 = vpop.f32.mrf.mxu0 }
0x149c   : > { %14424 = vmatmul.mubr.msk.f32.gmra.mxu0 %vm9783_vm5, %v12267_v48 }
0x149d   : > { %14426 = vmatprep.mubr.msk.f32.mxu0 %vm9783_vm5, %v12268_v15  ;;  %v16579_v13 = vpop.f32.mrf.mxu0 }
0x149e   : > { %14339 = vmatmul.mubr.msk.f32.gmra.mxu1 %vm9783_vm5, %v12193_v53 }
0x149f   : > { %14341 = vmatprep.mubr.msk.f32.mxu1 %vm9783_vm5, %v12194_v61  ;;  %v16581_v21 = vpop.f32.mrf.mxu0 }
0x14a0   : > { %14427 = vmatmul.mubr.msk.f32.gmra.mxu0 %vm9783_vm5, %v12269_v62 }
0x14a1   : > { %14429 = vmatprep.mubr.msk.f32.mxu0 %vm9783_vm5, %v12270_v43  ;;  %v16583_v1 = vpop.f32.mrf.mxu0 }
0x14a2   : > { %14342 = vmatmul.mubr.msk.f32.gmra.mxu1 %vm9783_vm5, %v12195_v5 }
0x14a3   : > { %14344 = vmatprep.mubr.msk.f32.mxu1 %vm9783_vm5, %v12196_v14  ;;  %v16585_v20 = vpop.f32.mrf.mxu0 }
0x14a4   : > { %14430 = vmatmul.mubr.msk.f32.gmra.mxu0 %vm9783_vm5, %v12271_v17 }
0x14a5   : > { %v16587_v23 = vpop.f32.mrf.mxu0 }
0x14a6   : > { %14345 = vmatmul.mubr.msk.f32.gmra.mxu1 %vm9783_vm5, %v12197_v6 }
0x14a7   : > { %14347 = vmatprep.mubr.msk.f32.mxu1 %vm9783_vm5, %v12198_v22  ;;  %v16589_v31 = vpop.f32.mrf.mxu0 }
0x14a9   : > { %v16591_v3 = vpop.f32.mrf.mxu0 }
0x14aa   : > { %14348 = vmatmul.mubr.msk.f32.gmra.mxu1 %vm9783_vm5, %v12199_v26 }
0x14ab   : > { %14350 = vmatprep.mubr.msk.f32.mxu1 %vm9783_vm5, %v12200_v47  ;;  %v16593_v12 = vpop.f32.mrf.mxu0 }
0x14ad   : > { %v16595_v29 = vpop.f32.mrf.mxu0 }
0x14ae   : > { %14351 = vmatmul.mubr.msk.f32.gmra.mxu1 %vm9783_vm5, %v12201_v18 }
0x14af   : > { %14353 = vmatprep.mubr.msk.f32.mxu1 %vm9783_vm5, %v12202_v4  ;;  %v16597_v30 = vpop.f32.mrf.mxu0 }
0x14b0   : > { %16904 = vst [vmem:[#allocation14_spill] sm:$0xff] %v16597_v30 }
0x14b1   : > { %v16599_v32 = vpop.f32.mrf.mxu0 }
0x14b2   : > { %14354 = vmatmul.mubr.msk.f32.gmra.mxu1 %vm9783_vm5, %v12203_v57  ;;  %16905 = vst [vmem:[#allocation15_spill] sm:$0xff] %v16599_v32 }
0x14b3   : > { %14356 = vmatprep.mubr.msk.f32.mxu1 %vm9783_vm5, %v12204_v56  ;;  %v16601_v27 = vpop.f32.mrf.mxu0 }
0x14b4   : > { %16906 = vst [vmem:[#allocation16_spill] sm:$0xff] %v16601_v27 }
0x14b5   : > { %v16603_v44 = vpop.f32.mrf.mxu0 }
0x14b6   : > { %14357 = vmatmul.mubr.msk.f32.gmra.mxu1 %vm9783_vm5, %v12205_v34  ;;  %16907 = vst [vmem:[#allocation17_spill] sm:$0xff] %v16603_v44 }
0x14b7   : > { %14359 = vmatprep.mubr.msk.f32.mxu1 %vm9783_vm5, %v12206_v58  ;;  %v16607_v46 = vpop.f32.mrf.mxu0 }
0x14b8   : > { %16908 = vst [vmem:[#allocation18_spill] sm:$0xff] %v16607_v46 }
0x14b9   : > { %v16613_v8 = vpop.f32.mrf.mxu0 }
0x14ba   : > { %14360 = vmatmul.mubr.msk.f32.gmra.mxu1 %vm9783_vm5, %v12207_v0  ;;  %16909 = vst [vmem:[#allocation19_spill] sm:$0xff] %v16613_v8 }
0x14bb   : > { %v16619_v42 = vpop.f32.mrf.mxu0 }
0x14bc   : > { %16910 = vst [vmem:[#allocation20_spill] sm:$0xff] %v16619_v42 }
0x14bd   : > { %v16623_v25 = vpop.f32.mrf.mxu0 }
0x14be   : > { %16911 = vst [vmem:[#allocation21_spill] sm:$0xff] %v16623_v25 }
0x14bf   : > { %v16629_v45 = vpop.f32.mrf.mxu0 }
0x14c0   : > { %16912 = vst [vmem:[#allocation22_spill] sm:$0xff] %v16629_v45 }
0x14c1   : > { %v16635_v63 = vpop.f32.mrf.mxu0 }
0x14c2   : > { %16913 = vst [vmem:[#allocation23_spill] sm:$0xff] %v16635_v63 }
0x14c3   : > { %v16641_v15 = vpop.f32.mrf.mxu0 }
0x14c4   : > { %16914 = vst [vmem:[#allocation24_spill] sm:$0xff] %v16641_v15 }
0x14c5   : > { %v16647_v62 = vpop.f32.mrf.mxu0 }
0x14c6   : > { %16915 = vst [vmem:[#allocation25_spill] sm:$0xff] %v16647_v62 }
0x14c7   : > { %v16653_v14 = vpop.f32.mrf.mxu0 }
0x14c8   : > { %16916 = vst [vmem:[#allocation26_spill] sm:$0xff] %v16653_v14 }
0x14fc   : > { %v14176_v50 = vpop.f32.mrf.mxu1 }
0x14fe   : > { %v9946_v40 = vpop.f32.mrf.mxu1 }
0x1500   : > { %v14179_v41 = vpop.f32.mrf.mxu1 }
0x1502   : > { %v9956_v28 = vpop.f32.mrf.mxu1 }
0x1504   : > { %v16605_v2 = vpop.f32.mrf.mxu1 }
0x1506   : > { %v16609_v37 = vpop.f32.mrf.mxu1 }
0x1508   : > { %v16611_v49 = vpop.f32.mrf.mxu1 }
0x150a   : > { %v16615_v51 = vpop.f32.mrf.mxu1 }
0x150c   : > { %v16617_v19 = vpop.f32.mrf.mxu1 }
0x150e   : > { %v16621_v39 = vpop.f32.mrf.mxu1 }
0x1511   : > { %v16625_v52 = vpop.f32.mrf.mxu1 }
0x1513   : > { %v16627_v33 = vpop.f32.mrf.mxu1 }
0x1516   : > { %v16631_v24 = vpop.f32.mrf.mxu1 }
0x1518   : > { %v16633_v54 = vpop.f32.mrf.mxu1 }
0x151a   : > { %v16637_v55 = vpop.f32.mrf.mxu1 }
0x151c   : > { %v16639_v48 = vpop.f32.mrf.mxu1 }
0x151e   : > { %v16643_v53 = vpop.f32.mrf.mxu1 }
0x1520   : > { %v16645_v61 = vpop.f32.mrf.mxu1 }
0x1522   : > { %v16649_v43 = vpop.f32.mrf.mxu1 }
0x1524   : > { %v16651_v5 = vpop.f32.mrf.mxu1 }
0x1526   : > { %v16655_v17 = vpop.f32.mrf.mxu1 }
0x1527   : > { %16917 = vst [vmem:[#allocation27_spill] sm:$0xff] %v16655_v17 }
0x1528   : > { %v16657_v6 = vpop.f32.mrf.mxu1  ;;  %v14386_v22 = vpop.f32.mrf.mxu0 }
0x1529   : > { %16918 = vst [vmem:[#allocation28_spill] sm:$0xff] %v16657_v6 }
0x152a   : > { %v16659_v26 = vpop.f32.mrf.mxu1  ;;  %v11073_v47 = vpop.f32.mrf.mxu0 }
0x152b   : > { %16919 = vst [vmem:[#allocation29_spill] sm:$0xff] %v16659_v26 }
0x152c   : > { %v16661_v18 = vpop.f32.mrf.mxu1  ;;  %v14389_v4 = vpop.f32.mrf.mxu0 }
0x152d   : > { %16920 = vst [vmem:[#allocation30_spill] sm:$0xff] %v16661_v18  ;;  %v10268_v18 = vadd.f32 %v16549_v35, %v9946_v40  ;;  %v10293_v35 = vadd.f32 %v16566_v59, %v16605_v2 }
0x152e   : > { %v16663_v57 = vpop.f32.mrf.mxu1  ;;  %v11083_v56 = vpop.f32.mrf.mxu0 }
0x152f   : > { %16921 = vst [vmem:[#allocation31_spill] sm:$0xff] %v16663_v57 }
0x1530   : > { %v16665_v34 = vpop.f32.mrf.mxu1  ;;  %v14392_v58 = vpop.f32.mrf.mxu0 }
0x1531   : > { %16922 = vst [vmem:[#allocation32_spill] sm:$0xff] %v16665_v34 }
0x1532   : > { %v16667_v0 = vpop.f32.mrf.mxu1  ;;  %v11093_v14 = vpop.f32.mrf.mxu0 }
0x1533   : > { %16923 = vst [vmem:[#allocation33_spill] sm:$0xff] %v16667_v0 }
0x1534   : > { %v16669_v62 = vpop.f32.mrf.mxu1  ;;  %v16671_v15 = vpop.f32.mrf.mxu0 }
0x1535   : > { %16924 = vst [vmem:[#allocation34_spill] sm:$0xff] %v16669_v62  ;;  %v10273_v62 = vadd.f32 %v16543_v60, %v14176_v50  ;;  %v10278_v60 = vadd.f32 %v16561_v36, %v9956_v28  ;;  %v10288_v36 = vadd.f32 %v16569_v9, %v16609_v37 }
0x1536   : > { %v16673_v63 = vpop.f32.mrf.mxu1  ;;  %v16675_v45 = vpop.f32.mrf.mxu0 }
0x1537   : > { %16925 = vst [vmem:[#allocation35_spill] sm:$0xff] %v16673_v63 }
0x1538   : > { %v16677_v25 = vpop.f32.mrf.mxu1  ;;  %v16679_v42 = vpop.f32.mrf.mxu0 }
0x1539   : > { %16926 = vst [vmem:[#allocation36_spill] sm:$0xff] %v16677_v25 }
0x153a   : > { %v16681_v8 = vpop.f32.mrf.mxu1  ;;  %v16683_v57 = vpop.f32.mrf.mxu0 }
0x153b   : > { %16927 = vst [vmem:[#allocation37_spill] sm:$0xff] %v16681_v8  ;;  %v10283_v8 = vadd.f32 %v16555_v10, %v14179_v41 }
0x153c   : > { %v16685_v34 = vpop.f32.mrf.mxu1  ;;  %v16687_v0 = vpop.f32.mrf.mxu0 }
0x153d   : > { %16928 = vst [vmem:[#allocation38_spill] sm:$0xff] %v16685_v34 }
0x153e   : > { %v14316_v46 = vpop.f32.mrf.mxu1  ;;  %v16690_v63 = vpop.f32.mrf.mxu0 }
0x153f   : > { %v10814_v25 = vadd.f32 %v14316_v46, %v10273_v62 }
0x1540   : > { %v10654_v44 = vpop.f32.mrf.mxu1  ;;  %v16693_v26 = vpop.f32.mrf.mxu0 }
0x1541   : > { %v10813_v27 = vadd.f32 %v10654_v44, %v10268_v18  ;;  %v11233_v6 = vadd.f32 %v14386_v22, %v10814_v25  ;;  %v10298_v18 = vadd.f32 %v16573_v11, %v16615_v51 }
0x1542   : > { %v14319_v34 = vpop.f32.mrf.mxu1  ;;  %v16696_v32 = vpop.f32.mrf.mxu0 }
0x1543   : > { %v11265_v50 = vmax.f32 %v11233_v6, 0.0  ;;  %v10816_v17 = vadd.f32 %v14319_v34, %v10283_v8  ;;  %v11232_v30 = vadd.f32 %v11073_v47, %v10813_v27  ;;  %v10303_v6 = vadd.f32 %v16571_v7, %v16611_v49 }
0x1544   : > { %v10664_v40 = vpop.f32.mrf.mxu1  ;;  %v16706_v10 = vpop.f32.mrf.mxu0 }
0x1545   : > { %v11297_v41 = vmin.f32 %v11265_v50, 1.0  ;;  %v11264_v44 = vmax.f32 %v11232_v30, 0.0  ;;  %v10815_v46 = vadd.f32 %v10664_v40, %v10278_v60  ;;  %v11235_v25 = vadd.f32 %v14389_v4, %v10816_v17 }
0x1546   : > { %v14322_v27 = vpop.f32.mrf.mxu1  ;;  %v16710_v28 = vpop.f32.mrf.mxu0  ;;  %v10313_v50 = vadd.f32 %v16575_v16, %v16617_v19 }
0x1547   : > { %11330 = vst.msk [vmem:[%s16702_s11 + $0x8] sm:$0xff] %vm11328_vm6, %v11297_v41  ;;  %v11296_v8 = vmin.f32 %v11264_v44, 1.0  ;;  %v11267_v59 = vmax.f32 %v11235_v25, 0.0  ;;  %v10818_v2 = vadd.f32 %v14322_v27, %v10293_v35  ;;  %v11234_v62 = vadd.f32 %v11083_v56, %v10815_v46 }
0x1548   : > { %v10674_v22 = vpop.f32.mrf.mxu1  ;;  %v16716_v30 = vpop.f32.mrf.mxu0  ;;  %v10308_v44 = vadd.f32 %v16577_v38, %v16621_v39  ;;  %v10323_v27 = vadd.f32 %v16579_v13, %v16625_v52 }
0x1549   : > { %11329 = vst.msk [vmem:[%s16702_s11] sm:$0xff] %vm11328_vm6, %v11296_v8  ;;  %v11299_v9 = vmin.f32 %v11267_v59, 1.0  ;;  %v11266_v37 = vmax.f32 %v11234_v62, 0.0  ;;  %v10817_v17 = vadd.f32 %v10674_v22, %v10288_v36  ;;  %v11237_v47 = vadd.f32 %v14392_v58, %v10818_v2 }
0x154a   : > { %v14325_v4 = vpop.f32.mrf.mxu1  ;;  %v16722_v34 = vpop.f32.mrf.mxu0  ;;  %v10318_v2 = vadd.f32 %v16581_v21, %v16627_v33 }
0x154b   : > { %11332 = vst.msk [vmem:[%s16702_s11 + $0x18] sm:$0xff] %vm11328_vm6, %v11299_v9  ;;  %v11298_v7 = vmin.f32 %v11266_v37, 1.0  ;;  %v11269_v49 = vmax.f32 %v11237_v47, 0.0  ;;  %v10820_v56 = vadd.f32 %v14325_v4, %v10303_v6  ;;  %v11236_v60 = vadd.f32 %v11093_v14, %v10817_v17 }
0x154c   : > { %v10684_v35 = vpop.f32.mrf.mxu1  ;;  %v16728_v40 = vpop.f32.mrf.mxu0  ;;  %v10333_v9 = vadd.f32 %v16583_v1, %v16631_v24  ;;  %v10328_v47 = vadd.f32 %v16585_v20, %v16633_v54 }
0x154d   : > { %11331 = vst.msk [vmem:[%s16702_s11 + $0x10] sm:$0xff] %vm11328_vm6, %v11298_v7  ;;  %v11301_v11 = vmin.f32 %v11269_v49, 1.0  ;;  %v11268_v51 = vmax.f32 %v11236_v60, 0.0  ;;  %v10819_v58 = vadd.f32 %v10684_v35, %v10298_v18  ;;  %v11239_v41 = vadd.f32 %v16671_v15, %v10820_v56 }
0x154e   : > { %v14328_v46 = vpop.f32.mrf.mxu1  ;;  %v16735_v25 = vpop.f32.mrf.mxu0  ;;  %v10343_v49 = vadd.f32 %v16587_v23, %v16637_v55 }
0x154f   : > { %11334 = vst.msk [vmem:[%s16702_s11 + $0x28] sm:$0xff] %vm11328_vm6, %v11301_v11  ;;  %v11300_v16 = vmin.f32 %v11268_v51, 1.0  ;;  %v11271_v19 = vmax.f32 %v11239_v41, 0.0  ;;  %v10822_v14 = vadd.f32 %v14328_v46, %v10313_v50  ;;  %v11238_v36 = vadd.f32 %v16675_v45, %v10819_v58 }
0x1550   : > { %v10694_v8 = vpop.f32.mrf.mxu1  ;;  %v16747_v6 = vpop.f32.mrf.mxu0  ;;  %v10338_v50 = vadd.f32 %v16589_v31, %v16639_v48  ;;  %v10353_v58 = vadd.f32 %v16591_v3, %v16643_v53  ;;  %v10348_v46 = vadd.f32 %v16593_v12, %v16645_v61 }
0x1551   : > { %11333 = vst.msk [vmem:[%s16702_s11 + $0x20] sm:$0xff] %vm11328_vm6, %v11300_v16  ;;  %v11303_v15 = vmin.f32 %v11271_v19, 1.0  ;;  %v11270_v38 = vmax.f32 %v11238_v36, 0.0  ;;  %v10821_v39 = vadd.f32 %v10694_v8, %v10308_v44  ;;  %v11241_v59 = vadd.f32 %v16679_v42, %v10822_v14 }
0x1552   : > { %v14331_v62 = vpop.f32.mrf.mxu1  ;;  %v16759_v4 = vpop.f32.mrf.mxu0  ;;  %v10363_v36 = vadd.f32 %v16595_v29, %v16649_v43 }
0x1553   : > { %11336 = vst.msk [vmem:[%s16702_s11 + $0x38] sm:$0xff] %vm11328_vm6, %v11303_v15  ;;  %v11302_v45 = vmin.f32 %v11270_v38, 1.0  ;;  %v11273_v13 = vmax.f32 %v11241_v59, 0.0  ;;  %v10824_v52 = vadd.f32 %v14331_v62, %v10323_v27  ;;  %v11240_v22 = vadd.f32 %v16683_v57, %v10821_v39  ;;  %v16930_v15 = vld [vmem:[#allocation14_spill] sm:$0xff]  ;;  %v16931_v62 = vld [vmem:[#allocation27_spill] sm:$0xff] }
0x1554   : > { %v10704_v37 = vpop.f32.mrf.mxu1  ;;  %v16771_v11 = vpop.f32.mrf.mxu0  ;;  %v10358_v38 = vadd.f32 %v16930_v15, %v16651_v5 }
0x1555   : > { %11335 = vst.msk [vmem:[%s16702_s11 + $0x30] sm:$0xff] %vm11328_vm6, %v11302_v45  ;;  %v11305_v42 = vmin.f32 %v11273_v13, 1.0  ;;  %v11272_v21 = vmax.f32 %v11240_v22, 0.0  ;;  %v10823_v33 = vadd.f32 %v10704_v37, %v10318_v2  ;;  %v11243_v17 = vadd.f32 %v16687_v0, %v10824_v52  ;;  %v16932_v45 = vld [vmem:[#allocation15_spill] sm:$0xff]  ;;  %v16933_v37 = vld [vmem:[#allocation28_spill] sm:$0xff] }
0x1556   : > { %v14334_v18 = vpop.f32.mrf.mxu1  ;;  %v16783_v19 = vpop.f32.mrf.mxu0  ;;  %v10373_v13 = vadd.f32 %v16932_v45, %v16931_v62 }
0x1557   : > { %11338 = vst.msk [vmem:[%s16702_s11 + $0x48] sm:$0xff] %vm11328_vm6, %v11305_v42  ;;  %v11304_v57 = vmin.f32 %v11272_v21, 1.0  ;;  %v11275_v1 = vmax.f32 %v11243_v17, 0.0  ;;  %v10826_v24 = vadd.f32 %v14334_v18, %v10333_v9  ;;  %v11242_v7 = vadd.f32 %v16690_v63, %v10823_v33  ;;  %v16934_v42 = vld [vmem:[#allocation16_spill] sm:$0xff] }
0x1558   : > { %v10714_v56 = vpop.f32.mrf.mxu1  ;;  %v14422_v59 = vpop.f32.mrf.mxu0  ;;  %v10368_v21 = vadd.f32 %v16934_v42, %v16933_v37 }
0x1559   : > { %11337 = vst.msk [vmem:[%s16702_s11 + $0x40] sm:$0xff] %vm11328_vm6, %v11304_v57  ;;  %v11307_v0 = vmin.f32 %v11275_v1, 1.0  ;;  %v11274_v20 = vmax.f32 %v11242_v7, 0.0  ;;  %v10825_v54 = vadd.f32 %v10714_v56, %v10328_v47  ;;  %v11245_v60 = vadd.f32 %v16693_v26, %v10826_v24  ;;  %v16935_v1 = vld [vmem:[#allocation29_spill] sm:$0xff] }
0x155a   : > { %v14337_v35 = vpop.f32.mrf.mxu1  ;;  %v11193_v17 = vpop.f32.mrf.mxu0  ;;  %v16936_v24 = vld [vmem:[#allocation17_spill] sm:$0xff] }
0x155b   : > { %11340 = vst.msk [vmem:[%s16702_s11 + $0x58] sm:$0xff] %vm11328_vm6, %v11307_v0  ;;  %v11306_v63 = vmin.f32 %v11274_v20, 1.0  ;;  %v11277_v23 = vmax.f32 %v11245_v60, 0.0  ;;  %v10828_v55 = vadd.f32 %v14337_v35, %v10343_v49  ;;  %v11244_v51 = vadd.f32 %v16696_v32, %v10825_v54  ;;  %v16937_v54 = vld [vmem:[#allocation30_spill] sm:$0xff] }
0x155c   : > { %v10724_v41 = vpop.f32.mrf.mxu1  ;;  %v10383_v7 = vadd.f32 %v16936_v24, %v16935_v1  ;;  %v16938_v60 = vld [vmem:[#allocation18_spill] sm:$0xff] }
0x155d   : > { %11339 = vst.msk [vmem:[%s16702_s11 + $0x50] sm:$0xff] %vm11328_vm6, %v11306_v63  ;;  %v11309_v26 = vmin.f32 %v11277_v23, 1.0  ;;  %v11276_v31 = vmax.f32 %v11244_v51, 0.0  ;;  %v10827_v48 = vadd.f32 %v10724_v41, %v10338_v50  ;;  %v11247_v44 = vadd.f32 %v16706_v10, %v10828_v55  ;;  %v14425_v63 = vpop.f32.mrf.mxu0  ;;  %v16940_v41 = vld [vmem:[#allocation19_spill] sm:$0xff] }
0x155e   : > { %v14340_v16 = vpop.f32.mrf.mxu1  ;;  %v10378_v50 = vadd.f32 %v16938_v60, %v16937_v54 }
0x155f   : > { %11342 = vst.msk [vmem:[%s16702_s11 + $0x68] sm:$0xff] %vm11328_vm6, %v11309_v26  ;;  %v11308_v32 = vmin.f32 %v11276_v31, 1.0  ;;  %v11279_v3 = vmax.f32 %v11247_v44, 0.0  ;;  %v10830_v53 = vadd.f32 %v14340_v16, %v10353_v58  ;;  %v11246_v14 = vadd.f32 %v16710_v28, %v10827_v48  ;;  %v16939_v58 = vld [vmem:[#allocation31_spill] sm:$0xff]  ;;  %v16941_v16 = vld [vmem:[#allocation32_spill] sm:$0xff] }
0x1560   : > { %v10734_v27 = vpop.f32.mrf.mxu1  ;;  %v10393_v26 = vadd.f32 %v16940_v41, %v16939_v58 }
0x1561   : > { %11341 = vst.msk [vmem:[%s16702_s11 + $0x60] sm:$0xff] %vm11328_vm6, %v11308_v32  ;;  %v11311_v10 = vmin.f32 %v11279_v3, 1.0  ;;  %v11278_v12 = vmax.f32 %v11246_v14, 0.0  ;;  %v10829_v61 = vadd.f32 %v10734_v27, %v10348_v46  ;;  %v11249_v8 = vadd.f32 %v16716_v30, %v10830_v53  ;;  %v16942_v32 = vld [vmem:[#allocation20_spill] sm:$0xff]  ;;  %v11203_v14 = vpop.f32.mrf.mxu0 }
0x1562   : > { %v14343_v39 = vpop.f32.mrf.mxu1  ;;  %v10388_v3 = vadd.f32 %v16942_v32, %v16941_v16 }
0x1563   : > { %11344 = vst.msk [vmem:[%s16702_s11 + $0x78] sm:$0xff] %vm11328_vm6, %v11311_v10  ;;  %v11310_v28 = vmin.f32 %v11278_v12, 1.0  ;;  %v11281_v2 = vmax.f32 %v11249_v8, 0.0  ;;  %v10832_v29 = vadd.f32 %v14343_v39, %v10363_v36  ;;  %v11248_v43 = vadd.f32 %v16722_v34, %v10829_v61  ;;  %v16943_v12 = vld [vmem:[#allocation33_spill] sm:$0xff]  ;;  %v14428_v45 = vpop.f32.mrf.mxu0 }
0x1564   : > { %v10744_v52 = vpop.f32.mrf.mxu1  ;;  %v16944_v61 = vld [vmem:[#allocation21_spill] sm:$0xff] }
0x1565   : > { %11343 = vst.msk [vmem:[%s16702_s11 + $0x70] sm:$0xff] %vm11328_vm6, %v11310_v28  ;;  %v11313_v30 = vmin.f32 %v11281_v2, 1.0  ;;  %v11280_v22 = vmax.f32 %v11248_v43, 0.0  ;;  %v10831_v5 = vadd.f32 %v10744_v52, %v10358_v38  ;;  %v11251_v9 = vadd.f32 %v16728_v40, %v10832_v29  ;;  %v16945_v2 = vld [vmem:[#allocation34_spill] sm:$0xff]  ;;  %v11213_v1 = vpop.f32.mrf.mxu0 }
0x1566   : > { %v14346_v33 = vpop.f32.mrf.mxu1  ;;  %v10403_v8 = vadd.f32 %v16944_v61, %v16943_v12  ;;  %v16946_v29 = vld [vmem:[#allocation22_spill] sm:$0xff] }
0x1567   : > { %11346 = vst.msk [vmem:[%s16702_s11 + $0x88] sm:$0xff] %vm11328_vm6, %v11313_v30  ;;  %v11312_v34 = vmin.f32 %v11280_v22, 1.0  ;;  %v11283_v47 = vmax.f32 %v11251_v9, 0.0  ;;  %v10834_v18 = vadd.f32 %v14346_v33, %v10373_v13  ;;  %v11250_v57 = vadd.f32 %v16735_v25, %v10831_v5  ;;  %v16947_v22 = vld [vmem:[#allocation35_spill] sm:$0xff] }
0x1568   : > { %v10754_v49 = vpop.f32.mrf.mxu1  ;;  %v10398_v43 = vadd.f32 %v16946_v29, %v16945_v2  ;;  %v16948_v5 = vld [vmem:[#allocation23_spill] sm:$0xff] }
0x1569   : > { %11345 = vst.msk [vmem:[%s16702_s11 + $0x80] sm:$0xff] %vm11328_vm6, %v11312_v34  ;;  %v11315_v40 = vmin.f32 %v11283_v47, 1.0  ;;  %v11282_v56 = vmax.f32 %v11250_v57, 0.0  ;;  %v10833_v0 = vadd.f32 %v10754_v49, %v10368_v21  ;;  %v11253_v20 = vadd.f32 %v16747_v6, %v10834_v18  ;;  %v16949_v34 = vld [vmem:[#allocation36_spill] sm:$0xff] }
0x156a   : > { %v14349_v35 = vpop.f32.mrf.mxu1  ;;  %v10413_v9 = vadd.f32 %v16948_v5, %v16947_v22  ;;  %v16950_v47 = vld [vmem:[#allocation24_spill] sm:$0xff] }
0x156b   : > { %11348 = vst.msk [vmem:[%s16702_s11 + $0x98] sm:$0xff] %vm11328_vm6, %v11315_v40  ;;  %v11314_v25 = vmin.f32 %v11282_v56, 1.0  ;;  %v11285_v23 = vmax.f32 %v11253_v20, 0.0  ;;  %v10836_v55 = vadd.f32 %v14349_v35, %v10383_v7  ;;  %v11252_v51 = vadd.f32 %v16759_v4, %v10833_v0  ;;  %v16951_v40 = vld [vmem:[#allocation37_spill] sm:$0xff] }
0x156c   : > { %v10764_v31 = vpop.f32.mrf.mxu1  ;;  %v10408_v18 = vadd.f32 %v16950_v47, %v16949_v34  ;;  %v16952_v56 = vld [vmem:[#allocation25_spill] sm:$0xff] }
0x156d   : > { %11347 = vst.msk [vmem:[%s16702_s11 + $0x90] sm:$0xff] %vm11328_vm6, %v11314_v25  ;;  %v11317_v6 = vmin.f32 %v11285_v23, 1.0  ;;  %v11284_v48 = vmax.f32 %v11252_v51, 0.0  ;;  %v10835_v44 = vadd.f32 %v10764_v31, %v10378_v50  ;;  %v11255_v46 = vadd.f32 %v16771_v11, %v10836_v55  ;;  %v16954_v25 = vld [vmem:[#allocation26_spill] sm:$0xff]  ;;  %v14431_v51 = vpop.f32.mrf.mxu0 }
0x156e   : > { %v14352_v53 = vpop.f32.mrf.mxu1  ;;  %v10423_v0 = vadd.f32 %v16952_v56, %v16951_v40 }
0x156f   : > { %11350 = vst.msk [vmem:[%s16702_s11 + $0xa8] sm:$0xff] %vm11328_vm6, %v11317_v6  ;;  %v11316_v4 = vmin.f32 %v11284_v48, 1.0  ;;  %v11287_v36 = vmax.f32 %v11255_v46, 0.0  ;;  %v10838_v27 = vadd.f32 %v14352_v53, %v10393_v26  ;;  %v11254_v10 = vadd.f32 %v16783_v19, %v10835_v44  ;;  %v11223_v32 = vpop.f32.mrf.mxu0 }
0x1570   : > { %v10774_v15 = vpop.f32.mrf.mxu1 }
0x1571   : > { %11349 = vst.msk [vmem:[%s16702_s11 + $0xa0] sm:$0xff] %vm11328_vm6, %v11316_v4  ;;  %v11319_v11 = vmin.f32 %v11287_v36, 1.0  ;;  %v11286_v38 = vmax.f32 %v11254_v10, 0.0  ;;  %v10837_v39 = vadd.f32 %v10774_v15, %v10388_v3  ;;  %v11257_v28 = vadd.f32 %v14422_v59, %v10838_v27 }
0x1572   : > { %v14355_v62 = vpop.f32.mrf.mxu1 }
0x1573   : > { %11352 = vst.msk [vmem:[%s16702_s11 + $0xb8] sm:$0xff] %vm11328_vm6, %v11319_v11  ;;  %v11318_v19 = vmin.f32 %v11286_v38, 1.0  ;;  %v11289_v13 = vmax.f32 %v11257_v28, 0.0  ;;  %v10840_v52 = vadd.f32 %v14355_v62, %v10403_v8  ;;  %v11256_v30 = vadd.f32 %v11193_v17, %v10837_v39 }
0x1574   : > { %v10784_v37 = vpop.f32.mrf.mxu1 }
0x1575   : > { %11351 = vst.msk [vmem:[%s16702_s11 + $0xb0] sm:$0xff] %vm11328_vm6, %v11318_v19  ;;  %v11321_v59 = vmin.f32 %v11289_v13, 1.0  ;;  %v11288_v42 = vmax.f32 %v11256_v30, 0.0  ;;  %v10839_v21 = vadd.f32 %v10784_v37, %v10398_v43  ;;  %v11259_v33 = vadd.f32 %v14425_v63, %v10840_v52  ;;  %v16953_v63 = vld [vmem:[#allocation38_spill] sm:$0xff] }
0x1576   : > { %v14358_v57 = vpop.f32.mrf.mxu1  ;;  %v10418_v23 = vadd.f32 %v16954_v25, %v16953_v63 }
0x1577   : > { %11354 = vst.msk [vmem:[%s16702_s11 + $0xc8] sm:$0xff] %vm11328_vm6, %v11321_v59  ;;  %v11320_v17 = vmin.f32 %v11288_v42, 1.0  ;;  %v11291_v24 = vmax.f32 %v11259_v33, 0.0  ;;  %v10842_v7 = vadd.f32 %v14358_v57, %v10413_v9  ;;  %v11258_v49 = vadd.f32 %v11203_v14, %v10839_v21 }
0x1578   : > { %v10794_v20 = vpop.f32.mrf.mxu1 }
0x1579   : > { %11353 = vst.msk [vmem:[%s16702_s11 + $0xc0] sm:$0xff] %vm11328_vm6, %v11320_v17  ;;  %v11323_v54 = vmin.f32 %v11291_v24, 1.0  ;;  %v11290_v60 = vmax.f32 %v11258_v49, 0.0  ;;  %v10841_v50 = vadd.f32 %v10794_v20, %v10408_v18  ;;  %v11261_v35 = vadd.f32 %v14428_v45, %v10842_v7 }
0x157a   : > { %v14361_v55 = vpop.f32.mrf.mxu1 }
0x157b   : > { %11356 = vst.msk [vmem:[%s16702_s11 + $0xd8] sm:$0xff] %vm11328_vm6, %v11323_v54  ;;  %v11322_v58 = vmin.f32 %v11290_v60, 1.0  ;;  %v11293_v41 = vmax.f32 %v11261_v35, 0.0  ;;  %v10844_v26 = vadd.f32 %v14361_v55, %v10423_v0  ;;  %v11260_v31 = vadd.f32 %v11213_v1, %v10841_v50 }
0x157c   : > { %v10804_v6 = vpop.f32.mrf.mxu1 }
0x157d   : > { %11355 = vst.msk [vmem:[%s16702_s11 + $0xd0] sm:$0xff] %vm11328_vm6, %v11322_v58  ;;  %v11325_v48 = vmin.f32 %v11293_v41, 1.0  ;;  %v11292_v44 = vmax.f32 %v11260_v31, 0.0  ;;  %v10843_v46 = vadd.f32 %v10804_v6, %v10418_v23  ;;  %v11263_v16 = vadd.f32 %v14431_v51, %v10844_v26 }
0x157f   : > { %11358 = vst.msk [vmem:[%s16702_s11 + $0xe8] sm:$0xff] %vm11328_vm6, %v11325_v48  ;;  %v11324_v3 = vmin.f32 %v11292_v44, 1.0  ;;  %v11295_v53 = vmax.f32 %v11263_v16, 0.0  ;;  %v11262_v14 = vadd.f32 %v11223_v32, %v10843_v46 }
0x1581   : > { %11357 = vst.msk [vmem:[%s16702_s11 + $0xe0] sm:$0xff] %vm11328_vm6, %v11324_v3  ;;  %v11327_v4 = vmin.f32 %v11295_v53, 1.0  ;;  %v11294_v36 = vmax.f32 %v11262_v14, 0.0 }
0x1583   : > { %11360 = vst.msk [vmem:[%s16702_s11 + $0xf8] sm:$0xff] %vm11328_vm6, %v11327_v4  ;;  %v11326_v27 = vmin.f32 %v11294_v36, 1.0 }
0x1585   : > { %11359 = vst.msk [vmem:[%s16702_s11 + $0xf0] sm:$0xff] %vm11328_vm6, %v11326_v27 }
0x1586 PF: > { %s69_s7 = sadd.s32 1, %s14529_s7  }
0x1587   : > { %p66_p4 = scmp.ge.s32.totalorder %s69_s7, 4  }
0x1589   :  { %68 = sbr.rel (!%p66_p4) target bundleno = 46 (0x2e), region = 251 }

</bundles_post_ra>
